<compile_context>
chip_gen: v7x
topology: tpu7x:2x2x1
jax: 0.10.0
libtpu: 0.0.40
codegen_flags: <defaults>
</compile_context>

<pallas_src>
import math

import numpy as np
import jax
import jax.numpy as jnp
from jax.experimental import pallas as pl
from jax.experimental.pallas import tpu as pltpu

# ----------------------------- model hyper-params ---------------------------
M = 7                  # state dim
N = 7                  # observation dim (h = identity observation model)
FEATURE_DIM = 32
WIDTH = 128            # shared feature-extractor width
NTOK = 8               # number of context tokens fed to the feature extractor
IN_MULT = 5            # cfg.TRAINER.IN_MULT_LKF
OUT_MULT = 2           # cfg.TRAINER.OUT_MULT_LKF
NUM_HEADS = 2
HEAD_DIM = FEATURE_DIM // NUM_HEADS

SEG = 128              # lane segment for the packed state slab
STATE_FIELDS = (('m1x_posterior', M),
                ('m1x_posterior_previous', M),
                ('m1x_posterior_previous_previous', M),
                ('m1x_prior_previous', M),
                ('y_previous', N),
                ('h_Q', M * M),
                ('h_Sigma', M * M),
                ('h_S', N * N))
STATE_LANES = SEG * len(STATE_FIELDS)        # 1024
TRAJ_LANES = 128
POST_LANE = 0
PRIOR_LANE = 64


# =============================================================================
# The fused LKF sequence kernel (grid over T, weights resident in VMEM)
# =============================================================================

def _lkf_kernel(
        state0_ref, y_ref,
        fe_w0, fe_b0, fe_wm, fe_aux, fe_wout,
        at_w, at_b, at_wo, at_bo, attn_mask, avg_mat,
        bb_w1a, bb_w1b, bb_w2a, bb_w2b, bb_w3b, bb_bias,
        ry_w1, ry_b1, ry_w2, ry_w3, ry_b23, ryl_w0, ryl_b0, ryl_w1, ryl_b1,
        fin_w, fin_b,
        fc56_w, fc7_w, fcsq_w, fc2a_w, fc2b_w, fc_b,
        gru_w49, gru_w35, gss_wih_b, gru_b,
        unc_ref, rep_mat, seg_mat, place_mat,
        traj_ref, st_out_ref, st_scr):
    t = pl.program_id(0)
    B = state0_ref.shape[0]
    HH = M * M                     # 49

    @pl.when(t == 0)
    def _init():
        st_scr[...] = state0_ref[...]

    # ------------------ carried state (VMEM scratch, 128-lane segments) -----
    x = st_scr[:, 0 * SEG:0 * SEG + M]
    x_prev = st_scr[:, 1 * SEG:1 * SEG + M]
    x_pp = st_scr[:, 2 * SEG:2 * SEG + M]
    x_prior_prev = st_scr[:, 3 * SEG:3 * SEG + M]
    y_prev = st_scr[:, 4 * SEG:4 * SEG + N]
    h_q = st_scr[:, 5 * SEG:5 * SEG + HH]
    h_sigma = st_scr[:, 6 * SEG:6 * SEG + HH]
    h_s = st_scr[:, 7 * SEG:7 * SEG + N * N]

    y = y_ref[0]                                   # (B, N)

    def mm(a, b):
        return jnp.dot(a, b, preferred_element_type=jnp.float32)

    def relu(v):
        return jnp.maximum(v, 0.0)

    def layer_norm(h, g, bta):
        mu = jnp.mean(h, axis=-1, keepdims=True)
        var = jnp.mean(h * h, axis=-1, keepdims=True) - mu * mu
        return (h - mu) * jax.lax.rsqrt(var + 1e-5) * g + bta

    def gelu(h):
        # TODO(synk): exact erf GELU not used (Mosaic lowering); tanh approx.
        return jax.nn.gelu(h, approximate=True)

    # --------------------- step_prior: shared feature extractor -------------
    resid = x - x_prev
    resid_prev = x_prev - x_pp
    resid_prior_post = x - x_prior_prev
    sod = x - 2.0 * x_prev + x_pp

    # token-major rows t*B+b (matches the per-token context bias fe_b0)
    base = jnp.concatenate(
        [x, x_prev, x_pp, sod, x_prior_prev, resid, resid_prev, resid_prior_post],
        axis=0)                                                      # (8B, 7)

    h = mm(base, fe_w0[...]) + fe_b0[...]                            # (8B, 128)
    h = gelu(layer_norm(h, fe_aux[0:1, :], fe_aux[4:5, :]))
    for i in range(3):
        h = mm(h, fe_wm[i]) + fe_aux[8 + i:9 + i, :]
        h = gelu(layer_norm(h, fe_aux[1 + i:2 + i, :], fe_aux[5 + i:6 + i, :]))
    feats = mm(h, fe_wout[...]) + fe_aux[11:12, 0:FEATURE_DIM]       # (8B, 32)

    # --------------------- fusion self-attention (block-diag masked) --------
    scale = 1.0 / math.sqrt(HEAD_DIM)
    mask = attn_mask[...]                                            # (8B, 8B)
    proj = jnp.zeros((NTOK * B, FEATURE_DIM), jnp.float32)
    for hd in range(NUM_HEADS):
        q = mm(feats, at_w[0, hd]) + at_b[0, hd]                     # (8B, 16)
        k = mm(feats, at_w[1, hd]) + at_b[1, hd]
        v = mm(feats, at_w[2, hd]) + at_b[2, hd]
        s = jax.lax.dot_general(q, k, (((1,), (1,)), ((), ())),
                                preferred_element_type=jnp.float32) * scale + mask
        s = s - jnp.max(s, axis=-1, keepdims=True)
        p = jnp.exp(s)
        p = p / jnp.sum(p, axis=-1, keepdims=True)
        o = mm(p, v)                                                 # (8B, 16)
        proj = proj + mm(o, at_wo[hd])                               # (8B, 32)
    fused = mm(avg_mat[...], proj) + at_bo[...]                      # (B, 32)

    # --------------------- bb3d heads (per-head small matmuls) --------------
    wlh_h1 = relu(mm(fused, bb_w1a[0]) + bb_bias[0:1, 0:128])
    wlh_h2 = relu(mm(wlh_h1, bb_w2a[0]) + bb_bias[4:5, 0:64])
    y_h1 = relu(mm(fused, bb_w1a[1]) + bb_bias[1:2, 0:128])
    y_h2 = relu(mm(y_h1, bb_w2a[1]) + bb_bias[5:6, 0:64])
    x_h1 = relu(mm(fused, bb_w1b[0]) + bb_bias[2:3, 0:256])
    x_h2 = relu(mm(x_h1, bb_w2b[0]) + bb_bias[6:7, 0:128])
    x_h3 = relu(mm(x_h2, bb_w3b[0]) + bb_bias[8:9, 0:64])
    z_h1 = relu(mm(fused, bb_w1b[1]) + bb_bias[3:4, 0:256])
    z_h2 = relu(mm(z_h1, bb_w2b[1]) + bb_bias[7:8, 0:128])
    z_h3 = relu(mm(z_h2, bb_w3b[1]) + bb_bias[9:10, 0:64])

    # --------------------- ry heads + ry_layer (BN folded) ------------------
    s_cur = x[:, 6:7]
    s_prev = x_prev[:, 6:7]
    s_res = s_cur - s_prev
    ry_in = (s_cur, s_prev, s_res)
    ry_pre = jnp.zeros((B, WIDTH), jnp.float32) + ryl_b0[...]
    for i in range(3):
        # Linear(1,128) realised as a VPU broadcast multiply (no K=1 matmul).
        a1 = relu(ry_in[i] * ry_w1[i:i + 1, :] + ry_b1[i:i + 1, :])  # (B,128)
        a2 = relu(mm(a1, ry_w2[i]) + ry_b23[i:i + 1, 0:64])          # (B,64)
        a3 = relu(mm(a2, ry_w3[i]) + ry_b23[3 + i:4 + i, 0:32])      # (B,32)
        ry_pre = ry_pre + mm(a3, ryl_w0[i])                          # (B,128)
    ry_h1 = relu(ry_pre)
    ry_h2 = relu(mm(ry_h1, ryl_w1[...]) + ryl_b1[...])               # (B,64)

    # final placement matmuls emit residual_m1xprior in PyTorch column order
    # [x(from bb 'y'), y(from bb 'x'), z, l, w, h, ry] (intentional x/y swap).
    residual = jnp.zeros((B, M), jnp.float32) + fin_b[...]
    for act, idx in ((wlh_h2, 0), (x_h3, 1), (y_h2, 2), (z_h3, 3), (ry_h2, 4)):
        residual = residual + mm(act, fin_w[idx])                    # (B,7)
    m1x_prior = x + residual
    m1y = m1x_prior

    # --------------------- step_KGain_est -----------------------------------
    def l2n(v):
        ssq = jnp.sum(v * v, axis=1, keepdims=True)
        return v * jax.lax.rsqrt(jnp.maximum(ssq, 1e-24))

    obs_diff = l2n(y - y_prev)
    obs_innov_diff = l2n(y - m1y)
    fw_evol_diff = l2n(x - x_prev)
    fw_update_diff = l2n(x - x_prior_prev)

    def gru(gi, hv, whh, bhh):
        """Fused-gate GRU step; gates lane-aligned at 0/128/256 (order r,z,n)."""
        gh = mm(hv, whh) + bhh                                       # (B, 384)
        r = jax.nn.sigmoid(gi[:, 0:HH] + gh[:, 0:HH])
        z = jax.nn.sigmoid(gi[:, 128:128 + HH] + gh[:, 128:128 + HH])
        n_ = jnp.tanh(gi[:, 256:256 + HH] + r * gh[:, 256:256 + HH])
        return (1.0 - z) * n_ + z * hv

    out_fc5 = relu(mm(fw_evol_diff, fc56_w[0]) + fc_b[0:1, 0:35])
    out_fc6 = relu(mm(fw_update_diff, fc56_w[1]) + fc_b[1:2, 0:35])
    out_fc7 = relu(mm(obs_diff, fc7_w[0]) + mm(obs_innov_diff, fc7_w[1])
                   + fc_b[2:3, 0:70])

    gi_q = mm(out_fc5, gru_w35[0]) + gru_b[0:1, :]
    h_q_new = gru(gi_q, h_q, gru_w49[0], gru_b[1:2, :])

    gi_sig = mm(h_q_new, gru_w49[1]) + mm(out_fc6, gru_w35[1]) + gru_b[2:3, :]
    h_sigma_new = gru(gi_sig, h_sigma, gru_w49[2], gru_b[3:4, :])

    out_fc1 = relu(mm(h_sigma_new, fcsq_w[0]) + fc_b[3:4, 0:49])

    gi_s = mm(out_fc1, gru_w49[3]) + mm(out_fc7, gss_wih_b[...]) + gru_b[4:5, :]
    h_s_new = gru(gi_s, h_s, gru_w49[4], gru_b[5:6, :])

    f2 = relu(mm(h_sigma_new, fc2a_w[0]) + mm(h_s_new, fc2a_w[1])
              + fc_b[4:5, 0:196])
    out_fc2 = relu(mm(f2, fc2b_w[...]) + fc_b[5:6, 0:49]) * unc_ref[0:1, 0:49]
    out_fc3 = relu(mm(h_s_new, fcsq_w[1]) + mm(out_fc2, fcsq_w[2])
                   + fc_b[6:7, 0:49])
    out_fc4 = relu(mm(h_sigma_new, fcsq_w[3]) + mm(out_fc3, fcsq_w[4])
                   + fc_b[7:8, 0:49])

    # --------------------- LKF_step: posterior update -----------------------
    # KGain[b,i,j] = out_fc2[b, i*N+j]; INOV = KGain @ dy via constant matmuls.
    dy = y - m1y
    dy_rep = mm(dy, rep_mat[...])                                    # (B, 49)
    inov = mm(out_fc2 * dy_rep, seg_mat[...])                        # (B, 7)
    m1x_posterior = m1x_prior + inov

    # --------------------- state update + lane-dense outputs ----------------
    st_scr[:, 0 * SEG:0 * SEG + M] = m1x_posterior
    st_scr[:, 1 * SEG:1 * SEG + M] = x
    st_scr[:, 2 * SEG:2 * SEG + M] = x_prev
    st_scr[:, 3 * SEG:3 * SEG + M] = m1x_prior
    st_scr[:, 4 * SEG:4 * SEG + N] = y
    st_scr[:, 5 * SEG:5 * SEG + HH] = h_q_new
    st_scr[:, 6 * SEG:6 * SEG + HH] = out_fc4     # PyTorch: self.h_Sigma = out_FC4
    st_scr[:, 7 * SEG:7 * SEG + N * N] = h_s_new

    st_out_ref[...] = st_scr[...]

    traj_ref[0] = (mm(m1x_posterior, place_mat[0])
                   + mm(m1x_prior, place_mat[1]))                    # (B, 128)


# =============================================================================
# Wrappers
# =============================================================================

def pack_state(state):
    B = state['m1x_posterior'].shape[0]
    s = jnp.zeros((B, STATE_LANES), jnp.float32)
    for i, (name, w) in enumerate(STATE_FIELDS):
        v = jnp.reshape(state[name], (B, -1)).astype(jnp.float32)
        s = s.at[:, i * SEG:i * SEG + w].set(v)
    return s


def unpack_state(s):
    return {name: s[:, i * SEG:i * SEG + w]
            for i, (name, w) in enumerate(STATE_FIELDS)}


def lkf_sequence(packed, state, ys):
    """Run T LKF steps in ONE pallas_call (grid over T, resident weights)."""
    T, B, _ = ys.shape
    state0 = pack_state(state)

    def wspec(arr):
        nd = jnp.ndim(arr)
        return pl.BlockSpec(tuple(jnp.shape(arr)), lambda t, _nd=nd: (0,) * _nd)

    in_specs = [pl.BlockSpec((B, STATE_LANES), lambda t: (0, 0)),
                pl.BlockSpec((1, B, N), lambda t: (t, 0, 0))]
    in_specs += [wspec(a) for a in packed]

    out_specs = [pl.BlockSpec((1, B, TRAJ_LANES), lambda t: (t, 0, 0)),
                 pl.BlockSpec((B, STATE_LANES), lambda t: (0, 0))]
    out_shape = [jax.ShapeDtypeStruct((T, B, TRAJ_LANES), jnp.float32),
                 jax.ShapeDtypeStruct((B, STATE_LANES), jnp.float32)]

    traj, st_out = pl.pallas_call(
        _lkf_kernel,
        grid=(T,),
        in_specs=in_specs,
        out_specs=out_specs,
        out_shape=out_shape,
        scratch_shapes=[pltpu.VMEM((B, STATE_LANES), jnp.float32)],
        compiler_params=pltpu.CompilerParams(
            dimension_semantics=("arbitrary",)),
    )(state0, ys, *packed)

    posts = traj[:, :, POST_LANE:POST_LANE + M][..., None]     # (T, B, M, 1)
    priors = traj[:, :, PRIOR_LANE:PRIOR_LANE + M][..., None]  # (T, B, M, 1)
    return (posts, priors), unpack_state(st_out)


def lkf_step(packed, state, y):
    """Single LKF step (T=1 sequence).  Returns ((post, prior), new_state)."""
    (posts, priors), new_state = lkf_sequence(packed, state, y[None])
    return (posts[0], priors[0]), new_state


# =============================================================================
# Parameter init (deterministic, synthetic) + host-side packing
# =============================================================================

def init_raw_params(key):
    keys = iter(jax.random.split(key, 200))

    def lin(fan_in, fan_out):
        bound = math.sqrt(6.0 / fan_in)     # kaiming_uniform_(relu)-style bound
        w = jax.random.uniform(next(keys), (fan_in, fan_out),
                               minval=-bound, maxval=bound, dtype=jnp.float32)
        return w, jnp.zeros((fan_out,), jnp.float32)

    p = {}

    # --- SharedFeatureExtractor (input M+8, width 128, depth 4, out 32) ---
    w0, b0 = lin(M + NTOK, WIDTH)
    mids = [lin(WIDTH, WIDTH) for _ in range(3)]
    wout, bout = lin(WIDTH, FEATURE_DIM)
    p['feat'] = dict(w0=w0, b0=b0,
                     wm=jnp.stack([w for w, _ in mids]),
                     bm=jnp.stack([b for _, b in mids]),
                     lng=jnp.ones((4, WIDTH), jnp.float32),
                     lnb=jnp.zeros((4, WIDTH), jnp.float32),
                     wout=wout, bout=bout)

    # --- fusion attention (MultiheadAttention dim 32, 2 heads) ---
    wq, bq = lin(FEATURE_DIM, FEATURE_DIM)
    wk, bk = lin(FEATURE_DIM, FEATURE_DIM)
    wv, bv = lin(FEATURE_DIM, FEATURE_DIM)
    wo, bo = lin(FEATURE_DIM, FEATURE_DIM)
    p['attn'] = dict(wq=wq, wk=wk, wv=wv, bq=bq, bk=bk, bv=bv, wo=wo, bo=bo)

    # --- bb3d heads ---
    p['bb_wlh'] = [lin(FEATURE_DIM, 128), lin(128, 64), lin(64, 3)]
    p['bb_x'] = [lin(FEATURE_DIM, 256), lin(256, 128), lin(128, 64), lin(64, 1)]
    p['bb_y'] = [lin(FEATURE_DIM, 128), lin(128, 64), lin(64, 1)]
    p['bb_z'] = [lin(FEATURE_DIM, 256), lin(256, 128), lin(128, 64), lin(64, 1)]

    # --- ry heads ---
    for name in ('ry_current', 'ry_previous', 'ry_residual'):
        p[name] = [lin(1, 128), lin(128, 64), lin(64, FEATURE_DIM)]
    # ry_layer: Linear(96,128) + eval-mode BatchNorm1d(128) folded + ...
    w_ry0, b_ry0 = lin(3 * FEATURE_DIM, 128)
    bn_scale = 1.0 / math.sqrt(1.0 + 1e-5)   # gamma=1, beta=0, rm=0, rv=1
    p['ry_layer'] = [(w_ry0 * bn_scale, b_ry0 * bn_scale), lin(128, 64), lin(64, 1)]

    # --- Kalman-gain FC nets ---
    p['FC1'] = lin(M * M, N * N)
    d2 = N * N + M * M
    p['FC2a'] = lin(d2, d2 * OUT_MULT)
    p['FC2b'] = lin(d2 * OUT_MULT, N * M)
    p['FC3'] = lin(N * N + N * M, M * M)
    p['FC4'] = lin(M * M + M * M, M * M)
    p['FC5'] = lin(M, M * IN_MULT)
    p['FC6'] = lin(M, M * IN_MULT)
    p['FC7'] = lin(2 * N, 2 * N * IN_MULT)

    # --- GRUs with fused gates (columns ordered r|z|n, x @ W layout) ---
    def gru_params(d_in, d_hid):
        k = 1.0 / math.sqrt(d_hid)

        def u(shape):
            return jax.random.uniform(next(keys), shape, minval=-k, maxval=k,
                                      dtype=jnp.float32)
        return dict(wih=u((d_in, 3 * d_hid)), whh=u((d_hid, 3 * d_hid)),
                    bih=u((3 * d_hid,)), bhh=u((3 * d_hid,)))

    p['GRU_Q'] = gru_params(M * IN_MULT, M * M)
    p['GRU_Sigma'] = gru_params(M * M + M * IN_MULT, M * M)
    p['GRU_S'] = gru_params(N * N + 2 * N * IN_MULT, N * N)

    p['uncertainty_scale'] = jnp.ones((1,), jnp.float32)
    return p


def pack_params(p, B):
    """Pack the logical (PyTorch-layout) params into the flat kernel operands."""
    HH = M * M

    # ---- feature extractor ----
    f = p['feat']
    fe_w0 = f['w0'][:M, :]                               # (7,128) state part
    ctx_rows = f['w0'][M:, :] + f['b0'][None, :]         # (8,128) ctx one-hot + bias
    fe_b0 = jnp.repeat(ctx_rows, B, axis=0)              # (8B,128) token-major rows t*B+b
    fe_wm = f['wm']                                      # (3,128,128)
    fe_aux = np.zeros((16, 128), np.float32)
    fe_aux[0:4] = np.asarray(f['lng'])
    fe_aux[4:8] = np.asarray(f['lnb'])
    fe_aux[8:11] = np.asarray(f['bm'])
    fe_aux[11, :FEATURE_DIM] = np.asarray(f['bout'])
    fe_wout = f['wout']                                  # (128,32)

    # ---- attention ----
    a = p['attn']
    at_w = np.zeros((3, NUM_HEADS, FEATURE_DIM, HEAD_DIM), np.float32)
    at_b = np.zeros((3, NUM_HEADS, 1, HEAD_DIM), np.float32)
    for qi, (w, b) in enumerate([(a['wq'], a['bq']), (a['wk'], a['bk']),
                                 (a['wv'], a['bv'])]):
        for hd in range(NUM_HEADS):
            at_w[qi, hd] = np.asarray(w[:, hd * HEAD_DIM:(hd + 1) * HEAD_DIM])
            at_b[qi, hd, 0] = np.asarray(b[hd * HEAD_DIM:(hd + 1) * HEAD_DIM])
    at_wo = np.stack([np.asarray(a['wo'][hd * HEAD_DIM:(hd + 1) * HEAD_DIM, :])
                      for hd in range(NUM_HEADS)])       # (2,16,32)
    at_bo = np.asarray(a['bo']).reshape(1, FEATURE_DIM)

    rows = np.arange(NTOK * B)
    attn_mask = np.where((rows[:, None] % B) == (rows[None, :] % B),
                         0.0, -1e30).astype(np.float32)  # (8B,8B) block-diag mask
    avg_mat = np.zeros((B, NTOK * B), np.float32)        # mean over the 8 tokens
    for b_ in range(B):
        avg_mat[b_, b_::B] = 1.0 / NTOK

    # ---- bb3d heads (per-head stacks) ----
    wlh, hx, hy, hz = p['bb_wlh'], p['bb_x'], p['bb_y'], p['bb_z']
    bb_w1a = jnp.stack([wlh[0][0], hy[0][0]])            # (2,32,128)
    bb_w1b = jnp.stack([hx[0][0], hz[0][0]])             # (2,32,256)
    bb_w2a = jnp.stack([wlh[1][0], hy[1][0]])            # (2,128,64)
    bb_w2b = jnp.stack([hx[1][0], hz[1][0]])             # (2,256,128)
    bb_w3b = jnp.stack([hx[2][0], hz[2][0]])             # (2,128,64)
    bb_bias = np.zeros((16, 256), np.float32)
    bb_bias[0, :128] = np.asarray(wlh[0][1]); bb_bias[1, :128] = np.asarray(hy[0][1])
    bb_bias[2, :256] = np.asarray(hx[0][1]);  bb_bias[3, :256] = np.asarray(hz[0][1])
    bb_bias[4, :64] = np.asarray(wlh[1][1]);  bb_bias[5, :64] = np.asarray(hy[1][1])
    bb_bias[6, :128] = np.asarray(hx[1][1]);  bb_bias[7, :128] = np.asarray(hz[1][1])
    bb_bias[8, :64] = np.asarray(hx[2][1]);   bb_bias[9, :64] = np.asarray(hz[2][1])

    # ---- ry heads ----
    rc, rp, rr = p['ry_current'], p['ry_previous'], p['ry_residual']
    ry_w1 = jnp.concatenate([rc[0][0], rp[0][0], rr[0][0]], axis=0)   # (3,128)
    ry_b1 = jnp.stack([rc[0][1], rp[0][1], rr[0][1]], axis=0)         # (3,128)
    ry_w2 = jnp.stack([rc[1][0], rp[1][0], rr[1][0]])                 # (3,128,64)
    ry_w3 = jnp.stack([rc[2][0], rp[2][0], rr[2][0]])                 # (3,64,32)
    ry_b23 = np.zeros((8, 64), np.float32)
    for i, h_ in enumerate((rc, rp, rr)):
        ry_b23[i, :64] = np.asarray(h_[1][1])
        ry_b23[3 + i, :32] = np.asarray(h_[2][1])
    ryl = p['ry_layer']
    ryl_w0 = jnp.stack([ryl[0][0][i * FEATURE_DIM:(i + 1) * FEATURE_DIM, :]
                        for i in range(3)])                           # (3,32,128)
    ryl_b0 = ryl[0][1].reshape(1, 128)
    ryl_w1 = ryl[1][0]                                                # (128,64)
    ryl_b1 = ryl[1][1].reshape(1, 64)

    # ---- final placement layer: residual = [x<-'y', y<-'x', z, l, w, h, ry] ----
    fin_w = np.zeros((5, 64, M), np.float32)
    fin_w[0, :, 3:6] = np.asarray(wlh[2][0])    # lwh -> cols 3..5
    fin_w[1, :, 1:2] = np.asarray(hx[3][0])     # bb 'x' head -> col 1 (vec_y)
    fin_w[2, :, 0:1] = np.asarray(hy[2][0])     # bb 'y' head -> col 0 (vec_x)
    fin_w[3, :, 2:3] = np.asarray(hz[3][0])     # bb 'z' head -> col 2
    fin_w[4, :, 6:7] = np.asarray(ryl[2][0])    # ry -> col 6
    fin_b = np.zeros((1, M), np.float32)
    fin_b[0, 0] = np.asarray(hy[2][1])[0]
    fin_b[0, 1] = np.asarray(hx[3][1])[0]
    fin_b[0, 2] = np.asarray(hz[3][1])[0]
    fin_b[0, 3:6] = np.asarray(wlh[2][1])
    fin_b[0, 6] = np.asarray(ryl[2][1])[0]

    # ---- Kalman-gain FC nets (split weights, no in-kernel concats) ----
    fc56_w = jnp.stack([p['FC5'][0], p['FC6'][0]])                    # (2,7,35)
    fc7_w = jnp.stack([p['FC7'][0][:N, :], p['FC7'][0][N:, :]])       # (2,7,70)
    fcsq_w = jnp.stack([p['FC1'][0],
                        p['FC3'][0][:HH, :], p['FC3'][0][HH:, :],
                        p['FC4'][0][:HH, :], p['FC4'][0][HH:, :]])    # (5,49,49)
    fc2a_w = jnp.stack([p['FC2a'][0][:HH, :], p['FC2a'][0][HH:, :]])  # (2,49,196)
    fc2b_w = p['FC2b'][0]                                             # (196,49)
    fc_b = np.zeros((8, 196), np.float32)
    fc_b[0, :35] = np.asarray(p['FC5'][1]); fc_b[1, :35] = np.asarray(p['FC6'][1])
    fc_b[2, :70] = np.asarray(p['FC7'][1]); fc_b[3, :49] = np.asarray(p['FC1'][1])
    fc_b[4, :196] = np.asarray(p['FC2a'][1]); fc_b[5, :49] = np.asarray(p['FC2b'][1])
    fc_b[6, :49] = np.asarray(p['FC3'][1]); fc_b[7, :49] = np.asarray(p['FC4'][1])

    # ---- GRUs: lane-align gates r|z|n at lane offsets 0/128/256 ----
    def align_gru(wih, whh, bih, bhh):
        d_in = wih.shape[0]
        wih_al = np.zeros((d_in, 3 * SEG), np.float32)
        whh_al = np.zeros((HH, 3 * SEG), np.float32)
        bih_al = np.zeros((1, 3 * SEG), np.float32)
        bhh_al = np.zeros((1, 3 * SEG), np.float32)
        for g in range(3):
            wih_al[:, g * SEG:g * SEG + HH] = np.asarray(wih[:, g * HH:(g + 1) * HH])
            whh_al[:, g * SEG:g * SEG + HH] = np.asarray(whh[:, g * HH:(g + 1) * HH])
            bih_al[0, g * SEG:g * SEG + HH] = np.asarray(bih[g * HH:(g + 1) * HH])
            bhh_al[0, g * SEG:g * SEG + HH] = np.asarray(bhh[g * HH:(g + 1) * HH])
        return wih_al, whh_al, bih_al, bhh_al

    q_wih, q_whh, q_bih, q_bhh = align_gru(**p['GRU_Q'])
    sg_wih, sg_whh, sg_bih, sg_bhh = align_gru(**p['GRU_Sigma'])
    s_wih, s_whh, s_bih, s_bhh = align_gru(**p['GRU_S'])

    gru_w49 = np.stack([q_whh, sg_wih[:HH], sg_whh, s_wih[:HH], s_whh])  # (5,49,384)
    gru_w35 = np.stack([q_wih, sg_wih[HH:]])                             # (2,35,384)
    gss_wih_b = s_wih[HH:]                                               # (70,384)
    gru_b = np.concatenate([q_bih, q_bhh, sg_bih, sg_bhh, s_bih, s_bhh], axis=0)

    unc = jnp.full((1, 128), p['uncertainty_scale'][0], dtype=jnp.float32)

    # ---- constant routing matrices (dy replication / KGain segment sum / traj) ----
    rep_mat = np.zeros((N, M * N), np.float32)
    seg_mat = np.zeros((M * N, M), np.float32)
    for i_ in range(M):
        for j_ in range(N):
            rep_mat[j_, i_ * N + j_] = 1.0
            seg_mat[i_ * N + j_, i_] = 1.0
    place_mat = np.zeros((2, M, TRAJ_LANES), np.float32)
    for j_ in range(M):
        place_mat[0, j_, POST_LANE + j_] = 1.0
        place_mat[1, j_, PRIOR_LANE + j_] = 1.0

    packed = tuple(jnp.asarray(arr, jnp.float32) for arr in (
        fe_w0, fe_b0, fe_wm, fe_aux, fe_wout,
        at_w, at_b, at_wo, at_bo, attn_mask, avg_mat,
        bb_w1a, bb_w1b, bb_w2a, bb_w2b, bb_w3b, bb_bias,
        ry_w1, ry_b1, ry_w2, ry_w3, ry_b23, ryl_w0, ryl_b0, ryl_w1, ryl_b1,
        fin_w, fin_b,
        fc56_w, fc7_w, fcsq_w, fc2a_w, fc2b_w, fc_b,
        gru_w49, gru_w35, gss_wih_b, gru_b,
        unc, rep_mat, seg_mat, place_mat))
    return packed


# =============================================================================
# main
# =============================================================================

if __name__ == "__main__":
    B = 8    # multiple of 8 sublanes
    T = 6
    key = jax.random.PRNGKey(0)
    kp, k1, k2, k3, k4, ky = jax.random.split(key, 6)

    raw = init_raw_params(kp)
    packed = pack_params(raw, B)

    M1_0 = jax.random.normal(k1, (B, M), jnp.float32)          # initial posterior mean
    prior_Q = 0.1 * jax.random.normal(k2, (M, M), jnp.float32)
    prior_Sigma = 0.1 * jax.random.normal(k3, (M, M), jnp.float32)
    prior_S = 0.1 * jax.random.normal(k4, (N, N), jnp.float32)

    state = dict(
        m1x_posterior=M1_0,
        m1x_posterior_previous=M1_0 - 1e-6,
        m1x_posterior_previous_previous=M1_0 - 2e-6,
        m1x_prior_previous=M1_0 - 1e-6,
        y_previous=M1_0,                                        # h = identity
        h_Q=jnp.tile(prior_Q.reshape(1, -1), (B, 1)),
        h_Sigma=jnp.tile(prior_Sigma.reshape(1, -1), (B, 1)),
        h_S=jnp.tile(prior_S.reshape(1, -1), (B, 1)),
    )

    # ---- single fused LKF step (T = 1 grid) ----
    y0 = jax.random.normal(ky, (B, N), jnp.float32)
    (post, prior), state1 = lkf_step(packed, state, y0)
    jax.block_until_ready((post, prior))
    assert post.shape == (B, M, 1) and prior.shape == (B, M, 1)
    assert bool(jnp.all(jnp.isfinite(post))) and bool(jnp.all(jnp.isfinite(prior)))

    # ---- full sequence: one pallas_call, grid=(T,), weights resident ----
    ys = jax.random.normal(jax.random.PRNGKey(1), (T, B, N), jnp.float32)
    run_seq = jax.jit(lambda st, yy: lkf_sequence(packed, st, yy))
    (posts, priors), final_state = run_seq(state, ys)
    jax.block_until_ready(posts)
    assert posts.shape == (T, B, M, 1) and priors.shape == (T, B, M, 1)
    assert bool(jnp.all(jnp.isfinite(posts))) and bool(jnp.all(jnp.isfinite(priors)))
    assert final_state['m1x_posterior'].shape == (B, M)
    assert bool(jnp.all(jnp.isfinite(final_state['m1x_posterior'])))

    print("KERNEL_OK")
</pallas_src>

<mosaic_0001>
module attributes {stable_mosaic.version = 11 : i64} {
  func.func @_lkf_kernel(%arg0: i32, %arg1: memref<8x1024xf32, #tpu.memory_space<vmem>>, %arg2: memref<1x8x7xf32, #tpu.memory_space<vmem>>, %arg3: memref<7x128xf32, #tpu.memory_space<vmem>>, %arg4: memref<64x128xf32, #tpu.memory_space<vmem>>, %arg5: memref<3x128x128xf32, #tpu.memory_space<vmem>>, %arg6: memref<16x128xf32, #tpu.memory_space<vmem>>, %arg7: memref<128x32xf32, #tpu.memory_space<vmem>>, %arg8: memref<3x2x32x16xf32, #tpu.memory_space<vmem>>, %arg9: memref<3x2x1x16xf32, #tpu.memory_space<vmem>>, %arg10: memref<2x16x32xf32, #tpu.memory_space<vmem>>, %arg11: memref<1x32xf32, #tpu.memory_space<vmem>>, %arg12: memref<64x64xf32, #tpu.memory_space<vmem>>, %arg13: memref<8x64xf32, #tpu.memory_space<vmem>>, %arg14: memref<2x32x128xf32, #tpu.memory_space<vmem>>, %arg15: memref<2x32x256xf32, #tpu.memory_space<vmem>>, %arg16: memref<2x128x64xf32, #tpu.memory_space<vmem>>, %arg17: memref<2x256x128xf32, #tpu.memory_space<vmem>>, %arg18: memref<2x128x64xf32, #tpu.memory_space<vmem>>, %arg19: memref<16x256xf32, #tpu.memory_space<vmem>>, %arg20: memref<3x128xf32, #tpu.memory_space<vmem>>, %arg21: memref<3x128xf32, #tpu.memory_space<vmem>>, %arg22: memref<3x128x64xf32, #tpu.memory_space<vmem>>, %arg23: memref<3x64x32xf32, #tpu.memory_space<vmem>>, %arg24: memref<8x64xf32, #tpu.memory_space<vmem>>, %arg25: memref<3x32x128xf32, #tpu.memory_space<vmem>>, %arg26: memref<1x128xf32, #tpu.memory_space<vmem>>, %arg27: memref<128x64xf32, #tpu.memory_space<vmem>>, %arg28: memref<1x64xf32, #tpu.memory_space<vmem>>, %arg29: memref<5x64x7xf32, #tpu.memory_space<vmem>>, %arg30: memref<1x7xf32, #tpu.memory_space<vmem>>, %arg31: memref<2x7x35xf32, #tpu.memory_space<vmem>>, %arg32: memref<2x7x70xf32, #tpu.memory_space<vmem>>, %arg33: memref<5x49x49xf32, #tpu.memory_space<vmem>>, %arg34: memref<2x49x196xf32, #tpu.memory_space<vmem>>, %arg35: memref<196x49xf32, #tpu.memory_space<vmem>>, %arg36: memref<8x196xf32, #tpu.memory_space<vmem>>, %arg37: memref<5x49x384xf32, #tpu.memory_space<vmem>>, %arg38: memref<2x35x384xf32, #tpu.memory_space<vmem>>, %arg39: memref<70x384xf32, #tpu.memory_space<vmem>>, %arg40: memref<6x384xf32, #tpu.memory_space<vmem>>, %arg41: memref<1x128xf32, #tpu.memory_space<vmem>>, %arg42: memref<7x49xf32, #tpu.memory_space<vmem>>, %arg43: memref<49x7xf32, #tpu.memory_space<vmem>>, %arg44: memref<2x7x128xf32, #tpu.memory_space<vmem>>, %arg45: memref<1x8x128xf32, #tpu.memory_space<vmem>>, %arg46: memref<8x1024xf32, #tpu.memory_space<vmem>>, %arg47: memref<8x1024xf32, #tpu.memory_space<vmem>>) attributes {dimension_semantics = [#tpu.dimension_semantics<arbitrary>], iteration_bounds = array<i64: 1>, scalar_prefetch = 0 : i64, scratch_operands = 1 : i64, tpu.core_type = #tpu.core_type<tc>, window_params = [{pipeline_mode = #tpu.pipeline_mode<synchronous>, transform_indices = @transform_0, window_bounds = array<i64: 8, 1024>}, {transform_indices = @transform_1, window_bounds = array<i64: 1, 8, 7>}, {pipeline_mode = #tpu.pipeline_mode<synchronous>, transform_indices = @transform_2, window_bounds = array<i64: 7, 128>}, {pipeline_mode = #tpu.pipeline_mode<synchronous>, transform_indices = @transform_3, window_bounds = array<i64: 64, 128>}, {pipeline_mode = #tpu.pipeline_mode<synchronous>, transform_indices = @transform_4, window_bounds = array<i64: 3, 128, 128>}, {pipeline_mode = #tpu.pipeline_mode<synchronous>, transform_indices = @transform_5, window_bounds = array<i64: 16, 128>}, {pipeline_mode = #tpu.pipeline_mode<synchronous>, transform_indices = @transform_6, window_bounds = array<i64: 128, 32>}, {pipeline_mode = #tpu.pipeline_mode<synchronous>, transform_indices = @transform_7, window_bounds = array<i64: 3, 2, 32, 16>}, {pipeline_mode = #tpu.pipeline_mode<synchronous>, transform_indices = @transform_8, window_bounds = array<i64: 3, 2, 1, 16>}, {pipeline_mode = #tpu.pipeline_mode<synchronous>, transform_indices = @transform_9, window_bounds = array<i64: 2, 16, 32>}, {pipeline_mode = #tpu.pipeline_mode<synchronous>, transform_indices = @transform_10, window_bounds = array<i64: 1, 32>}, {pipeline_mode = #tpu.pipeline_mode<synchronous>, transform_indices = @transform_11, window_bounds = array<i64: 64, 64>}, {pipeline_mode = #tpu.pipeline_mode<synchronous>, transform_indices = @transform_12, window_bounds = array<i64: 8, 64>}, {pipeline_mode = #tpu.pipeline_mode<synchronous>, transform_indices = @transform_13, window_bounds = array<i64: 2, 32, 128>}, {pipeline_mode = #tpu.pipeline_mode<synchronous>, transform_indices = @transform_14, window_bounds = array<i64: 2, 32, 256>}, {pipeline_mode = #tpu.pipeline_mode<synchronous>, transform_indices = @transform_15, window_bounds = array<i64: 2, 128, 64>}, {pipeline_mode = #tpu.pipeline_mode<synchronous>, transform_indices = @transform_16, window_bounds = array<i64: 2, 256, 128>}, {pipeline_mode = #tpu.pipeline_mode<synchronous>, transform_indices = @transform_17, window_bounds = array<i64: 2, 128, 64>}, {pipeline_mode = #tpu.pipeline_mode<synchronous>, transform_indices = @transform_18, window_bounds = array<i64: 16, 256>}, {pipeline_mode = #tpu.pipeline_mode<synchronous>, transform_indices = @transform_19, window_bounds = array<i64: 3, 128>}, {pipeline_mode = #tpu.pipeline_mode<synchronous>, transform_indices = @transform_20, window_bounds = array<i64: 3, 128>}, {pipeline_mode = #tpu.pipeline_mode<synchronous>, transform_indices = @transform_21, window_bounds = array<i64: 3, 128, 64>}, {pipeline_mode = #tpu.pipeline_mode<synchronous>, transform_indices = @transform_22, window_bounds = array<i64: 3, 64, 32>}, {pipeline_mode = #tpu.pipeline_mode<synchronous>, transform_indices = @transform_23, window_bounds = array<i64: 8, 64>}, {pipeline_mode = #tpu.pipeline_mode<synchronous>, transform_indices = @transform_24, window_bounds = array<i64: 3, 32, 128>}, {pipeline_mode = #tpu.pipeline_mode<synchronous>, transform_indices = @transform_25, window_bounds = array<i64: 1, 128>}, {pipeline_mode = #tpu.pipeline_mode<synchronous>, transform_indices = @transform_26, window_bounds = array<i64: 128, 64>}, {pipeline_mode = #tpu.pipeline_mode<synchronous>, transform_indices = @transform_27, window_bounds = array<i64: 1, 64>}, {pipeline_mode = #tpu.pipeline_mode<synchronous>, transform_indices = @transform_28, window_bounds = array<i64: 5, 64, 7>}, {pipeline_mode = #tpu.pipeline_mode<synchronous>, transform_indices = @transform_29, window_bounds = array<i64: 1, 7>}, {pipeline_mode = #tpu.pipeline_mode<synchronous>, transform_indices = @transform_30, window_bounds = array<i64: 2, 7, 35>}, {pipeline_mode = #tpu.pipeline_mode<synchronous>, transform_indices = @transform_31, window_bounds = array<i64: 2, 7, 70>}, {pipeline_mode = #tpu.pipeline_mode<synchronous>, transform_indices = @transform_32, window_bounds = array<i64: 5, 49, 49>}, {pipeline_mode = #tpu.pipeline_mode<synchronous>, transform_indices = @transform_33, window_bounds = array<i64: 2, 49, 196>}, {pipeline_mode = #tpu.pipeline_mode<synchronous>, transform_indices = @transform_34, window_bounds = array<i64: 196, 49>}, {pipeline_mode = #tpu.pipeline_mode<synchronous>, transform_indices = @transform_35, window_bounds = array<i64: 8, 196>}, {pipeline_mode = #tpu.pipeline_mode<synchronous>, transform_indices = @transform_36, window_bounds = array<i64: 5, 49, 384>}, {pipeline_mode = #tpu.pipeline_mode<synchronous>, transform_indices = @transform_37, window_bounds = array<i64: 2, 35, 384>}, {pipeline_mode = #tpu.pipeline_mode<synchronous>, transform_indices = @transform_38, window_bounds = array<i64: 70, 384>}, {pipeline_mode = #tpu.pipeline_mode<synchronous>, transform_indices = @transform_39, window_bounds = array<i64: 6, 384>}, {pipeline_mode = #tpu.pipeline_mode<synchronous>, transform_indices = @transform_40, window_bounds = array<i64: 1, 128>}, {pipeline_mode = #tpu.pipeline_mode<synchronous>, transform_indices = @transform_41, window_bounds = array<i64: 7, 49>}, {pipeline_mode = #tpu.pipeline_mode<synchronous>, transform_indices = @transform_42, window_bounds = array<i64: 49, 7>}, {pipeline_mode = #tpu.pipeline_mode<synchronous>, transform_indices = @transform_43, window_bounds = array<i64: 2, 7, 128>}, {transform_indices = @transform_44, window_bounds = array<i64: 1, 8, 128>}, {pipeline_mode = #tpu.pipeline_mode<synchronous>, transform_indices = @transform_45, window_bounds = array<i64: 8, 1024>}]} {
    %c0_i32 = arith.constant 0 : i32
    %0 = arith.cmpi eq, %arg0, %c0_i32 : i32
    %1 = arith.extui %0 : i1 to i32
    %c0_i32_0 = arith.constant 0 : i32
    %2 = arith.cmpi ne, %1, %c0_i32_0 : i32
    scf.if %2 {
      %c0_503 = arith.constant 0 : index
      %c0_504 = arith.constant 0 : index
      %755 = vector.load %arg1[%c0_503, %c0_504] : memref<8x1024xf32, #tpu.memory_space<vmem>>, vector<8x1024xf32>
      %c0_505 = arith.constant 0 : index
      %c0_506 = arith.constant 0 : index
      %756 = vector.load %arg47[%c0_505, %c0_506] : memref<8x1024xf32, #tpu.memory_space<vmem>>, vector<8x1024xf32>
      tpu.vector_store %arg47[%c0_505, %c0_506], %755 {strides = array<i32>} : memref<8x1024xf32, #tpu.memory_space<vmem>>, vector<8x1024xf32>,
    } else {
    }
    %c0 = arith.constant 0 : index
    %c0_1 = arith.constant 0 : index
    %3 = vector.load %arg47[%c0, %c0_1] : memref<8x1024xf32, #tpu.memory_space<vmem>>, vector<8x7xf32>
    %c0_2 = arith.constant 0 : index
    %c128 = arith.constant 128 : index
    %4 = vector.load %arg47[%c0_2, %c128] : memref<8x1024xf32, #tpu.memory_space<vmem>>, vector<8x7xf32>
    %c0_3 = arith.constant 0 : index
    %c256 = arith.constant 256 : index
    %5 = vector.load %arg47[%c0_3, %c256] : memref<8x1024xf32, #tpu.memory_space<vmem>>, vector<8x7xf32>
    %c0_4 = arith.constant 0 : index
    %c384 = arith.constant 384 : index
    %6 = vector.load %arg47[%c0_4, %c384] : memref<8x1024xf32, #tpu.memory_space<vmem>>, vector<8x7xf32>
    %c0_5 = arith.constant 0 : index
    %c512 = arith.constant 512 : index
    %7 = vector.load %arg47[%c0_5, %c512] : memref<8x1024xf32, #tpu.memory_space<vmem>>, vector<8x7xf32>
    %c0_6 = arith.constant 0 : index
    %c640 = arith.constant 640 : index
    %8 = vector.load %arg47[%c0_6, %c640] : memref<8x1024xf32, #tpu.memory_space<vmem>>, vector<8x49xf32>
    %c0_7 = arith.constant 0 : index
    %c768 = arith.constant 768 : index
    %9 = vector.load %arg47[%c0_7, %c768] : memref<8x1024xf32, #tpu.memory_space<vmem>>, vector<8x49xf32>
    %c0_8 = arith.constant 0 : index
    %c896 = arith.constant 896 : index
    %10 = vector.load %arg47[%c0_8, %c896] : memref<8x1024xf32, #tpu.memory_space<vmem>>, vector<8x49xf32>
    %c0_9 = arith.constant 0 : index
    %c0_10 = arith.constant 0 : index
    %c0_11 = arith.constant 0 : index
    %11 = vector.load %arg2[%c0_9, %c0_10, %c0_11] : memref<1x8x7xf32, #tpu.memory_space<vmem>>, vector<1x8x7xf32>
    %12 = vector.shape_cast %11 : vector<1x8x7xf32> to vector<8x7xf32>
    %13 = arith.subf %3, %4 : vector<8x7xf32>
    %14 = arith.subf %4, %5 : vector<8x7xf32>
    %15 = arith.subf %3, %6 : vector<8x7xf32>
    %cst = arith.constant 2.000000e+00 : f32
    %16 = vector.broadcast %cst : f32 to vector<8x7xf32>
    %17 = arith.mulf %16, %4 : vector<8x7xf32>
    %18 = arith.subf %3, %17 : vector<8x7xf32>
    %19 = arith.addf %18, %5 : vector<8x7xf32>
    %20 = tpu.concatenate %3, %4, %5, %19, %6, %13, %14, %15 in 0 : vector<8x7xf32>, vector<8x7xf32>, vector<8x7xf32>, vector<8x7xf32>, vector<8x7xf32>, vector<8x7xf32>, vector<8x7xf32>, vector<8x7xf32> -> vector<64x7xf32>
    %c0_12 = arith.constant 0 : index
    %c0_13 = arith.constant 0 : index
    %21 = vector.load %arg3[%c0_12, %c0_13] : memref<7x128xf32, #tpu.memory_space<vmem>>, vector<7x128xf32>
    %cst_14 = arith.constant dense<0.000000e+00> : vector<64x128xf32>
    %22 = tpu.matmul %20, %21, %cst_14 {dimension_numbers = #tpu.dot_dimension_numbers<[1], [0], [0], [1], [0, 0, 1, 1], [], []>} : vector<64x7xf32>, vector<7x128xf32>, vector<64x128xf32> -> vector<64x128xf32>
    %c0_15 = arith.constant 0 : index
    %c0_16 = arith.constant 0 : index
    %23 = vector.load %arg4[%c0_15, %c0_16] : memref<64x128xf32, #tpu.memory_space<vmem>>, vector<64x128xf32>
    %24 = arith.addf %22, %23 : vector<64x128xf32>
    %c0_17 = arith.constant 0 : index
    %c0_18 = arith.constant 0 : index
    %25 = vector.load %arg6[%c0_17, %c0_18] : memref<16x128xf32, #tpu.memory_space<vmem>>, vector<1x128xf32>
    %c4 = arith.constant 4 : index
    %c0_19 = arith.constant 0 : index
    %26 = vector.load %arg6[%c4, %c0_19] : memref<16x128xf32, #tpu.memory_space<vmem>>, vector<1x128xf32>
    %cst_20 = arith.constant dense<0.000000e+00> : vector<64xf32>
    %27 = vector.multi_reduction <add>, %24, %cst_20 [1] : vector<64x128xf32> to vector<64xf32>
    %28 = vector.shape_cast %27 : vector<64xf32> to vector<64x1xf32>
    %cst_21 = arith.constant 1.280000e+02 : f32
    %29 = vector.broadcast %cst_21 : f32 to vector<64x1xf32>
    %30 = arith.divf %28, %29 : vector<64x1xf32>
    %31 = arith.mulf %24, %24 : vector<64x128xf32>
    %cst_22 = arith.constant dense<0.000000e+00> : vector<64xf32>
    %32 = vector.multi_reduction <add>, %31, %cst_22 [1] : vector<64x128xf32> to vector<64xf32>
    %33 = vector.shape_cast %32 : vector<64xf32> to vector<64x1xf32>
    %cst_23 = arith.constant 1.280000e+02 : f32
    %34 = vector.broadcast %cst_23 : f32 to vector<64x1xf32>
    %35 = arith.divf %33, %34 : vector<64x1xf32>
    %36 = arith.mulf %30, %30 : vector<64x1xf32>
    %37 = arith.subf %35, %36 : vector<64x1xf32>
    %38 = vector.broadcast %30 : vector<64x1xf32> to vector<64x128xf32>
    %39 = arith.subf %24, %38 : vector<64x128xf32>
    %cst_24 = arith.constant 9.99999974E-6 : f32
    %40 = vector.broadcast %cst_24 : f32 to vector<64x1xf32>
    %41 = arith.addf %37, %40 : vector<64x1xf32>
    %42 = math.rsqrt %41 : vector<64x1xf32>
    %43 = vector.broadcast %42 : vector<64x1xf32> to vector<64x128xf32>
    %44 = arith.mulf %39, %43 : vector<64x128xf32>
    %45 = vector.broadcast %25 : vector<1x128xf32> to vector<64x128xf32>
    %46 = arith.mulf %44, %45 : vector<64x128xf32>
    %47 = vector.broadcast %26 : vector<1x128xf32> to vector<64x128xf32>
    %48 = arith.addf %46, %47 : vector<64x128xf32>
    %49 = arith.mulf %48, %48 : vector<64x128xf32>
    %50 = arith.mulf %48, %49 : vector<64x128xf32>
    %cst_25 = arith.constant 4.471500e-02 : f32
    %51 = vector.broadcast %cst_25 : f32 to vector<64x128xf32>
    %52 = arith.mulf %51, %50 : vector<64x128xf32>
    %53 = arith.addf %48, %52 : vector<64x128xf32>
    %cst_26 = arith.constant 0.797884583 : f32
    %54 = vector.broadcast %cst_26 : f32 to vector<64x128xf32>
    %55 = arith.mulf %54, %53 : vector<64x128xf32>
    %56 = math.tanh %55 : vector<64x128xf32>
    %cst_27 = arith.constant 1.000000e+00 : f32
    %57 = vector.broadcast %cst_27 : f32 to vector<64x128xf32>
    %58 = arith.addf %57, %56 : vector<64x128xf32>
    %cst_28 = arith.constant 5.000000e-01 : f32
    %59 = vector.broadcast %cst_28 : f32 to vector<64x128xf32>
    %60 = arith.mulf %59, %58 : vector<64x128xf32>
    %61 = arith.mulf %48, %60 : vector<64x128xf32>
    %c0_29 = arith.constant 0 : index
    %c0_30 = arith.constant 0 : index
    %c0_31 = arith.constant 0 : index
    %62 = vector.load %arg5[%c0_29, %c0_30, %c0_31] : memref<3x128x128xf32, #tpu.memory_space<vmem>>, vector<1x128x128xf32>
    %63 = vector.shape_cast %62 : vector<1x128x128xf32> to vector<128x128xf32>
    %cst_32 = arith.constant dense<0.000000e+00> : vector<64x128xf32>
    %64 = tpu.matmul %61, %63, %cst_32 {dimension_numbers = #tpu.dot_dimension_numbers<[1], [0], [0], [1], [0, 0, 1, 1], [], []>} : vector<64x128xf32>, vector<128x128xf32>, vector<64x128xf32> -> vector<64x128xf32>
    %c8 = arith.constant 8 : index
    %c0_33 = arith.constant 0 : index
    %65 = vector.load %arg6[%c8, %c0_33] : memref<16x128xf32, #tpu.memory_space<vmem>>, vector<1x128xf32>
    %66 = vector.broadcast %65 : vector<1x128xf32> to vector<64x128xf32>
    %67 = arith.addf %64, %66 : vector<64x128xf32>
    %c1 = arith.constant 1 : index
    %c0_34 = arith.constant 0 : index
    %68 = vector.load %arg6[%c1, %c0_34] : memref<16x128xf32, #tpu.memory_space<vmem>>, vector<1x128xf32>
    %c5 = arith.constant 5 : index
    %c0_35 = arith.constant 0 : index
    %69 = vector.load %arg6[%c5, %c0_35] : memref<16x128xf32, #tpu.memory_space<vmem>>, vector<1x128xf32>
    %cst_36 = arith.constant dense<0.000000e+00> : vector<64xf32>
    %70 = vector.multi_reduction <add>, %67, %cst_36 [1] : vector<64x128xf32> to vector<64xf32>
    %71 = vector.shape_cast %70 : vector<64xf32> to vector<64x1xf32>
    %cst_37 = arith.constant 1.280000e+02 : f32
    %72 = vector.broadcast %cst_37 : f32 to vector<64x1xf32>
    %73 = arith.divf %71, %72 : vector<64x1xf32>
    %74 = arith.mulf %67, %67 : vector<64x128xf32>
    %cst_38 = arith.constant dense<0.000000e+00> : vector<64xf32>
    %75 = vector.multi_reduction <add>, %74, %cst_38 [1] : vector<64x128xf32> to vector<64xf32>
    %76 = vector.shape_cast %75 : vector<64xf32> to vector<64x1xf32>
    %cst_39 = arith.constant 1.280000e+02 : f32
    %77 = vector.broadcast %cst_39 : f32 to vector<64x1xf32>
    %78 = arith.divf %76, %77 : vector<64x1xf32>
    %79 = arith.mulf %73, %73 : vector<64x1xf32>
    %80 = arith.subf %78, %79 : vector<64x1xf32>
    %81 = vector.broadcast %73 : vector<64x1xf32> to vector<64x128xf32>
    %82 = arith.subf %67, %81 : vector<64x128xf32>
    %cst_40 = arith.constant 9.99999974E-6 : f32
    %83 = vector.broadcast %cst_40 : f32 to vector<64x1xf32>
    %84 = arith.addf %80, %83 : vector<64x1xf32>
    %85 = math.rsqrt %84 : vector<64x1xf32>
    %86 = vector.broadcast %85 : vector<64x1xf32> to vector<64x128xf32>
    %87 = arith.mulf %82, %86 : vector<64x128xf32>
    %88 = vector.broadcast %68 : vector<1x128xf32> to vector<64x128xf32>
    %89 = arith.mulf %87, %88 : vector<64x128xf32>
    %90 = vector.broadcast %69 : vector<1x128xf32> to vector<64x128xf32>
    %91 = arith.addf %89, %90 : vector<64x128xf32>
    %92 = arith.mulf %91, %91 : vector<64x128xf32>
    %93 = arith.mulf %91, %92 : vector<64x128xf32>
    %cst_41 = arith.constant 4.471500e-02 : f32
    %94 = vector.broadcast %cst_41 : f32 to vector<64x128xf32>
    %95 = arith.mulf %94, %93 : vector<64x128xf32>
    %96 = arith.addf %91, %95 : vector<64x128xf32>
    %cst_42 = arith.constant 0.797884583 : f32
    %97 = vector.broadcast %cst_42 : f32 to vector<64x128xf32>
    %98 = arith.mulf %97, %96 : vector<64x128xf32>
    %99 = math.tanh %98 : vector<64x128xf32>
    %cst_43 = arith.constant 1.000000e+00 : f32
    %100 = vector.broadcast %cst_43 : f32 to vector<64x128xf32>
    %101 = arith.addf %100, %99 : vector<64x128xf32>
    %cst_44 = arith.constant 5.000000e-01 : f32
    %102 = vector.broadcast %cst_44 : f32 to vector<64x128xf32>
    %103 = arith.mulf %102, %101 : vector<64x128xf32>
    %104 = arith.mulf %91, %103 : vector<64x128xf32>
    %c1_45 = arith.constant 1 : index
    %c0_46 = arith.constant 0 : index
    %c0_47 = arith.constant 0 : index
    %105 = vector.load %arg5[%c1_45, %c0_46, %c0_47] : memref<3x128x128xf32, #tpu.memory_space<vmem>>, vector<1x128x128xf32>
    %106 = vector.shape_cast %105 : vector<1x128x128xf32> to vector<128x128xf32>
    %cst_48 = arith.constant dense<0.000000e+00> : vector<64x128xf32>
    %107 = tpu.matmul %104, %106, %cst_48 {dimension_numbers = #tpu.dot_dimension_numbers<[1], [0], [0], [1], [0, 0, 1, 1], [], []>} : vector<64x128xf32>, vector<128x128xf32>, vector<64x128xf32> -> vector<64x128xf32>
    %c9 = arith.constant 9 : index
    %c0_49 = arith.constant 0 : index
    %108 = vector.load %arg6[%c9, %c0_49] : memref<16x128xf32, #tpu.memory_space<vmem>>, vector<1x128xf32>
    %109 = vector.broadcast %108 : vector<1x128xf32> to vector<64x128xf32>
    %110 = arith.addf %107, %109 : vector<64x128xf32>
    %c2 = arith.constant 2 : index
    %c0_50 = arith.constant 0 : index
    %111 = vector.load %arg6[%c2, %c0_50] : memref<16x128xf32, #tpu.memory_space<vmem>>, vector<1x128xf32>
    %c6 = arith.constant 6 : index
    %c0_51 = arith.constant 0 : index
    %112 = vector.load %arg6[%c6, %c0_51] : memref<16x128xf32, #tpu.memory_space<vmem>>, vector<1x128xf32>
    %cst_52 = arith.constant dense<0.000000e+00> : vector<64xf32>
    %113 = vector.multi_reduction <add>, %110, %cst_52 [1] : vector<64x128xf32> to vector<64xf32>
    %114 = vector.shape_cast %113 : vector<64xf32> to vector<64x1xf32>
    %cst_53 = arith.constant 1.280000e+02 : f32
    %115 = vector.broadcast %cst_53 : f32 to vector<64x1xf32>
    %116 = arith.divf %114, %115 : vector<64x1xf32>
    %117 = arith.mulf %110, %110 : vector<64x128xf32>
    %cst_54 = arith.constant dense<0.000000e+00> : vector<64xf32>
    %118 = vector.multi_reduction <add>, %117, %cst_54 [1] : vector<64x128xf32> to vector<64xf32>
    %119 = vector.shape_cast %118 : vector<64xf32> to vector<64x1xf32>
    %cst_55 = arith.constant 1.280000e+02 : f32
    %120 = vector.broadcast %cst_55 : f32 to vector<64x1xf32>
    %121 = arith.divf %119, %120 : vector<64x1xf32>
    %122 = arith.mulf %116, %116 : vector<64x1xf32>
    %123 = arith.subf %121, %122 : vector<64x1xf32>
    %124 = vector.broadcast %116 : vector<64x1xf32> to vector<64x128xf32>
    %125 = arith.subf %110, %124 : vector<64x128xf32>
    %cst_56 = arith.constant 9.99999974E-6 : f32
    %126 = vector.broadcast %cst_56 : f32 to vector<64x1xf32>
    %127 = arith.addf %123, %126 : vector<64x1xf32>
    %128 = math.rsqrt %127 : vector<64x1xf32>
    %129 = vector.broadcast %128 : vector<64x1xf32> to vector<64x128xf32>
    %130 = arith.mulf %125, %129 : vector<64x128xf32>
    %131 = vector.broadcast %111 : vector<1x128xf32> to vector<64x128xf32>
    %132 = arith.mulf %130, %131 : vector<64x128xf32>
    %133 = vector.broadcast %112 : vector<1x128xf32> to vector<64x128xf32>
    %134 = arith.addf %132, %133 : vector<64x128xf32>
    %135 = arith.mulf %134, %134 : vector<64x128xf32>
    %136 = arith.mulf %134, %135 : vector<64x128xf32>
    %cst_57 = arith.constant 4.471500e-02 : f32
    %137 = vector.broadcast %cst_57 : f32 to vector<64x128xf32>
    %138 = arith.mulf %137, %136 : vector<64x128xf32>
    %139 = arith.addf %134, %138 : vector<64x128xf32>
    %cst_58 = arith.constant 0.797884583 : f32
    %140 = vector.broadcast %cst_58 : f32 to vector<64x128xf32>
    %141 = arith.mulf %140, %139 : vector<64x128xf32>
    %142 = math.tanh %141 : vector<64x128xf32>
    %cst_59 = arith.constant 1.000000e+00 : f32
    %143 = vector.broadcast %cst_59 : f32 to vector<64x128xf32>
    %144 = arith.addf %143, %142 : vector<64x128xf32>
    %cst_60 = arith.constant 5.000000e-01 : f32
    %145 = vector.broadcast %cst_60 : f32 to vector<64x128xf32>
    %146 = arith.mulf %145, %144 : vector<64x128xf32>
    %147 = arith.mulf %134, %146 : vector<64x128xf32>
    %c2_61 = arith.constant 2 : index
    %c0_62 = arith.constant 0 : index
    %c0_63 = arith.constant 0 : index
    %148 = vector.load %arg5[%c2_61, %c0_62, %c0_63] : memref<3x128x128xf32, #tpu.memory_space<vmem>>, vector<1x128x128xf32>
    %149 = vector.shape_cast %148 : vector<1x128x128xf32> to vector<128x128xf32>
    %cst_64 = arith.constant dense<0.000000e+00> : vector<64x128xf32>
    %150 = tpu.matmul %147, %149, %cst_64 {dimension_numbers = #tpu.dot_dimension_numbers<[1], [0], [0], [1], [0, 0, 1, 1], [], []>} : vector<64x128xf32>, vector<128x128xf32>, vector<64x128xf32> -> vector<64x128xf32>
    %c10 = arith.constant 10 : index
    %c0_65 = arith.constant 0 : index
    %151 = vector.load %arg6[%c10, %c0_65] : memref<16x128xf32, #tpu.memory_space<vmem>>, vector<1x128xf32>
    %152 = vector.broadcast %151 : vector<1x128xf32> to vector<64x128xf32>
    %153 = arith.addf %150, %152 : vector<64x128xf32>
    %c3 = arith.constant 3 : index
    %c0_66 = arith.constant 0 : index
    %154 = vector.load %arg6[%c3, %c0_66] : memref<16x128xf32, #tpu.memory_space<vmem>>, vector<1x128xf32>
    %c7 = arith.constant 7 : index
    %c0_67 = arith.constant 0 : index
    %155 = vector.load %arg6[%c7, %c0_67] : memref<16x128xf32, #tpu.memory_space<vmem>>, vector<1x128xf32>
    %cst_68 = arith.constant dense<0.000000e+00> : vector<64xf32>
    %156 = vector.multi_reduction <add>, %153, %cst_68 [1] : vector<64x128xf32> to vector<64xf32>
    %157 = vector.shape_cast %156 : vector<64xf32> to vector<64x1xf32>
    %cst_69 = arith.constant 1.280000e+02 : f32
    %158 = vector.broadcast %cst_69 : f32 to vector<64x1xf32>
    %159 = arith.divf %157, %158 : vector<64x1xf32>
    %160 = arith.mulf %153, %153 : vector<64x128xf32>
    %cst_70 = arith.constant dense<0.000000e+00> : vector<64xf32>
    %161 = vector.multi_reduction <add>, %160, %cst_70 [1] : vector<64x128xf32> to vector<64xf32>
    %162 = vector.shape_cast %161 : vector<64xf32> to vector<64x1xf32>
    %cst_71 = arith.constant 1.280000e+02 : f32
    %163 = vector.broadcast %cst_71 : f32 to vector<64x1xf32>
    %164 = arith.divf %162, %163 : vector<64x1xf32>
    %165 = arith.mulf %159, %159 : vector<64x1xf32>
    %166 = arith.subf %164, %165 : vector<64x1xf32>
    %167 = vector.broadcast %159 : vector<64x1xf32> to vector<64x128xf32>
    %168 = arith.subf %153, %167 : vector<64x128xf32>
    %cst_72 = arith.constant 9.99999974E-6 : f32
    %169 = vector.broadcast %cst_72 : f32 to vector<64x1xf32>
    %170 = arith.addf %166, %169 : vector<64x1xf32>
    %171 = math.rsqrt %170 : vector<64x1xf32>
    %172 = vector.broadcast %171 : vector<64x1xf32> to vector<64x128xf32>
    %173 = arith.mulf %168, %172 : vector<64x128xf32>
    %174 = vector.broadcast %154 : vector<1x128xf32> to vector<64x128xf32>
    %175 = arith.mulf %173, %174 : vector<64x128xf32>
    %176 = vector.broadcast %155 : vector<1x128xf32> to vector<64x128xf32>
    %177 = arith.addf %175, %176 : vector<64x128xf32>
    %178 = arith.mulf %177, %177 : vector<64x128xf32>
    %179 = arith.mulf %177, %178 : vector<64x128xf32>
    %cst_73 = arith.constant 4.471500e-02 : f32
    %180 = vector.broadcast %cst_73 : f32 to vector<64x128xf32>
    %181 = arith.mulf %180, %179 : vector<64x128xf32>
    %182 = arith.addf %177, %181 : vector<64x128xf32>
    %cst_74 = arith.constant 0.797884583 : f32
    %183 = vector.broadcast %cst_74 : f32 to vector<64x128xf32>
    %184 = arith.mulf %183, %182 : vector<64x128xf32>
    %185 = math.tanh %184 : vector<64x128xf32>
    %cst_75 = arith.constant 1.000000e+00 : f32
    %186 = vector.broadcast %cst_75 : f32 to vector<64x128xf32>
    %187 = arith.addf %186, %185 : vector<64x128xf32>
    %cst_76 = arith.constant 5.000000e-01 : f32
    %188 = vector.broadcast %cst_76 : f32 to vector<64x128xf32>
    %189 = arith.mulf %188, %187 : vector<64x128xf32>
    %190 = arith.mulf %177, %189 : vector<64x128xf32>
    %c0_77 = arith.constant 0 : index
    %c0_78 = arith.constant 0 : index
    %191 = vector.load %arg7[%c0_77, %c0_78] : memref<128x32xf32, #tpu.memory_space<vmem>>, vector<128x32xf32>
    %cst_79 = arith.constant dense<0.000000e+00> : vector<64x32xf32>
    %192 = tpu.matmul %190, %191, %cst_79 {dimension_numbers = #tpu.dot_dimension_numbers<[1], [0], [0], [1], [0, 0, 1, 1], [], []>} : vector<64x128xf32>, vector<128x32xf32>, vector<64x32xf32> -> vector<64x32xf32>
    %c11 = arith.constant 11 : index
    %c0_80 = arith.constant 0 : index
    %193 = vector.load %arg6[%c11, %c0_80] : memref<16x128xf32, #tpu.memory_space<vmem>>, vector<1x32xf32>
    %194 = vector.broadcast %193 : vector<1x32xf32> to vector<64x32xf32>
    %195 = arith.addf %192, %194 : vector<64x32xf32>
    %c0_81 = arith.constant 0 : index
    %c0_82 = arith.constant 0 : index
    %196 = vector.load %arg12[%c0_81, %c0_82] : memref<64x64xf32, #tpu.memory_space<vmem>>, vector<64x64xf32>
    %cst_83 = arith.constant 0.000000e+00 : f32
    %197 = vector.broadcast %cst_83 : f32 to vector<64x32xf32>
    %c0_84 = arith.constant 0 : index
    %c0_85 = arith.constant 0 : index
    %c0_86 = arith.constant 0 : index
    %c0_87 = arith.constant 0 : index
    %198 = vector.load %arg8[%c0_84, %c0_85, %c0_86, %c0_87] : memref<3x2x32x16xf32, #tpu.memory_space<vmem>>, vector<1x1x32x16xf32>
    %199 = vector.shape_cast %198 : vector<1x1x32x16xf32> to vector<32x16xf32>
    %cst_88 = arith.constant dense<0.000000e+00> : vector<64x16xf32>
    %200 = tpu.matmul %195, %199, %cst_88 {dimension_numbers = #tpu.dot_dimension_numbers<[1], [0], [0], [1], [0, 0, 1, 1], [], []>} : vector<64x32xf32>, vector<32x16xf32>, vector<64x16xf32> -> vector<64x16xf32>
    %c0_89 = arith.constant 0 : index
    %c0_90 = arith.constant 0 : index
    %c0_91 = arith.constant 0 : index
    %c0_92 = arith.constant 0 : index
    %201 = vector.load %arg9[%c0_89, %c0_90, %c0_91, %c0_92] : memref<3x2x1x16xf32, #tpu.memory_space<vmem>>, vector<1x1x1x16xf32>
    %202 = vector.shape_cast %201 : vector<1x1x1x16xf32> to vector<1x16xf32>
    %203 = vector.broadcast %202 : vector<1x16xf32> to vector<64x16xf32>
    %204 = arith.addf %200, %203 : vector<64x16xf32>
    %c1_93 = arith.constant 1 : index
    %c0_94 = arith.constant 0 : index
    %c0_95 = arith.constant 0 : index
    %c0_96 = arith.constant 0 : index
    %205 = vector.load %arg8[%c1_93, %c0_94, %c0_95, %c0_96] : memref<3x2x32x16xf32, #tpu.memory_space<vmem>>, vector<1x1x32x16xf32>
    %206 = vector.shape_cast %205 : vector<1x1x32x16xf32> to vector<32x16xf32>
    %cst_97 = arith.constant dense<0.000000e+00> : vector<64x16xf32>
    %207 = tpu.matmul %195, %206, %cst_97 {dimension_numbers = #tpu.dot_dimension_numbers<[1], [0], [0], [1], [0, 0, 1, 1], [], []>} : vector<64x32xf32>, vector<32x16xf32>, vector<64x16xf32> -> vector<64x16xf32>
    %c1_98 = arith.constant 1 : index
    %c0_99 = arith.constant 0 : index
    %c0_100 = arith.constant 0 : index
    %c0_101 = arith.constant 0 : index
    %208 = vector.load %arg9[%c1_98, %c0_99, %c0_100, %c0_101] : memref<3x2x1x16xf32, #tpu.memory_space<vmem>>, vector<1x1x1x16xf32>
    %209 = vector.shape_cast %208 : vector<1x1x1x16xf32> to vector<1x16xf32>
    %210 = vector.broadcast %209 : vector<1x16xf32> to vector<64x16xf32>
    %211 = arith.addf %207, %210 : vector<64x16xf32>
    %c2_102 = arith.constant 2 : index
    %c0_103 = arith.constant 0 : index
    %c0_104 = arith.constant 0 : index
    %c0_105 = arith.constant 0 : index
    %212 = vector.load %arg8[%c2_102, %c0_103, %c0_104, %c0_105] : memref<3x2x32x16xf32, #tpu.memory_space<vmem>>, vector<1x1x32x16xf32>
    %213 = vector.shape_cast %212 : vector<1x1x32x16xf32> to vector<32x16xf32>
    %cst_106 = arith.constant dense<0.000000e+00> : vector<64x16xf32>
    %214 = tpu.matmul %195, %213, %cst_106 {dimension_numbers = #tpu.dot_dimension_numbers<[1], [0], [0], [1], [0, 0, 1, 1], [], []>} : vector<64x32xf32>, vector<32x16xf32>, vector<64x16xf32> -> vector<64x16xf32>
    %c2_107 = arith.constant 2 : index
    %c0_108 = arith.constant 0 : index
    %c0_109 = arith.constant 0 : index
    %c0_110 = arith.constant 0 : index
    %215 = vector.load %arg9[%c2_107, %c0_108, %c0_109, %c0_110] : memref<3x2x1x16xf32, #tpu.memory_space<vmem>>, vector<1x1x1x16xf32>
    %216 = vector.shape_cast %215 : vector<1x1x1x16xf32> to vector<1x16xf32>
    %217 = vector.broadcast %216 : vector<1x16xf32> to vector<64x16xf32>
    %218 = arith.addf %214, %217 : vector<64x16xf32>
    %cst_111 = arith.constant dense<0.000000e+00> : vector<64x64xf32>
    %219 = tpu.matmul %204, %211, %cst_111 {dimension_numbers = #tpu.dot_dimension_numbers<[1], [1], [0], [0], [0, 0, 1, 0], [], []>} : vector<64x16xf32>, vector<64x16xf32>, vector<64x64xf32> -> vector<64x64xf32>
    %cst_112 = arith.constant 2.500000e-01 : f32
    %220 = vector.broadcast %cst_112 : f32 to vector<64x64xf32>
    %221 = arith.mulf %219, %220 : vector<64x64xf32>
    %222 = arith.addf %221, %196 : vector<64x64xf32>
    %cst_113 = arith.constant dense<0xFF800000> : vector<64xf32>
    %223 = vector.multi_reduction <maximumf>, %222, %cst_113 [1] : vector<64x64xf32> to vector<64xf32>
    %224 = vector.shape_cast %223 : vector<64xf32> to vector<64x1xf32>
    %225 = vector.broadcast %224 : vector<64x1xf32> to vector<64x64xf32>
    %226 = arith.subf %222, %225 : vector<64x64xf32>
    %227 = math.exp %226 : vector<64x64xf32>
    %cst_114 = arith.constant dense<0.000000e+00> : vector<64xf32>
    %228 = vector.multi_reduction <add>, %227, %cst_114 [1] : vector<64x64xf32> to vector<64xf32>
    %229 = vector.shape_cast %228 : vector<64xf32> to vector<64x1xf32>
    %230 = vector.broadcast %229 : vector<64x1xf32> to vector<64x64xf32>
    %231 = arith.divf %227, %230 : vector<64x64xf32>
    %cst_115 = arith.constant dense<0.000000e+00> : vector<64x16xf32>
    %232 = tpu.matmul %231, %218, %cst_115 {dimension_numbers = #tpu.dot_dimension_numbers<[1], [0], [0], [1], [0, 0, 1, 1], [], []>} : vector<64x64xf32>, vector<64x16xf32>, vector<64x16xf32> -> vector<64x16xf32>
    %c0_116 = arith.constant 0 : index
    %c0_117 = arith.constant 0 : index
    %c0_118 = arith.constant 0 : index
    %233 = vector.load %arg10[%c0_116, %c0_117, %c0_118] : memref<2x16x32xf32, #tpu.memory_space<vmem>>, vector<1x16x32xf32>
    %234 = vector.shape_cast %233 : vector<1x16x32xf32> to vector<16x32xf32>
    %cst_119 = arith.constant dense<0.000000e+00> : vector<64x32xf32>
    %235 = tpu.matmul %232, %234, %cst_119 {dimension_numbers = #tpu.dot_dimension_numbers<[1], [0], [0], [1], [0, 0, 1, 1], [], []>} : vector<64x16xf32>, vector<16x32xf32>, vector<64x32xf32> -> vector<64x32xf32>
    %236 = arith.addf %197, %235 : vector<64x32xf32>
    %c0_120 = arith.constant 0 : index
    %c1_121 = arith.constant 1 : index
    %c0_122 = arith.constant 0 : index
    %c0_123 = arith.constant 0 : index
    %237 = vector.load %arg8[%c0_120, %c1_121, %c0_122, %c0_123] : memref<3x2x32x16xf32, #tpu.memory_space<vmem>>, vector<1x1x32x16xf32>
    %238 = vector.shape_cast %237 : vector<1x1x32x16xf32> to vector<32x16xf32>
    %cst_124 = arith.constant dense<0.000000e+00> : vector<64x16xf32>
    %239 = tpu.matmul %195, %238, %cst_124 {dimension_numbers = #tpu.dot_dimension_numbers<[1], [0], [0], [1], [0, 0, 1, 1], [], []>} : vector<64x32xf32>, vector<32x16xf32>, vector<64x16xf32> -> vector<64x16xf32>
    %c0_125 = arith.constant 0 : index
    %c1_126 = arith.constant 1 : index
    %c0_127 = arith.constant 0 : index
    %c0_128 = arith.constant 0 : index
    %240 = vector.load %arg9[%c0_125, %c1_126, %c0_127, %c0_128] : memref<3x2x1x16xf32, #tpu.memory_space<vmem>>, vector<1x1x1x16xf32>
    %241 = vector.shape_cast %240 : vector<1x1x1x16xf32> to vector<1x16xf32>
    %242 = vector.broadcast %241 : vector<1x16xf32> to vector<64x16xf32>
    %243 = arith.addf %239, %242 : vector<64x16xf32>
    %c1_129 = arith.constant 1 : index
    %c1_130 = arith.constant 1 : index
    %c0_131 = arith.constant 0 : index
    %c0_132 = arith.constant 0 : index
    %244 = vector.load %arg8[%c1_129, %c1_130, %c0_131, %c0_132] : memref<3x2x32x16xf32, #tpu.memory_space<vmem>>, vector<1x1x32x16xf32>
    %245 = vector.shape_cast %244 : vector<1x1x32x16xf32> to vector<32x16xf32>
    %cst_133 = arith.constant dense<0.000000e+00> : vector<64x16xf32>
    %246 = tpu.matmul %195, %245, %cst_133 {dimension_numbers = #tpu.dot_dimension_numbers<[1], [0], [0], [1], [0, 0, 1, 1], [], []>} : vector<64x32xf32>, vector<32x16xf32>, vector<64x16xf32> -> vector<64x16xf32>
    %c1_134 = arith.constant 1 : index
    %c1_135 = arith.constant 1 : index
    %c0_136 = arith.constant 0 : index
    %c0_137 = arith.constant 0 : index
    %247 = vector.load %arg9[%c1_134, %c1_135, %c0_136, %c0_137] : memref<3x2x1x16xf32, #tpu.memory_space<vmem>>, vector<1x1x1x16xf32>
    %248 = vector.shape_cast %247 : vector<1x1x1x16xf32> to vector<1x16xf32>
    %249 = vector.broadcast %248 : vector<1x16xf32> to vector<64x16xf32>
    %250 = arith.addf %246, %249 : vector<64x16xf32>
    %c2_138 = arith.constant 2 : index
    %c1_139 = arith.constant 1 : index
    %c0_140 = arith.constant 0 : index
    %c0_141 = arith.constant 0 : index
    %251 = vector.load %arg8[%c2_138, %c1_139, %c0_140, %c0_141] : memref<3x2x32x16xf32, #tpu.memory_space<vmem>>, vector<1x1x32x16xf32>
    %252 = vector.shape_cast %251 : vector<1x1x32x16xf32> to vector<32x16xf32>
    %cst_142 = arith.constant dense<0.000000e+00> : vector<64x16xf32>
    %253 = tpu.matmul %195, %252, %cst_142 {dimension_numbers = #tpu.dot_dimension_numbers<[1], [0], [0], [1], [0, 0, 1, 1], [], []>} : vector<64x32xf32>, vector<32x16xf32>, vector<64x16xf32> -> vector<64x16xf32>
    %c2_143 = arith.constant 2 : index
    %c1_144 = arith.constant 1 : index
    %c0_145 = arith.constant 0 : index
    %c0_146 = arith.constant 0 : index
    %254 = vector.load %arg9[%c2_143, %c1_144, %c0_145, %c0_146] : memref<3x2x1x16xf32, #tpu.memory_space<vmem>>, vector<1x1x1x16xf32>
    %255 = vector.shape_cast %254 : vector<1x1x1x16xf32> to vector<1x16xf32>
    %256 = vector.broadcast %255 : vector<1x16xf32> to vector<64x16xf32>
    %257 = arith.addf %253, %256 : vector<64x16xf32>
    %cst_147 = arith.constant dense<0.000000e+00> : vector<64x64xf32>
    %258 = tpu.matmul %243, %250, %cst_147 {dimension_numbers = #tpu.dot_dimension_numbers<[1], [1], [0], [0], [0, 0, 1, 0], [], []>} : vector<64x16xf32>, vector<64x16xf32>, vector<64x64xf32> -> vector<64x64xf32>
    %cst_148 = arith.constant 2.500000e-01 : f32
    %259 = vector.broadcast %cst_148 : f32 to vector<64x64xf32>
    %260 = arith.mulf %258, %259 : vector<64x64xf32>
    %261 = arith.addf %260, %196 : vector<64x64xf32>
    %cst_149 = arith.constant dense<0xFF800000> : vector<64xf32>
    %262 = vector.multi_reduction <maximumf>, %261, %cst_149 [1] : vector<64x64xf32> to vector<64xf32>
    %263 = vector.shape_cast %262 : vector<64xf32> to vector<64x1xf32>
    %264 = vector.broadcast %263 : vector<64x1xf32> to vector<64x64xf32>
    %265 = arith.subf %261, %264 : vector<64x64xf32>
    %266 = math.exp %265 : vector<64x64xf32>
    %cst_150 = arith.constant dense<0.000000e+00> : vector<64xf32>
    %267 = vector.multi_reduction <add>, %266, %cst_150 [1] : vector<64x64xf32> to vector<64xf32>
    %268 = vector.shape_cast %267 : vector<64xf32> to vector<64x1xf32>
    %269 = vector.broadcast %268 : vector<64x1xf32> to vector<64x64xf32>
    %270 = arith.divf %266, %269 : vector<64x64xf32>
    %cst_151 = arith.constant dense<0.000000e+00> : vector<64x16xf32>
    %271 = tpu.matmul %270, %257, %cst_151 {dimension_numbers = #tpu.dot_dimension_numbers<[1], [0], [0], [1], [0, 0, 1, 1], [], []>} : vector<64x64xf32>, vector<64x16xf32>, vector<64x16xf32> -> vector<64x16xf32>
    %c1_152 = arith.constant 1 : index
    %c0_153 = arith.constant 0 : index
    %c0_154 = arith.constant 0 : index
    %272 = vector.load %arg10[%c1_152, %c0_153, %c0_154] : memref<2x16x32xf32, #tpu.memory_space<vmem>>, vector<1x16x32xf32>
    %273 = vector.shape_cast %272 : vector<1x16x32xf32> to vector<16x32xf32>
    %cst_155 = arith.constant dense<0.000000e+00> : vector<64x32xf32>
    %274 = tpu.matmul %271, %273, %cst_155 {dimension_numbers = #tpu.dot_dimension_numbers<[1], [0], [0], [1], [0, 0, 1, 1], [], []>} : vector<64x16xf32>, vector<16x32xf32>, vector<64x32xf32> -> vector<64x32xf32>
    %275 = arith.addf %236, %274 : vector<64x32xf32>
    %c0_156 = arith.constant 0 : index
    %c0_157 = arith.constant 0 : index
    %276 = vector.load %arg13[%c0_156, %c0_157] : memref<8x64xf32, #tpu.memory_space<vmem>>, vector<8x64xf32>
    %cst_158 = arith.constant dense<0.000000e+00> : vector<8x32xf32>
    %277 = tpu.matmul %276, %275, %cst_158 {dimension_numbers = #tpu.dot_dimension_numbers<[1], [0], [0], [1], [0, 0, 1, 1], [], []>} : vector<8x64xf32>, vector<64x32xf32>, vector<8x32xf32> -> vector<8x32xf32>
    %c0_159 = arith.constant 0 : index
    %c0_160 = arith.constant 0 : index
    %278 = vector.load %arg11[%c0_159, %c0_160] : memref<1x32xf32, #tpu.memory_space<vmem>>, vector<1x32xf32>
    %279 = vector.broadcast %278 : vector<1x32xf32> to vector<8x32xf32>
    %280 = arith.addf %277, %279 : vector<8x32xf32>
    %c0_161 = arith.constant 0 : index
    %c0_162 = arith.constant 0 : index
    %c0_163 = arith.constant 0 : index
    %281 = vector.load %arg14[%c0_161, %c0_162, %c0_163] : memref<2x32x128xf32, #tpu.memory_space<vmem>>, vector<1x32x128xf32>
    %282 = vector.shape_cast %281 : vector<1x32x128xf32> to vector<32x128xf32>
    %cst_164 = arith.constant dense<0.000000e+00> : vector<8x128xf32>
    %283 = tpu.matmul %280, %282, %cst_164 {dimension_numbers = #tpu.dot_dimension_numbers<[1], [0], [0], [1], [0, 0, 1, 1], [], []>} : vector<8x32xf32>, vector<32x128xf32>, vector<8x128xf32> -> vector<8x128xf32>
    %c0_165 = arith.constant 0 : index
    %c0_166 = arith.constant 0 : index
    %284 = vector.load %arg19[%c0_165, %c0_166] : memref<16x256xf32, #tpu.memory_space<vmem>>, vector<1x128xf32>
    %285 = vector.broadcast %284 : vector<1x128xf32> to vector<8x128xf32>
    %286 = arith.addf %283, %285 : vector<8x128xf32>
    %cst_167 = arith.constant 0.000000e+00 : f32
    %287 = vector.broadcast %cst_167 : f32 to vector<8x128xf32>
    %288 = arith.maximumf %286, %287 : vector<8x128xf32>
    %c0_168 = arith.constant 0 : index
    %c0_169 = arith.constant 0 : index
    %c0_170 = arith.constant 0 : index
    %289 = vector.load %arg16[%c0_168, %c0_169, %c0_170] : memref<2x128x64xf32, #tpu.memory_space<vmem>>, vector<1x128x64xf32>
    %290 = vector.shape_cast %289 : vector<1x128x64xf32> to vector<128x64xf32>
    %cst_171 = arith.constant dense<0.000000e+00> : vector<8x64xf32>
    %291 = tpu.matmul %288, %290, %cst_171 {dimension_numbers = #tpu.dot_dimension_numbers<[1], [0], [0], [1], [0, 0, 1, 1], [], []>} : vector<8x128xf32>, vector<128x64xf32>, vector<8x64xf32> -> vector<8x64xf32>
    %c4_172 = arith.constant 4 : index
    %c0_173 = arith.constant 0 : index
    %292 = vector.load %arg19[%c4_172, %c0_173] : memref<16x256xf32, #tpu.memory_space<vmem>>, vector<1x64xf32>
    %293 = vector.broadcast %292 : vector<1x64xf32> to vector<8x64xf32>
    %294 = arith.addf %291, %293 : vector<8x64xf32>
    %cst_174 = arith.constant 0.000000e+00 : f32
    %295 = vector.broadcast %cst_174 : f32 to vector<8x64xf32>
    %296 = arith.maximumf %294, %295 : vector<8x64xf32>
    %c1_175 = arith.constant 1 : index
    %c0_176 = arith.constant 0 : index
    %c0_177 = arith.constant 0 : index
    %297 = vector.load %arg14[%c1_175, %c0_176, %c0_177] : memref<2x32x128xf32, #tpu.memory_space<vmem>>, vector<1x32x128xf32>
    %298 = vector.shape_cast %297 : vector<1x32x128xf32> to vector<32x128xf32>
    %cst_178 = arith.constant dense<0.000000e+00> : vector<8x128xf32>
    %299 = tpu.matmul %280, %298, %cst_178 {dimension_numbers = #tpu.dot_dimension_numbers<[1], [0], [0], [1], [0, 0, 1, 1], [], []>} : vector<8x32xf32>, vector<32x128xf32>, vector<8x128xf32> -> vector<8x128xf32>
    %c1_179 = arith.constant 1 : index
    %c0_180 = arith.constant 0 : index
    %300 = vector.load %arg19[%c1_179, %c0_180] : memref<16x256xf32, #tpu.memory_space<vmem>>, vector<1x128xf32>
    %301 = vector.broadcast %300 : vector<1x128xf32> to vector<8x128xf32>
    %302 = arith.addf %299, %301 : vector<8x128xf32>
    %cst_181 = arith.constant 0.000000e+00 : f32
    %303 = vector.broadcast %cst_181 : f32 to vector<8x128xf32>
    %304 = arith.maximumf %302, %303 : vector<8x128xf32>
    %c1_182 = arith.constant 1 : index
    %c0_183 = arith.constant 0 : index
    %c0_184 = arith.constant 0 : index
    %305 = vector.load %arg16[%c1_182, %c0_183, %c0_184] : memref<2x128x64xf32, #tpu.memory_space<vmem>>, vector<1x128x64xf32>
    %306 = vector.shape_cast %305 : vector<1x128x64xf32> to vector<128x64xf32>
    %cst_185 = arith.constant dense<0.000000e+00> : vector<8x64xf32>
    %307 = tpu.matmul %304, %306, %cst_185 {dimension_numbers = #tpu.dot_dimension_numbers<[1], [0], [0], [1], [0, 0, 1, 1], [], []>} : vector<8x128xf32>, vector<128x64xf32>, vector<8x64xf32> -> vector<8x64xf32>
    %c5_186 = arith.constant 5 : index
    %c0_187 = arith.constant 0 : index
    %308 = vector.load %arg19[%c5_186, %c0_187] : memref<16x256xf32, #tpu.memory_space<vmem>>, vector<1x64xf32>
    %309 = vector.broadcast %308 : vector<1x64xf32> to vector<8x64xf32>
    %310 = arith.addf %307, %309 : vector<8x64xf32>
    %cst_188 = arith.constant 0.000000e+00 : f32
    %311 = vector.broadcast %cst_188 : f32 to vector<8x64xf32>
    %312 = arith.maximumf %310, %311 : vector<8x64xf32>
    %c0_189 = arith.constant 0 : index
    %c0_190 = arith.constant 0 : index
    %c0_191 = arith.constant 0 : index
    %313 = vector.load %arg15[%c0_189, %c0_190, %c0_191] : memref<2x32x256xf32, #tpu.memory_space<vmem>>, vector<1x32x256xf32>
    %314 = vector.shape_cast %313 : vector<1x32x256xf32> to vector<32x256xf32>
    %cst_192 = arith.constant dense<0.000000e+00> : vector<8x256xf32>
    %315 = tpu.matmul %280, %314, %cst_192 {dimension_numbers = #tpu.dot_dimension_numbers<[1], [0], [0], [1], [0, 0, 1, 1], [], []>} : vector<8x32xf32>, vector<32x256xf32>, vector<8x256xf32> -> vector<8x256xf32>
    %c2_193 = arith.constant 2 : index
    %c0_194 = arith.constant 0 : index
    %316 = vector.load %arg19[%c2_193, %c0_194] : memref<16x256xf32, #tpu.memory_space<vmem>>, vector<1x256xf32>
    %317 = vector.broadcast %316 : vector<1x256xf32> to vector<8x256xf32>
    %318 = arith.addf %315, %317 : vector<8x256xf32>
    %cst_195 = arith.constant 0.000000e+00 : f32
    %319 = vector.broadcast %cst_195 : f32 to vector<8x256xf32>
    %320 = arith.maximumf %318, %319 : vector<8x256xf32>
    %c0_196 = arith.constant 0 : index
    %c0_197 = arith.constant 0 : index
    %c0_198 = arith.constant 0 : index
    %321 = vector.load %arg17[%c0_196, %c0_197, %c0_198] : memref<2x256x128xf32, #tpu.memory_space<vmem>>, vector<1x256x128xf32>
    %322 = vector.shape_cast %321 : vector<1x256x128xf32> to vector<256x128xf32>
    %cst_199 = arith.constant dense<0.000000e+00> : vector<8x128xf32>
    %323 = tpu.matmul %320, %322, %cst_199 {dimension_numbers = #tpu.dot_dimension_numbers<[1], [0], [0], [1], [0, 0, 1, 1], [], []>} : vector<8x256xf32>, vector<256x128xf32>, vector<8x128xf32> -> vector<8x128xf32>
    %c6_200 = arith.constant 6 : index
    %c0_201 = arith.constant 0 : index
    %324 = vector.load %arg19[%c6_200, %c0_201] : memref<16x256xf32, #tpu.memory_space<vmem>>, vector<1x128xf32>
    %325 = vector.broadcast %324 : vector<1x128xf32> to vector<8x128xf32>
    %326 = arith.addf %323, %325 : vector<8x128xf32>
    %cst_202 = arith.constant 0.000000e+00 : f32
    %327 = vector.broadcast %cst_202 : f32 to vector<8x128xf32>
    %328 = arith.maximumf %326, %327 : vector<8x128xf32>
    %c0_203 = arith.constant 0 : index
    %c0_204 = arith.constant 0 : index
    %c0_205 = arith.constant 0 : index
    %329 = vector.load %arg18[%c0_203, %c0_204, %c0_205] : memref<2x128x64xf32, #tpu.memory_space<vmem>>, vector<1x128x64xf32>
    %330 = vector.shape_cast %329 : vector<1x128x64xf32> to vector<128x64xf32>
    %cst_206 = arith.constant dense<0.000000e+00> : vector<8x64xf32>
    %331 = tpu.matmul %328, %330, %cst_206 {dimension_numbers = #tpu.dot_dimension_numbers<[1], [0], [0], [1], [0, 0, 1, 1], [], []>} : vector<8x128xf32>, vector<128x64xf32>, vector<8x64xf32> -> vector<8x64xf32>
    %c8_207 = arith.constant 8 : index
    %c0_208 = arith.constant 0 : index
    %332 = vector.load %arg19[%c8_207, %c0_208] : memref<16x256xf32, #tpu.memory_space<vmem>>, vector<1x64xf32>
    %333 = vector.broadcast %332 : vector<1x64xf32> to vector<8x64xf32>
    %334 = arith.addf %331, %333 : vector<8x64xf32>
    %cst_209 = arith.constant 0.000000e+00 : f32
    %335 = vector.broadcast %cst_209 : f32 to vector<8x64xf32>
    %336 = arith.maximumf %334, %335 : vector<8x64xf32>
    %c1_210 = arith.constant 1 : index
    %c0_211 = arith.constant 0 : index
    %c0_212 = arith.constant 0 : index
    %337 = vector.load %arg15[%c1_210, %c0_211, %c0_212] : memref<2x32x256xf32, #tpu.memory_space<vmem>>, vector<1x32x256xf32>
    %338 = vector.shape_cast %337 : vector<1x32x256xf32> to vector<32x256xf32>
    %cst_213 = arith.constant dense<0.000000e+00> : vector<8x256xf32>
    %339 = tpu.matmul %280, %338, %cst_213 {dimension_numbers = #tpu.dot_dimension_numbers<[1], [0], [0], [1], [0, 0, 1, 1], [], []>} : vector<8x32xf32>, vector<32x256xf32>, vector<8x256xf32> -> vector<8x256xf32>
    %c3_214 = arith.constant 3 : index
    %c0_215 = arith.constant 0 : index
    %340 = vector.load %arg19[%c3_214, %c0_215] : memref<16x256xf32, #tpu.memory_space<vmem>>, vector<1x256xf32>
    %341 = vector.broadcast %340 : vector<1x256xf32> to vector<8x256xf32>
    %342 = arith.addf %339, %341 : vector<8x256xf32>
    %cst_216 = arith.constant 0.000000e+00 : f32
    %343 = vector.broadcast %cst_216 : f32 to vector<8x256xf32>
    %344 = arith.maximumf %342, %343 : vector<8x256xf32>
    %c1_217 = arith.constant 1 : index
    %c0_218 = arith.constant 0 : index
    %c0_219 = arith.constant 0 : index
    %345 = vector.load %arg17[%c1_217, %c0_218, %c0_219] : memref<2x256x128xf32, #tpu.memory_space<vmem>>, vector<1x256x128xf32>
    %346 = vector.shape_cast %345 : vector<1x256x128xf32> to vector<256x128xf32>
    %cst_220 = arith.constant dense<0.000000e+00> : vector<8x128xf32>
    %347 = tpu.matmul %344, %346, %cst_220 {dimension_numbers = #tpu.dot_dimension_numbers<[1], [0], [0], [1], [0, 0, 1, 1], [], []>} : vector<8x256xf32>, vector<256x128xf32>, vector<8x128xf32> -> vector<8x128xf32>
    %c7_221 = arith.constant 7 : index
    %c0_222 = arith.constant 0 : index
    %348 = vector.load %arg19[%c7_221, %c0_222] : memref<16x256xf32, #tpu.memory_space<vmem>>, vector<1x128xf32>
    %349 = vector.broadcast %348 : vector<1x128xf32> to vector<8x128xf32>
    %350 = arith.addf %347, %349 : vector<8x128xf32>
    %cst_223 = arith.constant 0.000000e+00 : f32
    %351 = vector.broadcast %cst_223 : f32 to vector<8x128xf32>
    %352 = arith.maximumf %350, %351 : vector<8x128xf32>
    %c1_224 = arith.constant 1 : index
    %c0_225 = arith.constant 0 : index
    %c0_226 = arith.constant 0 : index
    %353 = vector.load %arg18[%c1_224, %c0_225, %c0_226] : memref<2x128x64xf32, #tpu.memory_space<vmem>>, vector<1x128x64xf32>
    %354 = vector.shape_cast %353 : vector<1x128x64xf32> to vector<128x64xf32>
    %cst_227 = arith.constant dense<0.000000e+00> : vector<8x64xf32>
    %355 = tpu.matmul %352, %354, %cst_227 {dimension_numbers = #tpu.dot_dimension_numbers<[1], [0], [0], [1], [0, 0, 1, 1], [], []>} : vector<8x128xf32>, vector<128x64xf32>, vector<8x64xf32> -> vector<8x64xf32>
    %c9_228 = arith.constant 9 : index
    %c0_229 = arith.constant 0 : index
    %356 = vector.load %arg19[%c9_228, %c0_229] : memref<16x256xf32, #tpu.memory_space<vmem>>, vector<1x64xf32>
    %357 = vector.broadcast %356 : vector<1x64xf32> to vector<8x64xf32>
    %358 = arith.addf %355, %357 : vector<8x64xf32>
    %cst_230 = arith.constant 0.000000e+00 : f32
    %359 = vector.broadcast %cst_230 : f32 to vector<8x64xf32>
    %360 = arith.maximumf %358, %359 : vector<8x64xf32>
    %361 = vector.extract_strided_slice %3 {offsets = [0, 6], sizes = [8, 1], strides = [1, 1]} : vector<8x7xf32> to vector<8x1xf32>
    %362 = vector.extract_strided_slice %4 {offsets = [0, 6], sizes = [8, 1], strides = [1, 1]} : vector<8x7xf32> to vector<8x1xf32>
    %363 = arith.subf %361, %362 : vector<8x1xf32>
    %cst_231 = arith.constant 0.000000e+00 : f32
    %364 = vector.broadcast %cst_231 : f32 to vector<8x128xf32>
    %c0_232 = arith.constant 0 : index
    %c0_233 = arith.constant 0 : index
    %365 = vector.load %arg26[%c0_232, %c0_233] : memref<1x128xf32, #tpu.memory_space<vmem>>, vector<1x128xf32>
    %366 = vector.broadcast %365 : vector<1x128xf32> to vector<8x128xf32>
    %367 = arith.addf %364, %366 : vector<8x128xf32>
    %c0_234 = arith.constant 0 : index
    %c0_235 = arith.constant 0 : index
    %368 = vector.load %arg20[%c0_234, %c0_235] : memref<3x128xf32, #tpu.memory_space<vmem>>, vector<1x128xf32>
    %369 = vector.broadcast %361 : vector<8x1xf32> to vector<8x128xf32>
    %370 = vector.broadcast %368 : vector<1x128xf32> to vector<8x128xf32>
    %371 = arith.mulf %369, %370 : vector<8x128xf32>
    %c0_236 = arith.constant 0 : index
    %c0_237 = arith.constant 0 : index
    %372 = vector.load %arg21[%c0_236, %c0_237] : memref<3x128xf32, #tpu.memory_space<vmem>>, vector<1x128xf32>
    %373 = vector.broadcast %372 : vector<1x128xf32> to vector<8x128xf32>
    %374 = arith.addf %371, %373 : vector<8x128xf32>
    %cst_238 = arith.constant 0.000000e+00 : f32
    %375 = vector.broadcast %cst_238 : f32 to vector<8x128xf32>
    %376 = arith.maximumf %374, %375 : vector<8x128xf32>
    %c0_239 = arith.constant 0 : index
    %c0_240 = arith.constant 0 : index
    %c0_241 = arith.constant 0 : index
    %377 = vector.load %arg22[%c0_239, %c0_240, %c0_241] : memref<3x128x64xf32, #tpu.memory_space<vmem>>, vector<1x128x64xf32>
    %378 = vector.shape_cast %377 : vector<1x128x64xf32> to vector<128x64xf32>
    %cst_242 = arith.constant dense<0.000000e+00> : vector<8x64xf32>
    %379 = tpu.matmul %376, %378, %cst_242 {dimension_numbers = #tpu.dot_dimension_numbers<[1], [0], [0], [1], [0, 0, 1, 1], [], []>} : vector<8x128xf32>, vector<128x64xf32>, vector<8x64xf32> -> vector<8x64xf32>
    %c0_243 = arith.constant 0 : index
    %c0_244 = arith.constant 0 : index
    %380 = vector.load %arg24[%c0_243, %c0_244] : memref<8x64xf32, #tpu.memory_space<vmem>>, vector<1x64xf32>
    %381 = vector.broadcast %380 : vector<1x64xf32> to vector<8x64xf32>
    %382 = arith.addf %379, %381 : vector<8x64xf32>
    %cst_245 = arith.constant 0.000000e+00 : f32
    %383 = vector.broadcast %cst_245 : f32 to vector<8x64xf32>
    %384 = arith.maximumf %382, %383 : vector<8x64xf32>
    %c0_246 = arith.constant 0 : index
    %c0_247 = arith.constant 0 : index
    %c0_248 = arith.constant 0 : index
    %385 = vector.load %arg23[%c0_246, %c0_247, %c0_248] : memref<3x64x32xf32, #tpu.memory_space<vmem>>, vector<1x64x32xf32>
    %386 = vector.shape_cast %385 : vector<1x64x32xf32> to vector<64x32xf32>
    %cst_249 = arith.constant dense<0.000000e+00> : vector<8x32xf32>
    %387 = tpu.matmul %384, %386, %cst_249 {dimension_numbers = #tpu.dot_dimension_numbers<[1], [0], [0], [1], [0, 0, 1, 1], [], []>} : vector<8x64xf32>, vector<64x32xf32>, vector<8x32xf32> -> vector<8x32xf32>
    %c3_250 = arith.constant 3 : index
    %c0_251 = arith.constant 0 : index
    %388 = vector.load %arg24[%c3_250, %c0_251] : memref<8x64xf32, #tpu.memory_space<vmem>>, vector<1x32xf32>
    %389 = vector.broadcast %388 : vector<1x32xf32> to vector<8x32xf32>
    %390 = arith.addf %387, %389 : vector<8x32xf32>
    %cst_252 = arith.constant 0.000000e+00 : f32
    %391 = vector.broadcast %cst_252 : f32 to vector<8x32xf32>
    %392 = arith.maximumf %390, %391 : vector<8x32xf32>
    %c0_253 = arith.constant 0 : index
    %c0_254 = arith.constant 0 : index
    %c0_255 = arith.constant 0 : index
    %393 = vector.load %arg25[%c0_253, %c0_254, %c0_255] : memref<3x32x128xf32, #tpu.memory_space<vmem>>, vector<1x32x128xf32>
    %394 = vector.shape_cast %393 : vector<1x32x128xf32> to vector<32x128xf32>
    %cst_256 = arith.constant dense<0.000000e+00> : vector<8x128xf32>
    %395 = tpu.matmul %392, %394, %cst_256 {dimension_numbers = #tpu.dot_dimension_numbers<[1], [0], [0], [1], [0, 0, 1, 1], [], []>} : vector<8x32xf32>, vector<32x128xf32>, vector<8x128xf32> -> vector<8x128xf32>
    %396 = arith.addf %367, %395 : vector<8x128xf32>
    %c1_257 = arith.constant 1 : index
    %c0_258 = arith.constant 0 : index
    %397 = vector.load %arg20[%c1_257, %c0_258] : memref<3x128xf32, #tpu.memory_space<vmem>>, vector<1x128xf32>
    %398 = vector.broadcast %362 : vector<8x1xf32> to vector<8x128xf32>
    %399 = vector.broadcast %397 : vector<1x128xf32> to vector<8x128xf32>
    %400 = arith.mulf %398, %399 : vector<8x128xf32>
    %c1_259 = arith.constant 1 : index
    %c0_260 = arith.constant 0 : index
    %401 = vector.load %arg21[%c1_259, %c0_260] : memref<3x128xf32, #tpu.memory_space<vmem>>, vector<1x128xf32>
    %402 = vector.broadcast %401 : vector<1x128xf32> to vector<8x128xf32>
    %403 = arith.addf %400, %402 : vector<8x128xf32>
    %cst_261 = arith.constant 0.000000e+00 : f32
    %404 = vector.broadcast %cst_261 : f32 to vector<8x128xf32>
    %405 = arith.maximumf %403, %404 : vector<8x128xf32>
    %c1_262 = arith.constant 1 : index
    %c0_263 = arith.constant 0 : index
    %c0_264 = arith.constant 0 : index
    %406 = vector.load %arg22[%c1_262, %c0_263, %c0_264] : memref<3x128x64xf32, #tpu.memory_space<vmem>>, vector<1x128x64xf32>
    %407 = vector.shape_cast %406 : vector<1x128x64xf32> to vector<128x64xf32>
    %cst_265 = arith.constant dense<0.000000e+00> : vector<8x64xf32>
    %408 = tpu.matmul %405, %407, %cst_265 {dimension_numbers = #tpu.dot_dimension_numbers<[1], [0], [0], [1], [0, 0, 1, 1], [], []>} : vector<8x128xf32>, vector<128x64xf32>, vector<8x64xf32> -> vector<8x64xf32>
    %c1_266 = arith.constant 1 : index
    %c0_267 = arith.constant 0 : index
    %409 = vector.load %arg24[%c1_266, %c0_267] : memref<8x64xf32, #tpu.memory_space<vmem>>, vector<1x64xf32>
    %410 = vector.broadcast %409 : vector<1x64xf32> to vector<8x64xf32>
    %411 = arith.addf %408, %410 : vector<8x64xf32>
    %cst_268 = arith.constant 0.000000e+00 : f32
    %412 = vector.broadcast %cst_268 : f32 to vector<8x64xf32>
    %413 = arith.maximumf %411, %412 : vector<8x64xf32>
    %c1_269 = arith.constant 1 : index
    %c0_270 = arith.constant 0 : index
    %c0_271 = arith.constant 0 : index
    %414 = vector.load %arg23[%c1_269, %c0_270, %c0_271] : memref<3x64x32xf32, #tpu.memory_space<vmem>>, vector<1x64x32xf32>
    %415 = vector.shape_cast %414 : vector<1x64x32xf32> to vector<64x32xf32>
    %cst_272 = arith.constant dense<0.000000e+00> : vector<8x32xf32>
    %416 = tpu.matmul %413, %415, %cst_272 {dimension_numbers = #tpu.dot_dimension_numbers<[1], [0], [0], [1], [0, 0, 1, 1], [], []>} : vector<8x64xf32>, vector<64x32xf32>, vector<8x32xf32> -> vector<8x32xf32>
    %c4_273 = arith.constant 4 : index
    %c0_274 = arith.constant 0 : index
    %417 = vector.load %arg24[%c4_273, %c0_274] : memref<8x64xf32, #tpu.memory_space<vmem>>, vector<1x32xf32>
    %418 = vector.broadcast %417 : vector<1x32xf32> to vector<8x32xf32>
    %419 = arith.addf %416, %418 : vector<8x32xf32>
    %cst_275 = arith.constant 0.000000e+00 : f32
    %420 = vector.broadcast %cst_275 : f32 to vector<8x32xf32>
    %421 = arith.maximumf %419, %420 : vector<8x32xf32>
    %c1_276 = arith.constant 1 : index
    %c0_277 = arith.constant 0 : index
    %c0_278 = arith.constant 0 : index
    %422 = vector.load %arg25[%c1_276, %c0_277, %c0_278] : memref<3x32x128xf32, #tpu.memory_space<vmem>>, vector<1x32x128xf32>
    %423 = vector.shape_cast %422 : vector<1x32x128xf32> to vector<32x128xf32>
    %cst_279 = arith.constant dense<0.000000e+00> : vector<8x128xf32>
    %424 = tpu.matmul %421, %423, %cst_279 {dimension_numbers = #tpu.dot_dimension_numbers<[1], [0], [0], [1], [0, 0, 1, 1], [], []>} : vector<8x32xf32>, vector<32x128xf32>, vector<8x128xf32> -> vector<8x128xf32>
    %425 = arith.addf %396, %424 : vector<8x128xf32>
    %c2_280 = arith.constant 2 : index
    %c0_281 = arith.constant 0 : index
    %426 = vector.load %arg20[%c2_280, %c0_281] : memref<3x128xf32, #tpu.memory_space<vmem>>, vector<1x128xf32>
    %427 = vector.broadcast %363 : vector<8x1xf32> to vector<8x128xf32>
    %428 = vector.broadcast %426 : vector<1x128xf32> to vector<8x128xf32>
    %429 = arith.mulf %427, %428 : vector<8x128xf32>
    %c2_282 = arith.constant 2 : index
    %c0_283 = arith.constant 0 : index
    %430 = vector.load %arg21[%c2_282, %c0_283] : memref<3x128xf32, #tpu.memory_space<vmem>>, vector<1x128xf32>
    %431 = vector.broadcast %430 : vector<1x128xf32> to vector<8x128xf32>
    %432 = arith.addf %429, %431 : vector<8x128xf32>
    %cst_284 = arith.constant 0.000000e+00 : f32
    %433 = vector.broadcast %cst_284 : f32 to vector<8x128xf32>
    %434 = arith.maximumf %432, %433 : vector<8x128xf32>
    %c2_285 = arith.constant 2 : index
    %c0_286 = arith.constant 0 : index
    %c0_287 = arith.constant 0 : index
    %435 = vector.load %arg22[%c2_285, %c0_286, %c0_287] : memref<3x128x64xf32, #tpu.memory_space<vmem>>, vector<1x128x64xf32>
    %436 = vector.shape_cast %435 : vector<1x128x64xf32> to vector<128x64xf32>
    %cst_288 = arith.constant dense<0.000000e+00> : vector<8x64xf32>
    %437 = tpu.matmul %434, %436, %cst_288 {dimension_numbers = #tpu.dot_dimension_numbers<[1], [0], [0], [1], [0, 0, 1, 1], [], []>} : vector<8x128xf32>, vector<128x64xf32>, vector<8x64xf32> -> vector<8x64xf32>
    %c2_289 = arith.constant 2 : index
    %c0_290 = arith.constant 0 : index
    %438 = vector.load %arg24[%c2_289, %c0_290] : memref<8x64xf32, #tpu.memory_space<vmem>>, vector<1x64xf32>
    %439 = vector.broadcast %438 : vector<1x64xf32> to vector<8x64xf32>
    %440 = arith.addf %437, %439 : vector<8x64xf32>
    %cst_291 = arith.constant 0.000000e+00 : f32
    %441 = vector.broadcast %cst_291 : f32 to vector<8x64xf32>
    %442 = arith.maximumf %440, %441 : vector<8x64xf32>
    %c2_292 = arith.constant 2 : index
    %c0_293 = arith.constant 0 : index
    %c0_294 = arith.constant 0 : index
    %443 = vector.load %arg23[%c2_292, %c0_293, %c0_294] : memref<3x64x32xf32, #tpu.memory_space<vmem>>, vector<1x64x32xf32>
    %444 = vector.shape_cast %443 : vector<1x64x32xf32> to vector<64x32xf32>
    %cst_295 = arith.constant dense<0.000000e+00> : vector<8x32xf32>
    %445 = tpu.matmul %442, %444, %cst_295 {dimension_numbers = #tpu.dot_dimension_numbers<[1], [0], [0], [1], [0, 0, 1, 1], [], []>} : vector<8x64xf32>, vector<64x32xf32>, vector<8x32xf32> -> vector<8x32xf32>
    %c5_296 = arith.constant 5 : index
    %c0_297 = arith.constant 0 : index
    %446 = vector.load %arg24[%c5_296, %c0_297] : memref<8x64xf32, #tpu.memory_space<vmem>>, vector<1x32xf32>
    %447 = vector.broadcast %446 : vector<1x32xf32> to vector<8x32xf32>
    %448 = arith.addf %445, %447 : vector<8x32xf32>
    %cst_298 = arith.constant 0.000000e+00 : f32
    %449 = vector.broadcast %cst_298 : f32 to vector<8x32xf32>
    %450 = arith.maximumf %448, %449 : vector<8x32xf32>
    %c2_299 = arith.constant 2 : index
    %c0_300 = arith.constant 0 : index
    %c0_301 = arith.constant 0 : index
    %451 = vector.load %arg25[%c2_299, %c0_300, %c0_301] : memref<3x32x128xf32, #tpu.memory_space<vmem>>, vector<1x32x128xf32>
    %452 = vector.shape_cast %451 : vector<1x32x128xf32> to vector<32x128xf32>
    %cst_302 = arith.constant dense<0.000000e+00> : vector<8x128xf32>
    %453 = tpu.matmul %450, %452, %cst_302 {dimension_numbers = #tpu.dot_dimension_numbers<[1], [0], [0], [1], [0, 0, 1, 1], [], []>} : vector<8x32xf32>, vector<32x128xf32>, vector<8x128xf32> -> vector<8x128xf32>
    %454 = arith.addf %425, %453 : vector<8x128xf32>
    %cst_303 = arith.constant 0.000000e+00 : f32
    %455 = vector.broadcast %cst_303 : f32 to vector<8x128xf32>
    %456 = arith.maximumf %454, %455 : vector<8x128xf32>
    %c0_304 = arith.constant 0 : index
    %c0_305 = arith.constant 0 : index
    %457 = vector.load %arg27[%c0_304, %c0_305] : memref<128x64xf32, #tpu.memory_space<vmem>>, vector<128x64xf32>
    %cst_306 = arith.constant dense<0.000000e+00> : vector<8x64xf32>
    %458 = tpu.matmul %456, %457, %cst_306 {dimension_numbers = #tpu.dot_dimension_numbers<[1], [0], [0], [1], [0, 0, 1, 1], [], []>} : vector<8x128xf32>, vector<128x64xf32>, vector<8x64xf32> -> vector<8x64xf32>
    %c0_307 = arith.constant 0 : index
    %c0_308 = arith.constant 0 : index
    %459 = vector.load %arg28[%c0_307, %c0_308] : memref<1x64xf32, #tpu.memory_space<vmem>>, vector<1x64xf32>
    %460 = vector.broadcast %459 : vector<1x64xf32> to vector<8x64xf32>
    %461 = arith.addf %458, %460 : vector<8x64xf32>
    %cst_309 = arith.constant 0.000000e+00 : f32
    %462 = vector.broadcast %cst_309 : f32 to vector<8x64xf32>
    %463 = arith.maximumf %461, %462 : vector<8x64xf32>
    %cst_310 = arith.constant 0.000000e+00 : f32
    %464 = vector.broadcast %cst_310 : f32 to vector<8x7xf32>
    %c0_311 = arith.constant 0 : index
    %c0_312 = arith.constant 0 : index
    %465 = vector.load %arg30[%c0_311, %c0_312] : memref<1x7xf32, #tpu.memory_space<vmem>>, vector<1x7xf32>
    %466 = vector.broadcast %465 : vector<1x7xf32> to vector<8x7xf32>
    %467 = arith.addf %464, %466 : vector<8x7xf32>
    %c0_313 = arith.constant 0 : index
    %c0_314 = arith.constant 0 : index
    %c0_315 = arith.constant 0 : index
    %468 = vector.load %arg29[%c0_313, %c0_314, %c0_315] : memref<5x64x7xf32, #tpu.memory_space<vmem>>, vector<1x64x7xf32>
    %469 = vector.shape_cast %468 : vector<1x64x7xf32> to vector<64x7xf32>
    %cst_316 = arith.constant dense<0.000000e+00> : vector<8x7xf32>
    %470 = tpu.matmul %296, %469, %cst_316 {dimension_numbers = #tpu.dot_dimension_numbers<[1], [0], [0], [1], [0, 0, 1, 1], [], []>} : vector<8x64xf32>, vector<64x7xf32>, vector<8x7xf32> -> vector<8x7xf32>
    %471 = arith.addf %467, %470 : vector<8x7xf32>
    %c1_317 = arith.constant 1 : index
    %c0_318 = arith.constant 0 : index
    %c0_319 = arith.constant 0 : index
    %472 = vector.load %arg29[%c1_317, %c0_318, %c0_319] : memref<5x64x7xf32, #tpu.memory_space<vmem>>, vector<1x64x7xf32>
    %473 = vector.shape_cast %472 : vector<1x64x7xf32> to vector<64x7xf32>
    %cst_320 = arith.constant dense<0.000000e+00> : vector<8x7xf32>
    %474 = tpu.matmul %336, %473, %cst_320 {dimension_numbers = #tpu.dot_dimension_numbers<[1], [0], [0], [1], [0, 0, 1, 1], [], []>} : vector<8x64xf32>, vector<64x7xf32>, vector<8x7xf32> -> vector<8x7xf32>
    %475 = arith.addf %471, %474 : vector<8x7xf32>
    %c2_321 = arith.constant 2 : index
    %c0_322 = arith.constant 0 : index
    %c0_323 = arith.constant 0 : index
    %476 = vector.load %arg29[%c2_321, %c0_322, %c0_323] : memref<5x64x7xf32, #tpu.memory_space<vmem>>, vector<1x64x7xf32>
    %477 = vector.shape_cast %476 : vector<1x64x7xf32> to vector<64x7xf32>
    %cst_324 = arith.constant dense<0.000000e+00> : vector<8x7xf32>
    %478 = tpu.matmul %312, %477, %cst_324 {dimension_numbers = #tpu.dot_dimension_numbers<[1], [0], [0], [1], [0, 0, 1, 1], [], []>} : vector<8x64xf32>, vector<64x7xf32>, vector<8x7xf32> -> vector<8x7xf32>
    %479 = arith.addf %475, %478 : vector<8x7xf32>
    %c3_325 = arith.constant 3 : index
    %c0_326 = arith.constant 0 : index
    %c0_327 = arith.constant 0 : index
    %480 = vector.load %arg29[%c3_325, %c0_326, %c0_327] : memref<5x64x7xf32, #tpu.memory_space<vmem>>, vector<1x64x7xf32>
    %481 = vector.shape_cast %480 : vector<1x64x7xf32> to vector<64x7xf32>
    %cst_328 = arith.constant dense<0.000000e+00> : vector<8x7xf32>
    %482 = tpu.matmul %360, %481, %cst_328 {dimension_numbers = #tpu.dot_dimension_numbers<[1], [0], [0], [1], [0, 0, 1, 1], [], []>} : vector<8x64xf32>, vector<64x7xf32>, vector<8x7xf32> -> vector<8x7xf32>
    %483 = arith.addf %479, %482 : vector<8x7xf32>
    %c4_329 = arith.constant 4 : index
    %c0_330 = arith.constant 0 : index
    %c0_331 = arith.constant 0 : index
    %484 = vector.load %arg29[%c4_329, %c0_330, %c0_331] : memref<5x64x7xf32, #tpu.memory_space<vmem>>, vector<1x64x7xf32>
    %485 = vector.shape_cast %484 : vector<1x64x7xf32> to vector<64x7xf32>
    %cst_332 = arith.constant dense<0.000000e+00> : vector<8x7xf32>
    %486 = tpu.matmul %463, %485, %cst_332 {dimension_numbers = #tpu.dot_dimension_numbers<[1], [0], [0], [1], [0, 0, 1, 1], [], []>} : vector<8x64xf32>, vector<64x7xf32>, vector<8x7xf32> -> vector<8x7xf32>
    %487 = arith.addf %483, %486 : vector<8x7xf32>
    %488 = arith.addf %3, %487 : vector<8x7xf32>
    %489 = arith.subf %12, %7 : vector<8x7xf32>
    %490 = arith.mulf %489, %489 : vector<8x7xf32>
    %cst_333 = arith.constant dense<0.000000e+00> : vector<8xf32>
    %491 = vector.multi_reduction <add>, %490, %cst_333 [1] : vector<8x7xf32> to vector<8xf32>
    %492 = vector.shape_cast %491 : vector<8xf32> to vector<8x1xf32>
    %cst_334 = arith.constant 1.000000e-24 : f32
    %493 = vector.broadcast %cst_334 : f32 to vector<8x1xf32>
    %494 = arith.maximumf %492, %493 : vector<8x1xf32>
    %495 = math.rsqrt %494 : vector<8x1xf32>
    %496 = vector.broadcast %495 : vector<8x1xf32> to vector<8x7xf32>
    %497 = arith.mulf %489, %496 : vector<8x7xf32>
    %498 = arith.subf %12, %488 : vector<8x7xf32>
    %499 = arith.mulf %498, %498 : vector<8x7xf32>
    %cst_335 = arith.constant dense<0.000000e+00> : vector<8xf32>
    %500 = vector.multi_reduction <add>, %499, %cst_335 [1] : vector<8x7xf32> to vector<8xf32>
    %501 = vector.shape_cast %500 : vector<8xf32> to vector<8x1xf32>
    %cst_336 = arith.constant 1.000000e-24 : f32
    %502 = vector.broadcast %cst_336 : f32 to vector<8x1xf32>
    %503 = arith.maximumf %501, %502 : vector<8x1xf32>
    %504 = math.rsqrt %503 : vector<8x1xf32>
    %505 = vector.broadcast %504 : vector<8x1xf32> to vector<8x7xf32>
    %506 = arith.mulf %498, %505 : vector<8x7xf32>
    %507 = arith.subf %3, %4 : vector<8x7xf32>
    %508 = arith.mulf %507, %507 : vector<8x7xf32>
    %cst_337 = arith.constant dense<0.000000e+00> : vector<8xf32>
    %509 = vector.multi_reduction <add>, %508, %cst_337 [1] : vector<8x7xf32> to vector<8xf32>
    %510 = vector.shape_cast %509 : vector<8xf32> to vector<8x1xf32>
    %cst_338 = arith.constant 1.000000e-24 : f32
    %511 = vector.broadcast %cst_338 : f32 to vector<8x1xf32>
    %512 = arith.maximumf %510, %511 : vector<8x1xf32>
    %513 = math.rsqrt %512 : vector<8x1xf32>
    %514 = vector.broadcast %513 : vector<8x1xf32> to vector<8x7xf32>
    %515 = arith.mulf %507, %514 : vector<8x7xf32>
    %516 = arith.subf %3, %6 : vector<8x7xf32>
    %517 = arith.mulf %516, %516 : vector<8x7xf32>
    %cst_339 = arith.constant dense<0.000000e+00> : vector<8xf32>
    %518 = vector.multi_reduction <add>, %517, %cst_339 [1] : vector<8x7xf32> to vector<8xf32>
    %519 = vector.shape_cast %518 : vector<8xf32> to vector<8x1xf32>
    %cst_340 = arith.constant 1.000000e-24 : f32
    %520 = vector.broadcast %cst_340 : f32 to vector<8x1xf32>
    %521 = arith.maximumf %519, %520 : vector<8x1xf32>
    %522 = math.rsqrt %521 : vector<8x1xf32>
    %523 = vector.broadcast %522 : vector<8x1xf32> to vector<8x7xf32>
    %524 = arith.mulf %516, %523 : vector<8x7xf32>
    %c0_341 = arith.constant 0 : index
    %c0_342 = arith.constant 0 : index
    %c0_343 = arith.constant 0 : index
    %525 = vector.load %arg31[%c0_341, %c0_342, %c0_343] : memref<2x7x35xf32, #tpu.memory_space<vmem>>, vector<1x7x35xf32>
    %526 = vector.shape_cast %525 : vector<1x7x35xf32> to vector<7x35xf32>
    %cst_344 = arith.constant dense<0.000000e+00> : vector<8x35xf32>
    %527 = tpu.matmul %515, %526, %cst_344 {dimension_numbers = #tpu.dot_dimension_numbers<[1], [0], [0], [1], [0, 0, 1, 1], [], []>} : vector<8x7xf32>, vector<7x35xf32>, vector<8x35xf32> -> vector<8x35xf32>
    %c0_345 = arith.constant 0 : index
    %c0_346 = arith.constant 0 : index
    %528 = vector.load %arg36[%c0_345, %c0_346] : memref<8x196xf32, #tpu.memory_space<vmem>>, vector<1x35xf32>
    %529 = vector.broadcast %528 : vector<1x35xf32> to vector<8x35xf32>
    %530 = arith.addf %527, %529 : vector<8x35xf32>
    %cst_347 = arith.constant 0.000000e+00 : f32
    %531 = vector.broadcast %cst_347 : f32 to vector<8x35xf32>
    %532 = arith.maximumf %530, %531 : vector<8x35xf32>
    %c1_348 = arith.constant 1 : index
    %c0_349 = arith.constant 0 : index
    %c0_350 = arith.constant 0 : index
    %533 = vector.load %arg31[%c1_348, %c0_349, %c0_350] : memref<2x7x35xf32, #tpu.memory_space<vmem>>, vector<1x7x35xf32>
    %534 = vector.shape_cast %533 : vector<1x7x35xf32> to vector<7x35xf32>
    %cst_351 = arith.constant dense<0.000000e+00> : vector<8x35xf32>
    %535 = tpu.matmul %524, %534, %cst_351 {dimension_numbers = #tpu.dot_dimension_numbers<[1], [0], [0], [1], [0, 0, 1, 1], [], []>} : vector<8x7xf32>, vector<7x35xf32>, vector<8x35xf32> -> vector<8x35xf32>
    %c1_352 = arith.constant 1 : index
    %c0_353 = arith.constant 0 : index
    %536 = vector.load %arg36[%c1_352, %c0_353] : memref<8x196xf32, #tpu.memory_space<vmem>>, vector<1x35xf32>
    %537 = vector.broadcast %536 : vector<1x35xf32> to vector<8x35xf32>
    %538 = arith.addf %535, %537 : vector<8x35xf32>
    %cst_354 = arith.constant 0.000000e+00 : f32
    %539 = vector.broadcast %cst_354 : f32 to vector<8x35xf32>
    %540 = arith.maximumf %538, %539 : vector<8x35xf32>
    %c0_355 = arith.constant 0 : index
    %c0_356 = arith.constant 0 : index
    %c0_357 = arith.constant 0 : index
    %541 = vector.load %arg32[%c0_355, %c0_356, %c0_357] : memref<2x7x70xf32, #tpu.memory_space<vmem>>, vector<1x7x70xf32>
    %542 = vector.shape_cast %541 : vector<1x7x70xf32> to vector<7x70xf32>
    %cst_358 = arith.constant dense<0.000000e+00> : vector<8x70xf32>
    %543 = tpu.matmul %497, %542, %cst_358 {dimension_numbers = #tpu.dot_dimension_numbers<[1], [0], [0], [1], [0, 0, 1, 1], [], []>} : vector<8x7xf32>, vector<7x70xf32>, vector<8x70xf32> -> vector<8x70xf32>
    %c1_359 = arith.constant 1 : index
    %c0_360 = arith.constant 0 : index
    %c0_361 = arith.constant 0 : index
    %544 = vector.load %arg32[%c1_359, %c0_360, %c0_361] : memref<2x7x70xf32, #tpu.memory_space<vmem>>, vector<1x7x70xf32>
    %545 = vector.shape_cast %544 : vector<1x7x70xf32> to vector<7x70xf32>
    %cst_362 = arith.constant dense<0.000000e+00> : vector<8x70xf32>
    %546 = tpu.matmul %506, %545, %cst_362 {dimension_numbers = #tpu.dot_dimension_numbers<[1], [0], [0], [1], [0, 0, 1, 1], [], []>} : vector<8x7xf32>, vector<7x70xf32>, vector<8x70xf32> -> vector<8x70xf32>
    %547 = arith.addf %543, %546 : vector<8x70xf32>
    %c2_363 = arith.constant 2 : index
    %c0_364 = arith.constant 0 : index
    %548 = vector.load %arg36[%c2_363, %c0_364] : memref<8x196xf32, #tpu.memory_space<vmem>>, vector<1x70xf32>
    %549 = vector.broadcast %548 : vector<1x70xf32> to vector<8x70xf32>
    %550 = arith.addf %547, %549 : vector<8x70xf32>
    %cst_365 = arith.constant 0.000000e+00 : f32
    %551 = vector.broadcast %cst_365 : f32 to vector<8x70xf32>
    %552 = arith.maximumf %550, %551 : vector<8x70xf32>
    %c0_366 = arith.constant 0 : index
    %c0_367 = arith.constant 0 : index
    %c0_368 = arith.constant 0 : index
    %553 = vector.load %arg38[%c0_366, %c0_367, %c0_368] : memref<2x35x384xf32, #tpu.memory_space<vmem>>, vector<1x35x384xf32>
    %554 = vector.shape_cast %553 : vector<1x35x384xf32> to vector<35x384xf32>
    %cst_369 = arith.constant dense<0.000000e+00> : vector<8x384xf32>
    %555 = tpu.matmul %532, %554, %cst_369 {dimension_numbers = #tpu.dot_dimension_numbers<[1], [0], [0], [1], [0, 0, 1, 1], [], []>} : vector<8x35xf32>, vector<35x384xf32>, vector<8x384xf32> -> vector<8x384xf32>
    %c0_370 = arith.constant 0 : index
    %c0_371 = arith.constant 0 : index
    %556 = vector.load %arg40[%c0_370, %c0_371] : memref<6x384xf32, #tpu.memory_space<vmem>>, vector<1x384xf32>
    %557 = vector.broadcast %556 : vector<1x384xf32> to vector<8x384xf32>
    %558 = arith.addf %555, %557 : vector<8x384xf32>
    %c0_372 = arith.constant 0 : index
    %c0_373 = arith.constant 0 : index
    %c0_374 = arith.constant 0 : index
    %559 = vector.load %arg37[%c0_372, %c0_373, %c0_374] : memref<5x49x384xf32, #tpu.memory_space<vmem>>, vector<1x49x384xf32>
    %560 = vector.shape_cast %559 : vector<1x49x384xf32> to vector<49x384xf32>
    %c1_375 = arith.constant 1 : index
    %c0_376 = arith.constant 0 : index
    %561 = vector.load %arg40[%c1_375, %c0_376] : memref<6x384xf32, #tpu.memory_space<vmem>>, vector<1x384xf32>
    %cst_377 = arith.constant dense<0.000000e+00> : vector<8x384xf32>
    %562 = tpu.matmul %8, %560, %cst_377 {dimension_numbers = #tpu.dot_dimension_numbers<[1], [0], [0], [1], [0, 0, 1, 1], [], []>} : vector<8x49xf32>, vector<49x384xf32>, vector<8x384xf32> -> vector<8x384xf32>
    %563 = vector.broadcast %561 : vector<1x384xf32> to vector<8x384xf32>
    %564 = arith.addf %562, %563 : vector<8x384xf32>
    %565 = vector.extract_strided_slice %558 {offsets = [0, 0], sizes = [8, 49], strides = [1, 1]} : vector<8x384xf32> to vector<8x49xf32>
    %566 = vector.extract_strided_slice %564 {offsets = [0, 0], sizes = [8, 49], strides = [1, 1]} : vector<8x384xf32> to vector<8x49xf32>
    %567 = arith.addf %565, %566 : vector<8x49xf32>
    %568 = arith.negf %567 : vector<8x49xf32>
    %569 = math.exp %568 : vector<8x49xf32>
    %cst_378 = arith.constant 1.000000e+00 : f32
    %570 = vector.broadcast %cst_378 : f32 to vector<8x49xf32>
    %571 = arith.addf %570, %569 : vector<8x49xf32>
    %572 = arith.divf %570, %571 : vector<8x49xf32>
    %573 = vector.extract_strided_slice %558 {offsets = [0, 128], sizes = [8, 49], strides = [1, 1]} : vector<8x384xf32> to vector<8x49xf32>
    %574 = vector.extract_strided_slice %564 {offsets = [0, 128], sizes = [8, 49], strides = [1, 1]} : vector<8x384xf32> to vector<8x49xf32>
    %575 = arith.addf %573, %574 : vector<8x49xf32>
    %576 = arith.negf %575 : vector<8x49xf32>
    %577 = math.exp %576 : vector<8x49xf32>
    %cst_379 = arith.constant 1.000000e+00 : f32
    %578 = vector.broadcast %cst_379 : f32 to vector<8x49xf32>
    %579 = arith.addf %578, %577 : vector<8x49xf32>
    %580 = arith.divf %578, %579 : vector<8x49xf32>
    %581 = vector.extract_strided_slice %558 {offsets = [0, 256], sizes = [8, 49], strides = [1, 1]} : vector<8x384xf32> to vector<8x49xf32>
    %582 = vector.extract_strided_slice %564 {offsets = [0, 256], sizes = [8, 49], strides = [1, 1]} : vector<8x384xf32> to vector<8x49xf32>
    %583 = arith.mulf %572, %582 : vector<8x49xf32>
    %584 = arith.addf %581, %583 : vector<8x49xf32>
    %585 = math.tanh %584 : vector<8x49xf32>
    %cst_380 = arith.constant 1.000000e+00 : f32
    %586 = vector.broadcast %cst_380 : f32 to vector<8x49xf32>
    %587 = arith.subf %586, %580 : vector<8x49xf32>
    %588 = arith.mulf %587, %585 : vector<8x49xf32>
    %589 = arith.mulf %580, %8 : vector<8x49xf32>
    %590 = arith.addf %588, %589 : vector<8x49xf32>
    %c1_381 = arith.constant 1 : index
    %c0_382 = arith.constant 0 : index
    %c0_383 = arith.constant 0 : index
    %591 = vector.load %arg37[%c1_381, %c0_382, %c0_383] : memref<5x49x384xf32, #tpu.memory_space<vmem>>, vector<1x49x384xf32>
    %592 = vector.shape_cast %591 : vector<1x49x384xf32> to vector<49x384xf32>
    %cst_384 = arith.constant dense<0.000000e+00> : vector<8x384xf32>
    %593 = tpu.matmul %590, %592, %cst_384 {dimension_numbers = #tpu.dot_dimension_numbers<[1], [0], [0], [1], [0, 0, 1, 1], [], []>} : vector<8x49xf32>, vector<49x384xf32>, vector<8x384xf32> -> vector<8x384xf32>
    %c1_385 = arith.constant 1 : index
    %c0_386 = arith.constant 0 : index
    %c0_387 = arith.constant 0 : index
    %594 = vector.load %arg38[%c1_385, %c0_386, %c0_387] : memref<2x35x384xf32, #tpu.memory_space<vmem>>, vector<1x35x384xf32>
    %595 = vector.shape_cast %594 : vector<1x35x384xf32> to vector<35x384xf32>
    %cst_388 = arith.constant dense<0.000000e+00> : vector<8x384xf32>
    %596 = tpu.matmul %540, %595, %cst_388 {dimension_numbers = #tpu.dot_dimension_numbers<[1], [0], [0], [1], [0, 0, 1, 1], [], []>} : vector<8x35xf32>, vector<35x384xf32>, vector<8x384xf32> -> vector<8x384xf32>
    %597 = arith.addf %593, %596 : vector<8x384xf32>
    %c2_389 = arith.constant 2 : index
    %c0_390 = arith.constant 0 : index
    %598 = vector.load %arg40[%c2_389, %c0_390] : memref<6x384xf32, #tpu.memory_space<vmem>>, vector<1x384xf32>
    %599 = vector.broadcast %598 : vector<1x384xf32> to vector<8x384xf32>
    %600 = arith.addf %597, %599 : vector<8x384xf32>
    %c2_391 = arith.constant 2 : index
    %c0_392 = arith.constant 0 : index
    %c0_393 = arith.constant 0 : index
    %601 = vector.load %arg37[%c2_391, %c0_392, %c0_393] : memref<5x49x384xf32, #tpu.memory_space<vmem>>, vector<1x49x384xf32>
    %602 = vector.shape_cast %601 : vector<1x49x384xf32> to vector<49x384xf32>
    %c3_394 = arith.constant 3 : index
    %c0_395 = arith.constant 0 : index
    %603 = vector.load %arg40[%c3_394, %c0_395] : memref<6x384xf32, #tpu.memory_space<vmem>>, vector<1x384xf32>
    %cst_396 = arith.constant dense<0.000000e+00> : vector<8x384xf32>
    %604 = tpu.matmul %9, %602, %cst_396 {dimension_numbers = #tpu.dot_dimension_numbers<[1], [0], [0], [1], [0, 0, 1, 1], [], []>} : vector<8x49xf32>, vector<49x384xf32>, vector<8x384xf32> -> vector<8x384xf32>
    %605 = vector.broadcast %603 : vector<1x384xf32> to vector<8x384xf32>
    %606 = arith.addf %604, %605 : vector<8x384xf32>
    %607 = vector.extract_strided_slice %600 {offsets = [0, 0], sizes = [8, 49], strides = [1, 1]} : vector<8x384xf32> to vector<8x49xf32>
    %608 = vector.extract_strided_slice %606 {offsets = [0, 0], sizes = [8, 49], strides = [1, 1]} : vector<8x384xf32> to vector<8x49xf32>
    %609 = arith.addf %607, %608 : vector<8x49xf32>
    %610 = arith.negf %609 : vector<8x49xf32>
    %611 = math.exp %610 : vector<8x49xf32>
    %cst_397 = arith.constant 1.000000e+00 : f32
    %612 = vector.broadcast %cst_397 : f32 to vector<8x49xf32>
    %613 = arith.addf %612, %611 : vector<8x49xf32>
    %614 = arith.divf %612, %613 : vector<8x49xf32>
    %615 = vector.extract_strided_slice %600 {offsets = [0, 128], sizes = [8, 49], strides = [1, 1]} : vector<8x384xf32> to vector<8x49xf32>
    %616 = vector.extract_strided_slice %606 {offsets = [0, 128], sizes = [8, 49], strides = [1, 1]} : vector<8x384xf32> to vector<8x49xf32>
    %617 = arith.addf %615, %616 : vector<8x49xf32>
    %618 = arith.negf %617 : vector<8x49xf32>
    %619 = math.exp %618 : vector<8x49xf32>
    %cst_398 = arith.constant 1.000000e+00 : f32
    %620 = vector.broadcast %cst_398 : f32 to vector<8x49xf32>
    %621 = arith.addf %620, %619 : vector<8x49xf32>
    %622 = arith.divf %620, %621 : vector<8x49xf32>
    %623 = vector.extract_strided_slice %600 {offsets = [0, 256], sizes = [8, 49], strides = [1, 1]} : vector<8x384xf32> to vector<8x49xf32>
    %624 = vector.extract_strided_slice %606 {offsets = [0, 256], sizes = [8, 49], strides = [1, 1]} : vector<8x384xf32> to vector<8x49xf32>
    %625 = arith.mulf %614, %624 : vector<8x49xf32>
    %626 = arith.addf %623, %625 : vector<8x49xf32>
    %627 = math.tanh %626 : vector<8x49xf32>
    %cst_399 = arith.constant 1.000000e+00 : f32
    %628 = vector.broadcast %cst_399 : f32 to vector<8x49xf32>
    %629 = arith.subf %628, %622 : vector<8x49xf32>
    %630 = arith.mulf %629, %627 : vector<8x49xf32>
    %631 = arith.mulf %622, %9 : vector<8x49xf32>
    %632 = arith.addf %630, %631 : vector<8x49xf32>
    %c0_400 = arith.constant 0 : index
    %c0_401 = arith.constant 0 : index
    %c0_402 = arith.constant 0 : index
    %633 = vector.load %arg33[%c0_400, %c0_401, %c0_402] : memref<5x49x49xf32, #tpu.memory_space<vmem>>, vector<1x49x49xf32>
    %634 = vector.shape_cast %633 : vector<1x49x49xf32> to vector<49x49xf32>
    %cst_403 = arith.constant dense<0.000000e+00> : vector<8x49xf32>
    %635 = tpu.matmul %632, %634, %cst_403 {dimension_numbers = #tpu.dot_dimension_numbers<[1], [0], [0], [1], [0, 0, 1, 1], [], []>} : vector<8x49xf32>, vector<49x49xf32>, vector<8x49xf32> -> vector<8x49xf32>
    %c3_404 = arith.constant 3 : index
    %c0_405 = arith.constant 0 : index
    %636 = vector.load %arg36[%c3_404, %c0_405] : memref<8x196xf32, #tpu.memory_space<vmem>>, vector<1x49xf32>
    %637 = vector.broadcast %636 : vector<1x49xf32> to vector<8x49xf32>
    %638 = arith.addf %635, %637 : vector<8x49xf32>
    %cst_406 = arith.constant 0.000000e+00 : f32
    %639 = vector.broadcast %cst_406 : f32 to vector<8x49xf32>
    %640 = arith.maximumf %638, %639 : vector<8x49xf32>
    %c3_407 = arith.constant 3 : index
    %c0_408 = arith.constant 0 : index
    %c0_409 = arith.constant 0 : index
    %641 = vector.load %arg37[%c3_407, %c0_408, %c0_409] : memref<5x49x384xf32, #tpu.memory_space<vmem>>, vector<1x49x384xf32>
    %642 = vector.shape_cast %641 : vector<1x49x384xf32> to vector<49x384xf32>
    %cst_410 = arith.constant dense<0.000000e+00> : vector<8x384xf32>
    %643 = tpu.matmul %640, %642, %cst_410 {dimension_numbers = #tpu.dot_dimension_numbers<[1], [0], [0], [1], [0, 0, 1, 1], [], []>} : vector<8x49xf32>, vector<49x384xf32>, vector<8x384xf32> -> vector<8x384xf32>
    %c0_411 = arith.constant 0 : index
    %c0_412 = arith.constant 0 : index
    %644 = vector.load %arg39[%c0_411, %c0_412] : memref<70x384xf32, #tpu.memory_space<vmem>>, vector<70x384xf32>
    %cst_413 = arith.constant dense<0.000000e+00> : vector<8x384xf32>
    %645 = tpu.matmul %552, %644, %cst_413 {dimension_numbers = #tpu.dot_dimension_numbers<[1], [0], [0], [1], [0, 0, 1, 1], [], []>} : vector<8x70xf32>, vector<70x384xf32>, vector<8x384xf32> -> vector<8x384xf32>
    %646 = arith.addf %643, %645 : vector<8x384xf32>
    %c4_414 = arith.constant 4 : index
    %c0_415 = arith.constant 0 : index
    %647 = vector.load %arg40[%c4_414, %c0_415] : memref<6x384xf32, #tpu.memory_space<vmem>>, vector<1x384xf32>
    %648 = vector.broadcast %647 : vector<1x384xf32> to vector<8x384xf32>
    %649 = arith.addf %646, %648 : vector<8x384xf32>
    %c4_416 = arith.constant 4 : index
    %c0_417 = arith.constant 0 : index
    %c0_418 = arith.constant 0 : index
    %650 = vector.load %arg37[%c4_416, %c0_417, %c0_418] : memref<5x49x384xf32, #tpu.memory_space<vmem>>, vector<1x49x384xf32>
    %651 = vector.shape_cast %650 : vector<1x49x384xf32> to vector<49x384xf32>
    %c5_419 = arith.constant 5 : index
    %c0_420 = arith.constant 0 : index
    %652 = vector.load %arg40[%c5_419, %c0_420] : memref<6x384xf32, #tpu.memory_space<vmem>>, vector<1x384xf32>
    %cst_421 = arith.constant dense<0.000000e+00> : vector<8x384xf32>
    %653 = tpu.matmul %10, %651, %cst_421 {dimension_numbers = #tpu.dot_dimension_numbers<[1], [0], [0], [1], [0, 0, 1, 1], [], []>} : vector<8x49xf32>, vector<49x384xf32>, vector<8x384xf32> -> vector<8x384xf32>
    %654 = vector.broadcast %652 : vector<1x384xf32> to vector<8x384xf32>
    %655 = arith.addf %653, %654 : vector<8x384xf32>
    %656 = vector.extract_strided_slice %649 {offsets = [0, 0], sizes = [8, 49], strides = [1, 1]} : vector<8x384xf32> to vector<8x49xf32>
    %657 = vector.extract_strided_slice %655 {offsets = [0, 0], sizes = [8, 49], strides = [1, 1]} : vector<8x384xf32> to vector<8x49xf32>
    %658 = arith.addf %656, %657 : vector<8x49xf32>
    %659 = arith.negf %658 : vector<8x49xf32>
    %660 = math.exp %659 : vector<8x49xf32>
    %cst_422 = arith.constant 1.000000e+00 : f32
    %661 = vector.broadcast %cst_422 : f32 to vector<8x49xf32>
    %662 = arith.addf %661, %660 : vector<8x49xf32>
    %663 = arith.divf %661, %662 : vector<8x49xf32>
    %664 = vector.extract_strided_slice %649 {offsets = [0, 128], sizes = [8, 49], strides = [1, 1]} : vector<8x384xf32> to vector<8x49xf32>
    %665 = vector.extract_strided_slice %655 {offsets = [0, 128], sizes = [8, 49], strides = [1, 1]} : vector<8x384xf32> to vector<8x49xf32>
    %666 = arith.addf %664, %665 : vector<8x49xf32>
    %667 = arith.negf %666 : vector<8x49xf32>
    %668 = math.exp %667 : vector<8x49xf32>
    %cst_423 = arith.constant 1.000000e+00 : f32
    %669 = vector.broadcast %cst_423 : f32 to vector<8x49xf32>
    %670 = arith.addf %669, %668 : vector<8x49xf32>
    %671 = arith.divf %669, %670 : vector<8x49xf32>
    %672 = vector.extract_strided_slice %649 {offsets = [0, 256], sizes = [8, 49], strides = [1, 1]} : vector<8x384xf32> to vector<8x49xf32>
    %673 = vector.extract_strided_slice %655 {offsets = [0, 256], sizes = [8, 49], strides = [1, 1]} : vector<8x384xf32> to vector<8x49xf32>
    %674 = arith.mulf %663, %673 : vector<8x49xf32>
    %675 = arith.addf %672, %674 : vector<8x49xf32>
    %676 = math.tanh %675 : vector<8x49xf32>
    %cst_424 = arith.constant 1.000000e+00 : f32
    %677 = vector.broadcast %cst_424 : f32 to vector<8x49xf32>
    %678 = arith.subf %677, %671 : vector<8x49xf32>
    %679 = arith.mulf %678, %676 : vector<8x49xf32>
    %680 = arith.mulf %671, %10 : vector<8x49xf32>
    %681 = arith.addf %679, %680 : vector<8x49xf32>
    %c0_425 = arith.constant 0 : index
    %c0_426 = arith.constant 0 : index
    %c0_427 = arith.constant 0 : index
    %682 = vector.load %arg34[%c0_425, %c0_426, %c0_427] : memref<2x49x196xf32, #tpu.memory_space<vmem>>, vector<1x49x196xf32>
    %683 = vector.shape_cast %682 : vector<1x49x196xf32> to vector<49x196xf32>
    %cst_428 = arith.constant dense<0.000000e+00> : vector<8x196xf32>
    %684 = tpu.matmul %632, %683, %cst_428 {dimension_numbers = #tpu.dot_dimension_numbers<[1], [0], [0], [1], [0, 0, 1, 1], [], []>} : vector<8x49xf32>, vector<49x196xf32>, vector<8x196xf32> -> vector<8x196xf32>
    %c1_429 = arith.constant 1 : index
    %c0_430 = arith.constant 0 : index
    %c0_431 = arith.constant 0 : index
    %685 = vector.load %arg34[%c1_429, %c0_430, %c0_431] : memref<2x49x196xf32, #tpu.memory_space<vmem>>, vector<1x49x196xf32>
    %686 = vector.shape_cast %685 : vector<1x49x196xf32> to vector<49x196xf32>
    %cst_432 = arith.constant dense<0.000000e+00> : vector<8x196xf32>
    %687 = tpu.matmul %681, %686, %cst_432 {dimension_numbers = #tpu.dot_dimension_numbers<[1], [0], [0], [1], [0, 0, 1, 1], [], []>} : vector<8x49xf32>, vector<49x196xf32>, vector<8x196xf32> -> vector<8x196xf32>
    %688 = arith.addf %684, %687 : vector<8x196xf32>
    %c4_433 = arith.constant 4 : index
    %c0_434 = arith.constant 0 : index
    %689 = vector.load %arg36[%c4_433, %c0_434] : memref<8x196xf32, #tpu.memory_space<vmem>>, vector<1x196xf32>
    %690 = vector.broadcast %689 : vector<1x196xf32> to vector<8x196xf32>
    %691 = arith.addf %688, %690 : vector<8x196xf32>
    %cst_435 = arith.constant 0.000000e+00 : f32
    %692 = vector.broadcast %cst_435 : f32 to vector<8x196xf32>
    %693 = arith.maximumf %691, %692 : vector<8x196xf32>
    %c0_436 = arith.constant 0 : index
    %c0_437 = arith.constant 0 : index
    %694 = vector.load %arg35[%c0_436, %c0_437] : memref<196x49xf32, #tpu.memory_space<vmem>>, vector<196x49xf32>
    %cst_438 = arith.constant dense<0.000000e+00> : vector<8x49xf32>
    %695 = tpu.matmul %693, %694, %cst_438 {dimension_numbers = #tpu.dot_dimension_numbers<[1], [0], [0], [1], [0, 0, 1, 1], [], []>} : vector<8x196xf32>, vector<196x49xf32>, vector<8x49xf32> -> vector<8x49xf32>
    %c5_439 = arith.constant 5 : index
    %c0_440 = arith.constant 0 : index
    %696 = vector.load %arg36[%c5_439, %c0_440] : memref<8x196xf32, #tpu.memory_space<vmem>>, vector<1x49xf32>
    %697 = vector.broadcast %696 : vector<1x49xf32> to vector<8x49xf32>
    %698 = arith.addf %695, %697 : vector<8x49xf32>
    %cst_441 = arith.constant 0.000000e+00 : f32
    %699 = vector.broadcast %cst_441 : f32 to vector<8x49xf32>
    %700 = arith.maximumf %698, %699 : vector<8x49xf32>
    %c0_442 = arith.constant 0 : index
    %c0_443 = arith.constant 0 : index
    %701 = vector.load %arg41[%c0_442, %c0_443] : memref<1x128xf32, #tpu.memory_space<vmem>>, vector<1x49xf32>
    %702 = vector.broadcast %701 : vector<1x49xf32> to vector<8x49xf32>
    %703 = arith.mulf %700, %702 : vector<8x49xf32>
    %c1_444 = arith.constant 1 : index
    %c0_445 = arith.constant 0 : index
    %c0_446 = arith.constant 0 : index
    %704 = vector.load %arg33[%c1_444, %c0_445, %c0_446] : memref<5x49x49xf32, #tpu.memory_space<vmem>>, vector<1x49x49xf32>
    %705 = vector.shape_cast %704 : vector<1x49x49xf32> to vector<49x49xf32>
    %cst_447 = arith.constant dense<0.000000e+00> : vector<8x49xf32>
    %706 = tpu.matmul %681, %705, %cst_447 {dimension_numbers = #tpu.dot_dimension_numbers<[1], [0], [0], [1], [0, 0, 1, 1], [], []>} : vector<8x49xf32>, vector<49x49xf32>, vector<8x49xf32> -> vector<8x49xf32>
    %c2_448 = arith.constant 2 : index
    %c0_449 = arith.constant 0 : index
    %c0_450 = arith.constant 0 : index
    %707 = vector.load %arg33[%c2_448, %c0_449, %c0_450] : memref<5x49x49xf32, #tpu.memory_space<vmem>>, vector<1x49x49xf32>
    %708 = vector.shape_cast %707 : vector<1x49x49xf32> to vector<49x49xf32>
    %cst_451 = arith.constant dense<0.000000e+00> : vector<8x49xf32>
    %709 = tpu.matmul %703, %708, %cst_451 {dimension_numbers = #tpu.dot_dimension_numbers<[1], [0], [0], [1], [0, 0, 1, 1], [], []>} : vector<8x49xf32>, vector<49x49xf32>, vector<8x49xf32> -> vector<8x49xf32>
    %710 = arith.addf %706, %709 : vector<8x49xf32>
    %c6_452 = arith.constant 6 : index
    %c0_453 = arith.constant 0 : index
    %711 = vector.load %arg36[%c6_452, %c0_453] : memref<8x196xf32, #tpu.memory_space<vmem>>, vector<1x49xf32>
    %712 = vector.broadcast %711 : vector<1x49xf32> to vector<8x49xf32>
    %713 = arith.addf %710, %712 : vector<8x49xf32>
    %cst_454 = arith.constant 0.000000e+00 : f32
    %714 = vector.broadcast %cst_454 : f32 to vector<8x49xf32>
    %715 = arith.maximumf %713, %714 : vector<8x49xf32>
    %c3_455 = arith.constant 3 : index
    %c0_456 = arith.constant 0 : index
    %c0_457 = arith.constant 0 : index
    %716 = vector.load %arg33[%c3_455, %c0_456, %c0_457] : memref<5x49x49xf32, #tpu.memory_space<vmem>>, vector<1x49x49xf32>
    %717 = vector.shape_cast %716 : vector<1x49x49xf32> to vector<49x49xf32>
    %cst_458 = arith.constant dense<0.000000e+00> : vector<8x49xf32>
    %718 = tpu.matmul %632, %717, %cst_458 {dimension_numbers = #tpu.dot_dimension_numbers<[1], [0], [0], [1], [0, 0, 1, 1], [], []>} : vector<8x49xf32>, vector<49x49xf32>, vector<8x49xf32> -> vector<8x49xf32>
    %c4_459 = arith.constant 4 : index
    %c0_460 = arith.constant 0 : index
    %c0_461 = arith.constant 0 : index
    %719 = vector.load %arg33[%c4_459, %c0_460, %c0_461] : memref<5x49x49xf32, #tpu.memory_space<vmem>>, vector<1x49x49xf32>
    %720 = vector.shape_cast %719 : vector<1x49x49xf32> to vector<49x49xf32>
    %cst_462 = arith.constant dense<0.000000e+00> : vector<8x49xf32>
    %721 = tpu.matmul %715, %720, %cst_462 {dimension_numbers = #tpu.dot_dimension_numbers<[1], [0], [0], [1], [0, 0, 1, 1], [], []>} : vector<8x49xf32>, vector<49x49xf32>, vector<8x49xf32> -> vector<8x49xf32>
    %722 = arith.addf %718, %721 : vector<8x49xf32>
    %c7_463 = arith.constant 7 : index
    %c0_464 = arith.constant 0 : index
    %723 = vector.load %arg36[%c7_463, %c0_464] : memref<8x196xf32, #tpu.memory_space<vmem>>, vector<1x49xf32>
    %724 = vector.broadcast %723 : vector<1x49xf32> to vector<8x49xf32>
    %725 = arith.addf %722, %724 : vector<8x49xf32>
    %cst_465 = arith.constant 0.000000e+00 : f32
    %726 = vector.broadcast %cst_465 : f32 to vector<8x49xf32>
    %727 = arith.maximumf %725, %726 : vector<8x49xf32>
    %728 = arith.subf %12, %488 : vector<8x7xf32>
    %c0_466 = arith.constant 0 : index
    %c0_467 = arith.constant 0 : index
    %729 = vector.load %arg42[%c0_466, %c0_467] : memref<7x49xf32, #tpu.memory_space<vmem>>, vector<7x49xf32>
    %cst_468 = arith.constant dense<0.000000e+00> : vector<8x49xf32>
    %730 = tpu.matmul %728, %729, %cst_468 {dimension_numbers = #tpu.dot_dimension_numbers<[1], [0], [0], [1], [0, 0, 1, 1], [], []>} : vector<8x7xf32>, vector<7x49xf32>, vector<8x49xf32> -> vector<8x49xf32>
    %731 = arith.mulf %703, %730 : vector<8x49xf32>
    %c0_469 = arith.constant 0 : index
    %c0_470 = arith.constant 0 : index
    %732 = vector.load %arg43[%c0_469, %c0_470] : memref<49x7xf32, #tpu.memory_space<vmem>>, vector<49x7xf32>
    %cst_471 = arith.constant dense<0.000000e+00> : vector<8x7xf32>
    %733 = tpu.matmul %731, %732, %cst_471 {dimension_numbers = #tpu.dot_dimension_numbers<[1], [0], [0], [1], [0, 0, 1, 1], [], []>} : vector<8x49xf32>, vector<49x7xf32>, vector<8x7xf32> -> vector<8x7xf32>
    %734 = arith.addf %488, %733 : vector<8x7xf32>
    %c0_472 = arith.constant 0 : index
    %c0_473 = arith.constant 0 : index
    %735 = vector.load %arg47[%c0_472, %c0_473] : memref<8x1024xf32, #tpu.memory_space<vmem>>, vector<8x7xf32>
    tpu.vector_store %arg47[%c0_472, %c0_473], %734 {strides = array<i32>} : memref<8x1024xf32, #tpu.memory_space<vmem>>, vector<8x7xf32>,
    %c0_474 = arith.constant 0 : index
    %c128_475 = arith.constant 128 : index
    %736 = vector.load %arg47[%c0_474, %c128_475] : memref<8x1024xf32, #tpu.memory_space<vmem>>, vector<8x7xf32>
    tpu.vector_store %arg47[%c0_474, %c128_475], %3 {strides = array<i32>} : memref<8x1024xf32, #tpu.memory_space<vmem>>, vector<8x7xf32>,
    %c0_476 = arith.constant 0 : index
    %c256_477 = arith.constant 256 : index
    %737 = vector.load %arg47[%c0_476, %c256_477] : memref<8x1024xf32, #tpu.memory_space<vmem>>, vector<8x7xf32>
    tpu.vector_store %arg47[%c0_476, %c256_477], %4 {strides = array<i32>} : memref<8x1024xf32, #tpu.memory_space<vmem>>, vector<8x7xf32>,
    %c0_478 = arith.constant 0 : index
    %c384_479 = arith.constant 384 : index
    %738 = vector.load %arg47[%c0_478, %c384_479] : memref<8x1024xf32, #tpu.memory_space<vmem>>, vector<8x7xf32>
    tpu.vector_store %arg47[%c0_478, %c384_479], %488 {strides = array<i32>} : memref<8x1024xf32, #tpu.memory_space<vmem>>, vector<8x7xf32>,
    %c0_480 = arith.constant 0 : index
    %c512_481 = arith.constant 512 : index
    %739 = vector.load %arg47[%c0_480, %c512_481] : memref<8x1024xf32, #tpu.memory_space<vmem>>, vector<8x7xf32>
    tpu.vector_store %arg47[%c0_480, %c512_481], %12 {strides = array<i32>} : memref<8x1024xf32, #tpu.memory_space<vmem>>, vector<8x7xf32>,
    %c0_482 = arith.constant 0 : index
    %c640_483 = arith.constant 640 : index
    %740 = vector.load %arg47[%c0_482, %c640_483] : memref<8x1024xf32, #tpu.memory_space<vmem>>, vector<8x49xf32>
    tpu.vector_store %arg47[%c0_482, %c640_483], %590 {strides = array<i32>} : memref<8x1024xf32, #tpu.memory_space<vmem>>, vector<8x49xf32>,
    %c0_484 = arith.constant 0 : index
    %c768_485 = arith.constant 768 : index
    %741 = vector.load %arg47[%c0_484, %c768_485] : memref<8x1024xf32, #tpu.memory_space<vmem>>, vector<8x49xf32>
    tpu.vector_store %arg47[%c0_484, %c768_485], %727 {strides = array<i32>} : memref<8x1024xf32, #tpu.memory_space<vmem>>, vector<8x49xf32>,
    %c0_486 = arith.constant 0 : index
    %c896_487 = arith.constant 896 : index
    %742 = vector.load %arg47[%c0_486, %c896_487] : memref<8x1024xf32, #tpu.memory_space<vmem>>, vector<8x49xf32>
    tpu.vector_store %arg47[%c0_486, %c896_487], %681 {strides = array<i32>} : memref<8x1024xf32, #tpu.memory_space<vmem>>, vector<8x49xf32>,
    %c0_488 = arith.constant 0 : index
    %c0_489 = arith.constant 0 : index
    %743 = vector.load %arg47[%c0_488, %c0_489] : memref<8x1024xf32, #tpu.memory_space<vmem>>, vector<8x1024xf32>
    %c0_490 = arith.constant 0 : index
    %c0_491 = arith.constant 0 : index
    %744 = vector.load %arg46[%c0_490, %c0_491] : memref<8x1024xf32, #tpu.memory_space<vmem>>, vector<8x1024xf32>
    tpu.vector_store %arg46[%c0_490, %c0_491], %743 {strides = array<i32>} : memref<8x1024xf32, #tpu.memory_space<vmem>>, vector<8x1024xf32>,
    %c0_492 = arith.constant 0 : index
    %c0_493 = arith.constant 0 : index
    %c0_494 = arith.constant 0 : index
    %745 = vector.load %arg44[%c0_492, %c0_493, %c0_494] : memref<2x7x128xf32, #tpu.memory_space<vmem>>, vector<1x7x128xf32>
    %746 = vector.shape_cast %745 : vector<1x7x128xf32> to vector<7x128xf32>
    %cst_495 = arith.constant dense<0.000000e+00> : vector<8x128xf32>
    %747 = tpu.matmul %734, %746, %cst_495 {dimension_numbers = #tpu.dot_dimension_numbers<[1], [0], [0], [1], [0, 0, 1, 1], [], []>} : vector<8x7xf32>, vector<7x128xf32>, vector<8x128xf32> -> vector<8x128xf32>
    %c1_496 = arith.constant 1 : index
    %c0_497 = arith.constant 0 : index
    %c0_498 = arith.constant 0 : index
    %748 = vector.load %arg44[%c1_496, %c0_497, %c0_498] : memref<2x7x128xf32, #tpu.memory_space<vmem>>, vector<1x7x128xf32>
    %749 = vector.shape_cast %748 : vector<1x7x128xf32> to vector<7x128xf32>
    %cst_499 = arith.constant dense<0.000000e+00> : vector<8x128xf32>
    %750 = tpu.matmul %488, %749, %cst_499 {dimension_numbers = #tpu.dot_dimension_numbers<[1], [0], [0], [1], [0, 0, 1, 1], [], []>} : vector<8x7xf32>, vector<7x128xf32>, vector<8x128xf32> -> vector<8x128xf32>
    %751 = arith.addf %747, %750 : vector<8x128xf32>
    %c0_500 = arith.constant 0 : index
    %c0_501 = arith.constant 0 : index
    %c0_502 = arith.constant 0 : index
    %752 = vector.load %arg45[%c0_500, %c0_501, %c0_502] : memref<1x8x128xf32, #tpu.memory_space<vmem>>, vector<1x8x128xf32>
    %753 = vector.shape_cast %752 : vector<1x8x128xf32> to vector<8x128xf32>
    %754 = vector.shape_cast %751 : vector<8x128xf32> to vector<1x8x128xf32>
    tpu.vector_store %arg45[%c0_500, %c0_501, %c0_502], %754 {strides = array<i32>} : memref<1x8x128xf32, #tpu.memory_space<vmem>>, vector<1x8x128xf32>,
    return
  }
  func.func @transform_0(%arg0: i32) -> (i32, i32) {
    %c0_i32 = arith.constant 0 : i32
    %c0_i32_0 = arith.constant 0 : i32
    %c0_i32_1 = arith.constant 0 : i32
    return %c0_i32, %c0_i32_0 : i32, i32
  }
  func.func @transform_1(%arg0: i32) -> (i32, i32, i32) {
    %c0_i32 = arith.constant 0 : i32
    %c0_i32_0 = arith.constant 0 : i32
    %c0_i32_1 = arith.constant 0 : i32
    return %arg0, %c0_i32, %c0_i32_0 : i32, i32, i32
  }
  func.func @transform_2(%arg0: i32) -> (i32, i32) {
    %c0_i32 = arith.constant 0 : i32
    %c0_i32_0 = arith.constant 0 : i32
    %c0_i32_1 = arith.constant 0 : i32
    return %c0_i32, %c0_i32_0 : i32, i32
  }
  func.func @transform_3(%arg0: i32) -> (i32, i32) {
    %c0_i32 = arith.constant 0 : i32
    %c0_i32_0 = arith.constant 0 : i32
    %c0_i32_1 = arith.constant 0 : i32
    return %c0_i32, %c0_i32_0 : i32, i32
  }
  func.func @transform_4(%arg0: i32) -> (i32, i32, i32) {
    %c0_i32 = arith.constant 0 : i32
    %c0_i32_0 = arith.constant 0 : i32
    %c0_i32_1 = arith.constant 0 : i32
    %c0_i32_2 = arith.constant 0 : i32
    return %c0_i32, %c0_i32_0, %c0_i32_1 : i32, i32, i32
  }
  func.func @transform_5(%arg0: i32) -> (i32, i32) {
    %c0_i32 = arith.constant 0 : i32
    %c0_i32_0 = arith.constant 0 : i32
    %c0_i32_1 = arith.constant 0 : i32
    return %c0_i32, %c0_i32_0 : i32, i32
  }
  func.func @transform_6(%arg0: i32) -> (i32, i32) {
    %c0_i32 = arith.constant 0 : i32
    %c0_i32_0 = arith.constant 0 : i32
    %c0_i32_1 = arith.constant 0 : i32
    return %c0_i32, %c0_i32_0 : i32, i32
  }
  func.func @transform_7(%arg0: i32) -> (i32, i32, i32, i32) {
    %c0_i32 = arith.constant 0 : i32
    %c0_i32_0 = arith.constant 0 : i32
    %c0_i32_1 = arith.constant 0 : i32
    %c0_i32_2 = arith.constant 0 : i32
    %c0_i32_3 = arith.constant 0 : i32
    return %c0_i32, %c0_i32_0, %c0_i32_1, %c0_i32_2 : i32, i32, i32, i32
  }
  func.func @transform_8(%arg0: i32) -> (i32, i32, i32, i32) {
    %c0_i32 = arith.constant 0 : i32
    %c0_i32_0 = arith.constant 0 : i32
    %c0_i32_1 = arith.constant 0 : i32
    %c0_i32_2 = arith.constant 0 : i32
    %c0_i32_3 = arith.constant 0 : i32
    return %c0_i32, %c0_i32_0, %c0_i32_1, %c0_i32_2 : i32, i32, i32, i32
  }
  func.func @transform_9(%arg0: i32) -> (i32, i32, i32) {
    %c0_i32 = arith.constant 0 : i32
    %c0_i32_0 = arith.constant 0 : i32
    %c0_i32_1 = arith.constant 0 : i32
    %c0_i32_2 = arith.constant 0 : i32
    return %c0_i32, %c0_i32_0, %c0_i32_1 : i32, i32, i32
  }
  func.func @transform_10(%arg0: i32) -> (i32, i32) {
    %c0_i32 = arith.constant 0 : i32
    %c0_i32_0 = arith.constant 0 : i32
    %c0_i32_1 = arith.constant 0 : i32
    return %c0_i32, %c0_i32_0 : i32, i32
  }
  func.func @transform_11(%arg0: i32) -> (i32, i32) {
    %c0_i32 = arith.constant 0 : i32
    %c0_i32_0 = arith.constant 0 : i32
    %c0_i32_1 = arith.constant 0 : i32
    return %c0_i32, %c0_i32_0 : i32, i32
  }
  func.func @transform_12(%arg0: i32) -> (i32, i32) {
    %c0_i32 = arith.constant 0 : i32
    %c0_i32_0 = arith.constant 0 : i32
    %c0_i32_1 = arith.constant 0 : i32
    return %c0_i32, %c0_i32_0 : i32, i32
  }
  func.func @transform_13(%arg0: i32) -> (i32, i32, i32) {
    %c0_i32 = arith.constant 0 : i32
    %c0_i32_0 = arith.constant 0 : i32
    %c0_i32_1 = arith.constant 0 : i32
    %c0_i32_2 = arith.constant 0 : i32
    return %c0_i32, %c0_i32_0, %c0_i32_1 : i32, i32, i32
  }
  func.func @transform_14(%arg0: i32) -> (i32, i32, i32) {
    %c0_i32 = arith.constant 0 : i32
    %c0_i32_0 = arith.constant 0 : i32
    %c0_i32_1 = arith.constant 0 : i32
    %c0_i32_2 = arith.constant 0 : i32
    return %c0_i32, %c0_i32_0, %c0_i32_1 : i32, i32, i32
  }
  func.func @transform_15(%arg0: i32) -> (i32, i32, i32) {
    %c0_i32 = arith.constant 0 : i32
    %c0_i32_0 = arith.constant 0 : i32
    %c0_i32_1 = arith.constant 0 : i32
    %c0_i32_2 = arith.constant 0 : i32
    return %c0_i32, %c0_i32_0, %c0_i32_1 : i32, i32, i32
  }
  func.func @transform_16(%arg0: i32) -> (i32, i32, i32) {
    %c0_i32 = arith.constant 0 : i32
    %c0_i32_0 = arith.constant 0 : i32
    %c0_i32_1 = arith.constant 0 : i32
    %c0_i32_2 = arith.constant 0 : i32
    return %c0_i32, %c0_i32_0, %c0_i32_1 : i32, i32, i32
  }
  func.func @transform_17(%arg0: i32) -> (i32, i32, i32) {
    %c0_i32 = arith.constant 0 : i32
    %c0_i32_0 = arith.constant 0 : i32
    %c0_i32_1 = arith.constant 0 : i32
    %c0_i32_2 = arith.constant 0 : i32
    return %c0_i32, %c0_i32_0, %c0_i32_1 : i32, i32, i32
  }
  func.func @transform_18(%arg0: i32) -> (i32, i32) {
    %c0_i32 = arith.constant 0 : i32
    %c0_i32_0 = arith.constant 0 : i32
    %c0_i32_1 = arith.constant 0 : i32
    return %c0_i32, %c0_i32_0 : i32, i32
  }
  func.func @transform_19(%arg0: i32) -> (i32, i32) {
    %c0_i32 = arith.constant 0 : i32
    %c0_i32_0 = arith.constant 0 : i32
    %c0_i32_1 = arith.constant 0 : i32
    return %c0_i32, %c0_i32_0 : i32, i32
  }
  func.func @transform_20(%arg0: i32) -> (i32, i32) {
    %c0_i32 = arith.constant 0 : i32
    %c0_i32_0 = arith.constant 0 : i32
    %c0_i32_1 = arith.constant 0 : i32
    return %c0_i32, %c0_i32_0 : i32, i32
  }
  func.func @transform_21(%arg0: i32) -> (i32, i32, i32) {
    %c0_i32 = arith.constant 0 : i32
    %c0_i32_0 = arith.constant 0 : i32
    %c0_i32_1 = arith.constant 0 : i32
    %c0_i32_2 = arith.constant 0 : i32
    return %c0_i32, %c0_i32_0, %c0_i32_1 : i32, i32, i32
  }
  func.func @transform_22(%arg0: i32) -> (i32, i32, i32) {
    %c0_i32 = arith.constant 0 : i32
    %c0_i32_0 = arith.constant 0 : i32
    %c0_i32_1 = arith.constant 0 : i32
    %c0_i32_2 = arith.constant 0 : i32
    return %c0_i32, %c0_i32_0, %c0_i32_1 : i32, i32, i32
  }
  func.func @transform_23(%arg0: i32) -> (i32, i32) {
    %c0_i32 = arith.constant 0 : i32
    %c0_i32_0 = arith.constant 0 : i32
    %c0_i32_1 = arith.constant 0 : i32
    return %c0_i32, %c0_i32_0 : i32, i32
  }
  func.func @transform_24(%arg0: i32) -> (i32, i32, i32) {
    %c0_i32 = arith.constant 0 : i32
    %c0_i32_0 = arith.constant 0 : i32
    %c0_i32_1 = arith.constant 0 : i32
    %c0_i32_2 = arith.constant 0 : i32
    return %c0_i32, %c0_i32_0, %c0_i32_1 : i32, i32, i32
  }
  func.func @transform_25(%arg0: i32) -> (i32, i32) {
    %c0_i32 = arith.constant 0 : i32
    %c0_i32_0 = arith.constant 0 : i32
    %c0_i32_1 = arith.constant 0 : i32
    return %c0_i32, %c0_i32_0 : i32, i32
  }
  func.func @transform_26(%arg0: i32) -> (i32, i32) {
    %c0_i32 = arith.constant 0 : i32
    %c0_i32_0 = arith.constant 0 : i32
    %c0_i32_1 = arith.constant 0 : i32
    return %c0_i32, %c0_i32_0 : i32, i32
  }
  func.func @transform_27(%arg0: i32) -> (i32, i32) {
    %c0_i32 = arith.constant 0 : i32
    %c0_i32_0 = arith.constant 0 : i32
    %c0_i32_1 = arith.constant 0 : i32
    return %c0_i32, %c0_i32_0 : i32, i32
  }
  func.func @transform_28(%arg0: i32) -> (i32, i32, i32) {
    %c0_i32 = arith.constant 0 : i32
    %c0_i32_0 = arith.constant 0 : i32
    %c0_i32_1 = arith.constant 0 : i32
    %c0_i32_2 = arith.constant 0 : i32
    return %c0_i32, %c0_i32_0, %c0_i32_1 : i32, i32, i32
  }
  func.func @transform_29(%arg0: i32) -> (i32, i32) {
    %c0_i32 = arith.constant 0 : i32
    %c0_i32_0 = arith.constant 0 : i32
    %c0_i32_1 = arith.constant 0 : i32
    return %c0_i32, %c0_i32_0 : i32, i32
  }
  func.func @transform_30(%arg0: i32) -> (i32, i32, i32) {
    %c0_i32 = arith.constant 0 : i32
    %c0_i32_0 = arith.constant 0 : i32
    %c0_i32_1 = arith.constant 0 : i32
    %c0_i32_2 = arith.constant 0 : i32
    return %c0_i32, %c0_i32_0, %c0_i32_1 : i32, i32, i32
  }
  func.func @transform_31(%arg0: i32) -> (i32, i32, i32) {
    %c0_i32 = arith.constant 0 : i32
    %c0_i32_0 = arith.constant 0 : i32
    %c0_i32_1 = arith.constant 0 : i32
    %c0_i32_2 = arith.constant 0 : i32
    return %c0_i32, %c0_i32_0, %c0_i32_1 : i32, i32, i32
  }
  func.func @transform_32(%arg0: i32) -> (i32, i32, i32) {
    %c0_i32 = arith.constant 0 : i32
    %c0_i32_0 = arith.constant 0 : i32
    %c0_i32_1 = arith.constant 0 : i32
    %c0_i32_2 = arith.constant 0 : i32
    return %c0_i32, %c0_i32_0, %c0_i32_1 : i32, i32, i32
  }
  func.func @transform_33(%arg0: i32) -> (i32, i32, i32) {
    %c0_i32 = arith.constant 0 : i32
    %c0_i32_0 = arith.constant 0 : i32
    %c0_i32_1 = arith.constant 0 : i32
    %c0_i32_2 = arith.constant 0 : i32
    return %c0_i32, %c0_i32_0, %c0_i32_1 : i32, i32, i32
  }
  func.func @transform_34(%arg0: i32) -> (i32, i32) {
    %c0_i32 = arith.constant 0 : i32
    %c0_i32_0 = arith.constant 0 : i32
    %c0_i32_1 = arith.constant 0 : i32
    return %c0_i32, %c0_i32_0 : i32, i32
  }
  func.func @transform_35(%arg0: i32) -> (i32, i32) {
    %c0_i32 = arith.constant 0 : i32
    %c0_i32_0 = arith.constant 0 : i32
    %c0_i32_1 = arith.constant 0 : i32
    return %c0_i32, %c0_i32_0 : i32, i32
  }
  func.func @transform_36(%arg0: i32) -> (i32, i32, i32) {
    %c0_i32 = arith.constant 0 : i32
    %c0_i32_0 = arith.constant 0 : i32
    %c0_i32_1 = arith.constant 0 : i32
    %c0_i32_2 = arith.constant 0 : i32
    return %c0_i32, %c0_i32_0, %c0_i32_1 : i32, i32, i32
  }
  func.func @transform_37(%arg0: i32) -> (i32, i32, i32) {
    %c0_i32 = arith.constant 0 : i32
    %c0_i32_0 = arith.constant 0 : i32
    %c0_i32_1 = arith.constant 0 : i32
    %c0_i32_2 = arith.constant 0 : i32
    return %c0_i32, %c0_i32_0, %c0_i32_1 : i32, i32, i32
  }
  func.func @transform_38(%arg0: i32) -> (i32, i32) {
    %c0_i32 = arith.constant 0 : i32
    %c0_i32_0 = arith.constant 0 : i32
    %c0_i32_1 = arith.constant 0 : i32
    return %c0_i32, %c0_i32_0 : i32, i32
  }
  func.func @transform_39(%arg0: i32) -> (i32, i32) {
    %c0_i32 = arith.constant 0 : i32
    %c0_i32_0 = arith.constant 0 : i32
    %c0_i32_1 = arith.constant 0 : i32
    return %c0_i32, %c0_i32_0 : i32, i32
  }
  func.func @transform_40(%arg0: i32) -> (i32, i32) {
    %c0_i32 = arith.constant 0 : i32
    %c0_i32_0 = arith.constant 0 : i32
    %c0_i32_1 = arith.constant 0 : i32
    return %c0_i32, %c0_i32_0 : i32, i32
  }
  func.func @transform_41(%arg0: i32) -> (i32, i32) {
    %c0_i32 = arith.constant 0 : i32
    %c0_i32_0 = arith.constant 0 : i32
    %c0_i32_1 = arith.constant 0 : i32
    return %c0_i32, %c0_i32_0 : i32, i32
  }
  func.func @transform_42(%arg0: i32) -> (i32, i32) {
    %c0_i32 = arith.constant 0 : i32
    %c0_i32_0 = arith.constant 0 : i32
    %c0_i32_1 = arith.constant 0 : i32
    return %c0_i32, %c0_i32_0 : i32, i32
  }
  func.func @transform_43(%arg0: i32) -> (i32, i32, i32) {
    %c0_i32 = arith.constant 0 : i32
    %c0_i32_0 = arith.constant 0 : i32
    %c0_i32_1 = arith.constant 0 : i32
    %c0_i32_2 = arith.constant 0 : i32
    return %c0_i32, %c0_i32_0, %c0_i32_1 : i32, i32, i32
  }
  func.func @transform_44(%arg0: i32) -> (i32, i32, i32) {
    %c0_i32 = arith.constant 0 : i32
    %c0_i32_0 = arith.constant 0 : i32
    %c0_i32_1 = arith.constant 0 : i32
    return %arg0, %c0_i32, %c0_i32_0 : i32, i32, i32
  }
  func.func @transform_45(%arg0: i32) -> (i32, i32) {
    %c0_i32 = arith.constant 0 : i32
    %c0_i32_0 = arith.constant 0 : i32
    %c0_i32_1 = arith.constant 0 : i32
    return %c0_i32, %c0_i32_0 : i32, i32
  }
}

</mosaic_0001>

<bundles_post_ra>
// kernel: tpu_custom_call.1
= control target key start
LH: loop header
LB: loop body
LE: loop exit
PB: predicated region body
PF: predicated region fallthrough
CT: control target
= control target key end

     0   :  { %s13184_s6 = smov 1   ;;  %s13185_s10 = smov 2   ;;  %s15637_s0 = inlined_call_operand.smem [shape: u32[46], index: -1, kind: input, shape index: {}] }
   0x1   :  { %s13259_s5 = sld [smem:[%s15637_s0]]   ;;  %s13186_s14 = smov 3  }
   0x2   :  { %s13264_s9 = sld [smem:[%s15637_s0 + %s13184_s6]]   ;;  %s13187_s18 = smov 4  }
   0x3   :  { %s13269_s13 = sld [smem:[%s15637_s0 + %s13185_s10]]   ;;  %s13188_s22 = smov 5  }
   0x4   :  { %s13274_s17 = sld [smem:[%s15637_s0 + %s13186_s14]]   ;;  %s13189_s26 = smov 6  }
   0x5   :  { %s13279_s21 = sld [smem:[%s15637_s0 + %s13187_s18]]   ;;  %s13190_s30 = smov 7  }
   0x6   :  { %s13284_s25 = sld [smem:[%s15637_s0 + %s13188_s22]]   ;;  %s13191_s4 = smov 8  }
   0x7   :  { %s13289_s29 = sld [smem:[%s15637_s0 + %s13189_s26]]   ;;  %s13192_s10 = smov 9  }
   0x8   :  { %15663 = sst [smem:[#allocation35_spill]] %s13264_s9  ;;  %s13193_s15 = smov 10  }
   0x9   :  { %s13294_s3 = sld [smem:[%s15637_s0 + %s13190_s30]]   ;;  %s13194_s20 = smov 11  }
   0xa   :  { %s13299_s8 = sld [smem:[%s15637_s0 + %s13191_s4]]   ;;  %s13195_s26 = smov 12  }
   0xb   :  { %15664 = sst [smem:[#allocation36_spill]] %s13279_s21  ;;  %s13196_s1 = smov 13  }
   0xc   :  { %s13304_s14 = sld [smem:[%s15637_s0 + %s13192_s10]]   ;;  %s13197_s7 = smov 14  }
   0xd   :  { %15665 = sst [smem:[#allocation37_spill]] %s13289_s29  ;;  %s13199_s22 = smov 16  }
   0xe   :  { %s13309_s19 = sld [smem:[%s15637_s0 + %s13193_s15]]   ;;  %s13198_s15 = smov 15  }
   0xf   :  { %15666 = sst [smem:[#allocation38_spill]] %s13294_s3  ;;  %s13200_s28 = smov 17  }
  0x10   :  { %s13314_s24 = sld [smem:[%s15637_s0 + %s13194_s20]]  }
  0x11   :  { %s13319_s30 = sld [smem:[%s15637_s0 + %s13195_s26]]  }
  0x12   :  { %s13324_s6 = sld [smem:[%s15637_s0 + %s13196_s1]]  }
  0x13   :  { %s13329_s12 = sld [smem:[%s15637_s0 + %s13197_s7]]   ;;  %s13201_s7 = smov 18  }
  0x14   :  { %s13334_s20 = sld [smem:[%s15637_s0 + %s13198_s15]]   ;;  %s13202_s15 = smov 19  }
  0x15   :  { %s13339_s27 = sld [smem:[%s15637_s0 + %s13199_s22]]   ;;  %s13203_s22 = smov 20  }
  0x16   :  { %15667 = sst [smem:[#allocation39_spill]] %s13314_s24 }
  0x17   :  { %s13344_s4 = sld [smem:[%s15637_s0 + %s13200_s28]]   ;;  %s13204_s28 = smov 21  }
  0x18   :  { %15668 = sst [smem:[#allocation40_spill]] %s13324_s6 }
  0x19   :  { %15669 = sst [smem:[#allocation41_spill]] %s13329_s12 }
  0x1a   :  { %15670 = sst [smem:[#allocation42_spill]] %s13334_s20 }
  0x1b   :  { %15671 = sst [smem:[#allocation43_spill]] %s13339_s27 }
  0x1c   :  { %s13349_s9 = sld [smem:[%s15637_s0 + %s13201_s7]]   ;;  %s13205_s7 = smov 22  }
  0x1d   :  { %15672 = sst [smem:[#allocation44_spill]] %s13344_s4 }
  0x1e   :  { %s13354_s12 = sld [smem:[%s15637_s0 + %s13202_s15]]   ;;  %s13206_s15 = smov 23  }
  0x1f   :  { %s13359_s27 = sld [smem:[%s15637_s0 + %s13203_s22]]   ;;  %s13207_s22 = smov 24  }
  0x20   :  { %s13364_s4 = sld [smem:[%s15637_s0 + %s13204_s28]]   ;;  %s13208_s28 = smov 25  }
  0x21   :  { %s13374_s20 = sld [smem:[%s15637_s0 + %s13206_s15]]   ;;  %s13210_s15 = smov 27  }
  0x22   :  { %15673 = sst [smem:[#allocation45_spill]] %s13349_s9 }
  0x23   :  { %s13369_s9 = sld [smem:[%s15637_s0 + %s13205_s7]]   ;;  %s13209_s7 = smov 26  }
  0x24   :  { %s13379_s6 = sld [smem:[%s15637_s0 + %s13207_s22]]   ;;  %s13211_s22 = smov 28  }
  0x25   :  { %s13394_s24 = sld [smem:[%s15637_s0 + %s13210_s15]]   ;;  %s13214_s15 = smov 31  }
  0x26   :  { %15674 = sst [smem:[#allocation46_spill]] %s13364_s4 }
  0x27   :  { %s13384_s4 = sld [smem:[%s15637_s0 + %s13208_s28]]   ;;  %s13212_s28 = smov 29  }
  0x28   :  { %s13404_s3 = sld [smem:[%s15637_s0 + %s13212_s28]]   ;;  %s13216_s28 = smov 33  }
  0x29   :  { %15675 = sst [smem:[#allocation47_spill]] %s13369_s9 }
  0x2a   :  { %15676 = sst [smem:[#allocation48_spill]] %s13379_s6 }
  0x2b   :  { %s13389_s9 = sld [smem:[%s15637_s0 + %s13209_s7]]   ;;  %s13213_s7 = smov 30  }
  0x2c   :  { %s13399_s6 = sld [smem:[%s15637_s0 + %s13211_s22]]   ;;  %s13215_s22 = smov 32  }
  0x2d   :  { %s13414_s29 = sld [smem:[%s15637_s0 + %s13214_s15]]   ;;  %s13218_s15 = smov 35  }
  0x2e   :  { %s13424_s21 = sld [smem:[%s15637_s0 + %s13216_s28]]   ;;  %s13220_s28 = smov 37  }
  0x31   :  { %15677 = sst [smem:[#allocation49_spill]] %s13389_s9 }
  0x32   :  { %15678 = sst [smem:[#allocation50_spill]] %s13399_s6 }
  0x33   :  { %s13409_s9 = sld [smem:[%s15637_s0 + %s13213_s7]]   ;;  %s13217_s7 = smov 34  }
  0x34   :  { %15680 = sst [smem:[#allocation52_spill]] %s13414_s29 }
  0x35   :  { %s13419_s6 = sld [smem:[%s15637_s0 + %s13215_s22]]   ;;  %s13219_s22 = smov 36  }
  0x36   :  { %15682 = sst [smem:[#allocation54_spill]] %s13424_s21 }
  0x37   :  { %s13434_s29 = sld [smem:[%s15637_s0 + %s13218_s15]]   ;;  %s13222_s15 = smov 39  }
  0x38   :  { %s13444_s21 = sld [smem:[%s15637_s0 + %s13220_s28]]   ;;  %s13224_s28 = smov 41  }
  0x39   :  { %15679 = sst [smem:[#allocation51_spill]] %s13409_s9 }
  0x3a   :  { %s13429_s9 = sld [smem:[%s15637_s0 + %s13217_s7]]   ;;  %s13221_s7 = smov 38  }
  0x3b   :  { %15681 = sst [smem:[#allocation53_spill]] %s13419_s6 }
  0x3c   :  { %s13439_s6 = sld [smem:[%s15637_s0 + %s13219_s22]]   ;;  %s13223_s22 = smov 40  }
  0x3d   :  { %15684 = sst [smem:[#allocation56_spill]] %s13434_s29 }
  0x3e   :  { %15686 = sst [smem:[#allocation58_spill]] %s13444_s21 }
  0x3f   :  { %s13454_s29 = sld [smem:[%s15637_s0 + %s13222_s15]]   ;;  %s13226_s15 = smov 43  }
  0x40   :  { %15683 = sst [smem:[#allocation55_spill]] %s13429_s9 }
  0x41   :  { %s13449_s9 = sld [smem:[%s15637_s0 + %s13221_s7]]   ;;  %s13225_s7 = smov 42  }
  0x42   :  { %15685 = sst [smem:[#allocation57_spill]] %s13439_s6 }
  0x43   :  { %s13459_s6 = sld [smem:[%s15637_s0 + %s13223_s22]]   ;;  %s13227_s22 = smov 44  }
  0x44   :  { %s13464_s21 = sld [smem:[%s15637_s0 + %s13224_s28]]   ;;  %s13228_s28 = smov 45  }
  0x45   :  { %15688 = sst [smem:[#allocation60_spill]] %s13454_s29 }
  0x46   :  { %s13474_s29 = sld [smem:[%s15637_s0 + %s13226_s15]]  }
  0x47   :  { %15687 = sst [smem:[#allocation59_spill]] %s13449_s9 }
  0x48   :  { %s13469_s9 = sld [smem:[%s15637_s0 + %s13225_s7]]  }
  0x49   :  { %15689 = sst [smem:[#allocation61_spill]] %s13459_s6 }
  0x4a   :  { %15690 = sst [smem:[#allocation62_spill]] %s13464_s21 }
  0x4b   :  { %s13479_s6 = sld [smem:[%s15637_s0 + %s13227_s22]]  }
  0x4c   :  { %s13484_s21 = sld [smem:[%s15637_s0 + %s13228_s28]]  }
  0x4d   :  { %97 = vsyncpa [#allocation4], 0 }
  0x4e   :  { %98 = vsyncpa [#allocation7], 0 }
  0x4f   :  { %99 = vsyncpa [#allocation10], 0 }
  0x50   :  { %100 = vsyncpa [#allocation13], 0 }
  0x51   :  { %101 = vsyncpa [#allocation16], 0 }
  0x52   :  { %102 = vsyncpa [#allocation19], 0 }
  0x53   :  { %103 = vsyncpa [#allocation22], 0 }
  0x54   :  { %104 = vsyncpa [#allocation5], 0 }
  0x55   :  { %105 = vsyncpa [#allocation25], 0  ;;  %s13229_s7 = smov [#allocation6]   ;;  %s12858_s11 = scalar_lea.hbm %s13284_s25, 256 }
  0x56   :  { %s129_s10 = sshll.u32 %s13229_s7, 4  ;;  %p12859_p0 = scmp.ne.s32.totalorder %s13284_s25, %s12858_s11  ;;  %s130_s10 = int_to_ptr.vmem [resolvable:$true] %s129_s10 }
  0x57   :  { %p12862_p1 = scmp.lt.u32.totalorder %s12858_s11, %s13284_s25 }
  0x59   :  { %p12864_p2 = pnand %p12862_p1, %p12859_p0 }
  0x5b   :  { %12867 = shalt.err (!%p12864_p2)
}
  0x5c   :  { %s12868_s0 = scalar_lea.vmem %s130_s10, 256  ;;  %p12873_p4 = scmp.lt.s32.totalorder %s130_s10, %s130_s10 }
  0x5d   :  { %p12869_p3 = scmp.ne.s32.totalorder %s130_s10, %s12868_s0  ;;  %p12874_p5 = scmp.lt.s32.totalorder %s12868_s0, %s12868_s0 }
  0x5f   :  { %p12875_p6 = por %p12874_p5, %p12873_p4 }
  0x61   :  { %p12876_p7 = pnand %p12875_p6, %p12869_p3 }
  0x63   :  { %12879 = shalt.err (!%p12876_p7)
}
  0x64   :  { %s13230_s15 = smov 128   ;;  %s13231_s16 = smov 8  }
  0x65   :  { %135 = dma.hbm_to_vmem [thread:$0]  %s13284_s25, 256, %s130_s10, [#allocation7], %s13230_s15, %s13230_s15, %s13231_s16  }
  0x66   :  { %s13232_s18 = smov [#allocation9]   ;;  %s13233_s23 = smov [#allocation12]  }
  0x67   :  { %s157_s22 = sshll.u32 %s13232_s18, 4  ;;  %s182_s26 = sshll.u32 %s13233_s23, 4  ;;  %s158_s22 = int_to_ptr.vmem [resolvable:$true] %s157_s22  ;;  %s183_s26 = int_to_ptr.vmem [resolvable:$true] %s182_s26 }
  0x68   :  { %s12880_s28 = scalar_lea.hbm %s13304_s14, 512 }
  0x69   :  { %p12881_p8 = scmp.ne.s32.totalorder %s13304_s14, %s12880_s28  ;;  %p12884_p9 = scmp.lt.u32.totalorder %s12880_s28, %s13304_s14 }
  0x6b   :  { %p12886_p10 = pnand %p12884_p9, %p12881_p8 }
  0x6d   :  { %12889 = shalt.err (!%p12886_p10)
}
  0x6e   :  { %s12890_s1 = scalar_lea.vmem %s158_s22, 512  ;;  %p12895_p12 = scmp.lt.s32.totalorder %s158_s22, %s158_s22 }
  0x6f   :  { %p12891_p11 = scmp.ne.s32.totalorder %s158_s22, %s12890_s1  ;;  %p12896_p13 = scmp.lt.s32.totalorder %s12890_s1, %s12890_s1 }
  0x71   :  { %p12897_p0 = por %p12896_p13, %p12895_p12 }
  0x73   :  { %p12898_p1 = pnand %p12897_p0, %p12891_p11 }
  0x75   :  { %12901 = shalt.err (!%p12898_p1)
}
  0x76   :  { %163 = dma.hbm_to_vmem [thread:$0]  %s13304_s14, 512, %s158_s22, [#allocation10], %s13230_s15, %s13230_s15, %s13231_s16  }
  0x77   :  { %s12902_s25 = scalar_lea.hbm %s13319_s30, 128 }
  0x78   :  { %p12903_p2 = scmp.ne.s32.totalorder %s13319_s30, %s12902_s25  ;;  %p12906_p3 = scmp.lt.u32.totalorder %s12902_s25, %s13319_s30 }
  0x7a   :  { %p12908_p4 = pnand %p12906_p3, %p12903_p2 }
  0x7c   :  { %12911 = shalt.err (!%p12908_p4)
}
  0x7d   :  { %s12912_s2 = scalar_lea.vmem %s183_s26, 128  ;;  %p12917_p6 = scmp.lt.s32.totalorder %s183_s26, %s183_s26 }
  0x7e   :  { %p12913_p5 = scmp.ne.s32.totalorder %s183_s26, %s12912_s2  ;;  %p12918_p7 = scmp.lt.s32.totalorder %s12912_s2, %s12912_s2 }
  0x80   :  { %p12919_p8 = por %p12918_p7, %p12917_p6 }
  0x82   :  { %p12920_p9 = pnand %p12919_p8, %p12913_p5 }
  0x84   :  { %12923 = shalt.err (!%p12920_p9)
}
  0x85   :  { %185 = dma.hbm_to_vmem [thread:$0]  %s13319_s30, 128, %s183_s26, [#allocation13]  }
  0x86   :  { %s13234_s7 = smov [#allocation15]   ;;  %s13235_s10 = smov [#allocation18]  }
  0x87   :  { %s214_s14 = sshll.u32 %s13234_s7, 4  ;;  %s240_s11 = sshll.u32 %s13235_s10, 4  ;;  %s215_s14 = int_to_ptr.vmem [resolvable:$true] %s214_s14  ;;  %s241_s11 = int_to_ptr.vmem [resolvable:$true] %s240_s11 }
  0x88   :  { %s12924_s0 = scalar_lea.hbm %s13359_s27, 64 }
  0x89   :  { %p12925_p10 = scmp.ne.s32.totalorder %s13359_s27, %s12924_s0  ;;  %p12928_p11 = scmp.lt.u32.totalorder %s12924_s0, %s13359_s27 }
  0x8b   :  { %p12930_p12 = pnand %p12928_p11, %p12925_p10 }
  0x8d   :  { %12933 = shalt.err (!%p12930_p12)
}
  0x8e   :  { %s12934_s15 = scalar_lea.vmem %s215_s14, 64  ;;  %p12939_p0 = scmp.lt.s32.totalorder %s215_s14, %s215_s14 }
  0x8f   :  { %p12935_p13 = scmp.ne.s32.totalorder %s215_s14, %s12934_s15  ;;  %p12940_p1 = scmp.lt.s32.totalorder %s12934_s15, %s12934_s15 }
  0x91   :  { %p12941_p2 = por %p12940_p1, %p12939_p0 }
  0x93   :  { %p12942_p3 = pnand %p12941_p2, %p12935_p13 }
  0x95   :  { %12945 = shalt.err (!%p12942_p3)
}
  0x96   :  { %217 = dma.hbm_to_vmem [thread:$0]  %s13359_s27, 64, %s215_s14, [#allocation16]  }
  0x97   :  { %s12946_s30 = scalar_lea.hbm %s13384_s4, 16 }
  0x98   :  { %p12947_p4 = scmp.ne.s32.totalorder %s13384_s4, %s12946_s30  ;;  %p12950_p5 = scmp.lt.u32.totalorder %s12946_s30, %s13384_s4 }
  0x9a   :  { %p12952_p6 = pnand %p12950_p5, %p12947_p4 }
  0x9c   :  { %12955 = shalt.err (!%p12952_p6)
}
  0x9d   :  { %s12956_s16 = scalar_lea.vmem %s241_s11, 16  ;;  %s12960_s18 = scalar_lea.vmem %s241_s11, 32 }
  0x9e   :  { %p12957_p7 = scmp.ne.s32.totalorder %s241_s11, %s12956_s16  ;;  %p12961_p8 = scmp.lt.s32.totalorder %s241_s11, %s241_s11 }
  0x9f   :  { %p12962_p9 = scmp.lt.s32.totalorder %s12960_s18, %s12956_s16 }
  0xa1   :  { %p12963_p10 = por %p12962_p9, %p12961_p8 }
  0xa3   :  { %p12964_p11 = pnand %p12963_p10, %p12957_p7 }
  0xa5   :  { %12967 = shalt.err (!%p12964_p11)
}
  0xa6   :  { %243 = dma.hbm_to_vmem [thread:$0]  %s13384_s4, 16, %s241_s11, [#allocation19]  }
  0xa7   :  { %s13236_s27 = smov [#allocation3]   ;;  %s13237_s23 = smov [#allocation8]  }
  0xa8   :  { %s116_s22 = sshll.u32 %s13236_s27, 4  ;;  %s145_s26 = sshll.u32 %s13237_s23, 4  ;;  %s117_s22 = int_to_ptr.vmem [resolvable:$true] %s116_s22  ;;  %s146_s26 = int_to_ptr.vmem [resolvable:$true] %s145_s26 }
  0xa9   :  { %s12968_s28 = scalar_lea.hbm %s13269_s13, 128 }
  0xaa   :  { %p12969_p12 = scmp.ne.s32.totalorder %s13269_s13, %s12968_s28  ;;  %p12972_p13 = scmp.lt.u32.totalorder %s12968_s28, %s13269_s13 }
  0xac   :  { %p12974_p0 = pnand %p12972_p13, %p12969_p12 }
  0xae   :  { %12977 = shalt.err (!%p12974_p0)
}
  0xaf   :  { %s12978_s1 = scalar_lea.vmem %s117_s22, 128  ;;  %p12983_p2 = scmp.lt.s32.totalorder %s117_s22, %s117_s22 }
  0xb0   :  { %p12979_p1 = scmp.ne.s32.totalorder %s117_s22, %s12978_s1  ;;  %p12984_p3 = scmp.lt.s32.totalorder %s12978_s1, %s12978_s1 }
  0xb2   :  { %p12985_p4 = por %p12984_p3, %p12983_p2 }
  0xb4   :  { %p12986_p5 = pnand %p12985_p4, %p12979_p1 }
  0xb6   :  { %12989 = shalt.err (!%p12986_p5)
}
  0xb7   :  { %119 = dma.hbm_to_vmem [thread:$0]  %s13269_s13, 128, %s117_s22, [#allocation4]  }
  0xb8   :  { %s12990_s4 = scalar_lea.hbm %s13299_s8, 96 }
  0xb9   :  { %p12991_p6 = scmp.ne.s32.totalorder %s13299_s8, %s12990_s4  ;;  %p12994_p7 = scmp.lt.u32.totalorder %s12990_s4, %s13299_s8 }
  0xbb   :  { %p12996_p8 = pnand %p12994_p7, %p12991_p6 }
  0xbd   :  { %12999 = shalt.err (!%p12996_p8)
}
  0xbe   :  { %s13000_s25 = scalar_lea.vmem %s146_s26, 96  ;;  %p13005_p10 = scmp.lt.s32.totalorder %s146_s26, %s146_s26 }
  0xbf   :  { %p13001_p9 = scmp.ne.s32.totalorder %s146_s26, %s13000_s25  ;;  %p13006_p11 = scmp.lt.s32.totalorder %s13000_s25, %s13000_s25 }
  0xc1   :  { %p13007_p12 = por %p13006_p11, %p13005_p10 }
  0xc3   :  { %p13008_p13 = pnand %p13007_p12, %p13001_p9 }
  0xc5   :  { %13011 = shalt.err (!%p13008_p13)
}
  0xc6   :  { %s13238_s2 = smov 16   ;;  %s13239_s7 = smov 1  }
  0xc7   :  { %151 = dma.hbm_to_vmem [thread:$0]  %s13299_s8, 96, %s146_s26, [#allocation7], %s13238_s2, %s13238_s2, %s13239_s7  }
  0xc8   :  { %s13240_s13 = smov [#allocation11]   ;;  %s13241_s10 = smov [#allocation14]  }
  0xc9   :  { %s170_s14 = sshll.u32 %s13240_s13, 4  ;;  %s204_s11 = sshll.u32 %s13241_s10, 4  ;;  %s171_s14 = int_to_ptr.vmem [resolvable:$true] %s170_s14  ;;  %s205_s11 = int_to_ptr.vmem [resolvable:$true] %s204_s11 }
  0xca   :  { %s13012_s0 = scalar_lea.hbm %s13309_s19, 16 }
  0xcb   :  { %p13013_p0 = scmp.ne.s32.totalorder %s13309_s19, %s13012_s0  ;;  %p13016_p1 = scmp.lt.u32.totalorder %s13012_s0, %s13309_s19 }
  0xcd   :  { %p13018_p2 = pnand %p13016_p1, %p13013_p0 }
  0xcf   :  { %13021 = shalt.err (!%p13018_p2)
}
  0xd0   :  { %s13022_s15 = scalar_lea.vmem %s171_s14, 16  ;;  %s13026_s30 = scalar_lea.vmem %s171_s14, 32 }
  0xd1   :  { %p13023_p3 = scmp.ne.s32.totalorder %s171_s14, %s13022_s15  ;;  %p13027_p4 = scmp.lt.s32.totalorder %s171_s14, %s171_s14 }
  0xd2   :  { %p13028_p5 = scmp.lt.s32.totalorder %s13026_s30, %s13022_s15 }
  0xd4   :  { %p13029_p6 = por %p13028_p5, %p13027_p4 }
  0xd6   :  { %p13030_p7 = pnand %p13029_p6, %p13023_p3 }
  0xd8   :  { %13033 = shalt.err (!%p13030_p7)
}
  0xd9   :  { %173 = dma.hbm_to_vmem [thread:$0]  %s13309_s19, 16, %s171_s14, [#allocation10]  }
  0xda   :  { %s13034_s8 = scalar_lea.hbm %s13354_s12, 64 }
  0xdb   :  { %p13035_p8 = scmp.ne.s32.totalorder %s13354_s12, %s13034_s8  ;;  %p13038_p9 = scmp.lt.u32.totalorder %s13034_s8, %s13354_s12 }
  0xdd   :  { %p13040_p10 = pnand %p13038_p9, %p13035_p8 }
  0xdf   :  { %13043 = shalt.err (!%p13040_p10)
}
  0xe0   :  { %s13044_s16 = scalar_lea.vmem %s205_s11, 64  ;;  %p13049_p12 = scmp.lt.s32.totalorder %s205_s11, %s205_s11 }
  0xe1   :  { %p13045_p11 = scmp.ne.s32.totalorder %s205_s11, %s13044_s16  ;;  %p13050_p13 = scmp.lt.s32.totalorder %s13044_s16, %s13044_s16 }
  0xe3   :  { %p13051_p0 = por %p13050_p13, %p13049_p12 }
  0xe5   :  { %p13052_p1 = pnand %p13051_p0, %p13045_p11 }
  0xe7   :  { %13055 = shalt.err (!%p13052_p1)
}
  0xe8   :  { %207 = dma.hbm_to_vmem [thread:$0]  %s13354_s12, 64, %s205_s11, [#allocation13]  }
  0xe9   :  { %s13242_s18 = smov [#allocation17]   ;;  %s13243_s27 = smov [#allocation20]  }
  0xea   :  { %s228_s19 = sshll.u32 %s13242_s18, 4  ;;  %s252_s22 = sshll.u32 %s13243_s27, 4  ;;  %s229_s19 = int_to_ptr.vmem [resolvable:$true] %s228_s19  ;;  %s253_s22 = int_to_ptr.vmem [resolvable:$true] %s252_s22 }
  0xeb   :  { %s13056_s23 = scalar_lea.hbm %s13374_s20, 128 }
  0xec   :  { %p13057_p2 = scmp.ne.s32.totalorder %s13374_s20, %s13056_s23  ;;  %p13060_p3 = scmp.lt.u32.totalorder %s13056_s23, %s13374_s20 }
  0xee   :  { %p13062_p4 = pnand %p13060_p3, %p13057_p2 }
  0xf0   :  { %13065 = shalt.err (!%p13062_p4)
}
  0xf1   :  { %s13066_s26 = scalar_lea.vmem %s229_s19, 128  ;;  %p13071_p6 = scmp.lt.s32.totalorder %s229_s19, %s229_s19 }
  0xf2   :  { %p13067_p5 = scmp.ne.s32.totalorder %s229_s19, %s13066_s26  ;;  %p13072_p7 = scmp.lt.s32.totalorder %s13066_s26, %s13066_s26 }
  0xf4   :  { %p13073_p8 = por %p13072_p7, %p13071_p6 }
  0xf6   :  { %p13074_p9 = pnand %p13073_p8, %p13067_p5 }
  0xf8   :  { %13077 = shalt.err (!%p13074_p9)
}
  0xf9   :  { %231 = dma.hbm_to_vmem [thread:$0]  %s13374_s20, 128, %s229_s19, [#allocation16]  }
  0xfa   :  { %s13078_s12 = scalar_lea.hbm %s13394_s24, 16 }
  0xfb   :  { %p13079_p10 = scmp.ne.s32.totalorder %s13394_s24, %s13078_s12  ;;  %p13082_p11 = scmp.lt.u32.totalorder %s13078_s12, %s13394_s24 }
  0xfd   :  { %p13084_p12 = pnand %p13082_p11, %p13079_p10 }
  0xff   :  { %13087 = shalt.err (!%p13084_p12)
}
 0x100   :  { %s13088_s28 = scalar_lea.vmem %s253_s22, 16  ;;  %s13092_s1 = scalar_lea.vmem %s253_s22, 32 }
 0x101   :  { %p13089_p13 = scmp.ne.s32.totalorder %s253_s22, %s13088_s28  ;;  %p13093_p0 = scmp.lt.s32.totalorder %s253_s22, %s253_s22 }
 0x102   :  { %p13094_p1 = scmp.lt.s32.totalorder %s13092_s1, %s13088_s28 }
 0x104   :  { %p13095_p2 = por %p13094_p1, %p13093_p0 }
 0x106   :  { %p13096_p3 = pnand %p13095_p2, %p13089_p13 }
 0x108   :  { %13099 = shalt.err (!%p13096_p3)
}
 0x109   :  { %255 = dma.hbm_to_vmem [thread:$0]  %s13394_s24, 16, %s253_s22, [#allocation19]  }
 0x10a   :  { %s13244_s20 = smov [#allocation21]   ;;  %s13100_s25 = scalar_lea.hbm %s13404_s3, 16 }
 0x10b   :  { %s264_s4 = sshll.u32 %s13244_s20, 4  ;;  %p13101_p4 = scmp.ne.s32.totalorder %s13404_s3, %s13100_s25  ;;  %s265_s4 = int_to_ptr.vmem [resolvable:$true] %s264_s4 }
 0x10c   :  { %p13104_p5 = scmp.lt.u32.totalorder %s13100_s25, %s13404_s3 }
 0x10e   :  { %p13106_p6 = pnand %p13104_p5, %p13101_p4 }
 0x110   :  { %13109 = shalt.err (!%p13106_p6)
}
 0x111   :  { %s13110_s2 = scalar_lea.vmem %s265_s4, 16  ;;  %s13114_s7 = scalar_lea.vmem %s265_s4, 32 }
 0x112   :  { %p13111_p7 = scmp.ne.s32.totalorder %s265_s4, %s13110_s2  ;;  %p13115_p8 = scmp.lt.s32.totalorder %s265_s4, %s265_s4 }
 0x113   :  { %p13116_p9 = scmp.lt.s32.totalorder %s13114_s7, %s13110_s2 }
 0x115   :  { %p13117_p10 = por %p13116_p9, %p13115_p8 }
 0x117   :  { %p13118_p11 = pnand %p13117_p10, %p13111_p7 }
 0x119   :  { %13121 = shalt.err (!%p13118_p11)
}
 0x11a   :  { %267 = dma.hbm_to_vmem [thread:$0]  %s13404_s3, 16, %s265_s4, [#allocation22]  }
 0x11b   :  { %13166 = dma.done.wait [#allocation4], 128  }
 0x11c   :  { %13167 = vsyncadd [#allocation4], 4294967168 }
 0x11d   :  { %13168 = dma.done.wait [#allocation7], 352  }
 0x11e   :  { %13169 = vsyncadd [#allocation7], 4294966944 }
 0x11f   :  { %13170 = dma.done.wait [#allocation10], 528  }
 0x120   :  { %13171 = vsyncadd [#allocation10], 4294966768 }
 0x121   :  { %13172 = dma.done.wait [#allocation13], 192  }
 0x122   :  { %13173 = vsyncadd [#allocation13], 4294967104 }
 0x123   :  { %13174 = dma.done.wait [#allocation16], 192  }
 0x124   :  { %13175 = vsyncadd [#allocation16], 4294967104 }
 0x125   :  { %13176 = dma.done.wait [#allocation19], 32  }
 0x126   :  { %13177 = vsyncadd [#allocation19], 4294967264 }
 0x127   :  { %13178 = dma.done.wait [#allocation22], 16  }
 0x128   :  { %13179 = vsyncadd [#allocation22], 4294967280  ;;  %vm401_vm0 = vcmask 1046528   ;;  %vm376_vm1 = vcmask 56320   ;;  %v367_v0 = vld [vmem:[#allocation3] sm:$0x7f] }
 0x129   :  { %v336_v1 = vld [vmem:[%s13259_s5] sm:$0xff]  ;;  %v13536_v2 = vld [vmem:[%s13259_s5 + $0x8] sm:$0xff]  ;;  %10340 = vmatprep.subr.msk.mxu1 %vm401_vm0, %v367_v0  ;;  %v338_v3 = vld [vmem:[%s13259_s5 + $0x10] sm:$0xff]  ;;  %s15691_s3 = sld [smem:[#allocation36_spill]]  ;;  %s15693_s24 = sld [smem:[#allocation38_spill]]  ;;  %vm1844_vm2 = vcmask 261120  }
 0x12a   :  { %344 = vst [vmem:[#allocation2] sm:$0xff] %v336_v1  ;;  %10342 = vmatprep.mubr.msk.f32.mxu1 %vm376_vm1, %v336_v1  ;;  %345 = vst [vmem:[#allocation2 + $0x8] sm:$0xff] %v13536_v2  ;;  %v364_v4 = vmul.f32 2.0, %v13536_v2  ;;  %v339_v5 = vld [vmem:[%s13259_s5 + $0x18] sm:$0xff]  ;;  %10341 = vmatpush3.msk.msra.mxu1 %vm401_vm0, %v367_v0  ;;  %v13553_v8 = vsub.f32 %v336_v1, %v13536_v2  ;;  %v362_v9 = vsub.f32 %v13536_v2, %v338_v3  ;;  %v368_v11 = vld [vmem:[%s13274_s17] sm:$0xff]  ;;  %vm2210_vm3 = vcmask 130048  }
 0x12b   :  { %8764 = vst.msk [vmem:[#allocation2 + $0x8] sm:$0xff] %vm376_vm1, %v336_v1  ;;  %346 = vst [vmem:[#allocation2 + $0x10] sm:$0xff] %v338_v3  ;;  %10343 = vmatmul.mubr.msk.f32.vlgmr.msra.gmra.mrb[0].mxu1 %vm376_vm1, %v13536_v2  ;;  %v13557_v10 = vsub.f32 %v336_v1, %v339_v5  ;;  %v369_v13 = vld [vmem:[%s13274_s17 + $0x8] sm:$0xff]  ;;  %v370_v20 = vld [vmem:[%s13274_s17 + $0x10] sm:$0xff]  ;;  %s15696_s13 = sld [smem:[#allocation39_spill]]  ;;  %vm2380_vm5 = vcmask 523264  }
 0x12c   :  { %347 = vst [vmem:[#allocation2 + $0x18] sm:$0xff] %v339_v5  ;;  %8765 = vst.msk [vmem:[#allocation2 + $0x10] sm:$0xff] %vm376_vm1, %v13536_v2  ;;  %v365_v6 = vsub.f32 %v336_v1, %v364_v4  ;;  %10345 = vmatprep.mubr.msk.f32.mxu1 %vm376_vm1, %v338_v3  ;;  %v371_v24 = vld [vmem:[%s13274_s17 + $0x18] sm:$0xff]  ;;  %v372_v28 = vld [vmem:[%s13274_s17 + $0x20] sm:$0xff]  ;;  %s15697_s14 = sld [smem:[#allocation40_spill]]  ;;  %vm13246_vm6 = vmmov 0  }
 0x12d   :  { %v373_v33 = vld [vmem:[%s13274_s17 + $0x28] sm:$0xff]  ;;  %v374_v35 = vld [vmem:[%s13274_s17 + $0x30] sm:$0xff]  ;;  %v375_v39 = vld [vmem:[%s13274_s17 + $0x38] sm:$0xff]  ;;  %s15692_s17 = sld [smem:[#allocation37_spill]]  ;;  %s15698_s10 = sld [smem:[#allocation42_spill]]  ;;  %vm6327_vm7 = vcmask 1042432  }
 0x12e   :  { %v366_v7 = vadd.f32 %v365_v6, %v338_v3  ;;  %vm14246_vm4 = vmpackc.low %vm2210_vm3, %vm2210_vm3  ;;  %s15699_s11 = sld [smem:[#allocation41_spill]]  ;;  %s15700_s0 = sld [smem:[#allocation45_spill]]  ;;  %vm6323_vm8 = vcmask 285696   ;;  %vm6521_vm9 = vcmask 1040384   ;;  %vm6517_vm10 = vcmask 400384  }
 0x12f   :  { %v713_v43 = vld [vmem:[%s15691_s3] sm:$0xff]  ;;  %v714_v44 = vld [vmem:[%s15691_s3 + $0x8] sm:$0xff]  ;;  %v715_v46 = vld [vmem:[%s15691_s3 + $0x10] sm:$0xff]  ;;  %s15701_s15 = sld [smem:[#allocation43_spill]]  ;;  %s15702_s30 = sld [smem:[#allocation44_spill]]  ;;  %vm7410_vm11 = vcmask 1045504  }
 0x130   :  { %10346 = vmatmul.mubr.msk.f32.gmra.mrb[2].mxu1 %vm376_vm1, %v366_v7  ;;  %v11569_v45 = vpack.c.bf16 %v714_v44, %v713_v43  ;;  %v716_v47 = vld [vmem:[%s15691_s3 + $0x18] sm:$0xff]  ;;  %v717_v49 = vld [vmem:[%s15691_s3 + $0x20] sm:$0xff]  ;;  %v718_v50 = vld [vmem:[%s15691_s3 + $0x28] sm:$0xff]  ;;  %s15703_s8 = sld [smem:[#allocation46_spill]]  ;;  %s15704_s16 = sld [smem:[#allocation47_spill]]  ;;  %vm7406_vm12 = vcmask 572416  }
 0x131   :  { %10348 = vmatprep.mubr.msk.f32.mxu1 %vm376_vm1, %v339_v5  ;;  %v11573_v48 = vpack.c.bf16 %v716_v47, %v715_v46  ;;  %v11577_v51 = vpack.c.bf16 %v718_v50, %v717_v49  ;;  %v719_v52 = vld [vmem:[%s15691_s3 + $0x30] sm:$0xff]  ;;  %v720_v53 = vld [vmem:[%s15691_s3 + $0x38] sm:$0xff]  ;;  %v721_v55 = vld [vmem:[%s15691_s3 + $0x40] sm:$0xff]  ;;  %s15705_s18 = sld [smem:[#allocation48_spill]]  ;;  %s15706_s19 = sld [smem:[#allocation49_spill]]  ;;  %vm8182_vm13 = vcmask 1043456  }
 0x132   :  { %11570 = vmatprep.subr.bf16.mxu1 %v11569_v45  ;;  %v11581_v54 = vpack.c.bf16 %v720_v53, %v719_v52  ;;  %v722_v56 = vld [vmem:[%s15691_s3 + $0x48] sm:$0xff]  ;;  %v723_v58 = vld [vmem:[%s15691_s3 + $0x50] sm:$0xff]  ;;  %v724_v59 = vld [vmem:[%s15691_s3 + $0x58] sm:$0xff]  ;;  %s15707_s27 = sld [smem:[#allocation50_spill]]  ;;  %s15708_s22 = sld [smem:[#allocation51_spill]]  ;;  %vm8178_vm14 = vcmask 556032  }
 0x133   :  { %11572 = vmatpush3.bf16.msra.mxu1 %v11569_v45  ;;  %v11585_v57 = vpack.c.bf16 %v722_v56, %v721_v55  ;;  %v11589_v60 = vpack.c.bf16 %v724_v59, %v723_v58  ;;  %v725_v61 = vld [vmem:[%s15691_s3 + $0x60] sm:$0xff]  ;;  %v726_v62 = vld [vmem:[%s15691_s3 + $0x68] sm:$0xff]  ;;  %v727_v0 = vld [vmem:[%s15691_s3 + $0x70] sm:$0xff]  ;;  %s15709_s23 = sld [smem:[#allocation35_spill]]  ;;  %s15710_s26 = sld [smem:[#allocation58_spill]] }
 0x134   :  { %10349 = vmatmul.mubr.msk.f32.gmra.mrb[4].mxu1 %vm376_vm1, %v13553_v8  ;;  %11574 = vmatprep.subr.bf16.mxu1 %v11573_v48  ;;  %v11593_v63 = vpack.c.bf16 %v726_v62, %v725_v61  ;;  %v728_v1 = vld [vmem:[%s15691_s3 + $0x78] sm:$0xff]  ;;  %v13635_v46 = vld [vmem:[#allocation6] ss:$0 sm:$0xff]  ;;  %s15711_s12 = sld [smem:[#allocation52_spill]]  ;;  %s15712_s28 = sld [smem:[#allocation56_spill]] }
 0x135   :  { %10351 = vmatprep.mubr.msk.f32.mxu1 %vm376_vm1, %v362_v9  ;;  %v11597_v3 = vpack.c.bf16 %v728_v1, %v727_v0  ;;  %s15713_s1 = sld [smem:[#allocation57_spill]]  ;;  %s15714_s20 = sld [smem:[#allocation60_spill]] }
 0x136   :  { %s15715_s4 = sld [smem:[#allocation59_spill]]  ;;  %s15716_s25 = sld [smem:[#allocation53_spill]] }
 0x137   :  { %11576 = vmatpush3.bf16.msra.mxu1 %v11573_v48  ;;  %s15718_s2 = sld [smem:[#allocation55_spill]]  ;;  %s15719_s7 = sld [smem:[#allocation61_spill]] }
 0x138   :  { %10352 = vmatmul.mubr.msk.f32.gmra.mrb[6].mxu1 %vm376_vm1, %v13557_v10  ;;  %11578 = vmatprep.subr.bf16.mxu1 %v11577_v51 }
 0x13b   :  { %11580 = vmatpush3.bf16.msra.mxu1 %v11577_v51  ;;  %v13639_v51 = vld [vmem:[#allocation6 + $0x4] ss:$0 sm:$0xff] }
 0x13c   :  { %11582 = vmatprep.subr.bf16.mxu1 %v11581_v54 }
 0x13f   :  { %11584 = vmatpush3.bf16.msra.mxu1 %v11581_v54 }
 0x140   :  { %11586 = vmatprep.subr.bf16.mxu1 %v11585_v57 }
 0x143   :  { %11588 = vmatpush3.bf16.msra.mxu1 %v11585_v57 }
 0x144   :  { %11590 = vmatprep.subr.bf16.mxu1 %v11589_v60 }
 0x147   :  { %11592 = vmatpush3.bf16.msra.mxu1 %v11589_v60 }
 0x148   :  { %11594 = vmatprep.subr.bf16.mxu1 %v11593_v63 }
 0x14b   :  { %11596 = vmatpush3.bf16.msra.mxu1 %v11593_v63 }
 0x14c   :  { %11598 = vmatprep.subr.bf16.mxu1 %v11597_v3 }
 0x14f   :  { %11600 = vmatpush3.bf16.msra.mxu1 %v11597_v3 }
 0x1fe   :  { %v10344_v12 = vpop.f32.mrb[0].mxu1 }
 0x1ff   :  { %v471_v14 = vpop.f32.mrb[1].mxu1  ;;  %v13568_v16 = vadd.f32 %v10344_v12, %v369_v13 }
 0x200   :  { %v13566_v15 = vadd.f32 %v471_v14, %v368_v11 }
 0x201   :  { %v538_v22 = vmul.f32 %v13568_v16, %v13568_v16 }
 0x202   :  { %512 = vadd.xlane.f32.xlu0 %v13566_v15  ;;  %v537_v17 = vmul.f32 %v13566_v15, %v13566_v15 }
 0x203   :  { %v10347_v18 = vpop.f32.mrb[2].mxu1 }
 0x204   :  { %v481_v19 = vpop.f32.mrb[3].mxu1  ;;  %545 = vadd.xlane.f32.xlu1 %v537_v17  ;;  %v13580_v26 = vadd.f32 %v10347_v18, %v371_v24 }
 0x205   :  { %v13575_v21 = vadd.f32 %v481_v19, %v370_v20 }
 0x206   :  { %514 = vadd.xlane.f32.xlu0 %v13568_v16  ;;  %v540_v32 = vmul.f32 %v13580_v26, %v13580_v26 }
 0x207   :  { %v10350_v23 = vpop.f32.mrb[4].mxu1  ;;  %v539_v30 = vmul.f32 %v13575_v21, %v13575_v21 }
 0x208   :  { %v491_v25 = vpop.f32.mrb[5].mxu1  ;;  %547 = vadd.xlane.f32.xlu1 %v538_v22  ;;  %v13592_v34 = vadd.f32 %v10350_v23, %v373_v33 }
 0x209   :  { %v13587_v31 = vadd.f32 %v491_v25, %v372_v28 }
 0x20a   :  { %516 = vadd.xlane.f32.xlu0 %v13575_v21  ;;  %v542_v38 = vmul.f32 %v13592_v34, %v13592_v34 }
 0x20b   :  { %v10353_v27 = vpop.f32.mrb[6].mxu1  ;;  %v541_v36 = vmul.f32 %v13587_v31, %v13587_v31 }
 0x20c   :  { %v501_v29 = vpop.f32.mrb[7].mxu1  ;;  %518 = vadd.xlane.f32.xlu1 %v13580_v26  ;;  %v13604_v40 = vadd.f32 %v10353_v27, %v375_v39 }
 0x20d   :  { %v13599_v37 = vadd.f32 %v501_v29, %v374_v35 }
 0x20e   :  { %549 = vadd.xlane.f32.xlu0 %v539_v30  ;;  %v544_v42 = vmul.f32 %v13604_v40, %v13604_v40 }
 0x20f   :  { %v543_v41 = vmul.f32 %v13599_v37, %v13599_v37 }
 0x210   :  { %551 = vadd.xlane.f32.xlu1 %v540_v32 }
 0x212   :  { %520 = vadd.xlane.f32.xlu0 %v13587_v31 }
 0x214   :  { %522 = vadd.xlane.f32.xlu1 %v13592_v34 }
 0x216   :  { %553 = vadd.xlane.f32.xlu0 %v541_v36 }
 0x218   :  { %555 = vadd.xlane.f32.xlu1 %v542_v38 }
 0x21a   :  { %524 = vadd.xlane.f32.xlu0 %v13599_v37 }
 0x21c   :  { %526 = vadd.xlane.f32.xlu1 %v13604_v40 }
 0x21e   :  { %557 = vadd.xlane.f32.xlu0 %v543_v41 }
 0x220   :  { %559 = vadd.xlane.f32.xlu1 %v544_v42 }
 0x28f   :  { %v513_v4 = vpop.xlane.xlu0 %512 }
 0x290   :  { %v529_v5 = vmul.f32 0.0078125, %v513_v4 }
 0x291   :  { %v546_v6 = vpop.xlane.xlu1 %545 }
 0x292   :  { %v569_v7 = vmul.f32 %v529_v5, %v529_v5  ;;  %v561_v9 = vmul.f32 0.0078125, %v546_v6  ;;  %v585_v43 = vsub.f32 %v13566_v15, %v529_v5 }
 0x293   :  { %v515_v11 = vpop.xlane.xlu0 %514 }
 0x294   :  { %v577_v12 = vsub.f32 %v561_v9, %v569_v7  ;;  %v530_v13 = vmul.f32 0.0078125, %v515_v11 }
 0x295   :  { %v548_v14 = vpop.xlane.xlu1 %547 }
 0x296   :  { %v593_v17 = vadd.f32 1e-05, %v577_v12  ;;  %v570_v18 = vmul.f32 %v530_v13, %v530_v13  ;;  %v562_v19 = vmul.f32 0.0078125, %v548_v14  ;;  %v586_v54 = vsub.f32 %v13568_v16, %v530_v13 }
 0x297   :  { %v517_v20 = vpop.xlane.xlu0 %516 }
 0x298   :  { %12626 = vrsqrt.f32 %v593_v17  ;;  %v578_v22 = vsub.f32 %v562_v19, %v570_v18  ;;  %v531_v23 = vmul.f32 0.0078125, %v517_v20 }
 0x299   :  { %v519_v24 = vpop.xlane.xlu1 %518 }
 0x29a   :  { %v594_v25 = vadd.f32 1e-05, %v578_v22  ;;  %v13628_v27 = vmul.f32 0.0078125, %v519_v24  ;;  %v571_v29 = vmul.f32 %v531_v23, %v531_v23  ;;  %v587_v7 = vsub.f32 %v13575_v21, %v531_v23 }
 0x29b   :  { %v550_v28 = vpop.xlane.xlu0 %549 }
 0x29c   :  { %12628 = vrsqrt.f32 %v594_v25  ;;  %v563_v30 = vmul.f32 0.0078125, %v550_v28  ;;  %v572_v33 = vmul.f32 %v13628_v27, %v13628_v27  ;;  %v588_v18 = vsub.f32 %v13580_v26, %v13628_v27 }
 0x29d   :  { %v552_v32 = vpop.xlane.xlu1 %551 }
 0x29e   :  { %v579_v35 = vsub.f32 %v563_v30, %v571_v29  ;;  %v564_v36 = vmul.f32 0.0078125, %v552_v32 }
 0x29f   :  { %v521_v38 = vpop.xlane.xlu0 %520 }
 0x2a0   :  { %v595_v39 = vadd.f32 1e-05, %v579_v35  ;;  %v580_v41 = vsub.f32 %v564_v36, %v572_v33  ;;  %v13632_v42 = vmul.f32 0.0078125, %v521_v38 }
 0x2a1   :  { %v523_v44 = vpop.xlane.xlu1 %522 }
 0x2a2   :  { %v12627_v45 = vpop.eup %12626  ;;  %12630 = vrsqrt.f32 %v595_v39  ;;  %v596_v47 = vadd.f32 1e-05, %v580_v41  ;;  %v13637_v49 = vmul.f32 0.0078125, %v523_v44  ;;  %v573_v52 = vmul.f32 %v13632_v42, %v13632_v42 }
 0x2a3   :  { %v609_v48 = vmul.f32 %v12627_v45, %v585_v43  ;;  %v554_v50 = vpop.xlane.xlu0 %553  ;;  %v589_v43 = vsub.f32 %v13587_v31, %v13632_v42 }
 0x2a4   :  { %12632 = vrsqrt.f32 %v596_v47  ;;  %v565_v53 = vmul.f32 0.0078125, %v554_v50  ;;  %v574_v57 = vmul.f32 %v13637_v49, %v13637_v49  ;;  %v590_v50 = vsub.f32 %v13592_v34, %v13637_v49 }
 0x2a5   :  { %v556_v15 = vpop.xlane.xlu1 %555  ;;  %v621_v55 = vmul.f32 %v13635_v46, %v609_v48 }
 0x2a6   :  { %v12629_v56 = vpop.eup %12628  ;;  %v581_v58 = vsub.f32 %v565_v53, %v573_v52  ;;  %v566_v59 = vmul.f32 0.0078125, %v556_v15 }
 0x2a7   :  { %v610_v60 = vmul.f32 %v12629_v56, %v586_v54  ;;  %v525_v61 = vpop.xlane.xlu0 %524  ;;  %v13648_v62 = vadd.f32 %v13639_v51, %v621_v55 }
 0x2a8   :  { %v597_v63 = vadd.f32 1e-05, %v581_v58  ;;  %v582_v0 = vsub.f32 %v566_v59, %v574_v57  ;;  %v13650_v1 = vmul.f32 0.0078125, %v525_v61 }
 0x2a9   :  { %v622_v16 = vmul.f32 %v13635_v46, %v610_v60  ;;  %v527_v3 = vpop.xlane.xlu1 %526  ;;  %v641_v4 = vmul.f32 %v13648_v62, %v13648_v62 }
 0x2aa   :  { %12634 = vrsqrt.f32 %v597_v63  ;;  %v598_v5 = vadd.f32 1e-05, %v582_v0  ;;  %v13659_v9 = vmul.f32 0.0078125, %v527_v3  ;;  %v575_v14 = vmul.f32 %v13650_v1, %v13650_v1 }
 0x2ab   :  { %v13656_v6 = vadd.f32 %v13639_v51, %v622_v16  ;;  %v558_v11 = vpop.xlane.xlu0 %557  ;;  %v649_v12 = vmul.f32 %v641_v4, %v13648_v62  ;;  %v591_v60 = vsub.f32 %v13599_v37, %v13650_v1 }
 0x2ac   :  { %v12631_v13 = vpop.eup %12630  ;;  %12636 = vrsqrt.f32 %v598_v5  ;;  %v567_v17 = vmul.f32 0.0078125, %v558_v11  ;;  %v576_v21 = vmul.f32 %v13659_v9, %v13659_v9  ;;  %v592_v4 = vsub.f32 %v13604_v40, %v13659_v9 }
 0x2ad   :  { %v611_v19 = vmul.f32 %v12631_v13, %v587_v7  ;;  %v560_v20 = vpop.xlane.xlu1 %559  ;;  %v657_v22 = vmul.f32 0.044715, %v649_v12  ;;  %v642_v28 = vmul.f32 %v13656_v6, %v13656_v6 }
 0x2ae   :  { %v12633_v24 = vpop.eup %12632  ;;  %v583_v23 = vsub.f32 %v567_v17, %v575_v14  ;;  %v568_v25 = vmul.f32 0.0078125, %v560_v20 }
 0x2af   :  { %v612_v29 = vmul.f32 %v12633_v24, %v588_v18  ;;  %v665_v30 = vadd.f32 %v657_v22, %v13648_v62  ;;  %v623_v32 = vmul.f32 %v13635_v46, %v611_v19  ;;  %v650_v26 = vmul.f32 %v642_v28, %v13656_v6 }
 0x2b0   :  { %v599_v33 = vadd.f32 1e-05, %v583_v23  ;;  %v584_v35 = vsub.f32 %v568_v25, %v576_v21 }
 0x2b1   :  { %v673_v27 = vmul.f32 0.7978846, %v665_v30  ;;  %v13674_v36 = vadd.f32 %v13639_v51, %v623_v32  ;;  %v624_v38 = vmul.f32 %v13635_v46, %v612_v29  ;;  %v658_v41 = vmul.f32 0.044715, %v650_v26 }
 0x2b2   :  { %12638 = vrsqrt.f32 %v599_v33  ;;  %v600_v39 = vadd.f32 1e-05, %v584_v35 }
 0x2b3   :  { %12640 = vtanh.f32 %v673_v27  ;;  %v643_v44 = vmul.f32 %v13674_v36, %v13674_v36  ;;  %v13682_v45 = vadd.f32 %v13639_v51, %v624_v38  ;;  %v666_v48 = vadd.f32 %v658_v41, %v13656_v6 }
 0x2b4   :  { %v12635_v47 = vpop.eup %12634  ;;  %12642 = vrsqrt.f32 %v600_v39 }
 0x2b5   :  { %v613_v52 = vmul.f32 %v12635_v47, %v589_v43  ;;  %v651_v53 = vmul.f32 %v643_v44, %v13674_v36  ;;  %v644_v31 = vmul.f32 %v13682_v45, %v13682_v45  ;;  %v674_v54 = vmul.f32 0.7978846, %v666_v48 }
 0x2b6   :  { %v12637_v42 = vpop.eup %12636 }
 0x2b7   :  { %v614_v15 = vmul.f32 %v12637_v42, %v590_v50  ;;  %v659_v55 = vmul.f32 0.044715, %v651_v53  ;;  %v652_v56 = vmul.f32 %v644_v31, %v13682_v45  ;;  %v625_v57 = vmul.f32 %v13635_v46, %v613_v52 }
 0x2b8   :  { %12644 = vtanh.f32 %v674_v54 }
 0x2b9   :  { %v667_v58 = vadd.f32 %v659_v55, %v13674_v36  ;;  %v660_v59 = vmul.f32 0.044715, %v652_v56  ;;  %v13694_v34 = vadd.f32 %v13639_v51, %v625_v57  ;;  %v626_v49 = vmul.f32 %v13635_v46, %v614_v15 }
 0x2bb   :  { %v675_v61 = vmul.f32 0.7978846, %v667_v58  ;;  %v668_v63 = vadd.f32 %v660_v59, %v13682_v45  ;;  %v645_v0 = vmul.f32 %v13694_v34, %v13694_v34  ;;  %v13703_v16 = vadd.f32 %v13639_v51, %v626_v49 }
 0x2bc   :  { %v12639_v3 = vpop.eup %12638 }
 0x2bd   :  { %v12641_v5 = vpop.eup %12640  ;;  %v615_v7 = vmul.f32 %v12639_v3, %v591_v60  ;;  %12646 = vtanh.f32 %v675_v61  ;;  %v676_v11 = vmul.f32 0.7978846, %v668_v63  ;;  %v653_v12 = vmul.f32 %v645_v0, %v13694_v34 }
 0x2be   :  { %v12643_v37 = vpop.eup %12642  ;;  %v689_v1 = vadd.f32 1.0, %v12641_v5  ;;  %v646_v13 = vmul.f32 %v13703_v16, %v13703_v16  ;;  %v9034_v5 = vld [vmem:[#allocation6 + $0x8] ss:$0 sm:$0xff] }
 0x2bf   :  { %v616_v14 = vmul.f32 %v12643_v37, %v592_v4  ;;  %12648 = vtanh.f32 %v676_v11  ;;  %v661_v17 = vmul.f32 0.044715, %v653_v12  ;;  %v627_v18 = vmul.f32 %v13635_v46, %v615_v7 }
 0x2c0   :  { %v697_v19 = vmul.f32 0.5, %v689_v1  ;;  %v654_v20 = vmul.f32 %v646_v13, %v13703_v16 }
 0x2c1   :  { %v669_v40 = vadd.f32 %v661_v17, %v13694_v34  ;;  %v639_v9 = vadd.f32 %v13639_v51, %v627_v18  ;;  %v628_v22 = vmul.f32 %v13635_v46, %v616_v14 }
 0x2c2   :  { %v12645_v24 = vpop.eup %12644  ;;  %v705_v21 = vmul.f32 %v697_v19, %v13648_v62  ;;  %v662_v23 = vmul.f32 0.044715, %v654_v20 }
 0x2c3   :  { %v690_v25 = vadd.f32 1.0, %v12645_v24  ;;  %v677_v28 = vmul.f32 0.7978846, %v669_v40  ;;  %v647_v29 = vmul.f32 %v639_v9, %v639_v9  ;;  %v640_v30 = vadd.f32 %v13639_v51, %v628_v22 }
 0x2c4   :  { %10386 = vmatprep.mubr.f32.mxu1 %v705_v21  ;;  %v670_v32 = vadd.f32 %v662_v23, %v13703_v16 }
 0x2c5   :  { %v698_v33 = vmul.f32 0.5, %v690_v25  ;;  %12650 = vtanh.f32 %v677_v28  ;;  %v655_v35 = vmul.f32 %v647_v29, %v639_v9  ;;  %v648_v26 = vmul.f32 %v640_v30, %v640_v30 }
 0x2c6   :  { %v678_v27 = vmul.f32 0.7978846, %v670_v32 }
 0x2c7   :  { %v12647_v38 = vpop.eup %12646  ;;  %v706_v46 = vmul.f32 %v698_v33, %v13656_v6  ;;  %v663_v39 = vmul.f32 0.044715, %v655_v35  ;;  %v656_v41 = vmul.f32 %v648_v26, %v640_v30  ;;  %v9037_v33 = vld [vmem:[%s15691_s3 + $0x80] sm:$0xff]  ;;  %v9038_v35 = vld [vmem:[%s15691_s3 + $0x88] sm:$0xff] }
 0x2c8   :  { %v691_v62 = vadd.f32 1.0, %v12647_v38  ;;  %12652 = vtanh.f32 %v678_v27  ;;  %v11601_v26 = vpack.c.bf16 %v9038_v35, %v9037_v33  ;;  %v9039_v27 = vld [vmem:[%s15691_s3 + $0x90] sm:$0xff]  ;;  %v9040_v38 = vld [vmem:[%s15691_s3 + $0x98] sm:$0xff] }
 0x2c9   :  { %v12649_v43 = vpop.eup %12648  ;;  %10387 = vmatmul.mubr.f32.vlgmr.msra.gmra.mrb[8].mxu1 %v706_v46  ;;  %v671_v44 = vadd.f32 %v663_v39, %v639_v9  ;;  %v664_v47 = vmul.f32 0.044715, %v656_v41  ;;  %v11605_v46 = vpack.c.bf16 %v9040_v38, %v9039_v27  ;;  %v9041_v39 = vld [vmem:[%s15691_s3 + $0xa0] sm:$0xff]  ;;  %v9042_v41 = vld [vmem:[%s15691_s3 + $0xa8] sm:$0xff] }
 0x2ca   :  { %v699_v51 = vmul.f32 0.5, %v691_v62  ;;  %v692_v48 = vadd.f32 1.0, %v12649_v43  ;;  %11602 = vmatprep.subr.bf16.mxu0 %v11601_v26  ;;  %v11609_v62 = vpack.c.bf16 %v9042_v41, %v9041_v39  ;;  %v9043_v43 = vld [vmem:[%s15691_s3 + $0xb0] sm:$0xff] }
 0x2cb   :  { %v679_v50 = vmul.f32 0.7978846, %v671_v44  ;;  %v672_v52 = vadd.f32 %v664_v47, %v640_v30  ;;  %11604 = vmatpush3.bf16.msra.mxu0 %v11601_v26  ;;  %v9044_v44 = vld [vmem:[%s15691_s3 + $0xb8] sm:$0xff] }
 0x2cc   :  { %v707_v53 = vmul.f32 %v699_v51, %v13674_v36  ;;  %v700_v31 = vmul.f32 0.5, %v692_v48  ;;  %11606 = vmatprep.subr.bf16.mxu0 %v11605_v46  ;;  %v11613_v47 = vpack.c.bf16 %v9044_v44, %v9043_v43  ;;  %v9045_v51 = vld [vmem:[%s15691_s3 + $0xc0] sm:$0xff]  ;;  %v9046_v48 = vld [vmem:[%s15691_s3 + $0xc8] sm:$0xff] }
 0x2cd   :  { %12654 = vtanh.f32 %v679_v50  ;;  %v680_v42 = vmul.f32 0.7978846, %v672_v52  ;;  %v11617_v50 = vpack.c.bf16 %v9046_v48, %v9045_v51  ;;  %v9047_v52 = vld [vmem:[%s15691_s3 + $0xd0] sm:$0xff]  ;;  %v13787_v44 = vld [vmem:[#allocation6 + $0x1] ss:$0 sm:$0xff] }
 0x2ce   :  { %10389 = vmatprep.mubr.f32.mxu1 %v707_v53  ;;  %v708_v6 = vmul.f32 %v700_v31, %v13682_v45  ;;  %v9048_v53 = vld [vmem:[%s15691_s3 + $0xd8] sm:$0xff] }
 0x2cf   :  { %v12651_v54 = vpop.eup %12650  ;;  %12656 = vtanh.f32 %v680_v42  ;;  %11608 = vmatpush3.bf16.msra.mxu0 %v11605_v46  ;;  %v11621_v31 = vpack.c.bf16 %v9048_v53, %v9047_v52  ;;  %v9049_v42 = vld [vmem:[%s15691_s3 + $0xe0] sm:$0xff] }
 0x2d0   :  { %10390 = vmatmul.mubr.f32.gmra.mrb[10].mxu1 %v708_v6  ;;  %v693_v15 = vadd.f32 1.0, %v12651_v54  ;;  %11610 = vmatprep.subr.bf16.mxu0 %v11609_v62  ;;  %v9050_v6 = vld [vmem:[%s15691_s3 + $0xe8] sm:$0xff] }
 0x2d1   :  { %v11625_v54 = vpack.c.bf16 %v9050_v6, %v9049_v42 }
 0x2d2   :  { %v12653_v55 = vpop.eup %12652  ;;  %v701_v56 = vmul.f32 0.5, %v693_v15  ;;  %v9051_v15 = vld [vmem:[%s15691_s3 + $0xf0] sm:$0xff] }
 0x2d3   :  { %v694_v57 = vadd.f32 1.0, %v12653_v55  ;;  %11612 = vmatpush3.bf16.msra.mxu0 %v11609_v62  ;;  %v9052_v55 = vld [vmem:[%s15691_s3 + $0xf8] sm:$0xff] }
 0x2d4   :  { %v709_v58 = vmul.f32 %v701_v56, %v13694_v34  ;;  %11614 = vmatprep.subr.bf16.mxu0 %v11613_v47  ;;  %v11629_v56 = vpack.c.bf16 %v9052_v55, %v9051_v15 }
 0x2d5   :  { %v702_v59 = vmul.f32 0.5, %v694_v57 }
 0x2d6   :  { %10392 = vmatprep.mubr.f32.mxu1 %v709_v58 }
 0x2d7   :  { %v12655_v49 = vpop.eup %12654  ;;  %v710_v36 = vmul.f32 %v702_v59, %v13703_v16  ;;  %11616 = vmatpush3.bf16.msra.mxu0 %v11613_v47 }
 0x2d8   :  { %v695_v60 = vadd.f32 1.0, %v12655_v49  ;;  %11618 = vmatprep.subr.bf16.mxu0 %v11617_v50 }
 0x2d9   :  { %v12657_v61 = vpop.eup %12656  ;;  %10393 = vmatmul.mubr.f32.gmra.mrb[12].mxu1 %v710_v36 }
 0x2da   :  { %v703_v63 = vmul.f32 0.5, %v695_v60  ;;  %v696_v0 = vadd.f32 1.0, %v12657_v61 }
 0x2db   :  { %11620 = vmatpush3.bf16.msra.mxu0 %v11617_v50 }
 0x2dc   :  { %v711_v45 = vmul.f32 %v703_v63, %v639_v9  ;;  %v704_v3 = vmul.f32 0.5, %v696_v0  ;;  %11622 = vmatprep.subr.bf16.mxu0 %v11621_v31 }
 0x2de   :  { %10395 = vmatprep.mubr.f32.mxu1 %v711_v45  ;;  %v712_v4 = vmul.f32 %v704_v3, %v640_v30 }
 0x2df   :  { %11624 = vmatpush3.bf16.msra.mxu0 %v11621_v31 }
 0x2e0   :  { %10396 = vmatmul.mubr.f32.gmra.mrb[14].mxu1 %v712_v4  ;;  %11626 = vmatprep.subr.bf16.mxu0 %v11625_v54 }
 0x2e3   :  { %11628 = vmatpush3.bf16.msra.mxu0 %v11625_v54 }
 0x2e4   :  { %11630 = vmatprep.subr.bf16.mxu0 %v11629_v56 }
 0x2e7   :  { %11632 = vmatpush3.bf16.msra.mxu0 %v11629_v56 }
 0x39c   :  { %v10388_v7 = vpop.f32.mrb[8].mxu1 }
 0x39d   :  { %v13723_v11 = vadd.f32 %v10388_v7, %v9034_v5  ;;  %v800_v34 = vpop.f32.mrb[9].mxu1 }
 0x39e   :  { %v13725_v12 = vadd.f32 %v9034_v5, %v800_v34 }
 0x39f   :  { %843 = vadd.xlane.f32.xlu1 %v13723_v11  ;;  %v866_v16 = vmul.f32 %v13723_v11, %v13723_v11 }
 0x3a0   :  { %841 = vadd.xlane.f32.xlu0 %v13725_v12  ;;  %v865_v37 = vmul.f32 %v13725_v12, %v13725_v12 }
 0x3a3   :  { %875 = vadd.xlane.f32.xlu1 %v866_v16  ;;  %v10391_v1 = vpop.f32.mrb[10].mxu1 }
 0x3a4   :  { %v13733_v13 = vadd.f32 %v10391_v1, %v9034_v5  ;;  %873 = vadd.xlane.f32.xlu0 %v865_v37  ;;  %v810_v14 = vpop.f32.mrb[11].mxu1 }
 0x3a5   :  { %v13735_v17 = vadd.f32 %v9034_v5, %v810_v14 }
 0x3a6   :  { %v868_v18 = vmul.f32 %v13733_v13, %v13733_v13 }
 0x3a7   :  { %847 = vadd.xlane.f32.xlu1 %v13733_v13  ;;  %v867_v19 = vmul.f32 %v13735_v17, %v13735_v17 }
 0x3a8   :  { %845 = vadd.xlane.f32.xlu0 %v13735_v17 }
 0x3ab   :  { %879 = vadd.xlane.f32.xlu1 %v868_v18 }
 0x3ac   :  { %877 = vadd.xlane.f32.xlu0 %v867_v19  ;;  %v10394_v20 = vpop.f32.mrb[12].mxu1 }
 0x3ad   :  { %v13743_v40 = vadd.f32 %v10394_v20, %v9034_v5  ;;  %v820_v9 = vpop.f32.mrb[13].mxu1 }
 0x3ae   :  { %v13745_v22 = vadd.f32 %v9034_v5, %v820_v9 }
 0x3af   :  { %851 = vadd.xlane.f32.xlu1 %v13743_v40  ;;  %v870_v24 = vmul.f32 %v13743_v40, %v13743_v40 }
 0x3b0   :  { %849 = vadd.xlane.f32.xlu0 %v13745_v22  ;;  %v869_v21 = vmul.f32 %v13745_v22, %v13745_v22 }
 0x3b3   :  { %883 = vadd.xlane.f32.xlu1 %v870_v24  ;;  %v10397_v23 = vpop.f32.mrb[14].mxu1 }
 0x3b4   :  { %881 = vadd.xlane.f32.xlu0 %v869_v21  ;;  %v13753_v25 = vadd.f32 %v10397_v23, %v9034_v5  ;;  %v830_v28 = vpop.f32.mrb[15].mxu1 }
 0x3b5   :  { %v13755_v29 = vadd.f32 %v9034_v5, %v830_v28 }
 0x3b6   :  { %v872_v30 = vmul.f32 %v13753_v25, %v13753_v25 }
 0x3b7   :  { %855 = vadd.xlane.f32.xlu1 %v13753_v25  ;;  %v871_v32 = vmul.f32 %v13755_v29, %v13755_v29 }
 0x3b8   :  { %853 = vadd.xlane.f32.xlu0 %v13755_v29 }
 0x3bb   :  { %887 = vadd.xlane.f32.xlu1 %v872_v30 }
 0x3bc   :  { %885 = vadd.xlane.f32.xlu0 %v871_v32 }
 0x42c   :  { %v844_v57 = vpop.xlane.xlu1 %843 }
 0x42d   :  { %v858_v58 = vmul.f32 0.0078125, %v844_v57  ;;  %v842_v59 = vpop.xlane.xlu0 %841 }
 0x42e   :  { %v857_v49 = vmul.f32 0.0078125, %v842_v59 }
 0x42f   :  { %v898_v60 = vmul.f32 %v858_v58, %v858_v58  ;;  %v914_v27 = vsub.f32 %v13723_v11, %v858_v58  ;;  %v13791_v11 = vld [vmem:[#allocation6 + $0x5] ss:$0 sm:$0xff] }
 0x430   :  { %v876_v36 = vpop.xlane.xlu1 %875  ;;  %v897_v0 = vmul.f32 %v857_v49, %v857_v49  ;;  %v913_v39 = vsub.f32 %v13725_v12, %v857_v49 }
 0x431   :  { %v890_v61 = vmul.f32 0.0078125, %v876_v36  ;;  %v874_v63 = vpop.xlane.xlu0 %873 }
 0x432   :  { %v889_v45 = vmul.f32 0.0078125, %v874_v63 }
 0x433   :  { %v906_v3 = vsub.f32 %v890_v61, %v898_v60 }
 0x434   :  { %v905_v4 = vsub.f32 %v889_v45, %v897_v0  ;;  %v848_v5 = vpop.xlane.xlu1 %847 }
 0x435   :  { %v922_v7 = vadd.f32 1e-05, %v906_v3  ;;  %v860_v34 = vmul.f32 0.0078125, %v848_v5  ;;  %v846_v16 = vpop.xlane.xlu0 %845 }
 0x436   :  { %v921_v37 = vadd.f32 1e-05, %v905_v4  ;;  %v859_v1 = vmul.f32 0.0078125, %v846_v16 }
 0x437   :  { %12658 = vrsqrt.f32 %v922_v7  ;;  %v900_v18 = vmul.f32 %v860_v34, %v860_v34  ;;  %v916_v49 = vsub.f32 %v13733_v13, %v860_v34 }
 0x438   :  { %12660 = vrsqrt.f32 %v921_v37  ;;  %v880_v14 = vpop.xlane.xlu1 %879  ;;  %v899_v9 = vmul.f32 %v859_v1, %v859_v1  ;;  %v915_v63 = vsub.f32 %v13735_v17, %v859_v1 }
 0x439   :  { %v892_v19 = vmul.f32 0.0078125, %v880_v14  ;;  %v878_v20 = vpop.xlane.xlu0 %877 }
 0x43a   :  { %v891_v24 = vmul.f32 0.0078125, %v878_v20 }
 0x43b   :  { %v908_v21 = vsub.f32 %v892_v19, %v900_v18 }
 0x43c   :  { %v907_v23 = vsub.f32 %v891_v24, %v899_v9  ;;  %v852_v28 = vpop.xlane.xlu1 %851 }
 0x43d   :  { %v924_v30 = vadd.f32 1e-05, %v908_v21  ;;  %v13779_v32 = vmul.f32 0.0078125, %v852_v28  ;;  %v850_v33 = vpop.xlane.xlu0 %849 }
 0x43e   :  { %v923_v35 = vadd.f32 1e-05, %v907_v23  ;;  %v13781_v26 = vmul.f32 0.0078125, %v850_v33 }
 0x43f   :  { %12662 = vrsqrt.f32 %v924_v30  ;;  %v902_v41 = vmul.f32 %v13779_v32, %v13779_v32 }
 0x440   :  { %12664 = vrsqrt.f32 %v923_v35  ;;  %v884_v38 = vpop.xlane.xlu1 %883  ;;  %v901_v48 = vmul.f32 %v13781_v26, %v13781_v26  ;;  %v918_v35 = vsub.f32 %v13743_v40, %v13779_v32 }
 0x441   :  { %v12659_v46 = vpop.eup %12658  ;;  %v894_v62 = vmul.f32 0.0078125, %v884_v38  ;;  %v882_v43 = vpop.xlane.xlu0 %881 }
 0x442   :  { %v12661_v47 = vpop.eup %12660  ;;  %v938_v51 = vmul.f32 %v12659_v46, %v914_v27  ;;  %v893_v50 = vmul.f32 0.0078125, %v882_v43 }
 0x443   :  { %v910_v52 = vsub.f32 %v894_v62, %v902_v41  ;;  %v937_v53 = vmul.f32 %v12661_v47, %v913_v39  ;;  %v917_v39 = vsub.f32 %v13745_v22, %v13781_v26 }
 0x444   :  { %v909_v31 = vsub.f32 %v893_v50, %v901_v48  ;;  %v856_v42 = vpop.xlane.xlu1 %855  ;;  %v950_v12 = vmul.f32 %v13787_v44, %v938_v51 }
 0x445   :  { %v926_v6 = vadd.f32 1e-05, %v910_v52  ;;  %v13794_v54 = vmul.f32 0.0078125, %v856_v42  ;;  %v854_v15 = vpop.xlane.xlu0 %853  ;;  %v949_v55 = vmul.f32 %v13787_v44, %v937_v53 }
 0x446   :  { %v925_v56 = vadd.f32 1e-05, %v909_v31  ;;  %v13797_v57 = vmul.f32 0.0078125, %v854_v15  ;;  %v13800_v58 = vadd.f32 %v13791_v11, %v950_v12 }
 0x447   :  { %12666 = vrsqrt.f32 %v926_v6  ;;  %v13803_v59 = vadd.f32 %v13791_v11, %v949_v55  ;;  %v904_v0 = vmul.f32 %v13794_v54, %v13794_v54  ;;  %v920_v12 = vsub.f32 %v13753_v25, %v13794_v54 }
 0x448   :  { %12668 = vrsqrt.f32 %v925_v56  ;;  %v888_v36 = vpop.xlane.xlu1 %887  ;;  %v970_v60 = vmul.f32 %v13800_v58, %v13800_v58  ;;  %v903_v13 = vmul.f32 %v13797_v57, %v13797_v57  ;;  %v919_v56 = vsub.f32 %v13755_v29, %v13797_v57 }
 0x449   :  { %v12663_v61 = vpop.eup %12662  ;;  %v896_v45 = vmul.f32 0.0078125, %v888_v36  ;;  %v886_v3 = vpop.xlane.xlu0 %885  ;;  %v969_v4 = vmul.f32 %v13803_v59, %v13803_v59 }
 0x44a   :  { %v12665_v5 = vpop.eup %12664  ;;  %v940_v7 = vmul.f32 %v12663_v61, %v916_v49  ;;  %v895_v34 = vmul.f32 0.0078125, %v886_v3  ;;  %v978_v16 = vmul.f32 %v970_v60, %v13800_v58 }
 0x44b   :  { %v939_v37 = vmul.f32 %v12665_v5, %v915_v63  ;;  %v912_v14 = vsub.f32 %v896_v45, %v904_v0  ;;  %v977_v17 = vmul.f32 %v969_v4, %v13803_v59 }
 0x44c   :  { %v911_v1 = vsub.f32 %v895_v34, %v903_v13  ;;  %v986_v18 = vmul.f32 0.044715, %v978_v16  ;;  %v952_v19 = vmul.f32 %v13787_v44, %v940_v7 }
 0x44d   :  { %v928_v20 = vadd.f32 1e-05, %v912_v14  ;;  %v985_v9 = vmul.f32 0.044715, %v977_v17  ;;  %v951_v24 = vmul.f32 %v13787_v44, %v939_v37 }
 0x44e   :  { %v927_v21 = vadd.f32 1e-05, %v911_v1  ;;  %v994_v23 = vadd.f32 %v986_v18, %v13800_v58  ;;  %v13821_v28 = vadd.f32 %v13791_v11, %v952_v19 }
 0x44f   :  { %12670 = vrsqrt.f32 %v928_v20  ;;  %v993_v30 = vadd.f32 %v985_v9, %v13803_v59  ;;  %v13825_v33 = vadd.f32 %v13791_v11, %v951_v24 }
 0x450   :  { %12672 = vrsqrt.f32 %v927_v21  ;;  %v1002_v27 = vmul.f32 0.7978846, %v994_v23  ;;  %v972_v38 = vmul.f32 %v13821_v28, %v13821_v28 }
 0x451   :  { %v12667_v46 = vpop.eup %12666  ;;  %v1001_v41 = vmul.f32 0.7978846, %v993_v30  ;;  %v971_v62 = vmul.f32 %v13825_v33, %v13825_v33 }
 0x452   :  { %v12669_v43 = vpop.eup %12668  ;;  %v942_v47 = vmul.f32 %v12667_v46, %v918_v35  ;;  %12674 = vtanh.f32 %v1002_v27  ;;  %v980_v51 = vmul.f32 %v972_v38, %v13821_v28 }
 0x453   :  { %v941_v48 = vmul.f32 %v12669_v43, %v917_v39  ;;  %12676 = vtanh.f32 %v1001_v41  ;;  %v979_v40 = vmul.f32 %v971_v62, %v13825_v33 }
 0x454   :  { %v988_v32 = vmul.f32 0.044715, %v980_v51  ;;  %v954_v50 = vmul.f32 %v13787_v44, %v942_v47 }
 0x455   :  { %v987_v52 = vmul.f32 0.044715, %v979_v40  ;;  %v953_v53 = vmul.f32 %v13787_v44, %v941_v48 }
 0x456   :  { %v996_v22 = vadd.f32 %v988_v32, %v13821_v28  ;;  %v13841_v26 = vadd.f32 %v13791_v11, %v954_v50 }
 0x457   :  { %v995_v31 = vadd.f32 %v987_v52, %v13825_v33  ;;  %v13845_v42 = vadd.f32 %v13791_v11, %v953_v53 }
 0x458   :  { %v1004_v6 = vmul.f32 0.7978846, %v996_v22  ;;  %v974_v15 = vmul.f32 %v13841_v26, %v13841_v26 }
 0x459   :  { %v12671_v55 = vpop.eup %12670  ;;  %v1003_v49 = vmul.f32 0.7978846, %v995_v31  ;;  %v973_v36 = vmul.f32 %v13845_v42, %v13845_v42 }
 0x45a   :  { %v12673_v60 = vpop.eup %12672  ;;  %v944_v61 = vmul.f32 %v12671_v55, %v920_v12  ;;  %12678 = vtanh.f32 %v1004_v6  ;;  %v982_v63 = vmul.f32 %v974_v15, %v13841_v26 }
 0x45b   :  { %v943_v0 = vmul.f32 %v12673_v60, %v919_v56  ;;  %12680 = vtanh.f32 %v1003_v49  ;;  %v981_v25 = vmul.f32 %v973_v36, %v13845_v42  ;;  %v9053_v49 = vld [vmem:[#allocation6 + $0x9] ss:$0 sm:$0xff] }
 0x45c   :  { %v12675_v54 = vpop.eup %12674  ;;  %v990_v45 = vmul.f32 0.044715, %v982_v63  ;;  %v956_v3 = vmul.f32 %v13787_v44, %v944_v61 }
 0x45d   :  { %v12677_v4 = vpop.eup %12676  ;;  %v1018_v5 = vadd.f32 1.0, %v12675_v54  ;;  %v989_v29 = vmul.f32 0.044715, %v981_v25  ;;  %v955_v57 = vmul.f32 %v13787_v44, %v943_v0 }
 0x45e   :  { %v1017_v7 = vadd.f32 1.0, %v12677_v4  ;;  %v998_v13 = vadd.f32 %v990_v45, %v13841_v26  ;;  %v968_v34 = vadd.f32 %v13791_v11, %v956_v3 }
 0x45f   :  { %v1026_v16 = vmul.f32 0.5, %v1018_v5  ;;  %v997_v37 = vadd.f32 %v989_v29, %v13845_v42  ;;  %v967_v14 = vadd.f32 %v13791_v11, %v955_v57 }
 0x460   :  { %v1025_v17 = vmul.f32 0.5, %v1017_v7  ;;  %v1006_v1 = vmul.f32 0.7978846, %v998_v13  ;;  %v976_v18 = vmul.f32 %v968_v34, %v968_v34 }
 0x461   :  { %v1005_v19 = vmul.f32 0.7978846, %v997_v37  ;;  %v975_v20 = vmul.f32 %v967_v14, %v967_v14  ;;  %v1034_v44 = vmul.f32 %v1026_v16, %v13800_v58 }
 0x462   :  { %v1033_v9 = vmul.f32 %v1025_v17, %v13803_v59  ;;  %12682 = vtanh.f32 %v1006_v1  ;;  %v984_v24 = vmul.f32 %v976_v18, %v968_v34 }
 0x463   :  { %12684 = vtanh.f32 %v1005_v19  ;;  %v983_v21 = vmul.f32 %v975_v20, %v967_v14  ;;  %v9056_v19 = vld [vmem:[%s15691_s3 + $0x100] sm:$0xff]  ;;  %v9057_v20 = vld [vmem:[%s15691_s3 + $0x108] sm:$0xff] }
 0x464   :  { %v12679_v23 = vpop.eup %12678  ;;  %10430 = vmatprep.mubr.f32.mxu0 %v1033_v9  ;;  %v992_v30 = vmul.f32 0.044715, %v984_v24  ;;  %v11633_v9 = vpack.c.bf16 %v9057_v20, %v9056_v19  ;;  %v9058_v24 = vld [vmem:[%s15691_s3 + $0x110] sm:$0xff] }
 0x465   :  { %v12681_v35 = vpop.eup %12680  ;;  %10431 = vmatmul.mubr.f32.vlgmr.msra.gmra.mrb[0].mxu0 %v1034_v44  ;;  %v1020_v27 = vadd.f32 1.0, %v12679_v23  ;;  %v991_v11 = vmul.f32 0.044715, %v983_v21  ;;  %v9059_v44 = vld [vmem:[%s15691_s3 + $0x118] sm:$0xff]  ;;  %v9060_v23 = vld [vmem:[%s15691_s3 + $0x120] sm:$0xff] }
 0x466   :  { %v1019_v38 = vadd.f32 1.0, %v12681_v35  ;;  %v1000_v46 = vadd.f32 %v992_v30, %v968_v34  ;;  %11634 = vmatprep.subr.bf16.mxu1 %v11633_v9  ;;  %v11637_v21 = vpack.c.bf16 %v9059_v44, %v9058_v24  ;;  %v9061_v30 = vld [vmem:[%s15691_s3 + $0x128] sm:$0xff] }
 0x467   :  { %v1028_v39 = vmul.f32 0.5, %v1020_v27  ;;  %v999_v41 = vadd.f32 %v991_v11, %v967_v14  ;;  %11636 = vmatpush3.bf16.msra.mxu1 %v11633_v9  ;;  %v11641_v35 = vpack.c.bf16 %v9061_v30, %v9060_v23  ;;  %v9062_v27 = vld [vmem:[%s15691_s3 + $0x130] sm:$0xff]  ;;  %v9063_v11 = vld [vmem:[%s15691_s3 + $0x138] sm:$0xff]  ;;  %v13931_v30 = vld [vmem:[#allocation6 + $0x2] ss:$0 sm:$0xff] }
 0x468   :  { %v1027_v62 = vmul.f32 0.5, %v1019_v38  ;;  %v1008_v43 = vmul.f32 0.7978846, %v1000_v46  ;;  %11638 = vmatprep.subr.bf16.mxu1 %v11637_v21  ;;  %v11645_v38 = vpack.c.bf16 %v9063_v11, %v9062_v27  ;;  %v9064_v46 = vld [vmem:[%s15691_s3 + $0x140] sm:$0xff] }
 0x469   :  { %v1007_v59 = vmul.f32 0.7978846, %v999_v41  ;;  %v1036_v58 = vmul.f32 %v1028_v39, %v13821_v28  ;;  %v9065_v39 = vld [vmem:[%s15691_s3 + $0x148] sm:$0xff] }
 0x46a   :  { %v1035_v47 = vmul.f32 %v1027_v62, %v13825_v33  ;;  %12686 = vtanh.f32 %v1008_v43  ;;  %v11649_v41 = vpack.c.bf16 %v9065_v39, %v9064_v46  ;;  %v9066_v62 = vld [vmem:[%s15691_s3 + $0x150] sm:$0xff]  ;;  %v9067_v43 = vld [vmem:[%s15691_s3 + $0x158] sm:$0xff] }
 0x46b   :  { %12688 = vtanh.f32 %v1007_v59  ;;  %11640 = vmatpush3.bf16.msra.mxu1 %v11637_v21  ;;  %v11653_v59 = vpack.c.bf16 %v9067_v43, %v9066_v62  ;;  %v13937_v62 = vld [vmem:[#allocation6 + $0x6] ss:$0 sm:$0xff] }
 0x46c   :  { %v12683_v51 = vpop.eup %12682  ;;  %10433 = vmatprep.mubr.f32.mxu0 %v1035_v47  ;;  %11642 = vmatprep.subr.bf16.mxu1 %v11641_v35  ;;  %v9068_v47 = vld [vmem:[%s15691_s3 + $0x160] sm:$0xff] }
 0x46d   :  { %v12685_v48 = vpop.eup %12684  ;;  %10434 = vmatmul.mubr.f32.gmra.mrb[2].mxu0 %v1036_v58  ;;  %v1022_v40 = vadd.f32 1.0, %v12683_v51  ;;  %v9069_v58 = vld [vmem:[%s15691_s3 + $0x168] sm:$0xff] }
 0x46e   :  { %v1021_v32 = vadd.f32 1.0, %v12685_v48  ;;  %v11657_v51 = vpack.c.bf16 %v9069_v58, %v9068_v47  ;;  %v9070_v48 = vld [vmem:[%s15691_s3 + $0x170] sm:$0xff] }
 0x46f   :  { %v1030_v50 = vmul.f32 0.5, %v1022_v40  ;;  %11644 = vmatpush3.bf16.msra.mxu1 %v11641_v35  ;;  %v9071_v40 = vld [vmem:[%s15691_s3 + $0x178] sm:$0xff]  ;;  %s15720_s3 = sld [smem:[#allocation62_spill]] }
 0x470   :  { %v1029_v52 = vmul.f32 0.5, %v1021_v32  ;;  %11646 = vmatprep.subr.bf16.mxu1 %v11645_v38  ;;  %v11661_v32 = vpack.c.bf16 %v9071_v40, %v9070_v48 }
 0x471   :  { %v1038_v22 = vmul.f32 %v1030_v50, %v13841_v26 }
 0x472   :  { %v1037_v53 = vmul.f32 %v1029_v52, %v13845_v42 }
 0x473   :  { %11648 = vmatpush3.bf16.msra.mxu1 %v11645_v38 }
 0x474   :  { %v12687_v31 = vpop.eup %12686  ;;  %10436 = vmatprep.mubr.f32.mxu0 %v1037_v53  ;;  %11650 = vmatprep.subr.bf16.mxu1 %v11649_v41 }
 0x475   :  { %v12689_v12 = vpop.eup %12688  ;;  %10437 = vmatmul.mubr.f32.gmra.mrb[4].mxu0 %v1038_v22  ;;  %v1024_v33 = vadd.f32 1.0, %v12687_v31 }
 0x476   :  { %v1023_v6 = vadd.f32 1.0, %v12689_v12 }
 0x477   :  { %v1032_v28 = vmul.f32 0.5, %v1024_v33  ;;  %11652 = vmatpush3.bf16.msra.mxu1 %v11649_v41 }
 0x478   :  { %v1031_v15 = vmul.f32 0.5, %v1023_v6  ;;  %11654 = vmatprep.subr.bf16.mxu1 %v11653_v59 }
 0x479   :  { %v1040_v56 = vmul.f32 %v1032_v28, %v968_v34 }
 0x47a   :  { %v1039_v55 = vmul.f32 %v1031_v15, %v967_v14 }
 0x47b   :  { %11656 = vmatpush3.bf16.msra.mxu1 %v11653_v59 }
 0x47c   :  { %10439 = vmatprep.mubr.f32.mxu0 %v1039_v55  ;;  %11658 = vmatprep.subr.bf16.mxu1 %v11657_v51 }
 0x47d   :  { %10440 = vmatmul.mubr.f32.gmra.mrb[6].mxu0 %v1040_v56 }
 0x47f   :  { %11660 = vmatpush3.bf16.msra.mxu1 %v11657_v51 }
 0x480   :  { %11662 = vmatprep.subr.bf16.mxu1 %v11661_v32 }
 0x483   :  { %11664 = vmatpush3.bf16.msra.mxu1 %v11661_v32 }
 0x538   :  { %v10432_v36 = vpop.f32.mrb[0].mxu0 }
 0x539   :  { %v13869_v60 = vadd.f32 %v10432_v36, %v9053_v49  ;;  %v1129_v61 = vpop.f32.mrb[1].mxu0 }
 0x53a   :  { %v13871_v42 = vadd.f32 %v9053_v49, %v1129_v61 }
 0x53b   :  { %1172 = vadd.xlane.f32.xlu1 %v13869_v60  ;;  %v1195_v26 = vmul.f32 %v13869_v60, %v13869_v60 }
 0x53c   :  { %1170 = vadd.xlane.f32.xlu0 %v13871_v42  ;;  %v1194_v63 = vmul.f32 %v13871_v42, %v13871_v42 }
 0x53f   :  { %1204 = vadd.xlane.f32.xlu1 %v1195_v26 }
 0x540   :  { %1202 = vadd.xlane.f32.xlu0 %v1194_v63  ;;  %v10435_v0 = vpop.f32.mrb[2].mxu0 }
 0x541   :  { %v13879_v25 = vadd.f32 %v10435_v0, %v9053_v49  ;;  %v1139_v54 = vpop.f32.mrb[3].mxu0 }
 0x542   :  { %v13881_v45 = vadd.f32 %v9053_v49, %v1139_v54 }
 0x543   :  { %1176 = vadd.xlane.f32.xlu1 %v13879_v25  ;;  %v1197_v3 = vmul.f32 %v13879_v25, %v13879_v25 }
 0x544   :  { %1174 = vadd.xlane.f32.xlu0 %v13881_v45  ;;  %v1196_v4 = vmul.f32 %v13881_v45, %v13881_v45 }
 0x547   :  { %1208 = vadd.xlane.f32.xlu1 %v1197_v3 }
 0x548   :  { %1206 = vadd.xlane.f32.xlu0 %v1196_v4  ;;  %v10438_v5 = vpop.f32.mrb[4].mxu0 }
 0x549   :  { %v13889_v29 = vadd.f32 %v10438_v5, %v9053_v49  ;;  %v1149_v57 = vpop.f32.mrb[5].mxu0 }
 0x54a   :  { %v13891_v7 = vadd.f32 %v9053_v49, %v1149_v57 }
 0x54b   :  { %1180 = vadd.xlane.f32.xlu1 %v13889_v29  ;;  %v1199_v13 = vmul.f32 %v13889_v29, %v13889_v29 }
 0x54c   :  { %1178 = vadd.xlane.f32.xlu0 %v13891_v7  ;;  %v1198_v34 = vmul.f32 %v13891_v7, %v13891_v7 }
 0x54f   :  { %1212 = vadd.xlane.f32.xlu1 %v1199_v13 }
 0x550   :  { %1210 = vadd.xlane.f32.xlu0 %v1198_v34  ;;  %v10441_v16 = vpop.f32.mrb[6].mxu0 }
 0x551   :  { %v13899_v37 = vadd.f32 %v10441_v16, %v9053_v49  ;;  %v1159_v14 = vpop.f32.mrb[7].mxu0 }
 0x552   :  { %v13901_v17 = vadd.f32 %v9053_v49, %v1159_v14 }
 0x553   :  { %1184 = vadd.xlane.f32.xlu1 %v13899_v37  ;;  %v1201_v1 = vmul.f32 %v13899_v37, %v13899_v37 }
 0x554   :  { %1182 = vadd.xlane.f32.xlu0 %v13901_v17  ;;  %v1200_v18 = vmul.f32 %v13901_v17, %v13901_v17 }
 0x557   :  { %1216 = vadd.xlane.f32.xlu1 %v1201_v1 }
 0x558   :  { %1214 = vadd.xlane.f32.xlu0 %v1200_v18 }
 0x5c8   :  { %v1173_v50 = vpop.xlane.xlu1 %1172 }
 0x5c9   :  { %v1187_v52 = vmul.f32 0.0078125, %v1173_v50  ;;  %v1171_v53 = vpop.xlane.xlu0 %1170 }
 0x5ca   :  { %v1186_v22 = vmul.f32 0.0078125, %v1171_v53 }
 0x5cb   :  { %v1227_v12 = vmul.f32 %v1187_v52, %v1187_v52  ;;  %v1243_v24 = vsub.f32 %v13869_v60, %v1187_v52 }
 0x5cc   :  { %v1205_v31 = vpop.xlane.xlu1 %1204  ;;  %v1226_v28 = vmul.f32 %v1186_v22, %v1186_v22  ;;  %v1242_v23 = vsub.f32 %v13871_v42, %v1186_v22 }
 0x5cd   :  { %v1219_v33 = vmul.f32 0.0078125, %v1205_v31  ;;  %v1203_v6 = vpop.xlane.xlu0 %1202 }
 0x5ce   :  { %v1218_v15 = vmul.f32 0.0078125, %v1203_v6 }
 0x5cf   :  { %v1235_v55 = vsub.f32 %v1219_v33, %v1227_v12 }
 0x5d0   :  { %v1234_v56 = vsub.f32 %v1218_v15, %v1226_v28  ;;  %v1177_v49 = vpop.xlane.xlu1 %1176 }
 0x5d1   :  { %v1251_v36 = vadd.f32 1e-05, %v1235_v55  ;;  %v1189_v61 = vmul.f32 0.0078125, %v1177_v49  ;;  %v1175_v26 = vpop.xlane.xlu0 %1174 }
 0x5d2   :  { %v1250_v63 = vadd.f32 1e-05, %v1234_v56  ;;  %v1188_v0 = vmul.f32 0.0078125, %v1175_v26 }
 0x5d3   :  { %12690 = vrsqrt.f32 %v1251_v36  ;;  %v1229_v3 = vmul.f32 %v1189_v61, %v1189_v61  ;;  %v1245_v22 = vsub.f32 %v13879_v25, %v1189_v61 }
 0x5d4   :  { %12692 = vrsqrt.f32 %v1250_v63  ;;  %v1209_v54 = vpop.xlane.xlu1 %1208  ;;  %v1228_v57 = vmul.f32 %v1188_v0, %v1188_v0  ;;  %v1244_v6 = vsub.f32 %v13881_v45, %v1188_v0 }
 0x5d5   :  { %v1221_v4 = vmul.f32 0.0078125, %v1209_v54  ;;  %v1207_v5 = vpop.xlane.xlu0 %1206 }
 0x5d6   :  { %v1220_v13 = vmul.f32 0.0078125, %v1207_v5 }
 0x5d7   :  { %v1237_v34 = vsub.f32 %v1221_v4, %v1229_v3 }
 0x5d8   :  { %v1236_v16 = vsub.f32 %v1220_v13, %v1228_v57  ;;  %v1181_v14 = vpop.xlane.xlu1 %1180 }
 0x5d9   :  { %v1253_v1 = vadd.f32 1e-05, %v1237_v34  ;;  %v13925_v18 = vmul.f32 0.0078125, %v1181_v14  ;;  %v1179_v19 = vpop.xlane.xlu0 %1178 }
 0x5da   :  { %v1252_v20 = vadd.f32 1e-05, %v1236_v16  ;;  %v13927_v9 = vmul.f32 0.0078125, %v1179_v19 }
 0x5db   :  { %12694 = vrsqrt.f32 %v1253_v1  ;;  %v1231_v35 = vmul.f32 %v13925_v18, %v13925_v18 }
 0x5dc   :  { %12696 = vrsqrt.f32 %v1252_v20  ;;  %v1213_v44 = vpop.xlane.xlu1 %1212  ;;  %v1230_v39 = vmul.f32 %v13927_v9, %v13927_v9  ;;  %v1247_v20 = vsub.f32 %v13889_v29, %v13925_v18 }
 0x5dd   :  { %v12691_v21 = vpop.eup %12690  ;;  %v1223_v27 = vmul.f32 0.0078125, %v1213_v44  ;;  %v1211_v11 = vpop.xlane.xlu0 %1210 }
 0x5de   :  { %v12693_v38 = vpop.eup %12692  ;;  %v1267_v46 = vmul.f32 %v12691_v21, %v1243_v24  ;;  %v1222_v41 = vmul.f32 0.0078125, %v1211_v11 }
 0x5df   :  { %v1266_v60 = vmul.f32 %v12693_v38, %v1242_v23  ;;  %v1239_v43 = vsub.f32 %v1223_v27, %v1231_v35  ;;  %v1246_v23 = vsub.f32 %v13891_v7, %v13927_v9 }
 0x5e0   :  { %v1279_v59 = vmul.f32 %v13931_v30, %v1267_v46  ;;  %v1238_v42 = vsub.f32 %v1222_v41, %v1230_v39  ;;  %v1185_v47 = vpop.xlane.xlu1 %1184 }
 0x5e1   :  { %v1255_v58 = vadd.f32 1e-05, %v1239_v43  ;;  %v13940_v51 = vmul.f32 0.0078125, %v1185_v47  ;;  %v1183_v48 = vpop.xlane.xlu0 %1182  ;;  %v1278_v40 = vmul.f32 %v13931_v30, %v1266_v60 }
 0x5e2   :  { %v13944_v32 = vadd.f32 %v13937_v62, %v1279_v59  ;;  %v1254_v50 = vadd.f32 1e-05, %v1238_v42  ;;  %v13946_v52 = vmul.f32 0.0078125, %v1183_v48 }
 0x5e3   :  { %12698 = vrsqrt.f32 %v1255_v58  ;;  %v13949_v53 = vadd.f32 %v13937_v62, %v1278_v40  ;;  %v1233_v28 = vmul.f32 %v13940_v51, %v13940_v51  ;;  %v1249_v47 = vsub.f32 %v13899_v37, %v13940_v51 }
 0x5e4   :  { %12700 = vrsqrt.f32 %v1254_v50  ;;  %v1217_v31 = vpop.xlane.xlu1 %1216  ;;  %v1299_v12 = vmul.f32 %v13944_v32, %v13944_v32  ;;  %v1232_v25 = vmul.f32 %v13946_v52, %v13946_v52  ;;  %v1248_v50 = vsub.f32 %v13901_v17, %v13946_v52 }
 0x5e5   :  { %v12695_v33 = vpop.eup %12694  ;;  %v1225_v15 = vmul.f32 0.0078125, %v1217_v31  ;;  %v1215_v55 = vpop.xlane.xlu0 %1214  ;;  %v1298_v56 = vmul.f32 %v13949_v53, %v13949_v53 }
 0x5e6   :  { %v12697_v49 = vpop.eup %12696  ;;  %v1269_v36 = vmul.f32 %v12695_v33, %v1245_v22  ;;  %v1224_v61 = vmul.f32 0.0078125, %v1215_v55  ;;  %v1307_v26 = vmul.f32 %v1299_v12, %v13944_v32 }
 0x5e7   :  { %v1268_v63 = vmul.f32 %v12697_v49, %v1244_v6  ;;  %v1241_v54 = vsub.f32 %v1225_v15, %v1233_v28  ;;  %v1306_v45 = vmul.f32 %v1298_v56, %v13949_v53 }
 0x5e8   :  { %v1240_v0 = vsub.f32 %v1224_v61, %v1232_v25  ;;  %v1315_v3 = vmul.f32 0.044715, %v1307_v26  ;;  %v1281_v4 = vmul.f32 %v13931_v30, %v1269_v36 }
 0x5e9   :  { %v1257_v5 = vadd.f32 1e-05, %v1241_v54  ;;  %v1314_v57 = vmul.f32 0.044715, %v1306_v45  ;;  %v1280_v13 = vmul.f32 %v13931_v30, %v1268_v63 }
 0x5ea   :  { %v1256_v34 = vadd.f32 1e-05, %v1240_v0  ;;  %v1323_v16 = vadd.f32 %v1315_v3, %v13944_v32  ;;  %v13967_v14 = vadd.f32 %v13937_v62, %v1281_v4 }
 0x5eb   :  { %12702 = vrsqrt.f32 %v1257_v5  ;;  %v1322_v1 = vadd.f32 %v1314_v57, %v13949_v53  ;;  %v13971_v19 = vadd.f32 %v13937_v62, %v1280_v13 }
 0x5ec   :  { %12704 = vrsqrt.f32 %v1256_v34  ;;  %v1331_v24 = vmul.f32 0.7978846, %v1323_v16  ;;  %v1301_v44 = vmul.f32 %v13967_v14, %v13967_v14 }
 0x5ed   :  { %v12699_v21 = vpop.eup %12698  ;;  %v1330_v35 = vmul.f32 0.7978846, %v1322_v1  ;;  %v1300_v27 = vmul.f32 %v13971_v19, %v13971_v19 }
 0x5ee   :  { %v12701_v11 = vpop.eup %12700  ;;  %v1271_v38 = vmul.f32 %v12699_v21, %v1247_v20  ;;  %12706 = vtanh.f32 %v1331_v24  ;;  %v1309_v46 = vmul.f32 %v1301_v44, %v13967_v14 }
 0x5ef   :  { %v1270_v39 = vmul.f32 %v12701_v11, %v1246_v23  ;;  %12708 = vtanh.f32 %v1330_v35  ;;  %v1308_v29 = vmul.f32 %v1300_v27, %v13971_v19 }
 0x5f0   :  { %v1317_v18 = vmul.f32 0.044715, %v1309_v46  ;;  %v1283_v41 = vmul.f32 %v13931_v30, %v1271_v38 }
 0x5f1   :  { %v1316_v60 = vmul.f32 0.044715, %v1308_v29  ;;  %v1282_v43 = vmul.f32 %v13931_v30, %v1270_v39 }
 0x5f2   :  { %v1325_v7 = vadd.f32 %v1317_v18, %v13967_v14  ;;  %v13987_v9 = vadd.f32 %v13937_v62, %v1283_v41 }
 0x5f3   :  { %v1324_v59 = vadd.f32 %v1316_v60, %v13971_v19  ;;  %v13991_v42 = vadd.f32 %v13937_v62, %v1282_v43 }
 0x5f4   :  { %v1333_v58 = vmul.f32 0.7978846, %v1325_v7  ;;  %v1303_v48 = vmul.f32 %v13987_v9, %v13987_v9 }
 0x5f5   :  { %v12703_v40 = vpop.eup %12702  ;;  %v1332_v22 = vmul.f32 0.7978846, %v1324_v59  ;;  %v1302_v31 = vmul.f32 %v13991_v42, %v13991_v42 }
 0x5f6   :  { %v12705_v12 = vpop.eup %12704  ;;  %v1273_v33 = vmul.f32 %v12703_v40, %v1249_v47  ;;  %12710 = vtanh.f32 %v1333_v58  ;;  %v1311_v6 = vmul.f32 %v1303_v48, %v13987_v9 }
 0x5f7   :  { %v1272_v28 = vmul.f32 %v12705_v12, %v1248_v50  ;;  %12712 = vtanh.f32 %v1332_v22  ;;  %v1310_v37 = vmul.f32 %v1302_v31, %v13991_v42  ;;  %v9072_v22 = vld [vmem:[#allocation6 + $0xa] ss:$0 sm:$0xff] }
 0x5f8   :  { %v12707_v51 = vpop.eup %12706  ;;  %v1319_v15 = vmul.f32 0.044715, %v1311_v6  ;;  %v1285_v55 = vmul.f32 %v13931_v30, %v1273_v33 }
 0x5f9   :  { %v12709_v56 = vpop.eup %12708  ;;  %v1347_v49 = vadd.f32 1.0, %v12707_v51  ;;  %v1318_v17 = vmul.f32 0.044715, %v1310_v37  ;;  %v1284_v52 = vmul.f32 %v13931_v30, %v1272_v28 }
 0x5fa   :  { %v1346_v36 = vadd.f32 1.0, %v12709_v56  ;;  %v1327_v25 = vadd.f32 %v1319_v15, %v13987_v9  ;;  %v1297_v61 = vadd.f32 %v13937_v62, %v1285_v55 }
 0x5fb   :  { %v1355_v26 = vmul.f32 0.5, %v1347_v49  ;;  %v1326_v63 = vadd.f32 %v1318_v17, %v13991_v42  ;;  %v1296_v54 = vadd.f32 %v13937_v62, %v1284_v52 }
 0x5fc   :  { %v1354_v45 = vmul.f32 0.5, %v1346_v36  ;;  %v1335_v0 = vmul.f32 0.7978846, %v1327_v25  ;;  %v1305_v3 = vmul.f32 %v1297_v61, %v1297_v61 }
 0x5fd   :  { %v1334_v4 = vmul.f32 0.7978846, %v1326_v63  ;;  %v1304_v5 = vmul.f32 %v1296_v54, %v1296_v54  ;;  %v1363_v30 = vmul.f32 %v1355_v26, %v13944_v32 }
 0x5fe   :  { %v1362_v57 = vmul.f32 %v1354_v45, %v13949_v53  ;;  %12714 = vtanh.f32 %v1335_v0  ;;  %v1313_v13 = vmul.f32 %v1305_v3, %v1297_v61 }
 0x5ff   :  { %12716 = vtanh.f32 %v1334_v4  ;;  %v1312_v34 = vmul.f32 %v1304_v5, %v1296_v54  ;;  %v1699_v4 = vld [vmem:[%s15692_s17] sm:$0xff]  ;;  %v1700_v5 = vld [vmem:[%s15692_s17 + $0x8] sm:$0xff] }
 0x600   :  { %v12711_v16 = vpop.eup %12710  ;;  %10474 = vmatprep.mubr.f32.mxu1 %v1362_v57  ;;  %v1321_v1 = vmul.f32 0.044715, %v1313_v13  ;;  %v11665_v57 = vpack.c.bf16 %v1700_v5, %v1699_v4  ;;  %v1701_v13 = vld [vmem:[%s15692_s17 + $0x10] sm:$0xff] }
 0x601   :  { %v12713_v20 = vpop.eup %12712  ;;  %10475 = vmatmul.mubr.f32.vlgmr.msra.gmra.mrb[16].mxu1 %v1363_v30  ;;  %v1349_v24 = vadd.f32 1.0, %v12711_v16  ;;  %v1320_v62 = vmul.f32 0.044715, %v1312_v34  ;;  %v1702_v30 = vld [vmem:[%s15692_s17 + $0x18] sm:$0xff]  ;;  %v1703_v16 = vld [vmem:[%s15692_s17 + $0x20] sm:$0xff] }
 0x602   :  { %v1348_v44 = vadd.f32 1.0, %v12713_v20  ;;  %v1329_v21 = vadd.f32 %v1321_v1, %v1297_v61  ;;  %11666 = vmatprep.subr.bf16.mxu0 %v11665_v57  ;;  %v11669_v34 = vpack.c.bf16 %v1702_v30, %v1701_v13  ;;  %v1704_v1 = vld [vmem:[%s15692_s17 + $0x28] sm:$0xff] }
 0x603   :  { %v1357_v23 = vmul.f32 0.5, %v1349_v24  ;;  %v1328_v35 = vadd.f32 %v1320_v62, %v1296_v54  ;;  %11668 = vmatpush3.bf16.msra.mxu0 %v11665_v57  ;;  %v11673_v20 = vpack.c.bf16 %v1704_v1, %v1703_v16  ;;  %v1705_v24 = vld [vmem:[%s15692_s17 + $0x30] sm:$0xff]  ;;  %v1706_v62 = vld [vmem:[%s15692_s17 + $0x38] sm:$0xff] }
 0x604   :  { %v1356_v27 = vmul.f32 0.5, %v1348_v44  ;;  %v1337_v11 = vmul.f32 0.7978846, %v1329_v21  ;;  %11670 = vmatprep.subr.bf16.mxu0 %v11669_v34  ;;  %v11677_v44 = vpack.c.bf16 %v1706_v62, %v1705_v24  ;;  %v1707_v21 = vld [vmem:[%s15692_s17 + $0x40] sm:$0xff] }
 0x605   :  { %v1336_v53 = vmul.f32 0.7978846, %v1328_v35  ;;  %v1365_v32 = vmul.f32 %v1357_v23, %v13967_v14  ;;  %v1708_v23 = vld [vmem:[%s15692_s17 + $0x48] sm:$0xff] }
 0x606   :  { %v1364_v38 = vmul.f32 %v1356_v27, %v13971_v19  ;;  %12718 = vtanh.f32 %v1337_v11  ;;  %v11681_v35 = vpack.c.bf16 %v1708_v23, %v1707_v21  ;;  %v1709_v27 = vld [vmem:[%s15692_s17 + $0x50] sm:$0xff]  ;;  %v1710_v11 = vld [vmem:[%s15692_s17 + $0x58] sm:$0xff]  ;;  %v14084_v23 = vld [vmem:[#allocation6 + $0x3] ss:$0 sm:$0xff] }
 0x607   :  { %12720 = vtanh.f32 %v1336_v53  ;;  %11672 = vmatpush3.bf16.msra.mxu0 %v11669_v34  ;;  %v11685_v53 = vpack.c.bf16 %v1710_v11, %v1709_v27 }
 0x608   :  { %v12715_v46 = vpop.eup %12714  ;;  %10477 = vmatprep.mubr.f32.mxu1 %v1364_v38  ;;  %11674 = vmatprep.subr.bf16.mxu0 %v11673_v20  ;;  %v1711_v38 = vld [vmem:[%s15692_s17 + $0x60] sm:$0xff] }
 0x609   :  { %v12717_v39 = vpop.eup %12716  ;;  %10478 = vmatmul.mubr.f32.gmra.mrb[18].mxu1 %v1365_v32  ;;  %v1351_v29 = vadd.f32 1.0, %v12715_v46  ;;  %v1712_v32 = vld [vmem:[%s15692_s17 + $0x68] sm:$0xff] }
 0x60a   :  { %v1350_v18 = vadd.f32 1.0, %v12717_v39  ;;  %v11689_v46 = vpack.c.bf16 %v1712_v32, %v1711_v38  ;;  %v1713_v39 = vld [vmem:[%s15692_s17 + $0x70] sm:$0xff] }
 0x60b   :  { %v1359_v41 = vmul.f32 0.5, %v1351_v29  ;;  %11676 = vmatpush3.bf16.msra.mxu0 %v11673_v20  ;;  %v1714_v29 = vld [vmem:[%s15692_s17 + $0x78] sm:$0xff] }
 0x60c   :  { %v1358_v60 = vmul.f32 0.5, %v1350_v18  ;;  %11678 = vmatprep.subr.bf16.mxu0 %v11677_v44  ;;  %v11693_v18 = vpack.c.bf16 %v1714_v29, %v1713_v39  ;;  %v14090_v39 = vld [vmem:[#allocation6 + $0x7] ss:$0 sm:$0xff] }
 0x60d   :  { %v1367_v7 = vmul.f32 %v1359_v41, %v13987_v9  ;;  %v9085_v41 = vld [vmem:[%s15693_s24 + $0x40] sm:$0xff] }
 0x60e   :  { %v1366_v43 = vmul.f32 %v1358_v60, %v13991_v42  ;;  %v9086_v60 = vld [vmem:[%s15693_s24 + $0x48] sm:$0xff] }
 0x60f   :  { %11680 = vmatpush3.bf16.msra.mxu0 %v11677_v44 }
 0x610   :  { %v12719_v59 = vpop.eup %12718  ;;  %10480 = vmatprep.mubr.f32.mxu1 %v1366_v43  ;;  %11682 = vmatprep.subr.bf16.mxu0 %v11681_v35  ;;  %v1833_v43 = vld [vmem:[%s15693_s24] sm:$0xff] }
 0x611   :  { %v12721_v47 = vpop.eup %12720  ;;  %10481 = vmatmul.mubr.f32.gmra.mrb[20].mxu1 %v1367_v7  ;;  %v1353_v19 = vadd.f32 1.0, %v12719_v59  ;;  %v14074_v7 = vpack.c.bf16 %v9086_v60, %v9085_v41  ;;  %v1834_v59 = vld [vmem:[%s15693_s24 + $0x8] sm:$0xff] }
 0x612   :  { %v1352_v58 = vadd.f32 1.0, %v12721_v47  ;;  %v11697_v47 = vpack.c.bf16 %v1834_v59, %v1833_v43 }
 0x613   :  { %v1361_v14 = vmul.f32 0.5, %v1353_v19  ;;  %11684 = vmatpush3.bf16.msra.mxu0 %v11681_v35 }
 0x614   :  { %v1360_v48 = vmul.f32 0.5, %v1352_v58  ;;  %11686 = vmatprep.subr.bf16.mxu0 %v11685_v53  ;;  %11698 = vmatprep.subr.bf16.mxu1 %v11697_v47 }
 0x615   :  { %v1369_v50 = vmul.f32 %v1361_v14, %v1297_v61  ;;  %11700 = vmatpush3.bf16.msra.mxu1 %v11697_v47 }
 0x616   :  { %v1368_v40 = vmul.f32 %v1360_v48, %v1296_v54 }
 0x617   :  { %11688 = vmatpush3.bf16.msra.mxu0 %v11685_v53 }
 0x618   :  { %10483 = vmatprep.mubr.f32.mxu1 %v1368_v40  ;;  %11690 = vmatprep.subr.bf16.mxu0 %v11689_v46 }
 0x619   :  { %10484 = vmatmul.mubr.f32.gmra.mrb[22].mxu1 %v1369_v50 }
 0x61b   :  { %11692 = vmatpush3.bf16.msra.mxu0 %v11689_v46 }
 0x61c   :  { %11694 = vmatprep.subr.bf16.mxu0 %v11693_v18 }
 0x61f   :  { %11696 = vmatpush3.bf16.msra.mxu0 %v11693_v18 }
 0x620   :  { %11706 = vmatprep.subr.bf16.mxu0 %v14074_v7 }
 0x6d4   :  { %v10476_v31 = vpop.f32.mrb[16].mxu1 }
 0x6d5   :  { %v14015_v12 = vadd.f32 %v10476_v31, %v9072_v22  ;;  %v1458_v33 = vpop.f32.mrb[17].mxu1 }
 0x6d6   :  { %v14017_v42 = vadd.f32 %v9072_v22, %v1458_v33 }
 0x6d7   :  { %1501 = vadd.xlane.f32.xlu1 %v14015_v12  ;;  %v1524_v9 = vmul.f32 %v14015_v12, %v14015_v12 }
 0x6d8   :  { %1499 = vadd.xlane.f32.xlu0 %v14017_v42  ;;  %v1523_v6 = vmul.f32 %v14017_v42, %v14017_v42 }
 0x6db   :  { %1533 = vadd.xlane.f32.xlu1 %v1524_v9 }
 0x6dc   :  { %1531 = vadd.xlane.f32.xlu0 %v1523_v6  ;;  %v10479_v28 = vpop.f32.mrb[18].mxu1 }
 0x6dd   :  { %v14025_v37 = vadd.f32 %v10479_v28, %v9072_v22  ;;  %v1468_v51 = vpop.f32.mrb[19].mxu1 }
 0x6de   :  { %v14027_v15 = vadd.f32 %v9072_v22, %v1468_v51 }
 0x6df   :  { %1505 = vadd.xlane.f32.xlu1 %v14025_v37  ;;  %v1526_v55 = vmul.f32 %v14025_v37, %v14025_v37 }
 0x6e0   :  { %1503 = vadd.xlane.f32.xlu0 %v14027_v15  ;;  %v1525_v56 = vmul.f32 %v14027_v15, %v14027_v15 }
 0x6e3   :  { %1537 = vadd.xlane.f32.xlu1 %v1526_v55 }
 0x6e4   :  { %1535 = vadd.xlane.f32.xlu0 %v1525_v56  ;;  %v10482_v49 = vpop.f32.mrb[20].mxu1 }
 0x6e5   :  { %v14035_v17 = vadd.f32 %v10482_v49, %v9072_v22  ;;  %v1478_v52 = vpop.f32.mrb[21].mxu1 }
 0x6e6   :  { %v14037_v36 = vadd.f32 %v9072_v22, %v1478_v52 }
 0x6e7   :  { %1509 = vadd.xlane.f32.xlu1 %v14035_v17  ;;  %v1528_v25 = vmul.f32 %v14035_v17, %v14035_v17 }
 0x6e8   :  { %1507 = vadd.xlane.f32.xlu0 %v14037_v36  ;;  %v1527_v61 = vmul.f32 %v14037_v36, %v14037_v36 }
 0x6eb   :  { %1541 = vadd.xlane.f32.xlu1 %v1528_v25 }
 0x6ec   :  { %1539 = vadd.xlane.f32.xlu0 %v1527_v61  ;;  %v10485_v26 = vpop.f32.mrb[22].mxu1 }
 0x6ed   :  { %v14045_v63 = vadd.f32 %v10485_v26, %v9072_v22  ;;  %v1488_v54 = vpop.f32.mrb[23].mxu1 }
 0x6ee   :  { %v14047_v45 = vadd.f32 %v9072_v22, %v1488_v54 }
 0x6ef   :  { %1513 = vadd.xlane.f32.xlu1 %v14045_v63  ;;  %v1530_v0 = vmul.f32 %v14045_v63, %v14045_v63 }
 0x6f0   :  { %1511 = vadd.xlane.f32.xlu0 %v14047_v45  ;;  %v1529_v3 = vmul.f32 %v14047_v45, %v14047_v45 }
 0x6f3   :  { %1545 = vadd.xlane.f32.xlu1 %v1530_v0 }
 0x6f4   :  { %1543 = vadd.xlane.f32.xlu0 %v1529_v3 }
 0x764   :  { %v1502_v19 = vpop.xlane.xlu1 %1501 }
 0x765   :  { %v1516_v58 = vmul.f32 0.0078125, %v1502_v19  ;;  %v1500_v14 = vpop.xlane.xlu0 %1499 }
 0x766   :  { %v1515_v48 = vmul.f32 0.0078125, %v1500_v14 }
 0x767   :  { %v1556_v50 = vmul.f32 %v1516_v58, %v1516_v58  ;;  %v1572_v24 = vsub.f32 %v14015_v12, %v1516_v58 }
 0x768   :  { %v1534_v40 = vpop.xlane.xlu1 %1533  ;;  %v1555_v33 = vmul.f32 %v1515_v48, %v1515_v48  ;;  %v1571_v21 = vsub.f32 %v14017_v42, %v1515_v48 }
 0x769   :  { %v1548_v22 = vmul.f32 0.0078125, %v1534_v40  ;;  %v1532_v31 = vpop.xlane.xlu0 %1531 }
 0x76a   :  { %v1547_v9 = vmul.f32 0.0078125, %v1532_v31 }
 0x76b   :  { %v1564_v6 = vsub.f32 %v1548_v22, %v1556_v50 }
 0x76c   :  { %v1563_v28 = vsub.f32 %v1547_v9, %v1555_v33  ;;  %v1506_v51 = vpop.xlane.xlu1 %1505 }
 0x76d   :  { %v1580_v55 = vadd.f32 1e-05, %v1564_v6  ;;  %v1518_v56 = vmul.f32 0.0078125, %v1506_v51  ;;  %v1504_v49 = vpop.xlane.xlu0 %1503 }
 0x76e   :  { %v1579_v52 = vadd.f32 1e-05, %v1563_v28  ;;  %v1517_v25 = vmul.f32 0.0078125, %v1504_v49 }
 0x76f   :  { %12722 = vrsqrt.f32 %v1580_v55  ;;  %v1558_v26 = vmul.f32 %v1518_v56, %v1518_v56  ;;  %v1574_v40 = vsub.f32 %v14025_v37, %v1518_v56 }
 0x770   :  { %12724 = vrsqrt.f32 %v1579_v52  ;;  %v1538_v61 = vpop.xlane.xlu1 %1537  ;;  %v1557_v3 = vmul.f32 %v1517_v25, %v1517_v25  ;;  %v1573_v33 = vsub.f32 %v14027_v15, %v1517_v25 }
 0x771   :  { %v1550_v54 = vmul.f32 0.0078125, %v1538_v61  ;;  %v1536_v0 = vpop.xlane.xlu0 %1535 }
 0x772   :  { %v1549_v4 = vmul.f32 0.0078125, %v1536_v0 }
 0x773   :  { %v1566_v5 = vsub.f32 %v1550_v54, %v1558_v26 }
 0x774   :  { %v1565_v57 = vsub.f32 %v1549_v4, %v1557_v3  ;;  %v1510_v13 = vpop.xlane.xlu1 %1509 }
 0x775   :  { %v1582_v30 = vadd.f32 1e-05, %v1566_v5  ;;  %v14078_v34 = vmul.f32 0.0078125, %v1510_v13  ;;  %v1508_v16 = vpop.xlane.xlu0 %1507 }
 0x776   :  { %v1581_v1 = vadd.f32 1e-05, %v1565_v57  ;;  %v14080_v20 = vmul.f32 0.0078125, %v1508_v16 }
 0x777   :  { %12726 = vrsqrt.f32 %v1582_v30  ;;  %v1560_v35 = vmul.f32 %v14078_v34, %v14078_v34 }
 0x778   :  { %12728 = vrsqrt.f32 %v1581_v1  ;;  %v1542_v62 = vpop.xlane.xlu1 %1541  ;;  %v1559_v32 = vmul.f32 %v14080_v20, %v14080_v20 }
 0x779   :  { %v12723_v44 = vpop.eup %12722  ;;  %v1552_v27 = vmul.f32 0.0078125, %v1542_v62  ;;  %v1540_v11 = vpop.xlane.xlu0 %1539 }
 0x77a   :  { %v12725_v53 = vpop.eup %12724  ;;  %v1596_v38 = vmul.f32 %v12723_v44, %v1572_v24  ;;  %v1551_v46 = vmul.f32 0.0078125, %v1540_v11  ;;  %v1576_v24 = vsub.f32 %v14035_v17, %v14078_v34 }
 0x77b   :  { %v1595_v12 = vmul.f32 %v12725_v53, %v1571_v21  ;;  %v1568_v29 = vsub.f32 %v1552_v27, %v1560_v35  ;;  %v1575_v35 = vsub.f32 %v14037_v36, %v14080_v20 }
 0x77c   :  { %v1608_v18 = vmul.f32 %v14084_v23, %v1596_v38  ;;  %v1567_v42 = vsub.f32 %v1551_v46, %v1559_v32  ;;  %v1514_v41 = vpop.xlane.xlu1 %1513 }
 0x77d   :  { %v1584_v60 = vadd.f32 1e-05, %v1568_v29  ;;  %v14093_v43 = vmul.f32 0.0078125, %v1514_v41  ;;  %v1512_v59 = vpop.xlane.xlu0 %1511  ;;  %v1607_v47 = vmul.f32 %v14084_v23, %v1595_v12 }
 0x77e   :  { %v14097_v19 = vadd.f32 %v14090_v39, %v1608_v18  ;;  %v1583_v58 = vadd.f32 1e-05, %v1567_v42  ;;  %v14099_v14 = vmul.f32 0.0078125, %v1512_v59 }
 0x77f   :  { %12730 = vrsqrt.f32 %v1584_v60  ;;  %v14102_v48 = vadd.f32 %v14090_v39, %v1607_v47  ;;  %v1562_v9 = vmul.f32 %v14093_v43, %v14093_v43  ;;  %v1578_v60 = vsub.f32 %v14045_v63, %v14093_v43 }
 0x780   :  { %12732 = vrsqrt.f32 %v1583_v58  ;;  %v1546_v50 = vpop.xlane.xlu1 %1545  ;;  %v1628_v22 = vmul.f32 %v14097_v19, %v14097_v19  ;;  %v1561_v37 = vmul.f32 %v14099_v14, %v14099_v14 }
 0x781   :  { %v12727_v31 = vpop.eup %12726  ;;  %v1554_v6 = vmul.f32 0.0078125, %v1546_v50  ;;  %v1544_v28 = vpop.xlane.xlu0 %1543  ;;  %v1627_v51 = vmul.f32 %v14102_v48, %v14102_v48 }
 0x782   :  { %v12729_v55 = vpop.eup %12728  ;;  %v1598_v49 = vmul.f32 %v12727_v31, %v1574_v40  ;;  %v1553_v56 = vmul.f32 0.0078125, %v1544_v28  ;;  %v1636_v52 = vmul.f32 %v1628_v22, %v14097_v19  ;;  %v1577_v40 = vsub.f32 %v14047_v45, %v14099_v14 }
 0x783   :  { %v1597_v61 = vmul.f32 %v12729_v55, %v1573_v33  ;;  %v1570_v26 = vsub.f32 %v1554_v6, %v1562_v9  ;;  %v1635_v15 = vmul.f32 %v1627_v51, %v14102_v48 }
 0x784   :  { %v1569_v25 = vsub.f32 %v1553_v56, %v1561_v37  ;;  %v1644_v54 = vmul.f32 0.044715, %v1636_v52  ;;  %v1610_v0 = vmul.f32 %v14084_v23, %v1598_v49 }
 0x785   :  { %v1586_v3 = vadd.f32 1e-05, %v1570_v26  ;;  %v1643_v4 = vmul.f32 0.044715, %v1635_v15  ;;  %v1609_v5 = vmul.f32 %v14084_v23, %v1597_v61 }
 0x786   :  { %v1585_v57 = vadd.f32 1e-05, %v1569_v25  ;;  %v1652_v13 = vadd.f32 %v1644_v54, %v14097_v19  ;;  %v14120_v30 = vadd.f32 %v14090_v39, %v1610_v0 }
 0x787   :  { %12734 = vrsqrt.f32 %v1586_v3  ;;  %v1651_v16 = vadd.f32 %v1643_v4, %v14102_v48  ;;  %v14124_v1 = vadd.f32 %v14090_v39, %v1609_v5  ;;  %v9087_v3 = vld [vmem:[%s15693_s24 + $0x50] sm:$0xff]  ;;  %v9088_v4 = vld [vmem:[%s15693_s24 + $0x58] sm:$0xff] }
 0x788   :  { %12736 = vrsqrt.f32 %v1585_v57  ;;  %v1660_v62 = vmul.f32 0.7978846, %v1652_v13  ;;  %v1630_v44 = vmul.f32 %v14120_v30, %v14120_v30 }
 0x789   :  { %v12731_v21 = vpop.eup %12730  ;;  %v1659_v27 = vmul.f32 0.7978846, %v1651_v16  ;;  %v1629_v11 = vmul.f32 %v14124_v1, %v14124_v1 }
 0x78a   :  { %v12733_v53 = vpop.eup %12732  ;;  %v1600_v38 = vmul.f32 %v12731_v21, %v1576_v24  ;;  %12738 = vtanh.f32 %v1660_v62  ;;  %v1638_v32 = vmul.f32 %v1630_v44, %v14120_v30  ;;  %v11709_v62 = vpack.c.bf16 %v9088_v4, %v9087_v3 }
 0x78b   :  { %v1599_v46 = vmul.f32 %v12733_v53, %v1575_v35  ;;  %12740 = vtanh.f32 %v1659_v27  ;;  %v1637_v17 = vmul.f32 %v1629_v11, %v14124_v1 }
 0x78c   :  { %v1646_v34 = vmul.f32 0.044715, %v1638_v32  ;;  %v1612_v12 = vmul.f32 %v14084_v23, %v1600_v38 }
 0x78d   :  { %v1645_v29 = vmul.f32 0.044715, %v1637_v17  ;;  %v1611_v18 = vmul.f32 %v14084_v23, %v1599_v46 }
 0x78e   :  { %v1654_v36 = vadd.f32 %v1646_v34, %v14120_v30  ;;  %v14140_v20 = vadd.f32 %v14090_v39, %v1612_v12 }
 0x78f   :  { %v1653_v42 = vadd.f32 %v1645_v29, %v14124_v1  ;;  %v14144_v41 = vadd.f32 %v14090_v39, %v1611_v18 }
 0x790   :  { %v1662_v59 = vmul.f32 0.7978846, %v1654_v36  ;;  %v1632_v47 = vmul.f32 %v14140_v20, %v14140_v20 }
 0x791   :  { %v12735_v58 = vpop.eup %12734  ;;  %v1661_v50 = vmul.f32 0.7978846, %v1653_v42  ;;  %v1631_v22 = vmul.f32 %v14144_v41, %v14144_v41 }
 0x792   :  { %v12737_v31 = vpop.eup %12736  ;;  %v1602_v33 = vmul.f32 %v12735_v58, %v1578_v60  ;;  %12742 = vtanh.f32 %v1662_v59  ;;  %v1640_v9 = vmul.f32 %v1632_v47, %v14140_v20 }
 0x793   :  { %v1601_v6 = vmul.f32 %v12737_v31, %v1577_v40  ;;  %12744 = vtanh.f32 %v1661_v50  ;;  %v1639_v63 = vmul.f32 %v1631_v22, %v14144_v41 }
 0x794   :  { %v12739_v43 = vpop.eup %12738  ;;  %v1648_v28 = vmul.f32 0.044715, %v1640_v9  ;;  %v1614_v51 = vmul.f32 %v14084_v23, %v1602_v33  ;;  %v1835_v33 = vld [vmem:[%s15693_s24 + $0x10] sm:$0xff] }
 0x795   :  { %v12741_v45 = vpop.eup %12740  ;;  %v1676_v14 = vadd.f32 1.0, %v12739_v43  ;;  %v1647_v55 = vmul.f32 0.044715, %v1639_v63  ;;  %v1613_v49 = vmul.f32 %v14084_v23, %v1601_v6  ;;  %v9099_v6 = vld [vmem:[%s15693_s24 + $0x88] sm:$0xff]  ;;  %v9075_v43 = vld [vmem:[#allocation6 + $0xb] ss:$0 sm:$0xff] }
 0x796   :  { %v1675_v37 = vadd.f32 1.0, %v12741_v45  ;;  %v1656_v56 = vadd.f32 %v1648_v28, %v14140_v20  ;;  %v1626_v52 = vadd.f32 %v14090_v39, %v1614_v51  ;;  %v9100_v51 = vld [vmem:[%s15693_s24 + $0x90] sm:$0xff]  ;;  %v9101_v45 = vld [vmem:[%s15693_s24 + $0x98] sm:$0xff] }
 0x797   :  { %v1684_v61 = vmul.f32 0.5, %v1676_v14  ;;  %v1655_v26 = vadd.f32 %v1647_v55, %v14144_v41  ;;  %v1625_v15 = vadd.f32 %v14090_v39, %v1613_v49 }
 0x798   :  { %v1683_v25 = vmul.f32 0.5, %v1675_v37  ;;  %v1664_v54 = vmul.f32 0.7978846, %v1656_v56  ;;  %v1634_v0 = vmul.f32 %v1626_v52, %v1626_v52  ;;  %v11717_v37 = vpack.c.bf16 %v9101_v45, %v9100_v51 }
 0x799   :  { %v1663_v5 = vmul.f32 0.7978846, %v1655_v26  ;;  %v1633_v57 = vmul.f32 %v1625_v15, %v1625_v15  ;;  %v1692_v16 = vmul.f32 %v1684_v61, %v14097_v19 }
 0x79a   :  { %v1691_v13 = vmul.f32 %v1683_v25, %v14102_v48  ;;  %12746 = vtanh.f32 %v1664_v54  ;;  %v1642_v23 = vmul.f32 %v1634_v0, %v1626_v52 }
 0x79b   :  { %12748 = vtanh.f32 %v1663_v5  ;;  %v1641_v24 = vmul.f32 %v1633_v57, %v1625_v15 }
 0x79c   :  { %v12743_v44 = vpop.eup %12742  ;;  %10518 = vmatprep.mubr.f32.mxu0 %v1691_v13  ;;  %v1650_v21 = vmul.f32 0.044715, %v1642_v23  ;;  %v9089_v13 = vld [vmem:[#allocation8 + $0x2] ss:$0 sm:$0xff]  ;;  %v14241_v23 = vld [vmem:[#allocation8] ss:$0 sm:$0xff] }
 0x79d   :  { %v12745_v39 = vpop.eup %12744  ;;  %10519 = vmatmul.mubr.f32.vlgmr.msra.gmra.mrb[8].mxu0 %v1692_v16  ;;  %v1678_v35 = vadd.f32 1.0, %v12743_v44  ;;  %v1649_v27 = vmul.f32 0.044715, %v1641_v24 }
 0x79e   :  { %v1677_v11 = vadd.f32 1.0, %v12745_v39  ;;  %v1658_v53 = vadd.f32 %v1650_v21, %v1626_v52  ;;  %11708 = vmatpush3.bf16.msra.mxu0 %v14074_v7 }
 0x79f   :  { %v1686_v38 = vmul.f32 0.5, %v1678_v35  ;;  %v1657_v48 = vadd.f32 %v1649_v27, %v1625_v15  ;;  %11710 = vmatprep.subr.bf16.mxu0 %v11709_v62 }
 0x7a0   :  { %v1685_v32 = vmul.f32 0.5, %v1677_v11  ;;  %v1666_v46 = vmul.f32 0.7978846, %v1658_v53 }
 0x7a1   :  { %v1665_v19 = vmul.f32 0.7978846, %v1657_v48  ;;  %v1694_v34 = vmul.f32 %v1686_v38, %v14120_v30 }
 0x7a2   :  { %v1693_v17 = vmul.f32 %v1685_v32, %v14124_v1  ;;  %12750 = vtanh.f32 %v1666_v46  ;;  %11712 = vmatpush3.bf16.msra.mxu0 %v11709_v62 }
 0x7a3   :  { %12752 = vtanh.f32 %v1665_v19 }
 0x7a4   :  { %v12747_v12 = vpop.eup %12746  ;;  %10521 = vmatprep.mubr.f32.mxu0 %v1693_v17 }
 0x7a5   :  { %v12749_v29 = vpop.eup %12748  ;;  %10522 = vmatmul.mubr.f32.gmra.mrb[10].mxu0 %v1694_v34  ;;  %v1680_v18 = vadd.f32 1.0, %v12747_v12 }
 0x7a6   :  { %v1679_v36 = vadd.f32 1.0, %v12749_v29 }
 0x7a7   :  { %v1688_v7 = vmul.f32 0.5, %v1680_v18 }
 0x7a8   :  { %v1687_v42 = vmul.f32 0.5, %v1679_v36 }
 0x7a9   :  { %v1696_v59 = vmul.f32 %v1688_v7, %v14140_v20  ;;  %v9098_v20 = vld [vmem:[%s15693_s24 + $0x80] sm:$0xff] }
 0x7aa   :  { %v1695_v60 = vmul.f32 %v1687_v42, %v14144_v41  ;;  %v1836_v41 = vld [vmem:[%s15693_s24 + $0x18] sm:$0xff]  ;;  %v11713_v63 = vpack.c.bf16 %v9099_v6, %v9098_v20 }
 0x7ab   :  { %v11701_v9 = vpack.c.bf16 %v1836_v41, %v1835_v33 }
 0x7ac   :  { %v12751_v1 = vpop.eup %12750  ;;  %10524 = vmatprep.mubr.f32.mxu0 %v1695_v60 }
 0x7ad   :  { %v12753_v47 = vpop.eup %12752  ;;  %10525 = vmatmul.mubr.f32.gmra.mrb[12].mxu0 %v1696_v59  ;;  %v1682_v30 = vadd.f32 1.0, %v12751_v1  ;;  %11702 = vmatprep.subr.bf16.mxu1 %v11701_v9 }
 0x7ae   :  { %v1681_v58 = vadd.f32 1.0, %v12753_v47  ;;  %11704 = vmatpush3.bf16.msra.mxu1 %v11701_v9 }
 0x7af   :  { %v1690_v40 = vmul.f32 0.5, %v1682_v30  ;;  %11714 = vmatprep.subr.bf16.mxu1 %v11713_v63 }
 0x7b0   :  { %v1689_v50 = vmul.f32 0.5, %v1681_v58  ;;  %v9148_v58 = vld [vmem:[%s15693_s24 + $0x60] sm:$0xff] }
 0x7b1   :  { %v1698_v31 = vmul.f32 %v1690_v40, %v1626_v52  ;;  %v9149_v40 = vld [vmem:[%s15693_s24 + $0x68] sm:$0xff] }
 0x7b2   :  { %v1697_v22 = vmul.f32 %v1689_v50, %v1625_v15  ;;  %v11769_v41 = vpack.c.bf16 %v9149_v40, %v9148_v58 }
 0x7b4   :  { %10527 = vmatprep.mubr.f32.mxu0 %v1697_v22  ;;  %v9102_v22 = vld [vmem:[#allocation8 + $0x4] ss:$0 sm:$0xff] }
 0x7b5   :  { %10528 = vmatmul.mubr.f32.gmra.mrb[14].mxu0 %v1698_v31 }
 0x870   :  { %v10520_v28 = vpop.f32.mrb[8].mxu0 }
 0x871   :  { %v1786_v14 = vpop.f32.mrb[9].mxu0  ;;  %v14179_v49 = vadd.f32 %v10520_v28, %v9075_v43 }
 0x872   :  { %v14177_v55 = vadd.f32 %v9075_v43, %v1786_v14  ;;  %v9150_v14 = vld [vmem:[%s15693_s24 + $0x70] sm:$0xff] }
 0x874   :  { %10538 = vmatprep.mubr.msk.f32.mxu1 %vm1844_vm2, %v14177_v55  ;;  %10558 = vmatprep.mubr.msk.f32.mxu0 %vm1844_vm2, %v14177_v55 }
 0x875   :  { %10539 = vmatmul.mubr.msk.f32.vlgmr.msra.gmra.mrb[24].mxu1 %vm1844_vm2, %v14179_v49  ;;  %10559 = vmatmul.mubr.msk.f32.vlgmr.msra.gmra.mrb[16].mxu0 %vm1844_vm2, %v14179_v49 }
 0x876   :  { %11716 = vmatpush3.bf16.msra.mxu1 %v11713_v63 }
 0x877   :  { %11718 = vmatprep.subr.bf16.mxu1 %v11717_v37 }
 0x878   :  { %v10523_v56 = vpop.f32.mrb[10].mxu0 }
 0x879   :  { %v1796_v52 = vpop.f32.mrb[11].mxu0  ;;  %v14191_v26 = vadd.f32 %v10523_v56, %v9075_v43 }
 0x87a   :  { %v14189_v61 = vadd.f32 %v9075_v43, %v1796_v52  ;;  %11720 = vmatpush3.bf16.msra.mxu1 %v11717_v37  ;;  %v9151_v37 = vld [vmem:[%s15693_s24 + $0x78] sm:$0xff] }
 0x87c   :  { %10541 = vmatprep.mubr.msk.f32.mxu1 %vm1844_vm2, %v14189_v61  ;;  %10561 = vmatprep.mubr.msk.f32.mxu0 %vm1844_vm2, %v14189_v61 }
 0x87d   :  { %10542 = vmatmul.mubr.msk.f32.gmra.mrb[26].mxu1 %vm1844_vm2, %v14191_v26  ;;  %10562 = vmatmul.mubr.msk.f32.gmra.mrb[18].mxu0 %vm1844_vm2, %v14191_v26 }
 0x880   :  { %v10526_v15 = vpop.f32.mrb[12].mxu0 }
 0x881   :  { %v1806_v25 = vpop.f32.mrb[13].mxu0  ;;  %v14203_v0 = vadd.f32 %v10526_v15, %v9075_v43 }
 0x882   :  { %v14201_v54 = vadd.f32 %v9075_v43, %v1806_v25 }
 0x884   :  { %10544 = vmatprep.mubr.msk.f32.mxu1 %vm1844_vm2, %v14201_v54  ;;  %10564 = vmatprep.mubr.msk.f32.mxu0 %vm1844_vm2, %v14201_v54 }
 0x885   :  { %10545 = vmatmul.mubr.msk.f32.gmra.mrb[28].mxu1 %vm1844_vm2, %v14203_v0  ;;  %10565 = vmatmul.mubr.msk.f32.gmra.mrb[20].mxu0 %vm1844_vm2, %v14203_v0 }
 0x888   :  { %v10529_v3 = vpop.f32.mrb[14].mxu0 }
 0x889   :  { %v1816_v4 = vpop.f32.mrb[15].mxu0  ;;  %v14215_v57 = vadd.f32 %v10529_v3, %v9075_v43 }
 0x88a   :  { %v14213_v5 = vadd.f32 %v9075_v43, %v1816_v4 }
 0x88c   :  { %10547 = vmatprep.mubr.msk.f32.mxu1 %vm1844_vm2, %v14213_v5  ;;  %10567 = vmatprep.mubr.msk.f32.mxu0 %vm1844_vm2, %v14213_v5 }
 0x88d   :  { %10548 = vmatmul.mubr.msk.f32.gmra.mrb[30].mxu1 %vm1844_vm2, %v14215_v57  ;;  %10568 = vmatmul.mubr.msk.f32.gmra.mrb[22].mxu0 %vm1844_vm2, %v14215_v57 }
 0x88e   :  { %10578 = vmatprep.mubr.msk.f32.mxu1 %vm1844_vm2, %v14177_v55 }
 0x891   :  { %10579 = vmatmul.mubr.msk.f32.vlgmr.msra.gmra.mrb[32].mxu1 %vm1844_vm2, %v14179_v49 }
 0x892   :  { %10581 = vmatprep.mubr.msk.f32.mxu1 %vm1844_vm2, %v14189_v61 }
 0x895   :  { %10582 = vmatmul.mubr.msk.f32.gmra.mrb[34].mxu1 %vm1844_vm2, %v14191_v26 }
 0x896   :  { %10584 = vmatprep.mubr.msk.f32.mxu1 %vm1844_vm2, %v14201_v54 }
 0x899   :  { %10585 = vmatmul.mubr.msk.f32.gmra.mrb[36].mxu1 %vm1844_vm2, %v14203_v0 }
 0x89a   :  { %10587 = vmatprep.mubr.msk.f32.mxu1 %vm1844_vm2, %v14213_v5 }
 0x89d   :  { %10588 = vmatmul.mubr.msk.f32.gmra.mrb[38].mxu1 %vm1844_vm2, %v14215_v57 }
 0x948   :  { %v10540_v16 = vpop.f32.mrb[24].mxu1  ;;  %v10560_v24 = vpop.f32.mrb[16].mxu0 }
 0x949   :  { %v2059_v62 = vadd.f32 %v10560_v24, %v9089_v13  ;;  %v1935_v44 = vpop.f32.mrb[25].mxu1  ;;  %v2053_v21 = vpop.f32.mrb[17].mxu0  ;;  %v1941_v56 = vadd.f32 %v10540_v16, %v14241_v23 }
 0x94a   :  { %v1936_v39 = vadd.f32 %v14241_v23, %v1935_v44  ;;  %v2054_v35 = vadd.f32 %v9089_v13, %v2053_v21 }
 0x94c   :  { %v11721_v11 = vpack.c.bf16 %v2059_v62, %v2054_v35  ;;  %10606 = vmatprep.mubr.msk.f32.mxu0 %vm2210_vm3, %v1936_v39 }
 0x94e   :  { %11723 = vmatprep.subr.msk.bf16.mxu0 %vm14246_vm4, %v11721_v11 }
 0x94f   :  { %11726 = vmatpush3.bf16.xpose.msk.msra.mxu0 %vm14246_vm4, %v11721_v11 }
 0x950   :  { %v10543_v53 = vpop.f32.mrb[26].mxu1  ;;  %v10563_v38 = vpop.f32.mrb[18].mxu0 }
 0x951   :  { %v2069_v48 = vadd.f32 %v10563_v38, %v9089_v13  ;;  %v1945_v32 = vpop.f32.mrb[27].mxu1  ;;  %v2063_v46 = vpop.f32.mrb[19].mxu0  ;;  %v1951_v62 = vadd.f32 %v10543_v53, %v14241_v23 }
 0x952   :  { %v2064_v19 = vadd.f32 %v9089_v13, %v2063_v46  ;;  %v1946_v25 = vadd.f32 %v14241_v23, %v1945_v32  ;;  %v14302_v46 = vld [vmem:[%s15696_s13 + $0x8] sm:$0xff] }
 0x954   :  { %v11727_v17 = vpack.c.bf16 %v2069_v48, %v2064_v19 }
 0x956   :  { %11729 = vmatprep.subr.msk.bf16.mxu0 %vm14246_vm4, %v11727_v17 }
 0x957   :  { %11732 = vmatpush3.bf16.xpose.msk.msra.mxu0 %vm14246_vm4, %v11727_v17 }
 0x958   :  { %v10546_v34 = vpop.f32.mrb[28].mxu1  ;;  %v10566_v12 = vpop.f32.mrb[20].mxu0 }
 0x959   :  { %v2079_v29 = vadd.f32 %v10566_v12, %v9089_v13  ;;  %v1955_v18 = vpop.f32.mrb[29].mxu1  ;;  %v2073_v36 = vpop.f32.mrb[21].mxu0  ;;  %v1961_v38 = vadd.f32 %v10546_v34, %v14241_v23  ;;  %v14305_v34 = vld [vmem:[%s15696_s13] sm:$0xff] }
 0x95a   :  { %v2074_v7 = vadd.f32 %v9089_v13, %v2073_v36  ;;  %v1956_v16 = vadd.f32 %v14241_v23, %v1955_v18 }
 0x95c   :  { %v11733_v42 = vpack.c.bf16 %v2079_v29, %v2074_v7  ;;  %v14314_v7 = vld [vmem:[%s15696_s13 + $0x18] sm:$0xff] }
 0x95e   :  { %11735 = vmatprep.subr.msk.bf16.mxu0 %vm14246_vm4, %v11733_v42 }
 0x95f   :  { %11738 = vmatpush3.bf16.xpose.msk.msra.mxu0 %vm14246_vm4, %v11733_v42 }
 0x960   :  { %v10549_v60 = vpop.f32.mrb[30].mxu1  ;;  %v10569_v59 = vpop.f32.mrb[22].mxu0 }
 0x961   :  { %v2089_v1 = vadd.f32 %v10569_v59, %v9089_v13  ;;  %v1965_v47 = vpop.f32.mrb[31].mxu1  ;;  %v2083_v30 = vpop.f32.mrb[23].mxu0  ;;  %v1971_v32 = vadd.f32 %v10549_v60, %v14241_v23 }
 0x962   :  { %v2084_v50 = vadd.f32 %v9089_v13, %v2083_v30  ;;  %v11773_v13 = vpack.c.bf16 %v9151_v37, %v9150_v14  ;;  %v1966_v53 = vadd.f32 %v14241_v23, %v1965_v47 }
 0x964   :  { %v11739_v31 = vpack.c.bf16 %v2089_v1, %v2084_v50  ;;  %v10580_v33 = vpop.f32.mrb[32].mxu1  ;;  %v14319_v1 = vld [vmem:[%s15696_s13 + $0x10] sm:$0xff] }
 0x965   :  { %v2177_v9 = vadd.f32 %v10580_v33, %v9102_v22  ;;  %v2171_v20 = vpop.f32.mrb[33].mxu1 }
 0x966   :  { %v2172_v6 = vadd.f32 %v9102_v22, %v2171_v20  ;;  %11741 = vmatprep.subr.msk.bf16.mxu0 %vm14246_vm4, %v11739_v31 }
 0x967   :  { %11744 = vmatpush3.bf16.xpose.msk.msra.mxu0 %vm14246_vm4, %v11739_v31 }
 0x968   :  { %v11745_v63 = vpack.c.bf16 %v2177_v9, %v2172_v6  ;;  %v10583_v43 = vpop.f32.mrb[34].mxu1  ;;  %11770 = vmatprep.subr.bf16.mxu0 %v11769_v41  ;;  %v14335_v9 = vld [vmem:[%s15696_s13 + $0x20] sm:$0xff] }
 0x969   :  { %v2187_v28 = vadd.f32 %v10583_v43, %v9102_v22  ;;  %v2181_v51 = vpop.f32.mrb[35].mxu1 }
 0x96a   :  { %v2182_v45 = vadd.f32 %v9102_v22, %v2181_v51  ;;  %11746 = vmatprep.subr.bf16.mxu1 %v11745_v63  ;;  %v14346_v51 = vld [vmem:[%s15696_s13 + $0x38] sm:$0xff] }
 0x96b   :  { %11748 = vmatpush3.bf16.msra.mxu1 %v11745_v63 }
 0x96c   :  { %v11749_v52 = vpack.c.bf16 %v2187_v28, %v2182_v45  ;;  %v10586_v15 = vpop.f32.mrb[36].mxu1 }
 0x96d   :  { %v2197_v3 = vadd.f32 %v10586_v15, %v9102_v22  ;;  %v2191_v4 = vpop.f32.mrb[37].mxu1 }
 0x96e   :  { %v2192_v24 = vadd.f32 %v9102_v22, %v2191_v4  ;;  %10607 = vmatmul.mubr.msk.f32.vlgmr.msra.gmra.mrb[24].mxu0 %vm2210_vm3, %v1941_v56  ;;  %11750 = vmatprep.subr.bf16.mxu1 %v11749_v52  ;;  %v14351_v56 = vld [vmem:[%s15696_s13 + $0x30] sm:$0xff] }
 0x96f   :  { %10609 = vmatprep.mubr.msk.f32.mxu0 %vm2210_vm3, %v1946_v25  ;;  %11752 = vmatpush3.bf16.msra.mxu1 %v11749_v52  ;;  %v9152_v25 = vld [vmem:[#allocation8 + $0x3] ss:$0 sm:$0xff] }
 0x970   :  { %v11753_v44 = vpack.c.bf16 %v2197_v3, %v2192_v24  ;;  %v10589_v21 = vpop.f32.mrb[38].mxu1  ;;  %11772 = vmatpush3.bf16.msra.mxu0 %v11769_v41 }
 0x971   :  { %v2207_v39 = vadd.f32 %v10589_v21, %v9102_v22  ;;  %v2201_v35 = vpop.f32.mrb[39].mxu1  ;;  %11774 = vmatprep.subr.bf16.mxu0 %v11773_v13 }
 0x972   :  { %v2202_v11 = vadd.f32 %v9102_v22, %v2201_v35  ;;  %10610 = vmatmul.mubr.msk.f32.gmra.mrb[26].mxu0 %vm2210_vm3, %v1951_v62  ;;  %11754 = vmatprep.subr.bf16.mxu1 %v11753_v44  ;;  %v14330_v22 = vld [vmem:[%s15696_s13 + $0x28] sm:$0xff] }
 0x973   :  { %10612 = vmatprep.mubr.msk.f32.mxu0 %vm2210_vm3, %v1956_v16  ;;  %11756 = vmatpush3.bf16.msra.mxu1 %v11753_v44 }
 0x974   :  { %v11757_v48 = vpack.c.bf16 %v2207_v39, %v2202_v11  ;;  %11776 = vmatpush3.bf16.msra.mxu0 %v11773_v13 }
 0x976   :  { %10613 = vmatmul.mubr.msk.f32.gmra.mrb[28].mxu0 %vm2210_vm3, %v1961_v38  ;;  %11758 = vmatprep.subr.bf16.mxu1 %v11757_v48 }
 0x977   :  { %10615 = vmatprep.mubr.msk.f32.mxu0 %vm2210_vm3, %v1966_v53  ;;  %11760 = vmatpush3.bf16.msra.mxu1 %v11757_v48 }
 0x97a   :  { %10616 = vmatmul.mubr.msk.f32.gmra.mrb[30].mxu0 %vm2210_vm3, %v1971_v32 }
 0x97b   :  { %10674 = vmatprep.mubr.msk.f32.mxu0 %vm1844_vm2, %v14177_v55 }
 0x97e   :  { %10675 = vmatmul.mubr.msk.f32.vlgmr.msra.gmra.mrb[32].mxu0 %vm1844_vm2, %v14179_v49 }
 0x97f   :  { %10677 = vmatprep.mubr.msk.f32.mxu0 %vm1844_vm2, %v14189_v61 }
 0x982   :  { %10678 = vmatmul.mubr.msk.f32.gmra.mrb[34].mxu0 %vm1844_vm2, %v14191_v26 }
 0x983   :  { %10680 = vmatprep.mubr.msk.f32.mxu0 %vm1844_vm2, %v14201_v54 }
 0x986   :  { %10681 = vmatmul.mubr.msk.f32.gmra.mrb[36].mxu0 %vm1844_vm2, %v14203_v0 }
 0x987   :  { %10683 = vmatprep.mubr.msk.f32.mxu0 %vm1844_vm2, %v14213_v5 }
 0x98a   :  { %10684 = vmatmul.mubr.msk.f32.gmra.mrb[38].mxu0 %vm1844_vm2, %v14215_v57 }
 0xa41   :  { %v10608_v23 = vpop.f32.mrb[24].mxu0 }
 0xa42   :  { %v2365_v19 = vmul.f32 0.25, %v10608_v23  ;;  %v2325_v17 = vpop.f32.mrb[25].mxu0 }
 0xa43   :  { %v2364_v12 = vmul.f32 0.25, %v2325_v17 }
 0xa44   :  { %v14308_v29 = vadd.f32 %v2365_v19, %v14302_v46 }
 0xa45   :  { %v10611_v18 = vpop.f32.mrb[26].mxu0  ;;  %v14311_v36 = vadd.f32 %v2364_v12, %v14305_v34 }
 0xa46   :  { %v2367_v42 = vmul.f32 0.25, %v10611_v18  ;;  %v2335_v60 = vpop.f32.mrb[27].mxu0  ;;  %v2384_v59 = vsel %vm2380_vm5, %v14308_v29, -inf }
 0xa47   :  { %v2366_v47 = vmul.f32 0.25, %v2335_v60  ;;  %2385 = vmax.xlane.f32.xlu1 %v2384_v59  ;;  %v2381_v30 = vsel %vm2380_vm5, %v14311_v36, -inf }
 0xa48   :  { %2382 = vmax.xlane.f32.xlu0 %v2381_v30  ;;  %v14324_v58 = vadd.f32 %v2367_v42, %v14314_v7 }
 0xa49   :  { %v10614_v40 = vpop.f32.mrb[28].mxu0  ;;  %v14327_v50 = vadd.f32 %v2366_v47, %v14319_v1 }
 0xa4a   :  { %v2369_v31 = vmul.f32 0.25, %v10614_v40  ;;  %v2345_v33 = vpop.f32.mrb[29].mxu0  ;;  %v2390_v41 = vsel %vm2380_vm5, %v14324_v58, -inf }
 0xa4b   :  { %v2368_v20 = vmul.f32 0.25, %v2345_v33  ;;  %2391 = vmax.xlane.f32.xlu1 %v2390_v41  ;;  %v2387_v6 = vsel %vm2380_vm5, %v14327_v50, -inf }
 0xa4c   :  { %2388 = vmax.xlane.f32.xlu0 %v2387_v6  ;;  %v14340_v63 = vadd.f32 %v2369_v31, %v14330_v22 }
 0xa4d   :  { %v10617_v43 = vpop.f32.mrb[30].mxu0  ;;  %v14343_v28 = vadd.f32 %v2368_v20, %v14335_v9 }
 0xa4e   :  { %v2371_v45 = vmul.f32 0.25, %v10617_v43  ;;  %v2355_v14 = vpop.f32.mrb[31].mxu0  ;;  %v2396_v37 = vsel %vm2380_vm5, %v14340_v63, -inf }
 0xa4f   :  { %v2370_v52 = vmul.f32 0.25, %v2355_v14  ;;  %2397 = vmax.xlane.f32.xlu1 %v2396_v37  ;;  %v2393_v15 = vsel %vm2380_vm5, %v14343_v28, -inf }
 0xa50   :  { %2394 = vmax.xlane.f32.xlu0 %v2393_v15  ;;  %v14356_v3 = vadd.f32 %v2371_v45, %v14346_v51 }
 0xa51   :  { %v10676_v4 = vpop.f32.mrb[32].mxu0  ;;  %v14359_v13 = vadd.f32 %v2370_v52, %v14351_v56 }
 0xa52   :  { %v2803_v24 = vadd.f32 %v10676_v4, %v9152_v25  ;;  %v2797_v62 = vpop.f32.mrb[33].mxu0  ;;  %v2402_v44 = vsel %vm2380_vm5, %v14356_v3, -inf }
 0xa53   :  { %v2798_v21 = vadd.f32 %v9152_v25, %v2797_v62  ;;  %2403 = vmax.xlane.f32.xlu1 %v2402_v44  ;;  %v2399_v16 = vsel %vm2380_vm5, %v14359_v13, -inf }
 0xa54   :  { %2400 = vmax.xlane.f32.xlu0 %v2399_v16 }
 0xa55   :  { %v11785_v39 = vpack.c.bf16 %v2803_v24, %v2798_v21  ;;  %v10679_v35 = vpop.f32.mrb[34].mxu0 }
 0xa56   :  { %v2813_v11 = vadd.f32 %v10679_v35, %v9152_v25  ;;  %v2807_v38 = vpop.f32.mrb[35].mxu0 }
 0xa57   :  { %v2808_v48 = vadd.f32 %v9152_v25, %v2807_v38  ;;  %11787 = vmatprep.subr.msk.bf16.mxu0 %vm14246_vm4, %v11785_v39 }
 0xa58   :  { %11790 = vmatpush3.bf16.xpose.msk.msra.mxu0 %vm14246_vm4, %v11785_v39 }
 0xa59   :  { %v11791_v53 = vpack.c.bf16 %v2813_v11, %v2808_v48  ;;  %v10682_v32 = vpop.f32.mrb[36].mxu0 }
 0xa5a   :  { %v2823_v23 = vadd.f32 %v10682_v32, %v9152_v25  ;;  %v2817_v19 = vpop.f32.mrb[37].mxu0 }
 0xa5b   :  { %v2818_v17 = vadd.f32 %v9152_v25, %v2817_v19  ;;  %11793 = vmatprep.subr.msk.bf16.mxu0 %vm14246_vm4, %v11791_v53 }
 0xa5d   :  { %v11797_v12 = vpack.c.bf16 %v2823_v23, %v2818_v17  ;;  %v10685_v18 = vpop.f32.mrb[38].mxu0 }
 0xa5e   :  { %v2833_v42 = vadd.f32 %v10685_v18, %v9152_v25  ;;  %v2827_v60 = vpop.f32.mrb[39].mxu0  ;;  %v9135_v18 = vld [vmem:[%s15693_s24 + $0x20] sm:$0xff] }
 0xa5f   :  { %v2828_v59 = vadd.f32 %v9152_v25, %v2827_v60 }
 0xa60   :  { %11796 = vmatpush3.bf16.xpose.msk.msra.mxu0 %vm14246_vm4, %v11791_v53 }
 0xa61   :  { %v11803_v47 = vpack.c.bf16 %v2833_v42, %v2828_v59  ;;  %11799 = vmatprep.subr.msk.bf16.mxu0 %vm14246_vm4, %v11797_v12  ;;  %v9136_v42 = vld [vmem:[%s15693_s24 + $0x28] sm:$0xff] }
 0xa62   :  { %v11761_v60 = vpack.c.bf16 %v9136_v42, %v9135_v18 }
 0xa64   :  { %11762 = vmatprep.subr.bf16.mxu1 %v11761_v60 }
 0xa68   :  { %11802 = vmatpush3.bf16.xpose.msk.msra.mxu0 %vm14246_vm4, %v11797_v12 }
 0xa69   :  { %11805 = vmatprep.subr.msk.bf16.mxu0 %vm14246_vm4, %v11803_v47 }
 0xa70   :  { %11808 = vmatpush3.bf16.xpose.msk.msra.mxu0 %vm14246_vm4, %v11803_v47 }
 0xad4   :  { %v2386_v30 = vpop.xlane.xlu1 %2385 }
 0xad5   :  { %v2406_v40 = vsub.f32 %v14308_v29, %v2386_v30  ;;  %v2383_v31 = vpop.xlane.xlu0 %2382 }
 0xad6   :  { %v2405_v33 = vsub.f32 %v14311_v36, %v2383_v31 }
 0xad7   :  { %v2415_v41 = vmul.f32 1.442695, %v2406_v40 }
 0xad8   :  { %v2413_v20 = vmul.f32 1.442695, %v2405_v33  ;;  %v2392_v6 = vpop.xlane.xlu1 %2391 }
 0xad9   :  { %12754 = vpow2.f32 %v2415_v41  ;;  %v2408_v43 = vsub.f32 %v14324_v58, %v2392_v6  ;;  %v2389_v45 = vpop.xlane.xlu0 %2388  ;;  %v9138_v6 = vld [vmem:[%s15693_s24 + $0x38] sm:$0xff] }
 0xada   :  { %12756 = vpow2.f32 %v2413_v20  ;;  %v2407_v14 = vsub.f32 %v14327_v50, %v2389_v45  ;;  %v9137_v20 = vld [vmem:[%s15693_s24 + $0x30] sm:$0xff] }
 0xadb   :  { %v2419_v37 = vmul.f32 1.442695, %v2408_v43 }
 0xadc   :  { %v2417_v52 = vmul.f32 1.442695, %v2407_v14  ;;  %v2398_v27 = vpop.xlane.xlu1 %2397 }
 0xadd   :  { %12758 = vpow2.f32 %v2419_v37  ;;  %v2410_v15 = vsub.f32 %v14340_v63, %v2398_v27  ;;  %v2395_v29 = vpop.xlane.xlu0 %2394  ;;  %v11765_v27 = vpack.c.bf16 %v9138_v6, %v9137_v20 }
 0xade   :  { %12760 = vpow2.f32 %v2417_v52  ;;  %v2409_v36 = vsub.f32 %v14343_v28, %v2395_v29  ;;  %v9161_v29 = vld [vmem:[%s15693_s24 + $0xa0] sm:$0xff] }
 0xadf   :  { %v2423_v25 = vmul.f32 1.442695, %v2410_v15 }
 0xae0   :  { %v2421_v4 = vmul.f32 1.442695, %v2409_v36  ;;  %v2404_v24 = vpop.xlane.xlu1 %2403  ;;  %v9162_v36 = vld [vmem:[%s15693_s24 + $0xa8] sm:$0xff] }
 0xae1   :  { %12762 = vpow2.f32 %v2423_v25  ;;  %v2412_v58 = vsub.f32 %v14356_v3, %v2404_v24  ;;  %v2401_v62 = vpop.xlane.xlu0 %2400 }
 0xae2   :  { %12764 = vpow2.f32 %v2421_v4  ;;  %v2411_v50 = vsub.f32 %v14359_v13, %v2401_v62 }
 0xae3   :  { %v12755_v44 = vpop.eup %12754  ;;  %v2427_v21 = vmul.f32 1.442695, %v2412_v58  ;;  %v11777_v58 = vpack.c.bf16 %v9162_v36, %v9161_v29 }
 0xae4   :  { %v12757_v16 = vpop.eup %12756  ;;  %v2425_v39 = vmul.f32 1.442695, %v2411_v50  ;;  %v2432_v63 = vsel %vm2380_vm5, %v12755_v44, 0.0 }
 0xae5   :  { %12766 = vpow2.f32 %v2427_v21  ;;  %2433 = vadd.xlane.f32.xlu1 %v2432_v63  ;;  %v2429_v28 = vsel %vm2380_vm5, %v12757_v16, 0.0 }
 0xae6   :  { %12768 = vpow2.f32 %v2425_v39  ;;  %2430 = vadd.xlane.f32.xlu0 %v2429_v28 }
 0xae7   :  { %v12759_v35 = vpop.eup %12758 }
 0xae8   :  { %v12761_v11 = vpop.eup %12760  ;;  %v2438_v3 = vsel %vm2380_vm5, %v12759_v35, 0.0 }
 0xae9   :  { %2439 = vadd.xlane.f32.xlu1 %v2438_v3  ;;  %v2435_v13 = vsel %vm2380_vm5, %v12761_v11, 0.0 }
 0xaea   :  { %2436 = vadd.xlane.f32.xlu0 %v2435_v13 }
 0xaeb   :  { %v12763_v38 = vpop.eup %12762 }
 0xaec   :  { %v12765_v48 = vpop.eup %12764  ;;  %v2444_v53 = vsel %vm2380_vm5, %v12763_v38, 0.0 }
 0xaed   :  { %2445 = vadd.xlane.f32.xlu1 %v2444_v53  ;;  %v2441_v32 = vsel %vm2380_vm5, %v12765_v48, 0.0 }
 0xaee   :  { %2442 = vadd.xlane.f32.xlu0 %v2441_v32 }
 0xaef   :  { %v12767_v23 = vpop.eup %12766 }
 0xaf0   :  { %v12769_v19 = vpop.eup %12768  ;;  %v2450_v17 = vsel %vm2380_vm5, %v12767_v23, 0.0 }
 0xaf1   :  { %2451 = vadd.xlane.f32.xlu1 %v2450_v17  ;;  %v2447_v12 = vsel %vm2380_vm5, %v12769_v19, 0.0 }
 0xaf2   :  { %2448 = vadd.xlane.f32.xlu0 %v2447_v12 }
 0xb72   :  { %v2434_v59 = vpop.xlane.xlu1 %2433 }
 0xb73   :  { %12770 = vrcp.f32 %v2434_v59  ;;  %v2431_v47 = vpop.xlane.xlu0 %2430 }
 0xb74   :  { %12772 = vrcp.f32 %v2431_v47 }
 0xb76   :  { %v2440_v30 = vpop.xlane.xlu1 %2439 }
 0xb77   :  { %12774 = vrcp.f32 %v2440_v30  ;;  %v2437_v40 = vpop.xlane.xlu0 %2436 }
 0xb78   :  { %12776 = vrcp.f32 %v2437_v40 }
 0xb7a   :  { %v2446_v31 = vpop.xlane.xlu1 %2445 }
 0xb7b   :  { %12778 = vrcp.f32 %v2446_v31  ;;  %v2443_v33 = vpop.xlane.xlu0 %2442  ;;  %v9165_v31 = vld [vmem:[#allocation8 + $0x5] ss:$0 sm:$0xff] }
 0xb7c   :  { %12780 = vrcp.f32 %v2443_v33 }
 0xb7d   :  { %v12771_v41 = vpop.eup %12770 }
 0xb7e   :  { %v12773_v43 = vpop.eup %12772  ;;  %v2452_v45 = vpop.xlane.xlu1 %2451  ;;  %v2456_v52 = vmul.f32 %v12771_v41, %v12755_v44 }
 0xb7f   :  { %12782 = vrcp.f32 %v2452_v45  ;;  %v2449_v14 = vpop.xlane.xlu0 %2448  ;;  %v2454_v37 = vmul.f32 %v12773_v43, %v12757_v16 }
 0xb80   :  { %12784 = vrcp.f32 %v2449_v14 }
 0xb81   :  { %v12775_v15 = vpop.eup %12774  ;;  %10634 = vmatprep.mubr.msk.f32.mxu1 %vm2380_vm5, %v2454_v37 }
 0xb82   :  { %v12777_v25 = vpop.eup %12776  ;;  %10635 = vmatmul.mubr.msk.f32.vlgmr.msra.gmra.mrb[40].mxu1 %vm2380_vm5, %v2456_v52  ;;  %v2460_v24 = vmul.f32 %v12775_v15, %v12759_v35  ;;  %v9163_v35 = vld [vmem:[%s15693_s24 + $0xb0] sm:$0xff] }
 0xb83   :  { %11764 = vmatpush3.bf16.msra.mxu1 %v11761_v60  ;;  %v2458_v4 = vmul.f32 %v12777_v25, %v12761_v11  ;;  %v9164_v11 = vld [vmem:[%s15693_s24 + $0xb8] sm:$0xff] }
 0xb84   :  { %11766 = vmatprep.subr.bf16.mxu1 %v11765_v27  ;;  %v11781_v3 = vpack.c.bf16 %v9164_v11, %v9163_v35 }
 0xb85   :  { %v12779_v62 = vpop.eup %12778  ;;  %10637 = vmatprep.mubr.msk.f32.mxu1 %vm2380_vm5, %v2458_v4 }
 0xb86   :  { %v12781_v50 = vpop.eup %12780  ;;  %10638 = vmatmul.mubr.msk.f32.gmra.mrb[42].mxu1 %vm2380_vm5, %v2460_v24  ;;  %v2464_v21 = vmul.f32 %v12779_v62, %v12763_v38 }
 0xb87   :  { %v2462_v44 = vmul.f32 %v12781_v50, %v12765_v48  ;;  %11768 = vmatpush3.bf16.msra.mxu1 %v11765_v27 }
 0xb88   :  { %11778 = vmatprep.subr.bf16.mxu1 %v11777_v58 }
 0xb89   :  { %v12783_v16 = vpop.eup %12782  ;;  %10640 = vmatprep.mubr.msk.f32.mxu1 %vm2380_vm5, %v2462_v44 }
 0xb8a   :  { %v12785_v39 = vpop.eup %12784  ;;  %10641 = vmatmul.mubr.msk.f32.gmra.mrb[44].mxu1 %vm2380_vm5, %v2464_v21  ;;  %v2468_v28 = vmul.f32 %v12783_v16, %v12767_v23 }
 0xb8b   :  { %v2466_v63 = vmul.f32 %v12785_v39, %v12769_v19 }
 0xb8d   :  { %10643 = vmatprep.mubr.msk.f32.mxu1 %vm2380_vm5, %v2466_v63 }
 0xb8e   :  { %10644 = vmatmul.mubr.msk.f32.gmra.mrb[46].mxu1 %vm2380_vm5, %v2468_v28 }
 0xb8f   :  { %10654 = vmatprep.mubr.msk.f32.mxu1 %vm1844_vm2, %v14177_v55 }
 0xb92   :  { %10655 = vmatmul.mubr.msk.f32.vlgmr.msra.gmra.mrb[48].mxu1 %vm1844_vm2, %v14179_v49 }
 0xb93   :  { %10657 = vmatprep.mubr.msk.f32.mxu1 %vm1844_vm2, %v14189_v61  ;;  %11780 = vmatpush3.bf16.msra.mxu1 %v11777_v58 }
 0xb94   :  { %11782 = vmatprep.subr.bf16.mxu1 %v11781_v3 }
 0xb96   :  { %10658 = vmatmul.mubr.msk.f32.gmra.mrb[50].mxu1 %vm1844_vm2, %v14191_v26 }
 0xb97   :  { %10660 = vmatprep.mubr.msk.f32.mxu1 %vm1844_vm2, %v14201_v54  ;;  %11784 = vmatpush3.bf16.msra.mxu1 %v11781_v3 }
 0xb9a   :  { %10661 = vmatmul.mubr.msk.f32.gmra.mrb[52].mxu1 %vm1844_vm2, %v14203_v0 }
 0xb9b   :  { %10663 = vmatprep.mubr.msk.f32.mxu1 %vm1844_vm2, %v14213_v5 }
 0xb9e   :  { %10664 = vmatmul.mubr.msk.f32.gmra.mrb[54].mxu1 %vm1844_vm2, %v14215_v57 }
 0xb9f   :  { %10694 = vmatprep.mubr.msk.f32.mxu1 %vm1844_vm2, %v14177_v55 }
 0xba2   :  { %10695 = vmatmul.mubr.msk.f32.vlgmr.msra.gmra.mrb[56].mxu1 %vm1844_vm2, %v14179_v49 }
 0xba3   :  { %10697 = vmatprep.mubr.msk.f32.mxu1 %vm1844_vm2, %v14189_v61 }
 0xba6   :  { %10698 = vmatmul.mubr.msk.f32.gmra.mrb[58].mxu1 %vm1844_vm2, %v14191_v26 }
 0xba7   :  { %10700 = vmatprep.mubr.msk.f32.mxu1 %vm1844_vm2, %v14201_v54 }
 0xbaa   :  { %10701 = vmatmul.mubr.msk.f32.gmra.mrb[60].mxu1 %vm1844_vm2, %v14203_v0 }
 0xbab   :  { %10703 = vmatprep.mubr.msk.f32.mxu1 %vm1844_vm2, %v14213_v5  ;;  %v9139_v5 = vld [vmem:[#allocation8 + $0x1] ss:$0 sm:$0xff] }
 0xbae   :  { %10704 = vmatmul.mubr.msk.f32.gmra.mrb[62].mxu1 %vm1844_vm2, %v14215_v57 }
 0xc55   :  { %v14445_v55 = vpop.f32.mrb[40].mxu1 }
 0xc56   :  { %v14447_v49 = vpop.f32.mrb[41].mxu1 }
 0xc59   :  { %v14449_v61 = vpop.f32.mrb[42].mxu1 }
 0xc5a   :  { %v14451_v13 = vpop.f32.mrb[43].mxu1 }
 0xc5d   :  { %v14453_v26 = vpop.f32.mrb[44].mxu1 }
 0xc5e   :  { %v14455_v54 = vpop.f32.mrb[45].mxu1 }
 0xc61   :  { %v14457_v38 = vpop.f32.mrb[46].mxu1 }
 0xc62   :  { %v14459_v0 = vpop.f32.mrb[47].mxu1 }
 0xc65   :  { %v10656_v48 = vpop.f32.mrb[48].mxu1 }
 0xc66   :  { %v2679_v53 = vpop.f32.mrb[49].mxu1  ;;  %v2685_v32 = vadd.f32 %v10656_v48, %v9139_v5 }
 0xc67   :  { %v2680_v57 = vadd.f32 %v9139_v5, %v2679_v53 }
 0xc69   :  { %v10659_v23 = vpop.f32.mrb[50].mxu1  ;;  %10722 = vmatprep.mubr.msk.f32.mxu0 %vm2210_vm3, %v2680_v57 }
 0xc6a   :  { %v2689_v19 = vpop.f32.mrb[51].mxu1  ;;  %10723 = vmatmul.mubr.msk.f32.vlgmr.msra.gmra.mrb[40].mxu0 %vm2210_vm3, %v2685_v32  ;;  %v2695_v12 = vadd.f32 %v10659_v23, %v9139_v5 }
 0xc6b   :  { %v2690_v17 = vadd.f32 %v9139_v5, %v2689_v19 }
 0xc6d   :  { %v10662_v18 = vpop.f32.mrb[52].mxu1  ;;  %10725 = vmatprep.mubr.msk.f32.mxu0 %vm2210_vm3, %v2690_v17 }
 0xc6e   :  { %v2699_v42 = vpop.f32.mrb[53].mxu1  ;;  %10726 = vmatmul.mubr.msk.f32.gmra.mrb[42].mxu0 %vm2210_vm3, %v2695_v12  ;;  %v2705_v59 = vadd.f32 %v10662_v18, %v9139_v5 }
 0xc6f   :  { %v2700_v60 = vadd.f32 %v9139_v5, %v2699_v42 }
 0xc71   :  { %v10665_v47 = vpop.f32.mrb[54].mxu1  ;;  %10728 = vmatprep.mubr.msk.f32.mxu0 %vm2210_vm3, %v2700_v60 }
 0xc72   :  { %v2709_v30 = vpop.f32.mrb[55].mxu1  ;;  %10729 = vmatmul.mubr.msk.f32.gmra.mrb[44].mxu0 %vm2210_vm3, %v2705_v59  ;;  %v2715_v33 = vadd.f32 %v10665_v47, %v9139_v5 }
 0xc73   :  { %v2710_v40 = vadd.f32 %v9139_v5, %v2709_v30 }
 0xc75   :  { %v10696_v41 = vpop.f32.mrb[56].mxu1  ;;  %10731 = vmatprep.mubr.msk.f32.mxu0 %vm2210_vm3, %v2710_v40 }
 0xc76   :  { %v2921_v20 = vadd.f32 %v10696_v41, %v9165_v31  ;;  %v2915_v6 = vpop.f32.mrb[57].mxu1  ;;  %10732 = vmatmul.mubr.msk.f32.gmra.mrb[46].mxu0 %vm2210_vm3, %v2715_v33 }
 0xc77   :  { %v2916_v43 = vadd.f32 %v9165_v31, %v2915_v6 }
 0xc79   :  { %v11809_v45 = vpack.c.bf16 %v2921_v20, %v2916_v43  ;;  %v10699_v14 = vpop.f32.mrb[58].mxu1 }
 0xc7a   :  { %v2931_v37 = vadd.f32 %v10699_v14, %v9165_v31  ;;  %v2925_v52 = vpop.f32.mrb[59].mxu1 }
 0xc7b   :  { %v2926_v27 = vadd.f32 %v9165_v31, %v2925_v52  ;;  %11810 = vmatprep.subr.bf16.mxu1 %v11809_v45 }
 0xc7c   :  { %11812 = vmatpush3.bf16.msra.mxu1 %v11809_v45 }
 0xc7d   :  { %v11813_v15 = vpack.c.bf16 %v2931_v37, %v2926_v27  ;;  %v10702_v29 = vpop.f32.mrb[60].mxu1 }
 0xc7e   :  { %v2941_v36 = vadd.f32 %v10702_v29, %v9165_v31  ;;  %v2935_v25 = vpop.f32.mrb[61].mxu1 }
 0xc7f   :  { %v2936_v4 = vadd.f32 %v9165_v31, %v2935_v25  ;;  %11814 = vmatprep.subr.bf16.mxu1 %v11813_v15 }
 0xc80   :  { %11816 = vmatpush3.bf16.msra.mxu1 %v11813_v15 }
 0xc81   :  { %v11817_v24 = vpack.c.bf16 %v2941_v36, %v2936_v4  ;;  %v10705_v58 = vpop.f32.mrb[62].mxu1 }
 0xc82   :  { %v2951_v62 = vadd.f32 %v10705_v58, %v9165_v31  ;;  %v2945_v50 = vpop.f32.mrb[63].mxu1 }
 0xc83   :  { %v2946_v44 = vadd.f32 %v9165_v31, %v2945_v50  ;;  %11818 = vmatprep.subr.bf16.mxu1 %v11817_v24 }
 0xc84   :  { %11820 = vmatpush3.bf16.msra.mxu1 %v11817_v24 }
 0xc85   :  { %v11821_v21 = vpack.c.bf16 %v2951_v62, %v2946_v44 }
 0xc87   :  { %11822 = vmatprep.subr.bf16.mxu1 %v11821_v21 }
 0xc88   :  { %11824 = vmatpush3.bf16.msra.mxu1 %v11821_v21 }
 0xd3d   :  { %v10724_v16 = vpop.f32.mrb[40].mxu0 }
 0xd3e   :  { %v3108_v39 = vmul.f32 0.25, %v10724_v16  ;;  %v3068_v63 = vpop.f32.mrb[41].mxu0 }
 0xd3f   :  { %v3107_v28 = vmul.f32 0.25, %v3068_v63 }
 0xd40   :  { %v3116_v35 = vadd.f32 %v3108_v39, %v14302_v46 }
 0xd41   :  { %v10727_v11 = vpop.f32.mrb[42].mxu0  ;;  %v3115_v3 = vadd.f32 %v3107_v28, %v14305_v34 }
 0xd42   :  { %v3110_v5 = vmul.f32 0.25, %v10727_v11  ;;  %v3078_v48 = vpop.f32.mrb[43].mxu0  ;;  %v3126_v53 = vsel %vm2380_vm5, %v3116_v35, -inf }
 0xd43   :  { %v3109_v57 = vmul.f32 0.25, %v3078_v48  ;;  %3127 = vmax.xlane.f32.xlu1 %v3126_v53  ;;  %v3123_v32 = vsel %vm2380_vm5, %v3115_v3, -inf }
 0xd44   :  { %3124 = vmax.xlane.f32.xlu0 %v3123_v32  ;;  %v3118_v23 = vadd.f32 %v3110_v5, %v14314_v7 }
 0xd45   :  { %v10730_v19 = vpop.f32.mrb[44].mxu0  ;;  %v3117_v17 = vadd.f32 %v3109_v57, %v14319_v1 }
 0xd46   :  { %v3112_v12 = vmul.f32 0.25, %v10730_v19  ;;  %v3088_v18 = vpop.f32.mrb[45].mxu0  ;;  %v3132_v46 = vsel %vm2380_vm5, %v3118_v23, -inf }
 0xd47   :  { %v3111_v42 = vmul.f32 0.25, %v3088_v18  ;;  %3133 = vmax.xlane.f32.xlu1 %v3132_v46  ;;  %v3129_v34 = vsel %vm2380_vm5, %v3117_v17, -inf }
 0xd48   :  { %3130 = vmax.xlane.f32.xlu0 %v3129_v34  ;;  %v3120_v60 = vadd.f32 %v3112_v12, %v14330_v22  ;;  %v3341_v34 = vld [vmem:[#allocation9 + $0x10] sm:$0xff] }
 0xd49   :  { %v10733_v59 = vpop.f32.mrb[46].mxu0  ;;  %v3119_v47 = vadd.f32 %v3111_v42, %v14335_v9 }
 0xd4a   :  { %v3114_v30 = vmul.f32 0.25, %v10733_v59  ;;  %v3098_v40 = vpop.f32.mrb[47].mxu0  ;;  %v3138_v7 = vsel %vm2380_vm5, %v3120_v60, -inf }
 0xd4b   :  { %v3113_v31 = vmul.f32 0.25, %v3098_v40  ;;  %3139 = vmax.xlane.f32.xlu1 %v3138_v7  ;;  %v3135_v1 = vsel %vm2380_vm5, %v3119_v47, -inf }
 0xd4c   :  { %3136 = vmax.xlane.f32.xlu0 %v3135_v1  ;;  %v3122_v33 = vadd.f32 %v3114_v30, %v14346_v51 }
 0xd4d   :  { %v3121_v41 = vadd.f32 %v3113_v31, %v14351_v56 }
 0xd4e   :  { %v3144_v20 = vsel %vm2380_vm5, %v3122_v33, -inf }
 0xd4f   :  { %3145 = vmax.xlane.f32.xlu1 %v3144_v20  ;;  %v3141_v22 = vsel %vm2380_vm5, %v3121_v41, -inf }
 0xd50   :  { %3142 = vmax.xlane.f32.xlu0 %v3141_v22 }
 0xdd0   :  { %v3128_v9 = vpop.xlane.xlu1 %3127 }
 0xdd1   :  { %v3148_v6 = vsub.f32 %v3116_v35, %v3128_v9  ;;  %v3125_v43 = vpop.xlane.xlu0 %3124 }
 0xdd2   :  { %v3147_v45 = vsub.f32 %v3115_v3, %v3125_v43 }
 0xdd3   :  { %v3157_v14 = vmul.f32 1.442695, %v3148_v6 }
 0xdd4   :  { %v3155_v37 = vmul.f32 1.442695, %v3147_v45  ;;  %v3134_v52 = vpop.xlane.xlu1 %3133 }
 0xdd5   :  { %12786 = vpow2.f32 %v3157_v14  ;;  %v3150_v27 = vsub.f32 %v3118_v23, %v3134_v52  ;;  %v3131_v15 = vpop.xlane.xlu0 %3130 }
 0xdd6   :  { %12788 = vpow2.f32 %v3155_v37  ;;  %v3149_v51 = vsub.f32 %v3117_v17, %v3131_v15 }
 0xdd7   :  { %v3161_v29 = vmul.f32 1.442695, %v3150_v27 }
 0xdd8   :  { %v3159_v56 = vmul.f32 1.442695, %v3149_v51  ;;  %v3140_v36 = vpop.xlane.xlu1 %3139 }
 0xdd9   :  { %12790 = vpow2.f32 %v3161_v29  ;;  %v3152_v25 = vsub.f32 %v3120_v60, %v3140_v36  ;;  %v3137_v4 = vpop.xlane.xlu0 %3136  ;;  %v3342_v60 = vld [vmem:[#allocation9 + $0x18] sm:$0xff] }
 0xdda   :  { %12792 = vpow2.f32 %v3159_v56  ;;  %v3151_v24 = vsub.f32 %v3119_v47, %v3137_v4  ;;  %v11825_v59 = vpack.c.bf16 %v3342_v60, %v3341_v34  ;;  %v2598_v4 = vld [vmem:[#allocation9] sm:$0xff]  ;;  %v9219_v34 = vld [vmem:[%s15697_s14 + $0x30] sm:$0xff] }
 0xddb   :  { %v3165_v58 = vmul.f32 1.442695, %v3152_v25 }
 0xddc   :  { %v3163_v62 = vmul.f32 1.442695, %v3151_v24  ;;  %v3146_v50 = vpop.xlane.xlu1 %3145  ;;  %11826 = vmatprep.subr.bf16.mxu1 %v11825_v59  ;;  %v2599_v24 = vld [vmem:[#allocation9 + $0x8] sm:$0xff] }
 0xddd   :  { %12794 = vpow2.f32 %v3165_v58  ;;  %v3154_v44 = vsub.f32 %v3122_v33, %v3146_v50  ;;  %v3143_v21 = vpop.xlane.xlu0 %3142  ;;  %v11829_v58 = vpack.c.bf16 %v2599_v24, %v2598_v4  ;;  %v3768_v4 = vld [vmem:[%s15698_s10 + $0x38] sm:$0xff]  ;;  %v9228_v24 = vld [vmem:[%s15698_s10 + $0xb0] sm:$0xff] }
 0xdde   :  { %12796 = vpow2.f32 %v3163_v62  ;;  %v3153_v16 = vsub.f32 %v3121_v41, %v3143_v21 }
 0xddf   :  { %v12787_v39 = vpop.eup %12786  ;;  %v3169_v63 = vmul.f32 1.442695, %v3154_v44 }
 0xde0   :  { %v12789_v28 = vpop.eup %12788  ;;  %v3167_v35 = vmul.f32 1.442695, %v3153_v16  ;;  %v3174_v11 = vsel %vm2380_vm5, %v12787_v39, 0.0 }
 0xde1   :  { %12798 = vpow2.f32 %v3169_v63  ;;  %3175 = vadd.xlane.f32.xlu1 %v3174_v11  ;;  %v3171_v3 = vsel %vm2380_vm5, %v12789_v28, 0.0 }
 0xde2   :  { %12800 = vpow2.f32 %v3167_v35  ;;  %3172 = vadd.xlane.f32.xlu0 %v3171_v3 }
 0xde3   :  { %v12791_v5 = vpop.eup %12790 }
 0xde4   :  { %v12793_v48 = vpop.eup %12792  ;;  %v3180_v53 = vsel %vm2380_vm5, %v12791_v5, 0.0 }
 0xde5   :  { %3181 = vadd.xlane.f32.xlu1 %v3180_v53  ;;  %v3177_v57 = vsel %vm2380_vm5, %v12793_v48, 0.0 }
 0xde6   :  { %3178 = vadd.xlane.f32.xlu0 %v3177_v57 }
 0xde7   :  { %v12795_v32 = vpop.eup %12794 }
 0xde8   :  { %v12797_v23 = vpop.eup %12796  ;;  %v3186_v19 = vsel %vm2380_vm5, %v12795_v32, 0.0 }
 0xde9   :  { %3187 = vadd.xlane.f32.xlu1 %v3186_v19  ;;  %v3183_v17 = vsel %vm2380_vm5, %v12797_v23, 0.0  ;;  %v3683_v19 = vld [vmem:[%s15697_s14 + $0x8] sm:$0xff] }
 0xdea   :  { %3184 = vadd.xlane.f32.xlu0 %v3183_v17 }
 0xdeb   :  { %v12799_v12 = vpop.eup %12798 }
 0xdec   :  { %v12801_v18 = vpop.eup %12800  ;;  %v3192_v46 = vsel %vm2380_vm5, %v12799_v12, 0.0 }
 0xded   :  { %3193 = vadd.xlane.f32.xlu1 %v3192_v46  ;;  %v3189_v42 = vsel %vm2380_vm5, %v12801_v18, 0.0  ;;  %v3684_v46 = vld [vmem:[%s15697_s14 + $0x10] sm:$0xff] }
 0xdee   :  { %3190 = vadd.xlane.f32.xlu0 %v3189_v42  ;;  %v3685_v42 = vld [vmem:[%s15697_s14 + $0x18] sm:$0xff] }
 0xdef   :  { %v11849_v60 = vpack.c.bf16 %v3685_v42, %v3684_v46  ;;  %v4018_v46 = vld [vmem:[%s15699_s11 + $0x18] sm:$0xff] }
 0xe6e   :  { %v3176_v47 = vpop.xlane.xlu1 %3175 }
 0xe6f   :  { %12802 = vrcp.f32 %v3176_v47  ;;  %v3173_v30 = vpop.xlane.xlu0 %3172 }
 0xe70   :  { %12804 = vrcp.f32 %v3173_v30  ;;  %v3761_v30 = vld [vmem:[%s15698_s10] sm:$0xff] }
 0xe72   :  { %v3182_v40 = vpop.xlane.xlu1 %3181 }
 0xe73   :  { %12806 = vrcp.f32 %v3182_v40  ;;  %v3179_v7 = vpop.xlane.xlu0 %3178  ;;  %v3762_v40 = vld [vmem:[%s15698_s10 + $0x8] sm:$0xff] }
 0xe74   :  { %12808 = vrcp.f32 %v3179_v7  ;;  %v9222_v7 = vld [vmem:[%s15698_s10 + $0x80] sm:$0xff] }
 0xe76   :  { %v3188_v31 = vpop.xlane.xlu1 %3187 }
 0xe77   :  { %12810 = vrcp.f32 %v3188_v31  ;;  %v3185_v1 = vpop.xlane.xlu0 %3184  ;;  %v9223_v31 = vld [vmem:[%s15698_s10 + $0x88] sm:$0xff] }
 0xe78   :  { %12812 = vrcp.f32 %v3185_v1  ;;  %v9214_v1 = vld [vmem:[#allocation11] ss:$0 sm:$0xff] }
 0xe79   :  { %v12803_v33 = vpop.eup %12802 }
 0xe7a   :  { %v12805_v41 = vpop.eup %12804  ;;  %v3194_v20 = vpop.xlane.xlu1 %3193  ;;  %v3198_v6 = vmul.f32 %v12803_v33, %v12787_v39 }
 0xe7b   :  { %12814 = vrcp.f32 %v3194_v20  ;;  %v3191_v22 = vpop.xlane.xlu0 %3190  ;;  %v3196_v9 = vmul.f32 %v12805_v41, %v12789_v28  ;;  %v11852_v41 = vpack.c.bf16 %v3762_v40, %v3761_v30  ;;  %v11882_v20 = vpack.c.bf16 %v9223_v31, %v9222_v7  ;;  %v4020_v7 = vld [vmem:[%s15699_s11 + $0x28] sm:$0xff]  ;;  %v4022_v31 = vld [vmem:[%s15699_s11 + $0x38] sm:$0xff] }
 0xe7c   :  { %12816 = vrcp.f32 %v3191_v22  ;;  %v3763_v22 = vld [vmem:[%s15698_s10 + $0x10] sm:$0xff] }
 0xe7d   :  { %v12807_v43 = vpop.eup %12806  ;;  %10750 = vmatprep.mubr.msk.f32.mxu1 %vm2380_vm5, %v3196_v9 }
 0xe7e   :  { %v12809_v45 = vpop.eup %12808  ;;  %10751 = vmatmul.mubr.msk.f32.vlgmr.msra.gmra.mrb[64].mxu1 %vm2380_vm5, %v3198_v6  ;;  %v3202_v37 = vmul.f32 %v12807_v43, %v12791_v5  ;;  %v3764_v43 = vld [vmem:[%s15698_s10 + $0x18] sm:$0xff] }
 0xe7f   :  { %v3200_v14 = vmul.f32 %v12809_v45, %v12793_v48  ;;  %11828 = vmatpush3.bf16.msra.mxu1 %v11825_v59  ;;  %v9220_v59 = vld [vmem:[%s15697_s14 + $0x38] sm:$0xff]  ;;  %v9224_v45 = vld [vmem:[%s15698_s10 + $0x90] sm:$0xff] }
 0xe80   :  { %11830 = vmatprep.subr.bf16.mxu1 %v11829_v58  ;;  %v11879_v47 = vpack.c.bf16 %v9220_v59, %v9219_v34  ;;  %v3686_v34 = vld [vmem:[%s15700_s0] ss:$0 sm:$0xff] }
 0xe81   :  { %v12811_v52 = vpop.eup %12810  ;;  %10753 = vmatprep.mubr.msk.f32.mxu1 %vm2380_vm5, %v3200_v14  ;;  %v9225_v14 = vld [vmem:[%s15698_s10 + $0x98] sm:$0xff]  ;;  %v4015_v59 = vld [vmem:[%s15699_s11] sm:$0xff] }
 0xe82   :  { %v12813_v27 = vpop.eup %12812  ;;  %10754 = vmatmul.mubr.msk.f32.gmra.mrb[66].mxu1 %vm2380_vm5, %v3202_v37  ;;  %v3206_v51 = vmul.f32 %v12811_v52, %v12795_v32  ;;  %v11855_v37 = vpack.c.bf16 %v3764_v43, %v3763_v22  ;;  %v11885_v52 = vpack.c.bf16 %v9225_v14, %v9224_v45  ;;  %v11909_v45 = vpack.c.bf16 %v4022_v31, %v4020_v7  ;;  %v4019_v14 = vld [vmem:[%s15699_s11 + $0x20] sm:$0xff]  ;;  %v4123_v7 = vld [vmem:[%s15701_s15 + $0x70] sm:$0xff]  ;;  %v4124_v31 = vld [vmem:[%s15701_s15 + $0x78] sm:$0xff] }
 0xe83   :  { %v3204_v15 = vmul.f32 %v12813_v27, %v12797_v23  ;;  %v3682_v23 = vld [vmem:[%s15697_s14] sm:$0xff] }
 0xe84   :  { %v3765_v27 = vld [vmem:[%s15698_s10 + $0x20] sm:$0xff] }
 0xe85   :  { %v12815_v29 = vpop.eup %12814  ;;  %10756 = vmatprep.mubr.msk.f32.mxu1 %vm2380_vm5, %v3204_v15  ;;  %v3766_v15 = vld [vmem:[%s15698_s10 + $0x28] sm:$0xff] }
 0xe86   :  { %v12817_v56 = vpop.eup %12816  ;;  %10757 = vmatmul.mubr.msk.f32.gmra.mrb[68].mxu1 %vm2380_vm5, %v3206_v51  ;;  %v3210_v25 = vmul.f32 %v12815_v29, %v12799_v12  ;;  %v3601_v12 = vld [vmem:[#allocation12] sm:$0xff]  ;;  %v9227_v29 = vld [vmem:[%s15698_s10 + $0xa8] sm:$0xff] }
 0xe87   :  { %v3208_v36 = vmul.f32 %v12817_v56, %v12801_v18  ;;  %v11846_v18 = vpack.c.bf16 %v3683_v19, %v3682_v23  ;;  %v9226_v51 = vld [vmem:[%s15698_s10 + $0xa0] sm:$0xff]  ;;  %v11858_v56 = vpack.c.bf16 %v3766_v15, %v3765_v27  ;;  %v9236_v19 = vld [vmem:[%s15698_s10 + $0xf0] sm:$0xff]  ;;  %v4126_v27 = vld [vmem:[%s15701_s15 + $0x88] sm:$0xff] }
 0xe89   :  { %10759 = vmatprep.mubr.msk.f32.mxu1 %vm2380_vm5, %v3208_v36  ;;  %v11888_v36 = vpack.c.bf16 %v9227_v29, %v9226_v51  ;;  %v4109_v29 = vld [vmem:[%s15701_s15] sm:$0xff] }
 0xe8a   :  { %10760 = vmatmul.mubr.msk.f32.gmra.mrb[70].mxu1 %vm2380_vm5, %v3210_v25  ;;  %v3767_v25 = vld [vmem:[%s15698_s10 + $0x30] sm:$0xff] }
 0xf51   :  { %v10752_v62 = vpop.f32.mrb[64].mxu1 }
 0xf52   :  { %v3301_v50 = vpop.f32.mrb[65].mxu1 }
 0xf53   :  { %10766 = vmatprep.mubr.msk.f32.mxu1 %vm2210_vm3, %v3301_v50 }
 0xf54   :  { %10767 = vmatmul.mubr.msk.f32.vlgmr.msra.gmra.mrb[72].mxu1 %vm2210_vm3, %v10752_v62  ;;  %v11861_v62 = vpack.c.bf16 %v3768_v4, %v3767_v25  ;;  %v4128_v25 = vld [vmem:[%s15701_s15 + $0x98] sm:$0xff] }
 0xf55   :  { %v10755_v44 = vpop.f32.mrb[66].mxu1  ;;  %11832 = vmatpush3.bf16.msra.mxu1 %v11829_v58  ;;  %v9229_v58 = vld [vmem:[%s15698_s10 + $0xb8] sm:$0xff] }
 0xf56   :  { %v3311_v21 = vpop.f32.mrb[67].mxu1  ;;  %v11891_v50 = vpack.c.bf16 %v9229_v58, %v9228_v24  ;;  %v4111_v58 = vld [vmem:[%s15701_s15 + $0x10] sm:$0xff] }
 0xf57   :  { %10769 = vmatprep.mubr.msk.f32.mxu1 %vm2210_vm3, %v3311_v21  ;;  %v3770_v21 = vld [vmem:[%s15698_s10 + $0x48] sm:$0xff] }
 0xf58   :  { %10770 = vmatmul.mubr.msk.f32.gmra.mrb[74].mxu1 %vm2210_vm3, %v10755_v44  ;;  %v3769_v44 = vld [vmem:[%s15698_s10 + $0x40] sm:$0xff] }
 0xf59   :  { %v10758_v16 = vpop.f32.mrb[68].mxu1 }
 0xf5a   :  { %v3321_v39 = vpop.f32.mrb[69].mxu1 }
 0xf5b   :  { %10772 = vmatprep.mubr.msk.f32.mxu1 %vm2210_vm3, %v3321_v39  ;;  %v9231_v39 = vld [vmem:[%s15698_s10 + $0xc8] sm:$0xff] }
 0xf5c   :  { %10773 = vmatmul.mubr.msk.f32.gmra.mrb[76].mxu1 %vm2210_vm3, %v10758_v16  ;;  %v9230_v16 = vld [vmem:[%s15698_s10 + $0xc0] sm:$0xff] }
 0xf5d   :  { %v10761_v63 = vpop.f32.mrb[70].mxu1 }
 0xf5e   :  { %v3331_v28 = vpop.f32.mrb[71].mxu1 }
 0xf5f   :  { %10775 = vmatprep.mubr.msk.f32.mxu1 %vm2210_vm3, %v3331_v28  ;;  %v11894_v28 = vpack.c.bf16 %v9231_v39, %v9230_v16  ;;  %v4113_v39 = vld [vmem:[%s15701_s15 + $0x20] sm:$0xff] }
 0xf60   :  { %10776 = vmatmul.mubr.msk.f32.gmra.mrb[78].mxu1 %vm2210_vm3, %v10761_v63  ;;  %v11864_v63 = vpack.c.bf16 %v3770_v21, %v3769_v44  ;;  %v4130_v44 = vld [vmem:[%s15701_s15 + $0xa8] sm:$0xff] }
 0xf61   :  { %10782 = vmatprep.mubr.msk.f32.mxu1 %vm2210_vm3, %v14447_v49  ;;  %v13245_v49 = vmov 0.0|0.0  }
 0xf62   :  { %11833 = vmatprep.subr.bf16.mxu0 %v13245_v49  ;;  %11875 = vmatprep.subr.bf16.mxu1 %v13245_v49 }
 0xf64   :  { %10783 = vmatmul.mubr.msk.f32.vlgmr.msra.gmra.mrb[72].mxu1 %vm2210_vm3, %v14445_v55  ;;  %v13247_v55 = vmov 0.0  }
 0xf65   :  { %10785 = vmatprep.mubr.msk.f32.mxu1 %vm2210_vm3, %v14451_v13  ;;  %10810 = vmatprep.mubr.msk.f32.mxu0 %vm13246_vm6, %v13247_v55  ;;  %v9218_v13 = vld [vmem:[%s15697_s14 + $0x28] sm:$0xff] }
 0xf68   :  { %10786 = vmatmul.mubr.msk.f32.gmra.mrb[74].mxu1 %vm2210_vm3, %v14449_v61  ;;  %v9217_v61 = vld [vmem:[%s15697_s14 + $0x20] sm:$0xff] }
 0xf69   :  { %10788 = vmatprep.mubr.msk.f32.mxu1 %vm2210_vm3, %v14455_v54 }
 0xf6c   :  { %10789 = vmatmul.mubr.msk.f32.gmra.mrb[76].mxu1 %vm2210_vm3, %v14453_v26  ;;  %v11876_v26 = vpack.c.bf16 %v9218_v13, %v9217_v61  ;;  %v3771_v61 = vld [vmem:[%s15698_s10 + $0x50] sm:$0xff]  ;;  %v3772_v13 = vld [vmem:[%s15698_s10 + $0x58] sm:$0xff] }
 0xf6d   :  { %10791 = vmatprep.mubr.msk.f32.mxu1 %vm2210_vm3, %v14459_v0 }
 0xf6e   :  { %11877 = vmatpush3.bf16.msra.mxu1 %v11876_v26  ;;  %v9232_v26 = vld [vmem:[%s15698_s10 + $0xd0] sm:$0xff] }
 0xf6f   :  { %11878 = vmatprep.subr.bf16.mxu1 %v13245_v49 }
 0xf70   :  { %10792 = vmatmul.mubr.msk.f32.gmra.mrb[78].mxu1 %vm2210_vm3, %v14457_v38 }
 0xf71   :  { %10867 = vmatprep.mubr.msk.f32.mxu1 %vm13246_vm6, %v13247_v55 }
 0xf72   :  { %11880 = vmatpush3.bf16.msra.mxu1 %v11879_v47  ;;  %v4017_v47 = vld [vmem:[%s15699_s11 + $0x10] sm:$0xff] }
 0xf73   :  { %11881 = vmatprep.subr.bf16.mxu1 %v13245_v49  ;;  %v11907_v22 = vpack.c.bf16 %v4017_v47, %v4015_v59  ;;  %v4139_v47 = vld [vmem:[%s15701_s15 + $0xf0] sm:$0xff] }
0x1037   :  { %v10784_v54 = vpop.f32.mrb[72].mxu1 }
0x1038   :  { %v3562_v38 = vpop.f32.mrb[73].mxu1 }
0x1039   :  { %v11834_v0 = vpack.c.bf16 %v10784_v54, %v3562_v38  ;;  %v9233_v54 = vld [vmem:[%s15698_s10 + $0xd8] sm:$0xff]  ;;  %v11867_v38 = vpack.c.bf16 %v3772_v13, %v3771_v61 }
0x103a   :  { %v4132_v61 = vld [vmem:[%s15701_s15 + $0xb8] sm:$0xff] }
0x103b   :  { %v10787_v35 = vpop.f32.mrb[74].mxu1  ;;  %11835 = vmatpush3.bf16.msra.mxu0 %v11834_v0  ;;  %v11897_v0 = vpack.c.bf16 %v9233_v54, %v9232_v26  ;;  %v4115_v54 = vld [vmem:[%s15701_s15 + $0x30] sm:$0xff] }
0x103c   :  { %v3572_v11 = vpop.f32.mrb[75].mxu1  ;;  %11836 = vmatprep.subr.bf16.mxu0 %v13245_v49 }
0x103d   :  { %v11837_v3 = vpack.c.bf16 %v10787_v35, %v3572_v11  ;;  %v3773_v35 = vld [vmem:[%s15698_s10 + $0x60] sm:$0xff]  ;;  %v3774_v11 = vld [vmem:[%s15698_s10 + $0x68] sm:$0xff] }
0x103f   :  { %v10790_v5 = vpop.f32.mrb[76].mxu1  ;;  %11838 = vmatpush3.bf16.msra.mxu0 %v11837_v3  ;;  %v9234_v3 = vld [vmem:[%s15698_s10 + $0xe0] sm:$0xff] }
0x1040   :  { %v3582_v48 = vpop.f32.mrb[77].mxu1  ;;  %11839 = vmatprep.subr.bf16.mxu0 %v13245_v49 }
0x1041   :  { %v11840_v53 = vpack.c.bf16 %v10790_v5, %v3582_v48  ;;  %v9235_v5 = vld [vmem:[%s15698_s10 + $0xe8] sm:$0xff]  ;;  %v11870_v48 = vpack.c.bf16 %v3774_v11, %v3773_v35 }
0x1042   :  { %v4134_v35 = vld [vmem:[%s15701_s15 + $0xc8] sm:$0xff] }
0x1043   :  { %v10793_v57 = vpop.f32.mrb[78].mxu1  ;;  %11841 = vmatpush3.bf16.msra.mxu0 %v11840_v53  ;;  %v11900_v53 = vpack.c.bf16 %v9235_v5, %v9234_v3  ;;  %v4117_v5 = vld [vmem:[%s15701_s15 + $0x40] sm:$0xff] }
0x1044   :  { %v3592_v32 = vpop.f32.mrb[79].mxu1  ;;  %11842 = vmatprep.subr.bf16.mxu0 %v13245_v49 }
0x1045   :  { %v11843_v17 = vpack.c.bf16 %v10793_v57, %v3592_v32  ;;  %v3775_v57 = vld [vmem:[%s15698_s10 + $0x70] sm:$0xff]  ;;  %v3776_v32 = vld [vmem:[%s15698_s10 + $0x78] sm:$0xff] }
0x1046   :  { %v11873_v23 = vpack.c.bf16 %v3776_v32, %v3775_v57  ;;  %v4135_v57 = vld [vmem:[%s15701_s15 + $0xd0] sm:$0xff]  ;;  %v4136_v32 = vld [vmem:[%s15701_s15 + $0xd8] sm:$0xff] }
0x1047   :  { %11844 = vmatpush3.bf16.msra.mxu0 %v11843_v17  ;;  %v9237_v17 = vld [vmem:[%s15698_s10 + $0xf8] sm:$0xff] }
0x1048   :  { %11845 = vmatprep.subr.bf16.mxu0 %v13245_v49 }
0x104a   :  { %10811 = vmatmul.mubr.msk.f32.vlgmr.msra.gmra.mrb[48].mxu0 %vm2380_vm5, %v3601_v12  ;;  %v11903_v12 = vpack.c.bf16 %v9237_v17, %v9236_v19  ;;  %v4119_v19 = vld [vmem:[%s15701_s15 + $0x50] sm:$0xff]  ;;  %v4120_v17 = vld [vmem:[%s15701_s15 + $0x58] sm:$0xff] }
0x104b   :  { %11847 = vmatpush3.bf16.msra.mxu0 %v11846_v18  ;;  %10821 = vmatprep.mubr.msk.f32.mxu0 %vm13246_vm6, %v13247_v55  ;;  %v4016_v18 = vld [vmem:[%s15699_s11 + $0x8] sm:$0xff] }
0x104c   :  { %11848 = vmatprep.subr.bf16.mxu0 %v13245_v49  ;;  %v11905_v42 = vpack.c.bf16 %v4018_v46, %v4016_v18  ;;  %v4137_v18 = vld [vmem:[%s15701_s15 + $0xe0] sm:$0xff]  ;;  %v4138_v46 = vld [vmem:[%s15701_s15 + $0xe8] sm:$0xff] }
0x104f   :  { %11850 = vmatpush3.bf16.msra.mxu0 %v11849_v60  ;;  %v3854_v60 = vld [vmem:[%s15700_s0 + $0x1] ss:$0 sm:$0xff] }
0x1050   :  { %11851 = vmatprep.subr.bf16.mxu0 %v13245_v49 }
0x111d   :  { %v3678_v33 = vpop.f32.mrb[48].mxu0 }
0x111e   :  { %v14555_v9 = vadd.f32 %v9214_v1, %v3678_v33  ;;  %v10812_v6 = vpop.f32.mrb[49].mxu0 }
0x1120   :  { %10822 = vmatmul.mubr.msk.f32.vlgmr.msra.gmra.mrb[50].mxu0 %vm1844_vm2, %v14555_v9  ;;  %10868 = vmatmul.mubr.msk.f32.vlgmr.msra.gmra.mrb[80].mxu1 %vm1844_vm2, %v14555_v9 }
0x1121   :  { %11853 = vmatpush3.bf16.msra.mxu0 %v11852_v41  ;;  %11883 = vmatpush3.bf16.msra.mxu1 %v11882_v20 }
0x1122   :  { %11854 = vmatprep.subr.bf16.mxu0 %v13245_v49  ;;  %11884 = vmatprep.subr.bf16.mxu1 %v13245_v49 }
0x1123   :  { %10856 = vmatprep.mubr.msk.f32.mxu0 %vm13246_vm6, %v13247_v55  ;;  %10902 = vmatprep.mubr.msk.f32.mxu1 %vm13246_vm6, %v13247_v55 }
0x1125   :  { %11856 = vmatpush3.bf16.msra.mxu0 %v11855_v37  ;;  %11886 = vmatpush3.bf16.msra.mxu1 %v11885_v52  ;;  %v4021_v37 = vld [vmem:[%s15699_s11 + $0x30] sm:$0xff]  ;;  %v4125_v52 = vld [vmem:[%s15701_s15 + $0x80] sm:$0xff] }
0x1126   :  { %11857 = vmatprep.subr.bf16.mxu0 %v13245_v49  ;;  %11887 = vmatprep.subr.bf16.mxu1 %v13245_v49  ;;  %v11911_v15 = vpack.c.bf16 %v4021_v37, %v4019_v14  ;;  %v11913_v51 = vpack.c.bf16 %v4126_v27, %v4125_v52  ;;  %v4216_v37 = vld [vmem:[%s15702_s30 + $0x18] sm:$0xff]  ;;  %v12856_v52 = vld [vmem:[#allocation2] sm:$0xff] }
0x1129   :  { %11859 = vmatpush3.bf16.msra.mxu0 %v11858_v56  ;;  %11889 = vmatpush3.bf16.msra.mxu1 %v11888_v36  ;;  %v4110_v56 = vld [vmem:[%s15701_s15 + $0x8] sm:$0xff]  ;;  %v4127_v36 = vld [vmem:[%s15701_s15 + $0x90] sm:$0xff] }
0x112a   :  { %11860 = vmatprep.subr.bf16.mxu0 %v13245_v49  ;;  %11890 = vmatprep.subr.bf16.mxu1 %v13245_v49  ;;  %v11915_v4 = vpack.c.bf16 %v4110_v56, %v4109_v29  ;;  %v11917_v24 = vpack.c.bf16 %v4128_v25, %v4127_v36  ;;  %v4219_v56 = vld [vmem:[%s15702_s30 + $0x30] sm:$0xff]  ;;  %v4220_v36 = vld [vmem:[%s15702_s30 + $0x38] sm:$0xff] }
0x112b   :  { %v11955_v25 = vpack.c.bf16 %v4220_v36, %v4219_v56 }
0x112d   :  { %11862 = vmatpush3.bf16.msra.mxu0 %v11861_v62  ;;  %11892 = vmatpush3.bf16.msra.mxu1 %v11891_v50  ;;  %v4112_v62 = vld [vmem:[%s15701_s15 + $0x18] sm:$0xff]  ;;  %v4129_v50 = vld [vmem:[%s15701_s15 + $0xa0] sm:$0xff] }
0x112e   :  { %11863 = vmatprep.subr.bf16.mxu0 %v13245_v49  ;;  %11893 = vmatprep.subr.bf16.mxu1 %v13245_v49  ;;  %v11919_v21 = vpack.c.bf16 %v4112_v62, %v4111_v58  ;;  %v11921_v16 = vpack.c.bf16 %v4130_v44, %v4129_v50  ;;  %v4223_v58 = vld [vmem:[%s15702_s30 + $0x50] sm:$0xff]  ;;  %v4224_v62 = vld [vmem:[%s15702_s30 + $0x58] sm:$0xff]  ;;  %v4026_v44 = vlaneseq }
0x112f   :  { %v11961_v50 = vpack.c.bf16 %v4224_v62, %v4223_v58  ;;  %v4226_v58 = vld [vmem:[%s15702_s30 + $0x68] sm:$0xff]  ;;  %v9276_v62 = vld [vmem:[%s15701_s15 + $0x1d0] sm:$0xff] }
0x1131   :  { %11865 = vmatpush3.bf16.msra.mxu0 %v11864_v63  ;;  %11895 = vmatpush3.bf16.msra.mxu1 %v11894_v28  ;;  %v4114_v63 = vld [vmem:[%s15701_s15 + $0x28] sm:$0xff]  ;;  %v4131_v28 = vld [vmem:[%s15701_s15 + $0xb0] sm:$0xff] }
0x1132   :  { %11866 = vmatprep.subr.bf16.mxu0 %v13245_v49  ;;  %11896 = vmatprep.subr.bf16.mxu1 %v13245_v49  ;;  %v11923_v13 = vpack.c.bf16 %v4114_v63, %v4113_v39  ;;  %v11925_v26 = vpack.c.bf16 %v4132_v61, %v4131_v28 }
0x1135   :  { %11868 = vmatpush3.bf16.msra.mxu0 %v11867_v38  ;;  %11898 = vmatpush3.bf16.msra.mxu1 %v11897_v0  ;;  %v4116_v38 = vld [vmem:[%s15701_s15 + $0x38] sm:$0xff]  ;;  %v4133_v0 = vld [vmem:[%s15701_s15 + $0xc0] sm:$0xff] }
0x1136   :  { %11869 = vmatprep.subr.bf16.mxu0 %v13245_v49  ;;  %11899 = vmatprep.subr.bf16.mxu1 %v13245_v49  ;;  %v11927_v11 = vpack.c.bf16 %v4116_v38, %v4115_v54  ;;  %v11929_v3 = vpack.c.bf16 %v4134_v35, %v4133_v0 }
0x1139   :  { %11871 = vmatpush3.bf16.msra.mxu0 %v11870_v48  ;;  %11901 = vmatpush3.bf16.msra.mxu1 %v11900_v53  ;;  %v4118_v48 = vld [vmem:[%s15701_s15 + $0x48] sm:$0xff] }
0x113a   :  { %11872 = vmatprep.subr.bf16.mxu0 %v13245_v49  ;;  %11902 = vmatprep.subr.bf16.mxu1 %v13245_v49  ;;  %v11931_v53 = vpack.c.bf16 %v4118_v48, %v4117_v5  ;;  %v9242_v5 = vld [vmem:[%s15699_s11 + $0x50] sm:$0xff] }
0x113d   :  { %11874 = vmatpush3.bf16.msra.mxu0 %v11873_v23  ;;  %11904 = vmatpush3.bf16.msra.mxu1 %v11903_v12  ;;  %v11933_v23 = vpack.c.bf16 %v4136_v32, %v4135_v57  ;;  %v11935_v12 = vpack.c.bf16 %v4120_v17, %v4119_v19  ;;  %v9247_v57 = vld [vmem:[%s15699_s11 + $0x78] sm:$0xff] }
0x113e   :  { %11945 = vmatprep.subr.bf16.mxu1 %v13245_v49  ;;  %11906 = vmatprep.subr.bf16.mxu0 %v11905_v42  ;;  %v4121_v42 = vld [vmem:[%s15701_s15 + $0x60] sm:$0xff] }
0x11f3   :  { %v3756_v30 = vpop.f32.mrb[50].mxu0  ;;  %v3921_v40 = vpop.f32.mrb[80].mxu1 }
0x11f4   :  { %v3757_v1 = vadd.f32 %v3756_v30, %v3686_v34  ;;  %v3922_v33 = vadd.f32 %v3921_v40, %v3854_v60  ;;  %v10823_v41 = vpop.f32.mrb[51].mxu0  ;;  %v10869_v20 = vpop.f32.mrb[81].mxu1  ;;  %v11937_v34 = vpack.c.bf16 %v4138_v46, %v4137_v18  ;;  %v4122_v60 = vld [vmem:[%s15701_s15 + $0x68] sm:$0xff]  ;;  %v4140_v30 = vld [vmem:[%s15701_s15 + $0xf8] sm:$0xff]  ;;  %v9246_v18 = vld [vmem:[%s15699_s11 + $0x70] sm:$0xff] }
0x11f5   :  { %v11939_v59 = vpack.c.bf16 %v4122_v60, %v4121_v42  ;;  %v11941_v40 = vpack.c.bf16 %v4140_v30, %v4139_v47  ;;  %v9243_v41 = vld [vmem:[%s15699_s11 + $0x58] sm:$0xff]  ;;  %v9266_v46 = vld [vmem:[%s15701_s15 + $0x180] sm:$0xff]  ;;  %v9267_v42 = vld [vmem:[%s15701_s15 + $0x188] sm:$0xff] }
0x11f6   :  { %v3760_v6 = vmax.f32 %v3757_v1, 0.0  ;;  %v3925_v43 = vmax.f32 %v3922_v33, 0.0  ;;  %v11943_v1 = vpack.c.bf16 %v4124_v31, %v4123_v7  ;;  %v9241_v33 = vld [vmem:[%s15699_s11 + $0x48] sm:$0xff]  ;;  %v11977_v60 = vpack.c.bf16 %v9267_v42, %v9266_v46  ;;  %v9268_v30 = vld [vmem:[%s15701_s15 + $0x190] sm:$0xff]  ;;  %v4141_v42 = vld [vmem:[%s15700_s0 + $0x6] ss:$0 sm:$0xff] }
0x11f7   :  { %v11969_v20 = vpack.c.bf16 %v9243_v41, %v9241_v33  ;;  %v9251_v47 = vld [vmem:[%s15701_s15 + $0x108] sm:$0xff]  ;;  %v9253_v33 = vld [vmem:[%s15701_s15 + $0x118] sm:$0xff]  ;;  %v9270_v41 = vld [vmem:[%s15701_s15 + $0x1a0] sm:$0xff] }
0x11f8   :  { %10857 = vmatmul.mubr.f32.vlgmr.msra.gmra.mrb[52].mxu0 %v3760_v6  ;;  %10903 = vmatmul.mubr.f32.vlgmr.msra.gmra.mrb[82].mxu1 %v3925_v43  ;;  %v4214_v6 = vld [vmem:[%s15702_s30 + $0x8] sm:$0xff]  ;;  %v4215_v43 = vld [vmem:[%s15702_s30 + $0x10] sm:$0xff] }
0x11f9   :  { %11908 = vmatpush1.bf16.msra.mxu0 %v11907_v22  ;;  %4100 = vmatprep.mubr.f32.mxu0 %v13247_v55  ;;  %v4213_v22 = vld [vmem:[%s15702_s30] sm:$0xff]  ;;  %v11949_v27 = vpack.c.bf16 %v4216_v37, %v4215_v43  ;;  %v9273_v37 = vld [vmem:[%s15701_s15 + $0x1b8] sm:$0xff] }
0x11fa   :  { %11910 = vmatprep.subr.bf16.mxu0 %v11909_v45  ;;  %10937 = vmatprep.mubr.msk.f32.mxu1 %vm13246_vm6, %v13247_v55  ;;  %v13248_v45 = vmov 6   ;;  %v11946_v14 = vpack.c.bf16 %v4214_v6, %v4213_v22  ;;  %v9254_v43 = vld [vmem:[%s15701_s15 + $0x120] sm:$0xff] }
0x11fb   :  { %12624 = vset.pattern.permute.xlu0 %v13248_v45  ;;  %12625 = vset.pattern.permute.xlu1 %v13248_v45  ;;  %v9255_v45 = vld [vmem:[%s15701_s15 + $0x128] sm:$0xff] }
0x11fc   :  { %4600 = vperm.xlu0 %12624, %v12856_v52   ;;  %4874 = vperm.xlu1 %12625, %v13536_v2   ;;  %v4221_v2 = vld [vmem:[%s15702_s30 + $0x40] sm:$0xff]  ;;  %v11987_v52 = vpack.c.bf16 %v9255_v45, %v9254_v43 }
0x11fd   :  { %11912 = vmatpush1.bf16.msra.mxu0 %v11911_v15  ;;  %11947 = vmatpush3.bf16.msra.mxu1 %v11946_v14  ;;  %v4217_v15 = vld [vmem:[%s15702_s30 + $0x20] sm:$0xff]  ;;  %v9272_v14 = vld [vmem:[%s15701_s15 + $0x1b0] sm:$0xff] }
0x11fe   :  { %11914 = vmatprep.subr.bf16.mxu0 %v11913_v51  ;;  %11948 = vmatprep.subr.bf16.mxu1 %v13245_v49  ;;  %v4218_v51 = vld [vmem:[%s15702_s30 + $0x28] sm:$0xff]  ;;  %v4615_v45 = vld [vmem:[%s15703_s8] sm:$0xff] }
0x11ff   :  { %v11952_v29 = vpack.c.bf16 %v4218_v51, %v4217_v15  ;;  %v9256_v15 = vld [vmem:[%s15701_s15 + $0x130] sm:$0xff]  ;;  %v9274_v51 = vld [vmem:[%s15701_s15 + $0x1c0] sm:$0xff] }
0x1200   :  { %9239 = vmatmul.mubr.msk.f32.vlgmr.msra.gmra.mrb[54].mxu0 %vm1844_vm2, %v14555_v9  ;;  %5151 = vperm.xlu1 %12625, %v13553_v8  }
0x1201   :  { %11916 = vmatpush3.bf16.msra.mxu0 %v11915_v4  ;;  %11950 = vmatpush3.bf16.msra.mxu1 %v11949_v27  ;;  %v4222_v4 = vld [vmem:[%s15702_s30 + $0x48] sm:$0xff]  ;;  %v11989_v27 = vpack.c.bf16 %v9273_v37, %v9272_v14 }
0x1202   :  { %11918 = vmatprep.subr.bf16.mxu0 %v11917_v24  ;;  %11951 = vmatprep.subr.bf16.mxu1 %v13245_v49  ;;  %v11958_v24 = vpack.c.bf16 %v4222_v4, %v4221_v2  ;;  %v9259_v2 = vld [vmem:[%s15701_s15 + $0x148] sm:$0xff] }
0x1203   :  { %v4616_v14 = vld [vmem:[%s15703_s8 + $0x8] sm:$0xff] }
0x1205   :  { %11920 = vmatpush3.bf16.msra.mxu0 %v11919_v21  ;;  %11953 = vmatpush3.bf16.msra.mxu1 %v11952_v29  ;;  %v14676_v21 = vshrl.u32 %v4026_v44, 7  ;;  %v9275_v29 = vld [vmem:[%s15701_s15 + $0x1c8] sm:$0xff]  ;;  %v9277_v44 = vld [vmem:[%s15701_s15 + $0x1d8] sm:$0xff] }
0x1206   :  { %11922 = vmatprep.subr.bf16.mxu0 %v11921_v16  ;;  %11954 = vmatprep.subr.bf16.mxu1 %v13245_v49  ;;  %v11993_v36 = vpack.c.bf16 %v9275_v29, %v9274_v51  ;;  %v12034_v51 = vpack.c.bf16 %v4616_v14, %v4615_v45  ;;  %v4429_v45 = vld [vmem:[%s15700_s0 + $0x7] ss:$0 sm:$0xff] }
0x1207   :  { %v14683_v61 = vsub.s32 0, %v14676_v21 }
0x1209   :  { %11924 = vmatpush3.bf16.msra.mxu0 %v11923_v13  ;;  %11956 = vmatpush3.bf16.msra.mxu1 %v11955_v25  ;;  %v9238_v13 = vld [vmem:[%s15700_s0 + $0x2] ss:$8 sm:$0x3] }
0x120a   :  { %11926 = vmatprep.subr.bf16.mxu0 %v11925_v26  ;;  %11957 = vmatprep.subr.bf16.mxu1 %v13245_v49  ;;  %v14687_v26 = vsub.s32 1, %v14676_v21  ;;  %v4029_v54 = vrot.slane %v9238_v13, %v14683_v61  ;;  %v9258_v25 = vld [vmem:[%s15701_s15 + $0x140] sm:$0xff] }
0x120b   :  { %v11995_v4 = vpack.c.bf16 %v9259_v2, %v9258_v25  ;;  %v9288_v2 = vld [vmem:[%s15702_s30 + $0xb0] sm:$0xff] }
0x120c   :  { %v4033_v38 = vrot.slane %v9238_v13, %v14687_v26  ;;  %v9261_v13 = vld [vmem:[%s15701_s15 + $0x158] sm:$0xff] }
0x120d   :  { %11928 = vmatpush3.bf16.msra.mxu0 %v11927_v11  ;;  %11959 = vmatpush3.bf16.msra.mxu1 %v11958_v24  ;;  %v4225_v24 = vld [vmem:[%s15702_s30 + $0x60] sm:$0xff] }
0x120e   :  { %11930 = vmatprep.subr.bf16.mxu0 %v11929_v3  ;;  %11960 = vmatprep.subr.bf16.mxu1 %v13245_v49  ;;  %v9240_v3 = vld [vmem:[%s15699_s11 + $0x40] sm:$0xff] }
0x1211   :  { %11932 = vmatpush3.bf16.msra.mxu0 %v11931_v53  ;;  %11962 = vmatpush3.bf16.msra.mxu1 %v11961_v50  ;;  %v9245_v53 = vld [vmem:[%s15699_s11 + $0x68] sm:$0xff]  ;;  %v11964_v50 = vpack.c.bf16 %v4226_v58, %v4225_v24  ;;  %v4619_v58 = vld [vmem:[%s15703_s8 + $0x20] sm:$0xff] }
0x1212   :  { %11934 = vmatprep.subr.bf16.mxu0 %v11933_v23  ;;  %11963 = vmatprep.subr.bf16.mxu1 %v13245_v49  ;;  %v11971_v23 = vpack.c.bf16 %v9242_v5, %v9240_v3  ;;  %v11973_v17 = vpack.c.bf16 %v9247_v57, %v9245_v53  ;;  %v9279_v3 = vld [vmem:[%s15701_s15 + $0x1e8] sm:$0xff]  ;;  %v9262_v5 = vld [vmem:[%s15701_s15 + $0x160] sm:$0xff] }
0x1215   :  { %11936 = vmatpush3.bf16.msra.mxu0 %v11935_v12  ;;  %v9244_v12 = vld [vmem:[%s15699_s11 + $0x60] sm:$0xff]  ;;  %11965 = vmatpush3.bf16.msra.mxu1 %v11964_v50 }
0x1216   :  { %11938 = vmatprep.subr.bf16.mxu0 %v11937_v34  ;;  %v11975_v34 = vpack.c.bf16 %v9246_v18, %v9244_v12  ;;  %11966 = vmatprep.subr.bf16.mxu1 %v13245_v49  ;;  %v9265_v12 = vld [vmem:[%s15701_s15 + $0x178] sm:$0xff] }
0x1219   :  { %11940 = vmatpush3.bf16.msra.mxu0 %v11939_v59  ;;  %v9250_v59 = vld [vmem:[%s15701_s15 + $0x100] sm:$0xff] }
0x121a   :  { %11942 = vmatprep.subr.bf16.mxu0 %v11941_v40  ;;  %v9269_v40 = vld [vmem:[%s15701_s15 + $0x198] sm:$0xff]  ;;  %v11979_v7 = vpack.c.bf16 %v9251_v47, %v9250_v59  ;;  %v9248_v59 = vld [vmem:[%s15700_s0 + $0x3] ss:$8 sm:$0x3] }
0x121b   :  { %v11981_v31 = vpack.c.bf16 %v9269_v40, %v9268_v30  ;;  %v9282_v47 = vld [vmem:[%s15702_s30 + $0x80] sm:$0xff]  ;;  %v9283_v30 = vld [vmem:[%s15702_s30 + $0x88] sm:$0xff] }
0x121d   :  { %11944 = vmatpush3.bf16.msra.mxu0 %v11943_v1  ;;  %v9252_v1 = vld [vmem:[%s15701_s15 + $0x110] sm:$0xff] }
0x121e   :  { %11970 = vmatprep.subr.bf16.mxu0 %v11969_v20  ;;  %v9271_v20 = vld [vmem:[%s15701_s15 + $0x1a8] sm:$0xff]  ;;  %v11983_v22 = vpack.c.bf16 %v9253_v33, %v9252_v1  ;;  %v4320_v33 = vrot.slane %v9248_v59, %v14687_v26 }
0x121f   :  { %v11985_v6 = vpack.c.bf16 %v9271_v20, %v9270_v41  ;;  %v9284_v41 = vld [vmem:[%s15702_s30 + $0x90] sm:$0xff]  ;;  %v9285_v20 = vld [vmem:[%s15702_s30 + $0x98] sm:$0xff] }
0x1220   :  { %v12013_v37 = vpack.c.bf16 %v9285_v20, %v9284_v41  ;;  %v9297_v41 = vld [vmem:[%s15702_s30 + $0xf8] sm:$0xff] }
0x12cb   :  { %v14678_v16 = vpop.f32.mrb[52].mxu0  ;;  %v14680_v39 = vpop.f32.mrb[82].mxu1 }
0x12cc   :  { %v10858_v63 = vpop.f32.mrb[53].mxu0  ;;  %v10904_v28 = vpop.f32.mrb[83].mxu1 }
0x12cd   :  { %v9260_v63 = vld [vmem:[%s15701_s15 + $0x150] sm:$0xff]  ;;  %v11997_v28 = vpack.c.bf16 %v9277_v44, %v9276_v62  ;;  %v4620_v62 = vld [vmem:[%s15703_s8 + $0x28] sm:$0xff]  ;;  %v9290_v44 = vld [vmem:[%s15702_s30 + $0xc0] sm:$0xff] }
0x12d3   :  { %v4102_v0 = vpop.f32.mrb[54].mxu0 }
0x12d4   :  { %v4103_v35 = vadd.f32 %v4102_v0, %v4029_v54  ;;  %v4104_v11 = vpop.f32.mrb[55].mxu0  ;;  %v11999_v54 = vpack.c.bf16 %v9261_v13, %v9260_v63  ;;  %v4228_v0 = vld [vmem:[%s15702_s30 + $0x78] sm:$0xff]  ;;  %v9291_v63 = vld [vmem:[%s15702_s30 + $0xc8] sm:$0xff]  ;;  %v4621_v13 = vld [vmem:[%s15703_s8 + $0x30] sm:$0xff] }
0x12d5   :  { %v4105_v48 = vadd.f32 %v4104_v11, %v4033_v38  ;;  %v4227_v38 = vld [vmem:[%s15702_s30 + $0x70] sm:$0xff] }
0x12d6   :  { %v4107_v19 = vmax.f32 %v4103_v35, 0.0  ;;  %v9278_v35 = vld [vmem:[%s15701_s15 + $0x1e0] sm:$0xff]  ;;  %v11967_v11 = vpack.c.bf16 %v4228_v0, %v4227_v38  ;;  %v12022_v38 = vpack.c.bf16 %v9291_v63, %v9290_v44 }
0x12d7   :  { %v4108_v32 = vmax.f32 %v4105_v48, 0.0  ;;  %v9263_v48 = vld [vmem:[%s15701_s15 + $0x168] sm:$0xff]  ;;  %v12001_v53 = vpack.c.bf16 %v9279_v3, %v9278_v35  ;;  %v4623_v35 = vld [vmem:[%s15703_s8 + $0x40] sm:$0xff] }
0x12d8   :  { %v12003_v57 = vpack.c.bf16 %v9263_v48, %v9262_v5  ;;  %11968 = vmatpush3.bf16.msra.mxu1 %v11967_v11  ;;  %v4624_v11 = vld [vmem:[%s15703_s8 + $0x48] sm:$0xff]  ;;  %v4625_v5 = vld [vmem:[%s15703_s8 + $0x50] sm:$0xff]  ;;  %v4626_v48 = vld [vmem:[%s15703_s8 + $0x58] sm:$0xff] }
0x12d9   :  { %4206 = vmatprep.mubr.f32.mxu0 %v4108_v32  ;;  %v9280_v32 = vld [vmem:[%s15701_s15 + $0x1f0] sm:$0xff]  ;;  %12009 = vmatprep.subr.bf16.mxu1 %v13245_v49  ;;  %v12046_v3 = vpack.c.bf16 %v4624_v11, %v4623_v35  ;;  %v4797_v11 = vld [vmem:[%s15705_s18 + $0x18] sm:$0xff] }
0x12da   :  { %4207 = vmatmul.mubr.f32.vlgmr.msra.gmra.mrb[56].mxu0 %v4107_v19  ;;  %v4796_v35 = vld [vmem:[%s15705_s18 + $0x10] sm:$0xff] }
0x12db   :  { %11972 = vmatpush1.bf16.msra.mxu0 %v11971_v23  ;;  %4387 = vmatprep.mubr.f32.mxu0 %v13247_v55  ;;  %v9281_v23 = vld [vmem:[%s15701_s15 + $0x1f8] sm:$0xff] }
0x12dc   :  { %11974 = vmatprep.subr.bf16.mxu0 %v11973_v17  ;;  %v12005_v19 = vpack.c.bf16 %v9281_v23, %v9280_v32  ;;  %v9264_v17 = vld [vmem:[%s15701_s15 + $0x170] sm:$0xff]  ;;  %v4601_v32 = vpop.permute.xlu0 %4600  ;;  %v4627_v23 = vld [vmem:[%s15703_s8 + $0x60] sm:$0xff] }
0x12dd   :  { %v12007_v18 = vpack.c.bf16 %v9265_v12, %v9264_v17 }
0x12df   :  { %11976 = vmatpush1.bf16.msra.mxu0 %v11975_v34 }
0x12e0   :  { %11978 = vmatprep.subr.bf16.mxu0 %v11977_v60 }
0x12e2   :  { %9249 = vmatmul.mubr.msk.f32.vlgmr.msra.gmra.mrb[58].mxu0 %vm1844_vm2, %v14555_v9  ;;  %v9257_v9 = vld [vmem:[%s15701_s15 + $0x138] sm:$0xff] }
0x12e3   :  { %11980 = vmatpush3.bf16.msra.mxu0 %v11979_v7  ;;  %v11991_v56 = vpack.c.bf16 %v9257_v9, %v9256_v15  ;;  %v4316_v7 = vrot.slane %v9248_v59, %v14683_v61  ;;  %v9287_v15 = vld [vmem:[%s15702_s30 + $0xa8] sm:$0xff] }
0x12e4   :  { %11982 = vmatprep.subr.bf16.mxu0 %v11981_v31  ;;  %v12010_v31 = vpack.c.bf16 %v9283_v30, %v9282_v47  ;;  %v9292_v47 = vld [vmem:[%s15702_s30 + $0xd0] sm:$0xff]  ;;  %v9293_v30 = vld [vmem:[%s15702_s30 + $0xd8] sm:$0xff] }
0x12e7   :  { %11984 = vmatpush3.bf16.msra.mxu0 %v11983_v22 }
0x12e8   :  { %11986 = vmatprep.subr.bf16.mxu0 %v11985_v6 }
0x12eb   :  { %11988 = vmatpush3.bf16.msra.mxu0 %v11987_v52 }
0x12ec   :  { %11990 = vmatprep.subr.bf16.mxu0 %v11989_v27  ;;  %v9286_v27 = vld [vmem:[%s15702_s30 + $0xa0] sm:$0xff] }
0x12ed   :  { %v12016_v25 = vpack.c.bf16 %v9287_v15, %v9286_v27  ;;  %v4708_v27 = vld [vmem:[%s15704_s16 + $0x8] sm:$0xff] }
0x12ef   :  { %11992 = vmatpush3.bf16.msra.mxu0 %v11991_v56  ;;  %v4617_v56 = vld [vmem:[%s15703_s8 + $0x10] sm:$0xff] }
0x12f0   :  { %11994 = vmatprep.subr.bf16.mxu0 %v11993_v36  ;;  %v4618_v36 = vld [vmem:[%s15703_s8 + $0x18] sm:$0xff] }
0x12f1   :  { %v12037_v24 = vpack.c.bf16 %v4618_v36, %v4617_v56  ;;  %v4710_v56 = vld [vmem:[%s15704_s16 + $0x18] sm:$0xff] }
0x12f3   :  { %11996 = vmatpush3.bf16.msra.mxu0 %v11995_v4  ;;  %v9289_v4 = vld [vmem:[%s15702_s30 + $0xb8] sm:$0xff] }
0x12f4   :  { %11998 = vmatprep.subr.bf16.mxu0 %v11997_v28  ;;  %v12019_v50 = vpack.c.bf16 %v9289_v4, %v9288_v2  ;;  %v12040_v28 = vpack.c.bf16 %v4620_v62, %v4619_v58  ;;  %v4712_v2 = vld [vmem:[%s15704_s16 + $0x28] sm:$0xff]  ;;  %v4714_v58 = vld [vmem:[%s15704_s16 + $0x38] sm:$0xff] }
0x12f7   :  { %12000 = vmatpush3.bf16.msra.mxu0 %v11999_v54  ;;  %v4622_v54 = vld [vmem:[%s15703_s8 + $0x38] sm:$0xff] }
0x12f8   :  { %12002 = vmatprep.subr.bf16.mxu0 %v12001_v53  ;;  %v12043_v0 = vpack.c.bf16 %v4622_v54, %v4621_v13  ;;  %v12049_v53 = vpack.c.bf16 %v4626_v48, %v4625_v5  ;;  %v4794_v54 = vld [vmem:[%s15705_s18] sm:$0xff]  ;;  %v9325_v48 = vld [vmem:[%s15704_s16 + $0x48] sm:$0xff] }
0x12f9   :  { %v9324_v5 = vld [vmem:[%s15704_s16 + $0x40] sm:$0xff] }
0x12fb   :  { %12004 = vmatpush3.bf16.msra.mxu0 %v12003_v57  ;;  %v9299_v57 = vld [vmem:[#allocation14] ss:$0 sm:$0xff] }
0x12fc   :  { %12006 = vmatprep.subr.bf16.mxu0 %v12005_v19  ;;  %v4628_v19 = vld [vmem:[%s15703_s8 + $0x68] sm:$0xff]  ;;  %v4607_v17 = vmul.f32 %v9299_v57, %v4601_v32  ;;  %v12100_v57 = vpack.c.bf16 %v9325_v48, %v9324_v5  ;;  %v9327_v32 = vld [vmem:[%s15704_s16 + $0x58] sm:$0xff] }
0x12fd   :  { %v12052_v12 = vpack.c.bf16 %v4628_v19, %v4627_v23  ;;  %v9328_v19 = vld [vmem:[%s15704_s16 + $0x60] sm:$0xff]  ;;  %v9342_v5 = vld [vmem:[%s15703_s8 + $0x108] sm:$0xff] }
0x12ff   :  { %12008 = vmatpush3.bf16.msra.mxu0 %v12007_v18  ;;  %v9300_v18 = vld [vmem:[#allocation15] ss:$0 sm:$0xff] }
0x1300   :  { %12033 = vmatprep.subr.bf16.mxu0 %v13245_v49 }
0x13ad   :  { %v9989_v46 = vpop.f32.mrb[56].mxu0 }
0x13ae   :  { %v9990_v34 = vpop.f32.mrb[57].mxu0 }
0x13af   :  { %v9991_v60 = vadd.f32 %v9990_v34, %v9989_v46  ;;  %v4629_v46 = vld [vmem:[%s15703_s8 + $0x70] sm:$0xff]  ;;  %v4613_v34 = vadd.f32 %v9300_v18, %v4607_v17  ;;  %v9329_v17 = vld [vmem:[%s15704_s16 + $0x68] sm:$0xff] }
0x13b1   :  { %v4209_v40 = vadd.f32 %v9991_v60, %v4141_v42  ;;  %v4630_v42 = vld [vmem:[%s15703_s8 + $0x78] sm:$0xff]  ;;  %v4614_v59 = vmax.f32 %v4613_v34, 0.0  ;;  %v9307_v34 = vld [vmem:[%s15703_s8 + $0x80] sm:$0xff] }
0x13b2   :  { %v12055_v60 = vpack.c.bf16 %v4630_v42, %v4629_v46  ;;  %v9302_v42 = vld [vmem:[#allocation17 + $0x3] ss:$0 sm:$0xff] }
0x13b3   :  { %v4212_v1 = vmax.f32 %v4209_v40, 0.0  ;;  %v12025_v40 = vpack.c.bf16 %v9293_v30, %v9292_v47 }
0x13b5   :  { %v4389_v22 = vpop.f32.mrb[58].mxu0  ;;  %10938 = vmatmul.mubr.f32.vlgmr.msra.gmra.mrb[84].mxu1 %v4212_v1 }
0x13b6   :  { %v4390_v6 = vadd.f32 %v4389_v22, %v4316_v7  ;;  %v4391_v43 = vpop.f32.mrb[59].mxu0  ;;  %12011 = vmatpush3.bf16.msra.mxu1 %v12010_v31  ;;  %10972 = vmatprep.mubr.msk.f32.mxu1 %vm13246_vm6, %v13247_v55  ;;  %v9294_v7 = vld [vmem:[%s15702_s30 + $0xe0] sm:$0xff]  ;;  %v9295_v31 = vld [vmem:[%s15702_s30 + $0xe8] sm:$0xff] }
0x13b7   :  { %v4392_v52 = vadd.f32 %v4391_v43, %v4320_v33  ;;  %12012 = vmatprep.subr.bf16.mxu1 %v13245_v49  ;;  %v12028_v1 = vpack.c.bf16 %v9295_v31, %v9294_v7  ;;  %v9296_v33 = vld [vmem:[%s15702_s30 + $0xf0] sm:$0xff] }
0x13b8   :  { %v4394_v29 = vmax.f32 %v4390_v6, 0.0  ;;  %v12031_v20 = vpack.c.bf16 %v9297_v41, %v9296_v33  ;;  %v9309_v31 = vld [vmem:[%s15703_s8 + $0x90] sm:$0xff]  ;;  %v9311_v41 = vld [vmem:[%s15703_s8 + $0xa0] sm:$0xff] }
0x13b9   :  { %v4395_v9 = vmax.f32 %v4392_v52, 0.0  ;;  %v4707_v52 = vld [vmem:[%s15704_s16] sm:$0xff] }
0x13ba   :  { %12014 = vmatpush3.bf16.msra.mxu1 %v12013_v37 }
0x13bb   :  { %4494 = vmatprep.mubr.f32.mxu0 %v4395_v9  ;;  %12015 = vmatprep.subr.bf16.mxu1 %v13245_v49  ;;  %v12058_v9 = vpack.c.bf16 %v4708_v27, %v4707_v52  ;;  %v9316_v52 = vld [vmem:[%s15703_s8 + $0xc8] sm:$0xff] }
0x13bc   :  { %4495 = vmatmul.mubr.f32.vlgmr.msra.gmra.mrb[60].mxu0 %v4394_v29  ;;  %v4709_v29 = vld [vmem:[%s15704_s16 + $0x10] sm:$0xff] }
0x13bd   :  { %12035 = vmatpush3.bf16.msra.mxu0 %v12034_v51  ;;  %11007 = vmatprep.mubr.msk.f32.mxu0 %vm13246_vm6, %v13247_v55  ;;  %v12061_v36 = vpack.c.bf16 %v4710_v56, %v4709_v29  ;;  %v9319_v56 = vld [vmem:[%s15703_s8 + $0xe0] sm:$0xff] }
0x13be   :  { %12036 = vmatprep.subr.bf16.mxu0 %v13245_v49  ;;  %12017 = vmatpush3.bf16.msra.mxu1 %v12016_v25  ;;  %v4711_v25 = vld [vmem:[%s15704_s16 + $0x20] sm:$0xff] }
0x13bf   :  { %12018 = vmatprep.subr.bf16.mxu1 %v13245_v49  ;;  %v12064_v4 = vpack.c.bf16 %v4712_v2, %v4711_v25  ;;  %v4875_v25 = vpop.permute.xlu1 %4874 }
0x13c1   :  { %12038 = vmatpush3.bf16.msra.mxu0 %v12037_v24  ;;  %v4713_v24 = vld [vmem:[%s15704_s16 + $0x30] sm:$0xff] }
0x13c2   :  { %12039 = vmatprep.subr.bf16.mxu0 %v13245_v49  ;;  %12020 = vmatpush3.bf16.msra.mxu1 %v12019_v50  ;;  %v12067_v62 = vpack.c.bf16 %v4714_v58, %v4713_v24  ;;  %v9301_v50 = vld [vmem:[#allocation17] ss:$0 sm:$0xff] }
0x13c3   :  { %12021 = vmatprep.subr.bf16.mxu1 %v13245_v49  ;;  %v9321_v58 = vld [vmem:[%s15703_s8 + $0xf0] sm:$0xff] }
0x13c5   :  { %12041 = vmatpush3.bf16.msra.mxu0 %v12040_v28 }
0x13c6   :  { %12042 = vmatprep.subr.bf16.mxu0 %v13245_v49  ;;  %12023 = vmatpush3.bf16.msra.mxu1 %v12022_v38  ;;  %v4795_v38 = vld [vmem:[%s15705_s18 + $0x8] sm:$0xff] }
0x13c7   :  { %12024 = vmatprep.subr.bf16.mxu1 %v13245_v49 }
0x13c9   :  { %12044 = vmatpush3.bf16.msra.mxu0 %v12043_v0  ;;  %v12070_v0 = vpack.c.bf16 %v4795_v38, %v4794_v54  ;;  %v9334_v38 = vld [vmem:[%s15705_s18 + $0x20] sm:$0xff] }
0x13ca   :  { %12045 = vmatprep.subr.bf16.mxu0 %v13245_v49  ;;  %12026 = vmatpush3.bf16.msra.mxu1 %v12025_v40 }
0x13cb   :  { %12027 = vmatprep.subr.bf16.mxu1 %v13245_v49 }
0x13cd   :  { %12047 = vmatpush3.bf16.msra.mxu0 %v12046_v3  ;;  %v12073_v3 = vpack.c.bf16 %v4797_v11, %v4796_v35  ;;  %v9323_v11 = vld [vmem:[#allocation17 + $0x1] ss:$0 sm:$0xff] }
0x13ce   :  { %12048 = vmatprep.subr.bf16.mxu0 %v13245_v49  ;;  %12029 = vmatpush3.bf16.msra.mxu1 %v12028_v1  ;;  %v9310_v1 = vld [vmem:[%s15703_s8 + $0x98] sm:$0xff] }
0x13cf   :  { %12030 = vmatprep.subr.bf16.mxu1 %v13245_v49  ;;  %v12079_v33 = vpack.c.bf16 %v9310_v1, %v9309_v31  ;;  %v9351_v31 = vld [vmem:[%s15703_s8 + $0x150] sm:$0xff]  ;;  %v9352_v1 = vld [vmem:[%s15703_s8 + $0x158] sm:$0xff] }
0x13d1   :  { %12050 = vmatpush3.bf16.msra.mxu0 %v12049_v53  ;;  %v9326_v53 = vld [vmem:[%s15704_s16 + $0x50] sm:$0xff] }
0x13d2   :  { %12051 = vmatprep.subr.bf16.mxu0 %v13245_v49  ;;  %12032 = vmatpush3.bf16.msra.mxu1 %v12031_v20  ;;  %v12103_v23 = vpack.c.bf16 %v9327_v32, %v9326_v53  ;;  %v9312_v20 = vld [vmem:[%s15703_s8 + $0xa8] sm:$0xff] }
0x13d3   :  { %12057 = vmatprep.subr.bf16.mxu1 %v13245_v49 }
0x13d5   :  { %12053 = vmatpush3.bf16.msra.mxu0 %v12052_v12  ;;  %v12106_v12 = vpack.c.bf16 %v9329_v17, %v9328_v19  ;;  %v9343_v19 = vld [vmem:[%s15703_s8 + $0x110] sm:$0xff]  ;;  %v9344_v17 = vld [vmem:[%s15703_s8 + $0x118] sm:$0xff] }
0x13d6   :  { %12054 = vmatprep.subr.bf16.mxu0 %v13245_v49 }
0x13d9   :  { %12056 = vmatpush3.bf16.msra.mxu0 %v12055_v60  ;;  %v9308_v60 = vld [vmem:[%s15703_s8 + $0x88] sm:$0xff] }
0x13da   :  { %12099 = vmatprep.subr.bf16.mxu0 %v13245_v49  ;;  %v12076_v40 = vpack.c.bf16 %v9308_v60, %v9307_v34  ;;  %v9347_v60 = vld [vmem:[%s15703_s8 + $0x130] sm:$0xff] }
0x13dc   :  { %11008 = vmatmul.mubr.f32.vlgmr.msra.gmra.mrb[62].mxu0 %v4614_v59 }
0x13dd   :  { %11091 = vmatprep.mubr.msk.f32.mxu0 %vm13246_vm6, %v13247_v55  ;;  %12101 = vmatpush3.bf16.msra.mxu0 %v12100_v57 }
0x13de   :  { %12102 = vmatprep.subr.bf16.mxu0 %v13245_v49 }
0x13e1   :  { %12104 = vmatpush3.bf16.msra.mxu0 %v12103_v23 }
0x13e2   :  { %12105 = vmatprep.subr.bf16.mxu0 %v13245_v49 }
0x13e5   :  { %12107 = vmatpush3.bf16.msra.mxu0 %v12106_v12  ;;  %v12121_v12 = vpack.c.bf16 %v9344_v17, %v9343_v19 }
0x13e6   :  { %12108 = vmatprep.subr.bf16.mxu0 %v13245_v49 }
0x1488   :  { %v14797_v22 = vpop.f32.mrb[84].mxu1 }
0x1489   :  { %v10939_v6 = vpop.f32.mrb[85].mxu1 }
0x148a   :  { %v12082_v6 = vpack.c.bf16 %v9312_v20, %v9311_v41  ;;  %v9353_v41 = vld [vmem:[%s15703_s8 + $0x160] sm:$0xff]  ;;  %v9354_v20 = vld [vmem:[%s15703_s8 + $0x168] sm:$0xff] }
0x148f   :  { %v10041_v43 = vpop.f32.mrb[60].mxu0 }
0x1490   :  { %v10042_v14 = vpop.f32.mrb[61].mxu0 }
0x1491   :  { %v10043_v37 = vadd.f32 %v10042_v14, %v10041_v43  ;;  %v9313_v43 = vld [vmem:[%s15703_s8 + $0xb0] sm:$0xff] }
0x1493   :  { %v4497_v15 = vadd.f32 %v10043_v37, %v4429_v45  ;;  %v9314_v45 = vld [vmem:[%s15703_s8 + $0xb8] sm:$0xff]  ;;  %v9315_v37 = vld [vmem:[%s15703_s8 + $0xc0] sm:$0xff] }
0x1494   :  { %v12085_v14 = vpack.c.bf16 %v9314_v45, %v9313_v43  ;;  %v12088_v27 = vpack.c.bf16 %v9316_v52, %v9315_v37  ;;  %v5152_v43 = vpop.permute.xlu1 %5151  ;;  %v12136_v45 = vpack.c.bf16 %v9354_v20, %v9353_v41  ;;  %v9355_v37 = vld [vmem:[%s15703_s8 + $0x170] sm:$0xff]  ;;  %v9356_v52 = vld [vmem:[%s15703_s8 + $0x178] sm:$0xff] }
0x1495   :  { %v4500_v51 = vmax.f32 %v4497_v15, 0.0  ;;  %v9317_v15 = vld [vmem:[%s15703_s8 + $0xd0] sm:$0xff]  ;;  %v5434_v41 = vld [vmem:[%s15706_s19 + $0x38] sm:$0xff] }
0x1497   :  { %10973 = vmatmul.mubr.f32.vlgmr.msra.gmra.mrb[86].mxu1 %v4500_v51  ;;  %v9305_v51 = vld [vmem:[#allocation14 + $0x1] ss:$0 sm:$0xff] }
0x1498   :  { %12059 = vmatpush3.bf16.msra.mxu1 %v12058_v9  ;;  %11026 = vmatprep.mubr.msk.f32.mxu1 %vm13246_vm6, %v13247_v55  ;;  %v9318_v9 = vld [vmem:[%s15703_s8 + $0xd8] sm:$0xff]  ;;  %v4881_v2 = vmul.f32 %v9305_v51, %v4875_v25  ;;  %v9332_v25 = vld [vmem:[#allocation17 + $0x4] ss:$0 sm:$0xff] }
0x1499   :  { %12060 = vmatprep.subr.bf16.mxu1 %v13245_v49  ;;  %v12091_v29 = vpack.c.bf16 %v9318_v9, %v9317_v15  ;;  %v12139_v15 = vpack.c.bf16 %v9356_v52, %v9355_v37  ;;  %v5438_v37 = vld [vmem:[%s15706_s19 + $0x58] sm:$0xff] }
0x149c   :  { %12062 = vmatpush3.bf16.msra.mxu1 %v12061_v36  ;;  %v9320_v36 = vld [vmem:[%s15703_s8 + $0xe8] sm:$0xff] }
0x149d   :  { %12063 = vmatprep.subr.bf16.mxu1 %v13245_v49  ;;  %v12094_v24 = vpack.c.bf16 %v9320_v36, %v9319_v56  ;;  %v9337_v56 = vld [vmem:[%s15705_s18 + $0x38] sm:$0xff] }
0x14a0   :  { %12065 = vmatpush3.bf16.msra.mxu1 %v12064_v4  ;;  %v9306_v4 = vld [vmem:[#allocation15 + $0x1] ss:$0 sm:$0xff] }
0x14a1   :  { %12066 = vmatprep.subr.bf16.mxu1 %v13245_v49 }
0x14a4   :  { %12068 = vmatpush3.bf16.msra.mxu1 %v12067_v62  ;;  %v9322_v62 = vld [vmem:[%s15703_s8 + $0xf8] sm:$0xff] }
0x14a5   :  { %12069 = vmatprep.subr.bf16.mxu1 %v13245_v49 }
0x14af   :  { %v4702_v44 = vpop.f32.mrb[62].mxu0 }
0x14b0   :  { %v4703_v63 = vadd.f32 %v9301_v50, %v4702_v44  ;;  %v11009_v28 = vpop.f32.mrb[63].mxu0  ;;  %v4887_v50 = vadd.f32 %v9306_v4, %v4881_v2  ;;  %v12097_v44 = vpack.c.bf16 %v9322_v62, %v9321_v58  ;;  %v9358_v2 = vld [vmem:[%s15704_s16 + $0x80] sm:$0xff]  ;;  %v9359_v4 = vld [vmem:[%s15704_s16 + $0x88] sm:$0xff] }
0x14b1   :  { %v9330_v28 = vld [vmem:[%s15704_s16 + $0x70] sm:$0xff] }
0x14b2   :  { %v4706_v13 = vmax.f32 %v4703_v63, 0.0  ;;  %v4888_v63 = vmax.f32 %v4887_v50, 0.0  ;;  %v12142_v50 = vpack.c.bf16 %v9359_v4, %v9358_v2 }
0x14b4   :  { %11027 = vmatmul.mubr.msk.f32.vlgmr.msra.gmra.mrb[88].mxu1 %vm2380_vm5, %v4706_v13  ;;  %v9331_v13 = vld [vmem:[%s15704_s16 + $0x78] sm:$0xff] }
0x14b5   :  { %11037 = vmatprep.mubr.msk.f32.mxu1 %vm13246_vm6, %v13247_v55  ;;  %12071 = vmatpush3.bf16.msra.mxu1 %v12070_v0  ;;  %v12109_v54 = vpack.c.bf16 %v9331_v13, %v9330_v28  ;;  %v9335_v0 = vld [vmem:[%s15705_s18 + $0x28] sm:$0xff]  ;;  %v9361_v28 = vld [vmem:[%s15704_s16 + $0x98] sm:$0xff] }
0x14b6   :  { %12072 = vmatprep.subr.bf16.mxu1 %v13245_v49  ;;  %v12112_v35 = vpack.c.bf16 %v9335_v0, %v9334_v38  ;;  %v9363_v38 = vld [vmem:[%s15704_s16 + $0xa8] sm:$0xff] }
0x14b7   :  { %12110 = vmatpush3.bf16.msra.mxu0 %v12109_v54  ;;  %v9362_v54 = vld [vmem:[%s15704_s16 + $0xa0] sm:$0xff] }
0x14b8   :  { %12117 = vmatprep.subr.bf16.mxu0 %v13245_v49  ;;  %v12148_v0 = vpack.c.bf16 %v9363_v38, %v9362_v54  ;;  %v5536_v54 = vld [vmem:[%s15707_s27 + $0x38] sm:$0xff]  ;;  %v3777_v38 = vld [vmem:[%s15700_s0 + $0x4] ss:$0 sm:$0xff] }
0x14b9   :  { %12074 = vmatpush3.bf16.msra.mxu1 %v12073_v3  ;;  %v9341_v3 = vld [vmem:[%s15703_s8 + $0x100] sm:$0xff] }
0x14ba   :  { %12075 = vmatprep.subr.bf16.mxu1 %v13245_v49  ;;  %v12118_v32 = vpack.c.bf16 %v9342_v5, %v9341_v3  ;;  %v9357_v5 = vld [vmem:[#allocation17 + $0x2] ss:$0 sm:$0xff] }
0x156a   :  { %v14832_v18 = vpop.f32.mrb[86].mxu1 }
0x156b   :  { %v10974_v46 = vpop.f32.mrb[87].mxu1 }
0x156c   :  { %v9345_v46 = vld [vmem:[%s15703_s8 + $0x120] sm:$0xff] }
0x1587   :  { %v4789_v59 = vpop.f32.mrb[88].mxu1 }
0x1588   :  { %v4790_v47 = vadd.f32 %v9302_v42, %v4789_v59  ;;  %v11028_v30 = vpop.f32.mrb[89].mxu1  ;;  %v9346_v42 = vld [vmem:[%s15703_s8 + $0x128] sm:$0xff]  ;;  %v9348_v59 = vld [vmem:[%s15703_s8 + $0x138] sm:$0xff] }
0x1589   :  { %v12124_v34 = vpack.c.bf16 %v9346_v42, %v9345_v46  ;;  %v9349_v30 = vld [vmem:[%s15703_s8 + $0x140] sm:$0xff]  ;;  %v9371_v46 = vld [vmem:[%s15705_s18 + $0x58] sm:$0xff] }
0x158a   :  { %v4793_v7 = vmax.f32 %v4790_v47, 0.0  ;;  %v12127_v47 = vpack.c.bf16 %v9348_v59, %v9347_v60  ;;  %v5428_v60 = vld [vmem:[%s15706_s19 + $0x8] sm:$0xff]  ;;  %v5429_v59 = vld [vmem:[%s15706_s19 + $0x10] sm:$0xff] }
0x158c   :  { %11038 = vmatmul.mubr.msk.f32.vlgmr.msra.gmra.mrb[90].mxu1 %vm1844_vm2, %v4793_v7 }
0x158d   :  { %12077 = vmatpush3.bf16.msra.mxu1 %v12076_v40  ;;  %11072 = vmatprep.mubr.msk.f32.mxu1 %vm13246_vm6, %v13247_v55  ;;  %v9350_v40 = vld [vmem:[%s15703_s8 + $0x148] sm:$0xff] }
0x158e   :  { %12078 = vmatprep.subr.bf16.mxu1 %v13245_v49  ;;  %v12130_v7 = vpack.c.bf16 %v9350_v40, %v9349_v30  ;;  %v5430_v30 = vld [vmem:[%s15706_s19 + $0x18] sm:$0xff] }
0x158f   :  { %v12163_v40 = vpack.c.bf16 %v5430_v30, %v5429_v59  ;;  %v9395_v59 = vld [vmem:[%s15707_s27 + $0xc8] sm:$0xff] }
0x1591   :  { %12080 = vmatpush3.bf16.msra.mxu1 %v12079_v33  ;;  %v12133_v33 = vpack.c.bf16 %v9352_v1, %v9351_v31  ;;  %v5432_v31 = vld [vmem:[%s15706_s19 + $0x28] sm:$0xff] }
0x1592   :  { %12081 = vmatprep.subr.bf16.mxu1 %v13245_v49 }
0x1595   :  { %12083 = vmatpush3.bf16.msra.mxu1 %v12082_v6  ;;  %v9339_v6 = vld [vmem:[#allocation14 + $0x2] ss:$0 sm:$0xff] }
0x1596   :  { %12084 = vmatprep.subr.bf16.mxu1 %v13245_v49 }
0x1599   :  { %12086 = vmatpush3.bf16.msra.mxu1 %v12085_v14  ;;  %v5158_v14 = vmul.f32 %v9339_v6, %v5152_v43  ;;  %v5435_v6 = vld [vmem:[%s15706_s19 + $0x40] sm:$0xff]  ;;  %v5436_v43 = vld [vmem:[%s15706_s19 + $0x48] sm:$0xff] }
0x159a   :  { %12087 = vmatprep.subr.bf16.mxu1 %v13245_v49 }
0x159d   :  { %12089 = vmatpush3.bf16.msra.mxu1 %v12088_v27  ;;  %v9340_v27 = vld [vmem:[#allocation15 + $0x2] ss:$0 sm:$0xff] }
0x159e   :  { %12090 = vmatprep.subr.bf16.mxu1 %v13245_v49  ;;  %v5164_v9 = vadd.f32 %v9340_v27, %v5158_v14  ;;  %v5437_v14 = vld [vmem:[%s15706_s19 + $0x50] sm:$0xff]  ;;  %v5439_v27 = vld [vmem:[%s15706_s19 + $0x60] sm:$0xff] }
0x159f   :  { %v12175_v52 = vpack.c.bf16 %v5438_v37, %v5437_v14  ;;  %v5441_v37 = vld [vmem:[%s15706_s19 + $0x70] sm:$0xff] }
0x15a0   :  { %v5165_v51 = vmax.f32 %v5164_v9, 0.0 }
0x15a1   :  { %12092 = vmatpush3.bf16.msra.mxu1 %v12091_v29  ;;  %v9336_v29 = vld [vmem:[%s15705_s18 + $0x30] sm:$0xff] }
0x15a2   :  { %12093 = vmatprep.subr.bf16.mxu1 %v13245_v49  ;;  %v12115_v36 = vpack.c.bf16 %v9337_v56, %v9336_v29  ;;  %v5529_v29 = vld [vmem:[%s15707_s27] sm:$0xff]  ;;  %v5530_v56 = vld [vmem:[%s15707_s27 + $0x8] sm:$0xff] }
0x15a3   :  { %v12184_v4 = vpack.c.bf16 %v5530_v56, %v5529_v29 }
0x15a5   :  { %12095 = vmatpush3.bf16.msra.mxu1 %v12094_v24 }
0x15a6   :  { %12096 = vmatprep.subr.bf16.mxu1 %v13245_v49 }
0x15a9   :  { %12098 = vmatpush3.bf16.msra.mxu1 %v12097_v44 }
0x15aa   :  { %12111 = vmatprep.subr.bf16.mxu1 %v13245_v49 }
0x15ac   :  { %11073 = vmatmul.mubr.f32.vlgmr.msra.gmra.mrb[92].mxu1 %v4888_v63  ;;  %v9360_v63 = vld [vmem:[%s15704_s16 + $0x90] sm:$0xff] }
0x15ad   :  { %11102 = vmatprep.mubr.msk.f32.mxu1 %vm13246_vm6, %v13247_v55  ;;  %12113 = vmatpush3.bf16.msra.mxu1 %v12112_v35  ;;  %v12145_v13 = vpack.c.bf16 %v9361_v28, %v9360_v63  ;;  %v9364_v35 = vld [vmem:[%s15704_s16 + $0xb0] sm:$0xff]  ;;  %v5534_v63 = vld [vmem:[%s15707_s27 + $0x28] sm:$0xff] }
0x15ae   :  { %12114 = vmatprep.subr.bf16.mxu1 %v13245_v49 }
0x15b1   :  { %12116 = vmatpush3.bf16.msra.mxu1 %v12115_v36 }
0x15b2   :  { %12141 = vmatprep.subr.bf16.mxu1 %v13245_v49 }
0x167f   :  { %v4977_v48 = vpop.f32.mrb[92].mxu1 }
0x1680   :  { %v4978_v53 = vadd.f32 %v9323_v11, %v4977_v48  ;;  %v11074_v57 = vpop.f32.mrb[93].mxu1  ;;  %v9365_v11 = vld [vmem:[%s15704_s16 + $0xb8] sm:$0xff]  ;;  %v9368_v48 = vld [vmem:[%s15705_s18 + $0x40] sm:$0xff] }
0x1681   :  { %v12151_v3 = vpack.c.bf16 %v9365_v11, %v9364_v35  ;;  %v3845_v35 = vadd.f32 %v14678_v16, %v3777_v38  ;;  %v9376_v11 = vld [vmem:[%s15707_s27 + $0x40] sm:$0xff] }
0x1682   :  { %v4981_v23 = vmax.f32 %v4978_v53, 0.0  ;;  %v9369_v53 = vld [vmem:[%s15705_s18 + $0x48] sm:$0xff]  ;;  %v9403_v38 = vld [vmem:[%s15707_s27 + $0x100] sm:$0xff] }
0x1683   :  { %v12154_v19 = vpack.c.bf16 %v9369_v53, %v9368_v48  ;;  %v3848_v48 = vmax.f32 %v3845_v35, 0.0  ;;  %v9378_v53 = vld [vmem:[%s15707_s27 + $0x50] sm:$0xff] }
0x1684   :  { %11092 = vmatmul.mubr.msk.f32.vlgmr.msra.gmra.mrb[64].mxu0 %vm2380_vm5, %v4981_v23 }
0x1685   :  { %12119 = vmatpush3.bf16.msra.mxu0 %v12118_v32  ;;  %11137 = vmatprep.mubr.msk.f32.mxu0 %vm13246_vm6, %v13247_v55 }
0x1686   :  { %12120 = vmatprep.subr.bf16.mxu0 %v13245_v49 }
0x1689   :  { %12122 = vmatpush3.bf16.msra.mxu0 %v12121_v12  ;;  %v9370_v12 = vld [vmem:[%s15705_s18 + $0x50] sm:$0xff] }
0x168a   :  { %12123 = vmatprep.subr.bf16.mxu0 %v13245_v49  ;;  %v12157_v42 = vpack.c.bf16 %v9371_v46, %v9370_v12  ;;  %v9383_v12 = vld [vmem:[%s15707_s27 + $0x78] sm:$0xff]  ;;  %v4229_v46 = vld [vmem:[%s15700_s0 + $0x10] ss:$0 sm:$0xff] }
0x168d   :  { %12125 = vmatpush3.bf16.msra.mxu0 %v12124_v34  ;;  %v5427_v34 = vld [vmem:[%s15706_s19] sm:$0xff] }
0x168e   :  { %12126 = vmatprep.subr.bf16.mxu0 %v13245_v49 }
0x1691   :  { %12128 = vmatpush3.bf16.msra.mxu0 %v12127_v47  ;;  %v12160_v47 = vpack.c.bf16 %v5428_v60, %v5427_v34  ;;  %v4297_v34 = vadd.f32 %v14797_v22, %v4229_v46  ;;  %v9394_v60 = vld [vmem:[%s15707_s27 + $0xc0] sm:$0xff] }
0x1692   :  { %12129 = vmatprep.subr.bf16.mxu0 %v13245_v49  ;;  %v9398_v22 = vld [vmem:[%s15707_s27 + $0xe0] sm:$0xff] }
0x1693   :  { %v4300_v30 = vmax.f32 %v4297_v34, 0.0 }
0x1695   :  { %12131 = vmatpush3.bf16.msra.mxu0 %v12130_v7  ;;  %v5431_v7 = vld [vmem:[%s15706_s19 + $0x20] sm:$0xff] }
0x1696   :  { %12132 = vmatprep.subr.bf16.mxu0 %v13245_v49  ;;  %v12166_v1 = vpack.c.bf16 %v5432_v31, %v5431_v7  ;;  %v9397_v7 = vld [vmem:[%s15707_s27 + $0xd8] sm:$0xff] }
0x1699   :  { %12134 = vmatpush3.bf16.msra.mxu0 %v12133_v33  ;;  %v5433_v33 = vld [vmem:[%s15706_s19 + $0x30] sm:$0xff] }
0x169a   :  { %12135 = vmatprep.subr.bf16.mxu0 %v13245_v49  ;;  %v12169_v20 = vpack.c.bf16 %v5434_v41, %v5433_v33  ;;  %v9400_v41 = vld [vmem:[%s15707_s27 + $0xf0] sm:$0xff] }
0x169d   :  { %12137 = vmatpush3.bf16.msra.mxu0 %v12136_v45  ;;  %v12172_v45 = vpack.c.bf16 %v5436_v43, %v5435_v6  ;;  %v4518_v6 = vld [vmem:[%s15700_s0 + $0x11] ss:$0 sm:$0xff] }
0x169e   :  { %12138 = vmatprep.subr.bf16.mxu0 %v13245_v49 }
0x16a1   :  { %12140 = vmatpush3.bf16.msra.mxu0 %v12139_v15  ;;  %v5440_v15 = vld [vmem:[%s15706_s19 + $0x68] sm:$0xff] }
0x16a2   :  { %12159 = vmatprep.subr.bf16.mxu0 %v13245_v49  ;;  %v12178_v9 = vpack.c.bf16 %v5440_v15, %v5439_v27  ;;  %v9385_v15 = vld [vmem:[%s15707_s27 + $0x80] sm:$0xff] }
0x16a4   :  { %11138 = vmatmul.mubr.f32.vlgmr.msra.gmra.mrb[66].mxu0 %v5165_v51  ;;  %v9366_v51 = vld [vmem:[#allocation17 + $0x5] ss:$0 sm:$0xff] }
0x16a5   :  { %11202 = vmatprep.mubr.msk.f32.mxu0 %vm13246_vm6, %v13247_v55  ;;  %12161 = vmatpush3.bf16.msra.mxu0 %v12160_v47  ;;  %v12220_v47 = vpack.c.bf16 %v9395_v59, %v9394_v60  ;;  %v9409_v60 = vld [vmem:[%s15707_s27 + $0x130] sm:$0xff]  ;;  %v9410_v59 = vld [vmem:[%s15707_s27 + $0x138] sm:$0xff] }
0x16a6   :  { %12162 = vmatprep.subr.bf16.mxu0 %v13245_v49 }
0x16a9   :  { %12164 = vmatpush3.bf16.msra.mxu0 %v12163_v40  ;;  %v9396_v40 = vld [vmem:[%s15707_s27 + $0xd0] sm:$0xff] }
0x16aa   :  { %12165 = vmatprep.subr.bf16.mxu0 %v13245_v49  ;;  %v12223_v31 = vpack.c.bf16 %v9397_v7, %v9396_v40  ;;  %v5974_v7 = vld [vmem:[%s15708_s22] sm:$0x7f] }
0x16ad   :  { %12167 = vmatpush3.bf16.msra.mxu0 %v12166_v1  ;;  %v9399_v1 = vld [vmem:[%s15707_s27 + $0xe8] sm:$0xff] }
0x16ae   :  { %12168 = vmatprep.subr.bf16.mxu0 %v13245_v49  ;;  %v12226_v33 = vpack.c.bf16 %v9399_v1, %v9398_v22 }
0x16b1   :  { %12170 = vmatpush3.bf16.msra.mxu0 %v12169_v20  ;;  %v9401_v20 = vld [vmem:[%s15707_s27 + $0xf8] sm:$0xff] }
0x16b2   :  { %12171 = vmatprep.subr.bf16.mxu0 %v13245_v49  ;;  %v12229_v43 = vpack.c.bf16 %v9401_v20, %v9400_v41 }
0x16b5   :  { %12173 = vmatpush3.bf16.msra.mxu0 %v12172_v45  ;;  %v4586_v45 = vadd.f32 %v14832_v18, %v4518_v6  ;;  %v9298_v18 = vld [vmem:[#allocation18] ss:$0 sm:$0xff] }
0x16b6   :  { %12174 = vmatprep.subr.bf16.mxu0 %v13245_v49 }
0x16b7   :  { %v4589_v14 = vmax.f32 %v4586_v45, 0.0 }
0x16b9   :  { %12176 = vmatpush3.bf16.msra.mxu0 %v12175_v52  ;;  %v5442_v52 = vld [vmem:[%s15706_s19 + $0x78] sm:$0xff] }
0x16ba   :  { %12177 = vmatprep.subr.bf16.mxu0 %v13245_v49  ;;  %v12181_v27 = vpack.c.bf16 %v5442_v52, %v5441_v37 }
0x16bd   :  { %12179 = vmatpush3.bf16.msra.mxu0 %v12178_v9  ;;  %v9386_v9 = vld [vmem:[%s15707_s27 + $0x88] sm:$0xff] }
0x16be   :  { %12180 = vmatprep.subr.bf16.mxu0 %v13245_v49 }
0x16c1   :  { %12182 = vmatpush3.bf16.msra.mxu0 %v12181_v27 }
0x16c2   :  { %12207 = vmatprep.subr.bf16.mxu0 %v13245_v49 }
0x1757   :  { %v5065_v24 = vpop.f32.mrb[64].mxu0 }
0x1758   :  { %v5066_v58 = vadd.f32 %v9332_v25, %v5065_v24  ;;  %v11093_v62 = vpop.f32.mrb[65].mxu0 }
0x1759   :  { %v5532_v62 = vld [vmem:[%s15707_s27 + $0x18] sm:$0xff] }
0x175a   :  { %v5069_v44 = vmax.f32 %v5066_v58, 0.0  ;;  %v5531_v58 = vld [vmem:[%s15707_s27 + $0x10] sm:$0xff] }
0x175c   :  { %11103 = vmatmul.mubr.msk.f32.vlgmr.msra.gmra.mrb[90].mxu1 %vm1844_vm2, %v5069_v44  ;;  %v5533_v44 = vld [vmem:[%s15707_s27 + $0x20] sm:$0xff] }
0x175d   :  { %12143 = vmatpush3.bf16.msra.mxu1 %v12142_v50  ;;  %11156 = vmatprep.mubr.msk.f32.mxu1 %vm13246_vm6, %v13247_v55  ;;  %v12187_v50 = vpack.c.bf16 %v5532_v62, %v5531_v58  ;;  %v12190_v28 = vpack.c.bf16 %v5534_v63, %v5533_v44  ;;  %v9389_v58 = vld [vmem:[%s15707_s27 + $0xa0] sm:$0xff]  ;;  %v9390_v62 = vld [vmem:[%s15707_s27 + $0xa8] sm:$0xff]  ;;  %v9391_v44 = vld [vmem:[%s15707_s27 + $0xb0] sm:$0xff] }
0x175e   :  { %12144 = vmatprep.subr.bf16.mxu1 %v13245_v49  ;;  %v9392_v63 = vld [vmem:[%s15707_s27 + $0xb8] sm:$0xff] }
0x1761   :  { %12146 = vmatpush3.bf16.msra.mxu1 %v12145_v13  ;;  %v5535_v13 = vld [vmem:[%s15707_s27 + $0x30] sm:$0xff] }
0x1762   :  { %12147 = vmatprep.subr.bf16.mxu1 %v13245_v49 }
0x1765   :  { %12149 = vmatpush3.bf16.msra.mxu1 %v12148_v0  ;;  %v12193_v0 = vpack.c.bf16 %v5536_v54, %v5535_v13  ;;  %v12217_v13 = vpack.c.bf16 %v9392_v63, %v9391_v44 }
0x1766   :  { %12150 = vmatprep.subr.bf16.mxu1 %v13245_v49 }
0x1769   :  { %12152 = vmatpush3.bf16.msra.mxu1 %v12151_v3  ;;  %v9377_v3 = vld [vmem:[%s15707_s27 + $0x48] sm:$0xff] }
0x176a   :  { %12153 = vmatprep.subr.bf16.mxu1 %v13245_v49 }
0x1777   :  { %v5254_v57 = vpop.f32.mrb[66].mxu0 }
0x1778   :  { %v5255_v32 = vadd.f32 %v9357_v5, %v5254_v57  ;;  %v11139_v23 = vpop.f32.mrb[67].mxu0  ;;  %v12196_v5 = vpack.c.bf16 %v9377_v3, %v9376_v11  ;;  %v9379_v57 = vld [vmem:[%s15707_s27 + $0x58] sm:$0xff] }
0x1779   :  { %v12199_v16 = vpack.c.bf16 %v9379_v57, %v9378_v53  ;;  %v9381_v23 = vld [vmem:[%s15707_s27 + $0x68] sm:$0xff]  ;;  %v9406_v53 = vld [vmem:[%s15707_s27 + $0x118] sm:$0xff] }
0x177a   :  { %v5258_v17 = vmax.f32 %v5255_v32, 0.0  ;;  %v9380_v32 = vld [vmem:[%s15707_s27 + $0x60] sm:$0xff] }
0x177c   :  { %11157 = vmatmul.mubr.msk.f32.vlgmr.msra.gmra.mrb[94].mxu1 %vm2380_vm5, %v5258_v17  ;;  %v9382_v17 = vld [vmem:[%s15707_s27 + $0x70] sm:$0xff] }
0x177d   :  { %12155 = vmatpush3.bf16.msra.mxu1 %v12154_v19  ;;  %11167 = vmatprep.mubr.msk.f32.mxu1 %vm13246_vm6, %v13247_v55  ;;  %v12202_v19 = vpack.c.bf16 %v9381_v23, %v9380_v32  ;;  %v9374_v23 = vld [vmem:[#allocation21] ss:$0 sm:$0xff] }
0x177e   :  { %12156 = vmatprep.subr.bf16.mxu1 %v13245_v49 }
0x1781   :  { %12158 = vmatpush3.bf16.msra.mxu1 %v12157_v42  ;;  %v12205_v42 = vpack.c.bf16 %v9383_v12, %v9382_v17 }
0x1782   :  { %12183 = vmatprep.subr.bf16.mxu1 %v13245_v49 }
0x184f   :  { %v5342_v36 = vpop.f32.mrb[94].mxu1 }
0x1850   :  { %v5343_v25 = vadd.f32 %v9366_v51, %v5342_v36  ;;  %v11158_v2 = vpop.f32.mrb[95].mxu1  ;;  %v12208_v36 = vpack.c.bf16 %v9386_v9, %v9385_v15  ;;  %v340_v15 = vld [vmem:[%s13259_s5 + $0x20] sm:$0xff] }
0x1851   :  { %v9387_v2 = vld [vmem:[%s15707_s27 + $0x90] sm:$0xff]  ;;  %v360_v9 = vld [vmem:[%s15709_s23] sm:$0xff]  ;;  %348 = vst [vmem:[#allocation2 + $0x20] sm:$0xff] %v340_v15 }
0x1852   :  { %v5346_v24 = vmax.f32 %v5343_v25, 0.0  ;;  %8767 = vst.msk [vmem:[#allocation2 + $0x20] sm:$0xff] %vm376_vm1, %v360_v9 }
0x1854   :  { %11168 = vmatmul.mubr.msk.f32.vlgmr.msra.gmra.mrb[90].mxu1 %vm1844_vm2, %v5346_v24 }
0x1855   :  { %12185 = vmatpush3.bf16.msra.mxu1 %v12184_v4  ;;  %11221 = vmatprep.mubr.msk.f32.mxu1 %vm13246_vm6, %v13247_v55  ;;  %v9388_v4 = vld [vmem:[%s15707_s27 + $0x98] sm:$0xff] }
0x1856   :  { %12186 = vmatprep.subr.bf16.mxu1 %v13245_v49  ;;  %v12211_v24 = vpack.c.bf16 %v9388_v4, %v9387_v2  ;;  %v12857_v4 = vld [vmem:[#allocation2] sm:$0xff] }
0x1859   :  { %12188 = vmatpush3.bf16.msra.mxu1 %v12187_v50  ;;  %v12214_v50 = vpack.c.bf16 %v9390_v62, %v9389_v58 }
0x185a   :  { %12189 = vmatprep.subr.bf16.mxu1 %v13245_v49 }
0x185d   :  { %12191 = vmatpush3.bf16.msra.mxu1 %v12190_v28  ;;  %v3943_v28 = vld [vmem:[%s15700_s0 + $0x5] ss:$0 sm:$0xff] }
0x185e   :  { %12192 = vmatprep.subr.bf16.mxu1 %v13245_v49  ;;  %v4011_v54 = vadd.f32 %v14680_v39, %v3943_v28  ;;  %v9407_v39 = vld [vmem:[%s15707_s27 + $0x120] sm:$0xff] }
0x1861   :  { %12194 = vmatpush3.bf16.msra.mxu1 %v12193_v0  ;;  %v9404_v0 = vld [vmem:[%s15707_s27 + $0x108] sm:$0xff] }
0x1862   :  { %12195 = vmatprep.subr.bf16.mxu1 %v13245_v49  ;;  %v12232_v3 = vpack.c.bf16 %v9404_v0, %v9403_v38  ;;  %v9414_v0 = vld [vmem:[%s15708_s22 + $0x8] sm:$0x7f] }
0x1864   :  { %11222 = vmatmul.mubr.msk.f32.vlgmr.msra.gmra.mrb[96].mxu1 %vm2380_vm5, %v3848_v48  ;;  %v9405_v48 = vld [vmem:[%s15707_s27 + $0x110] sm:$0xff] }
0x1865   :  { %12197 = vmatpush3.bf16.msra.mxu1 %v12196_v5  ;;  %11240 = vmatprep.mubr.msk.f32.mxu1 %vm13246_vm6, %v13247_v55  ;;  %v4014_v5 = vmax.f32 %v4011_v54, 0.0  ;;  %v12235_v57 = vpack.c.bf16 %v9406_v53, %v9405_v48  ;;  %v9417_v48 = vld [vmem:[%s15711_s12 + $0x8] sm:$0x7f]  ;;  %v6133_v53 = vld [vmem:[%s15711_s12] sm:$0x7f] }
0x1866   :  { %12198 = vmatprep.subr.bf16.mxu1 %v13245_v49 }
0x1869   :  { %12200 = vmatpush3.bf16.msra.mxu1 %v12199_v16  ;;  %v9408_v16 = vld [vmem:[%s15707_s27 + $0x128] sm:$0xff] }
0x186a   :  { %12201 = vmatprep.subr.bf16.mxu1 %v13245_v49  ;;  %v12238_v32 = vpack.c.bf16 %v9408_v16, %v9407_v39  ;;  %v6296_v16 = vld [vmem:[%s15710_s26 + $0x28] sm:$0xff] }
0x186d   :  { %12203 = vmatpush3.bf16.msra.mxu1 %v12202_v19 }
0x186e   :  { %12204 = vmatprep.subr.bf16.mxu1 %v13245_v49 }
0x1871   :  { %12206 = vmatpush3.bf16.msra.mxu1 %v12205_v42 }
0x1872   :  { %12219 = vmatprep.subr.bf16.mxu1 %v13245_v49 }
0x1874   :  { %11241 = vmatmul.mubr.msk.f32.vlgmr.msra.gmra.mrb[98].mxu1 %vm2380_vm5, %v4300_v30  ;;  %v5960_v30 = vmul.f32 %v13553_v8, %v13553_v8 }
0x1875   :  { %12221 = vmatpush3.bf16.msra.mxu1 %v12220_v47  ;;  %11278 = vmatprep.mubr.msk.f32.mxu1 %vm13246_vm6, %v13247_v55  ;;  %v12241_v47 = vpack.c.bf16 %v9410_v59, %v9409_v60  ;;  %v6305_v59 = vld [vmem:[%s15710_s26 + $0x70] sm:$0x7] }
0x1876   :  { %12222 = vmatprep.subr.bf16.mxu1 %v13245_v49  ;;  %v5961_v40 = vsel %vm376_vm1, %v5960_v30, 0.0  ;;  %v6480_v30 = vld [vmem:[%s15713_s1 + $0x10] sm:$0xff] }
0x1877   :  { %5962 = vadd.xlane.f32.xlu1 %v5961_v40  ;;  %v6483_v40 = vld [vmem:[%s15713_s1 + $0x28] sm:$0xff] }
0x1879   :  { %12224 = vmatpush3.bf16.msra.mxu1 %v12223_v31  ;;  %v9373_v31 = vld [vmem:[#allocation20] ss:$0 sm:$0xff] }
0x187a   :  { %12225 = vmatprep.subr.bf16.mxu1 %v13245_v49 }
0x187d   :  { %12227 = vmatpush3.bf16.msra.mxu1 %v12226_v33 }
0x187e   :  { %12228 = vmatprep.subr.bf16.mxu1 %v13245_v49 }
0x1881   :  { %12230 = vmatpush3.bf16.msra.mxu1 %v12229_v43 }
0x1882   :  { %11300 = vmatprep.subr.mxu1 %v13247_v55 }
0x1884   :  { %11279 = vmatmul.mubr.msk.f32.vlgmr.msra.gmra.mrb[100].mxu1 %vm2380_vm5, %v4589_v14 }
0x1885   :  { %11302 = vmatprep.mubr.msk.f32.mxu1 %vm13246_vm6, %v13247_v55  ;;  %11301 = vmatpush3.msk.msra.mxu1 %vm401_vm0, %v5974_v7  ;;  %v6486_v7 = vld [vmem:[%s15713_s1 + $0x40] sm:$0xff] }
0x1886   :  { %11310 = vmatprep.subr.mxu1 %v13247_v55 }
0x1904   :  { %v5963_v14 = vpop.xlane.xlu1 %5962 }
0x1905   :  { %v5964_v37 = vmax.f32 %v5963_v14, 1e-24  ;;  %v6291_v14 = vld [vmem:[%s15710_s26] sm:$0xff] }
0x1907   :  { %12818 = vrsqrt.f32 %v5964_v37  ;;  %v6294_v37 = vld [vmem:[%s15710_s26 + $0x18] sm:$0xff] }
0x1911   :  { %v12819_v52 = vpop.eup %12818 }
0x1912   :  { %v5966_v27 = vmul.f32 %v12819_v52, %v13553_v8  ;;  %v6298_v52 = vld [vmem:[%s15710_s26 + $0x38] sm:$0xff] }
0x1914   :  { %11303 = vmatmul.mubr.msk.f32.vlgmr.msra.gmra.mrb[102].mxu1 %vm376_vm1, %v5966_v27  ;;  %v6301_v27 = vld [vmem:[%s15710_s26 + $0x50] sm:$0xff] }
0x1915   :  { %11312 = vmatprep.mubr.msk.f32.mxu1 %vm13246_vm6, %v13247_v55  ;;  %11311 = vmatpush3.msk.msra.mxu1 %vm401_vm0, %v9417_v48  ;;  %v6490_v48 = vld [vmem:[%s15713_s1 + $0x60] sm:$0xff] }
0x1927   :  { %v5421_v51 = vpop.f32.mrb[90].mxu1 }
0x1928   :  { %v12518_v29 = vadd.f32 %v9298_v18, %v5421_v51  ;;  %v11169_v56 = vpop.f32.mrb[91].mxu1  ;;  %v5967_v18 = vmul.f32 %v13557_v10, %v13557_v10 }
0x192a   :  { %v5426_v25 = vmax.f32 %v12518_v29, 0.0  ;;  %v5968_v51 = vsel %vm376_vm1, %v5967_v18, 0.0  ;;  %v5944_v29 = vsub.f32 %v360_v9, %v340_v15  ;;  %v12245_v15 = vpack.c.bf16 %v6294_v37, %v6291_v14  ;;  %v6055_v37 = vld [vmem:[%s15712_s28 + $0x1] ss:$0 sm:$0xff] }
0x192b   :  { %5969 = vadd.xlane.f32.xlu1 %v5968_v51  ;;  %v12247_v51 = vpack.c.bf16 %v6301_v27, %v6298_v52 }
0x192c   :  { %11203 = vmatmul.mubr.f32.vlgmr.msra.gmra.mrb[68].mxu0 %v5426_v25  ;;  %v5945_v56 = vmul.f32 %v5944_v29, %v5944_v29 }
0x192d   :  { %12209 = vmatpush3.bf16.msra.mxu0 %v12208_v36  ;;  %11259 = vmatprep.mubr.msk.f32.mxu0 %vm13246_vm6, %v13247_v55 }
0x192e   :  { %12210 = vmatprep.subr.bf16.mxu0 %v13245_v49  ;;  %v5946_v8 = vsel %vm376_vm1, %v5945_v56, 0.0  ;;  %v6300_v56 = vld [vmem:[%s15710_s26 + $0x48] sm:$0xff] }
0x192f   :  { %5947 = vadd.xlane.f32.xlu1 %v5946_v8 }
0x1931   :  { %12212 = vmatpush3.bf16.msra.mxu0 %v12211_v24 }
0x1932   :  { %12213 = vmatprep.subr.bf16.mxu0 %v13245_v49 }
0x1935   :  { %12215 = vmatpush3.bf16.msra.mxu0 %v12214_v50 }
0x1936   :  { %12216 = vmatprep.subr.bf16.mxu0 %v13245_v49 }
0x1937   :  { %v5606_v35 = vpop.f32.mrb[96].mxu1 }
0x1938   :  { %v11223_v11 = vpop.f32.mrb[97].mxu1  ;;  %v5610_v19 = vadd.f32 %v9374_v23, %v5606_v35  ;;  %v5975_v23 = vld [vmem:[%s15712_s28] ss:$0 sm:$0xff] }
0x1939   :  { %12218 = vmatpush3.bf16.msra.mxu0 %v12217_v13  ;;  %v6292_v11 = vld [vmem:[%s15710_s26 + $0x8] sm:$0xff] }
0x193a   :  { %12231 = vmatprep.subr.bf16.mxu0 %v13245_v49 }
0x193c   :  { %11260 = vmatmul.mubr.msk.f32.vlgmr.msra.gmra.mrb[70].mxu0 %vm2380_vm5, %v4014_v5 }
0x193d   :  { %12233 = vmatpush3.bf16.msra.mxu0 %v12232_v3  ;;  %11297 = vmatprep.mubr.msk.f32.mxu0 %vm13246_vm6, %v13247_v55  ;;  %v6295_v3 = vld [vmem:[%s15710_s26 + $0x20] sm:$0xff] }
0x193e   :  { %12234 = vmatprep.subr.bf16.mxu0 %v13245_v49 }
0x1941   :  { %12236 = vmatpush3.bf16.msra.mxu0 %v12235_v57  ;;  %v12243_v57 = vpack.c.bf16 %v6295_v3, %v6292_v11  ;;  %v6494_v11 = vld [vmem:[%s15713_s1 + $0x80] sm:$0xff] }
0x1942   :  { %12237 = vmatprep.subr.bf16.mxu0 %v13245_v49 }
0x1943   :  { %12244 = vmatprep.subr.bf16.mxu1 %v12243_v57 }
0x1945   :  { %12239 = vmatpush3.bf16.msra.mxu0 %v12238_v32 }
0x1946   :  { %12240 = vmatprep.subr.bf16.mxu0 %v13245_v49 }
0x1947   :  { %v5689_v17 = vpop.f32.mrb[98].mxu1 }
0x1948   :  { %v5693_v12 = vadd.f32 %v5689_v17, %v5610_v19  ;;  %v11242_v46 = vpop.f32.mrb[99].mxu1  ;;  %v6299_v19 = vld [vmem:[%s15710_s26 + $0x40] sm:$0xff]  ;;  %v6302_v17 = vld [vmem:[%s15710_s26 + $0x58] sm:$0xff] }
0x1949   :  { %12242 = vmatpush3.bf16.msra.mxu0 %v12241_v47  ;;  %v15100_v47 = vld [vmem:[%s13259_s5 + $0x28] sm:$0xff] }
0x194a   :  { %11305 = vmatprep.subr.mxu0 %v13247_v55  ;;  %349 = vst [vmem:[#allocation2 + $0x28] sm:$0xff] %v15100_v47 }
0x1957   :  { %v5855_v42 = vpop.f32.mrb[100].mxu1 }
0x1958   :  { %v11280_v34 = vpop.f32.mrb[101].mxu1 }
0x19b8   :  { %v5970_v63 = vpop.xlane.xlu1 %5969 }
0x19b9   :  { %v5971_v28 = vmax.f32 %v5970_v63, 1e-24  ;;  %v6303_v63 = vld [vmem:[%s15710_s26 + $0x60] sm:$0x7] }
0x19bb   :  { %12820 = vrsqrt.f32 %v5971_v28 }
0x19bc   :  { %v5948_v13 = vpop.xlane.xlu1 %5947 }
0x19bd   :  { %v5949_v54 = vmax.f32 %v5948_v13, 1e-24 }
0x19bf   :  { %12822 = vrsqrt.f32 %v5949_v54 }
0x19c5   :  { %v12821_v38 = vpop.eup %12820 }
0x19c6   :  { %v5973_v35 = vmul.f32 %v12821_v38, %v13557_v10  ;;  %v6293_v10 = vld [vmem:[%s15710_s26 + $0x10] sm:$0xff] }
0x19c7   :  { %v12252_v32 = vpack.c.bf16 %v6296_v16, %v6293_v10  ;;  %v6484_v38 = vld [vmem:[%s15713_s1 + $0x30] sm:$0xff] }
0x19c8   :  { %v6496_v10 = vld [vmem:[%s15713_s1 + $0x90] sm:$0x1] }
0x19c9   :  { %v12823_v5 = vpop.eup %12822 }
0x19ca   :  { %v5951_v39 = vmul.f32 %v12823_v5, %v5944_v29  ;;  %v6297_v29 = vld [vmem:[%s15710_s26 + $0x30] sm:$0xff] }
0x19cb   :  { %v12249_v8 = vpack.c.bf16 %v6300_v56, %v6297_v29  ;;  %v9436_v56 = vld [vmem:[%s15713_s1 + $0xb0] sm:$0xff] }
0x19e7   :  { %v6048_v46 = vpop.f32.mrb[102].mxu1 }
0x19e8   :  { %v11304_v34 = vpop.f32.mrb[103].mxu1 }
0x19e9   :  { %v9461_v34 = vld [vmem:[%s15710_s26 + $0xa0] sm:$0xff] }
0x19ff   :  { %v5516_v22 = vpop.f32.mrb[68].mxu0 }
0x1a00   :  { %v5517_v1 = vadd.f32 %v9373_v31, %v5516_v22  ;;  %v11204_v33 = vpop.f32.mrb[69].mxu0  ;;  %v12270_v31 = vpack.c.bf16 %v6483_v40, %v6480_v30  ;;  %v6489_v22 = vld [vmem:[%s15713_s1 + $0x58] sm:$0xff]  ;;  %v9459_v30 = vld [vmem:[%s15710_s26 + $0x90] sm:$0xff] }
0x1a01   :  { %v6492_v33 = vld [vmem:[%s15713_s1 + $0x70] sm:$0xff] }
0x1a02   :  { %v5520_v41 = vmax.f32 %v5517_v1, 0.0  ;;  %v12273_v1 = vpack.c.bf16 %v6489_v22, %v6486_v7  ;;  %v9463_v40 = vld [vmem:[%s15710_s26 + $0xb0] sm:$0xff]  ;;  %v9466_v7 = vld [vmem:[%s15710_s26 + $0xc8] sm:$0xff] }
0x1a03   :  { %v12282_v22 = vpack.c.bf16 %v9466_v7, %v9463_v40 }
0x1a04   :  { %11298 = vmatmul.mubr.msk.f32.vlgmr.msra.gmra.mrb[72].mxu0 %vm2380_vm5, %v5520_v41  ;;  %v6495_v41 = vld [vmem:[%s15713_s1 + $0x88] sm:$0xff] }
0x1a05   :  { %11307 = vmatprep.mubr.msk.f32.mxu0 %vm13246_vm6, %v13247_v55  ;;  %11306 = vmatpush3.msk.msra.mxu0 %vm401_vm0, %v9414_v0  ;;  %v6487_v0 = vld [vmem:[%s15713_s1 + $0x48] sm:$0xff] }
0x1a06   :  { %11315 = vmatprep.subr.mxu0 %v13247_v55  ;;  %v12263_v3 = vpack.c.bf16 %v6487_v0, %v6484_v38  ;;  %v9444_v38 = vld [vmem:[%s15713_s1 + $0xf0] sm:$0xff]  ;;  %v9443_v0 = vld [vmem:[%s15713_s1 + $0xe8] sm:$0xff] }
0x1a08   :  { %11308 = vmatmul.mubr.msk.f32.vlgmr.msra.gmra.mrb[74].mxu0 %vm376_vm1, %v5973_v35  ;;  %v6491_v35 = vld [vmem:[%s15713_s1 + $0x68] sm:$0xff] }
0x1a09   :  { %11317 = vmatprep.mubr.msk.f32.mxu0 %vm13246_vm6, %v13247_v55  ;;  %11316 = vmatpush3.msk.msra.mxu0 %vm401_vm0, %v6133_v53  ;;  %v12265_v5 = vpack.c.bf16 %v6494_v11, %v6491_v35  ;;  %v6493_v53 = vld [vmem:[%s15713_s1 + $0x78] sm:$0xff]  ;;  %v9446_v35 = vld [vmem:[%s15713_s1 + $0x100] sm:$0xff] }
0x1a0a   :  { %12251 = vmatprep.subr.bf16.mxu0 %v13245_v49  ;;  %v12267_v57 = vpack.c.bf16 %v6493_v53, %v6490_v48  ;;  %v9451_v48 = vld [vmem:[%s15713_s1 + $0x128] sm:$0xff] }
0x1a0b   :  { %v9447_v53 = vld [vmem:[%s15713_s1 + $0x108] sm:$0xff] }
0x1a0c   :  { %11318 = vmatmul.mubr.msk.f32.vlgmr.msra.gmra.mrb[76].mxu0 %vm376_vm1, %v5951_v39  ;;  %v6497_v39 = vld [vmem:[%s15713_s1 + $0x98] sm:$0x1] }
0x1a0d   :  { %12253 = vmatpush3.bf16.msra.mxu0 %v12252_v32  ;;  %11330 = vmatprep.mubr.msk.f32.mxu0 %vm13246_vm6, %v13247_v55 }
0x1a0e   :  { %12254 = vmatprep.subr.bf16.mxu0 %v13245_v49 }
0x1a0f   :  { %v5772_v20 = vpop.f32.mrb[70].mxu0 }
0x1a10   :  { %v5776_v6 = vadd.f32 %v5772_v20, %v5693_v12  ;;  %v11261_v43 = vpop.f32.mrb[71].mxu0  ;;  %v12255_v12 = vpack.c.bf16 %v6302_v17, %v6299_v19  ;;  %v12276_v20 = vpack.c.bf16 %v6495_v41, %v6492_v33  ;;  %v9457_v17 = vld [vmem:[%s15710_s26 + $0x80] sm:$0xff]  ;;  %v9467_v33 = vld [vmem:[%s15710_s26 + $0xd0] sm:$0xff]  ;;  %v9462_v41 = vld [vmem:[%s15710_s26 + $0xa8] sm:$0xff] }
0x1a12   :  { %v5859_v45 = vadd.f32 %v5855_v42, %v5776_v6  ;;  %v15087_v42 = vadd.f32 %v6048_v46, %v5975_v23  ;;  %12256 = vmatpush3.bf16.msra.mxu0 %v12255_v12  ;;  %v6498_v6 = vld [vmem:[%s15713_s1 + $0xa0] sm:$0x1]  ;;  %v9460_v12 = vld [vmem:[%s15710_s26 + $0x98] sm:$0xff] }
0x1a13   :  { %11328 = vmatprep.subr.mxu0 %v13247_v55  ;;  %v12278_v46 = vpack.c.bf16 %v9460_v12, %v9457_v17  ;;  %v9454_v17 = vld [vmem:[%s15713_s1 + $0x140] sm:$0x1]  ;;  %v9483_v12 = vld [vmem:[%s15713_s1 + $0x158] sm:$0xff] }
0x1a14   :  { %v6052_v60 = vmax.f32 %v15087_v42, 0.0  ;;  %v9458_v42 = vld [vmem:[%s15710_s26 + $0x88] sm:$0xff] }
0x1a16   :  { %11329 = vmatpush3.msk.msra.mxu0 %vm6327_vm7, %v6305_v59  ;;  %v12287_v59 = vpack.c.bf16 %v9461_v34, %v9458_v42  ;;  %v9453_v42 = vld [vmem:[%s15713_s1 + $0x138] sm:$0x1] }
0x1a17   :  { %11331 = vmatmul.mubr.msk.f32.vlgmr.msra.gmra.mrb[78].mxu0 %vm6323_vm8, %v6052_v60  ;;  %12269 = vmatprep.subr.bf16.mxu0 %v13245_v49 }
0x1a18   :  { %11347 = vmatprep.mubr.msk.f32.mxu0 %vm13246_vm6, %v13247_v55  ;;  %12271 = vmatpush3.bf16.msra.mxu0 %v12270_v31 }
0x1a19   :  { %12272 = vmatprep.subr.bf16.mxu0 %v13245_v49 }
0x1a1c   :  { %12274 = vmatpush3.bf16.msra.mxu0 %v12273_v1  ;;  %v9464_v1 = vld [vmem:[%s15710_s26 + $0xb8] sm:$0xff] }
0x1a1d   :  { %12275 = vmatprep.subr.bf16.mxu0 %v13245_v49 }
0x1a20   :  { %12277 = vmatpush3.bf16.msra.mxu0 %v12276_v20  ;;  %v12290_v20 = vpack.c.bf16 %v9467_v33, %v9464_v1 }
0x1a21   :  { %11345 = vmatprep.subr.mxu0 %v13247_v55 }
0x1a24   :  { %11346 = vmatpush3.msk.msra.mxu0 %vm6521_vm9, %v6498_v6  ;;  %v9465_v6 = vld [vmem:[%s15710_s26 + $0xc0] sm:$0xff] }
0x1a25   :  { %11348 = vmatmul.mubr.msk.f32.vlgmr.msra.gmra.mrb[80].mxu0 %vm6517_vm10, %v15100_v47  ;;  %12286 = vmatprep.subr.bf16.mxu0 %v13245_v49 }
0x1a26   :  { %11360 = vmatprep.mubr.msk.f32.mxu0 %vm13246_vm6, %v13247_v55  ;;  %12288 = vmatpush3.bf16.msra.mxu0 %v12287_v59  ;;  %v15219_v59 = vld [vmem:[%s13259_s5 + $0x30] sm:$0xff] }
0x1a27   :  { %12289 = vmatprep.subr.bf16.mxu0 %v13245_v49  ;;  %350 = vst [vmem:[#allocation2 + $0x30] sm:$0xff] %v15219_v59 }
0x1a2a   :  { %12291 = vmatpush3.bf16.msra.mxu0 %v12290_v20 }
0x1a2b   :  { %11358 = vmatprep.subr.mxu0 %v13247_v55 }
0x1ad7   :  { %v5938_v36 = vpop.f32.mrb[72].mxu0 }
0x1ad8   :  { %v5942_v25 = vadd.f32 %v5938_v36, %v5859_v45  ;;  %v11299_v2 = vpop.f32.mrb[73].mxu0  ;;  %v6304_v36 = vld [vmem:[%s15710_s26 + $0x68] sm:$0x7] }
0x1ad9   :  { %v6482_v2 = vld [vmem:[%s15713_s1 + $0x20] sm:$0xff] }
0x1ada   :  { %v15054_v24 = vadd.f32 %v12857_v4, %v5942_v25  ;;  %v6479_v25 = vld [vmem:[%s15713_s1 + $0x8] sm:$0xff]  ;;  %v6478_v4 = vld [vmem:[%s15713_s1] sm:$0xff] }
0x1adb   :  { %v12257_v28 = vpack.c.bf16 %v6482_v2, %v6479_v25  ;;  %v6128_v16 = vpop.f32.mrb[74].mxu0  ;;  %v9435_v25 = vld [vmem:[%s15713_s1 + $0xa8] sm:$0xff]  ;;  %v9438_v2 = vld [vmem:[%s15713_s1 + $0xc0] sm:$0xff] }
0x1adc   :  { %8766 = vst.msk [vmem:[#allocation2 + $0x18] sm:$0xff] %vm376_vm1, %v15054_v24  ;;  %v15059_v58 = vsub.f32 %v360_v9, %v15054_v24  ;;  %v11309_v32 = vpop.f32.mrb[75].mxu0  ;;  %v6129_v52 = vadd.f32 %v6128_v16, %v6055_v37  ;;  %v9452_v16 = vld [vmem:[%s15713_s1 + $0x130] sm:$0xff] }
0x1ade   :  { %v5953_v62 = vmul.f32 %v15059_v58, %v15059_v58  ;;  %v6132_v27 = vmax.f32 %v6129_v52, 0.0 }
0x1adf   :  { %v15155_v23 = vpop.f32.mrb[76].mxu0 }
0x1ae0   :  { %v5954_v50 = vsel %vm376_vm1, %v5953_v62, 0.0  ;;  %v6481_v62 = vld [vmem:[%s15713_s1 + $0x18] sm:$0xff]  ;;  %v11319_v19 = vpop.f32.mrb[77].mxu0 }
0x1ae1   :  { %5955 = vadd.xlane.f32.xlu0 %v5954_v50  ;;  %v6485_v50 = vld [vmem:[%s15713_s1 + $0x38] sm:$0xff]  ;;  %v12259_v13 = vpack.c.bf16 %v6481_v62, %v6478_v4  ;;  %v12294_v62 = vpack.c.bf16 %v9438_v2, %v9435_v25 }
0x1ae2   :  { %v9437_v4 = vld [vmem:[%s15713_s1 + $0xb8] sm:$0xff] }
0x1ae3   :  { %v8774_v44 = vld [vmem:[#allocation2 + $0x18] sm:$0xff] }
0x1ae4   :  { %8782 = vst [vmem:[#allocation24 + $0x18] sm:$0xff] %v8774_v44  ;;  %v6488_v44 = vld [vmem:[%s15713_s1 + $0x50] sm:$0xff] }
0x1ae5   :  { %v12261_v54 = vpack.c.bf16 %v6488_v44, %v6485_v50  ;;  %v9440_v50 = vld [vmem:[%s15713_s1 + $0xd0] sm:$0xff] }
0x1ae6   :  { %v12305_v44 = vpack.c.bf16 %v9440_v50, %v9437_v4 }
0x1b6e   :  { %v5956_v43 = vpop.xlane.xlu0 %5955 }
0x1b6f   :  { %v5957_v45 = vmax.f32 %v5956_v43, 1e-24  ;;  %v12284_v43 = vpack.c.bf16 %v9465_v6, %v9462_v41 }
0x1b71   :  { %12824 = vrsqrt.f32 %v5957_v45  ;;  %v15170_v45 = vpop.f32.mrb[78].mxu0 }
0x1b72   :  { %v11332_v14 = vpop.f32.mrb[79].mxu0 }
0x1b7b   :  { %v12825_v18 = vpop.eup %12824 }
0x1b7c   :  { %v5959_v9 = vmul.f32 %v12825_v18, %v15059_v58  ;;  %v9469_v18 = vld [vmem:[%s15710_s26 + $0xe0] sm:$0x7] }
0x1b7e   :  { %11313 = vmatmul.mubr.msk.f32.vlgmr.msra.gmra.mrb[104].mxu1 %vm376_vm1, %v5959_v9  ;;  %v9468_v9 = vld [vmem:[%s15710_s26 + $0xd8] sm:$0x7] }
0x1b7f   :  { %12246 = vmatpush1.bf16.msra.mxu1 %v12245_v15  ;;  %6401 = vmatprep.mubr.f32.mxu1 %v13247_v55  ;;  %v9470_v15 = vld [vmem:[%s15710_s26 + $0xe8] sm:$0x7] }
0x1b80   :  { %12248 = vmatprep.subr.bf16.mxu1 %v12247_v51  ;;  %11359 = vmatpush3.msk.msra.mxu0 %vm6327_vm7, %v9470_v15  ;;  %v15186_v51 = vpop.f32.mrb[80].mxu0 }
0x1b81   :  { %11361 = vmatmul.mubr.msk.f32.vlgmr.msra.gmra.mrb[82].mxu0 %vm6323_vm8, %v6132_v27  ;;  %12304 = vmatprep.subr.bf16.mxu0 %v13245_v49  ;;  %v11349_v29 = vpop.f32.mrb[81].mxu0 }
0x1b82   :  { %11377 = vmatprep.mubr.msk.f32.mxu0 %vm13246_vm6, %v13247_v55  ;;  %12306 = vmatpush3.bf16.msra.mxu0 %v12305_v44  ;;  %v15232_v29 = vsub.s32 2, %v14676_v21 }
0x1b83   :  { %12250 = vmatpush1.bf16.msra.mxu1 %v12249_v8  ;;  %v9439_v8 = vld [vmem:[%s15713_s1 + $0xc8] sm:$0xff]  ;;  %12307 = vmatprep.subr.bf16.mxu0 %v13245_v49 }
0x1b84   :  { %9422 = vmatprep.subr.msk.mxu1 %vm6327_vm7, %v6304_v36  ;;  %v12292_v36 = vpack.c.bf16 %v9439_v8, %v9436_v56 }
0x1b87   :  { %9423 = vmatpush1.msk.msra.mxu1 %vm6327_vm7, %v6303_v63  ;;  %v9442_v63 = vld [vmem:[%s15713_s1 + $0xe0] sm:$0xff] }
0x1b88   :  { %12258 = vmatprep.subr.bf16.mxu1 %v12257_v28  ;;  %9424 = vmatmul.mubr.msk.f32.vlgmr.msra.gmra.mrb[106].mxu1 %vm6323_vm8, %v6052_v60  ;;  %v9456_v60 = vld [vmem:[%s15710_s26 + $0x78] sm:$0xff] }
0x1b89   :  { %12260 = vmatpush1.bf16.msra.mxu1 %v12259_v13  ;;  %6595 = vmatprep.mubr.f32.mxu1 %v13247_v55  ;;  %v12280_v31 = vpack.c.bf16 %v9459_v30, %v9456_v60  ;;  %v9445_v28 = vld [vmem:[%s15713_s1 + $0xf8] sm:$0xff]  ;;  %v9455_v60 = vld [vmem:[%s15713_s1 + $0x148] sm:$0x1] }
0x1b8a   :  { %12262 = vmatprep.subr.bf16.mxu1 %v12261_v54  ;;  %v9441_v13 = vld [vmem:[%s15713_s1 + $0xd8] sm:$0xff]  ;;  %v12296_v54 = vpack.c.bf16 %v9445_v28, %v9442_v63  ;;  %v9482_v63 = vld [vmem:[%s15713_s1 + $0x150] sm:$0xff] }
0x1b8b   :  { %v12298_v11 = vpack.c.bf16 %v9444_v38, %v9441_v13  ;;  %v9485_v13 = vld [vmem:[%s15713_s1 + $0x168] sm:$0xff]  ;;  %v9487_v38 = vld [vmem:[%s15713_s1 + $0x178] sm:$0xff] }
0x1b8d   :  { %12264 = vmatpush1.bf16.msra.mxu1 %v12263_v3  ;;  %v12308_v3 = vpack.c.bf16 %v9446_v35, %v9443_v0  ;;  %v9489_v0 = vld [vmem:[%s15713_s1 + $0x188] sm:$0xff]  ;;  %v9492_v35 = vld [vmem:[%s15713_s1 + $0x1a0] sm:$0xff] }
0x1b8e   :  { %12266 = vmatprep.subr.bf16.mxu1 %v12265_v5  ;;  %v9448_v5 = vld [vmem:[%s15713_s1 + $0x110] sm:$0xff] }
0x1b8f   :  { %12309 = vmatpush3.bf16.msra.mxu0 %v12308_v3  ;;  %v12315_v3 = vpack.c.bf16 %v9485_v13, %v9482_v63  ;;  %v7400_v63 = vld [vmem:[%s15715_s4 + $0xa8] sm:$0xff] }
0x1b90   :  { %12310 = vmatprep.subr.bf16.mxu0 %v13245_v49 }
0x1b91   :  { %12268 = vmatpush1.bf16.msra.mxu1 %v12267_v57  ;;  %v12300_v57 = vpack.c.bf16 %v9451_v48, %v9448_v5  ;;  %v9488_v48 = vld [vmem:[%s15713_s1 + $0x180] sm:$0xff] }
0x1b92   :  { %9428 = vmatprep.subr.msk.mxu1 %vm6521_vm9, %v6497_v39  ;;  %v9450_v39 = vld [vmem:[%s15713_s1 + $0x120] sm:$0xff] }
0x1b93   :  { %v12302_v32 = vpack.c.bf16 %v9450_v39, %v9447_v53  ;;  %v9491_v39 = vld [vmem:[%s15713_s1 + $0x198] sm:$0xff] }
0x1b95   :  { %9429 = vmatpush1.msk.msra.mxu1 %vm6521_vm9, %v6496_v10  ;;  %v9449_v10 = vld [vmem:[%s15713_s1 + $0x118] sm:$0xff] }
0x1b96   :  { %9430 = vmatmul.mubr.msk.f32.vlgmr.msra.gmra.mrb[106].mxu1 %vm6517_vm10, %v15100_v47  ;;  %12279 = vmatprep.subr.bf16.mxu1 %v12278_v46  ;;  %v12311_v19 = vpack.c.bf16 %v9452_v16, %v9449_v10  ;;  %v9486_v46 = vld [vmem:[%s15713_s1 + $0x170] sm:$0xff]  ;;  %v9493_v16 = vld [vmem:[%s15713_s1 + $0x1a8] sm:$0xff] }
0x1b97   :  { %6807 = vmatprep.mubr.f32.mxu1 %v13247_v55  ;;  %12281 = vmatpush1.bf16.msra.mxu1 %v12280_v31  ;;  %v12313_v34 = vpack.c.bf16 %v9486_v46, %v9483_v12  ;;  %v9427_v31 = vld [vmem:[%s15714_s20 + $0x1] ss:$8 sm:$0x7] }
0x1b98   :  { %12283 = vmatprep.subr.bf16.mxu1 %v12282_v22  ;;  %12312 = vmatpush3.bf16.msra.mxu0 %v12311_v19  ;;  %v6306_v22 = vld [vmem:[%s15714_s20] ss:$8 sm:$0x7]  ;;  %v6505_v33 = vrot.slane %v9427_v31, %v14683_v61  ;;  %v6509_v20 = vrot.slane %v9427_v31, %v14687_v26  ;;  %v6513_v56 = vrot.slane %v9427_v31, %v15232_v29 }
0x1b99   :  { %11375 = vmatprep.subr.mxu0 %v13247_v55  ;;  %v6311_v1 = vrot.slane %v6306_v22, %v14683_v61  ;;  %v6315_v41 = vrot.slane %v6306_v22, %v14687_v26  ;;  %v9490_v10 = vld [vmem:[%s15713_s1 + $0x190] sm:$0xff]  ;;  %v9501_v31 = vld [vmem:[%s15713_s1 + $0x1e8] sm:$0x1] }
0x1b9a   :  { %v6669_v2 = vadd.f32 %v15186_v51, %v6513_v56  ;;  %v9498_v19 = vld [vmem:[%s15713_s1 + $0x1d0] sm:$0xff]  ;;  %v7395_v56 = vld [vmem:[%s15715_s4 + $0x80] sm:$0xff] }
0x1b9b   :  { %12285 = vmatpush1.bf16.msra.mxu1 %v12284_v43  ;;  %v12519_v6 = vadd.f32 %v6505_v33, %v6311_v1  ;;  %v12521_v14 = vadd.f32 %v6509_v20, %v6315_v41  ;;  %v9494_v12 = vld [vmem:[%s15713_s1 + $0x1b0] sm:$0xff]  ;;  %v7383_v1 = vld [vmem:[%s15715_s4 + $0x20] sm:$0xff] }
0x1b9c   :  { %9471 = vmatprep.subr.msk.mxu1 %vm6327_vm7, %v9469_v18  ;;  %11376 = vmatpush3.msk.msra.mxu0 %vm6521_vm9, %v9455_v60  ;;  %v9499_v60 = vld [vmem:[%s15713_s1 + $0x1d8] sm:$0xff]  ;;  %v9500_v41 = vld [vmem:[%s15713_s1 + $0x1e0] sm:$0x1] }
0x1b9d   :  { %12325 = vmatprep.subr.bf16.mxu0 %v13245_v49  ;;  %v7379_v20 = vld [vmem:[%s15715_s4] sm:$0xff] }
0x1b9f   :  { %9472 = vmatpush1.msk.msra.mxu1 %vm6327_vm7, %v9468_v9 }
0x1ba0   :  { %9473 = vmatmul.mubr.msk.f32.vlgmr.msra.gmra.mrb[108].mxu1 %vm6323_vm8, %v6132_v27  ;;  %12293 = vmatprep.subr.bf16.mxu1 %v12292_v36  ;;  %v6319_v36 = vrot.slane %v6306_v22, %v15232_v29  ;;  %v7380_v22 = vld [vmem:[%s15715_s4 + $0x8] sm:$0xff] }
0x1ba1   :  { %6960 = vmatprep.mubr.f32.mxu1 %v13247_v55  ;;  %12295 = vmatpush1.bf16.msra.mxu1 %v12294_v62 }
0x1ba2   :  { %12297 = vmatprep.subr.bf16.mxu1 %v12296_v54  ;;  %v6475_v62 = vadd.f32 %v15170_v45, %v6319_v36  ;;  %v9484_v54 = vld [vmem:[%s15713_s1 + $0x160] sm:$0xff] }
0x1ba3   :  { %v12326_v5 = vpack.c.bf16 %v9487_v38, %v9484_v54  ;;  %v7404_v54 = vld [vmem:[%s15715_s4 + $0xc8] sm:$0x3f] }
0x1ba5   :  { %12299 = vmatpush1.bf16.msra.mxu1 %v12298_v11 }
0x1ba6   :  { %12301 = vmatprep.subr.bf16.mxu1 %v12300_v57  ;;  %v12317_v57 = vpack.c.bf16 %v9492_v35, %v9489_v0 }
0x1ba9   :  { %12303 = vmatpush1.bf16.msra.mxu1 %v12302_v32  ;;  %v9495_v32 = vld [vmem:[%s15713_s1 + $0x1b8] sm:$0xff] }
0x1baa   :  { %9476 = vmatprep.subr.msk.mxu1 %vm6521_vm9, %v9454_v17  ;;  %v12329_v17 = vpack.c.bf16 %v9493_v16, %v9490_v10  ;;  %v12321_v46 = vpack.c.bf16 %v9498_v19, %v9495_v32  ;;  %v7278_v16 = vld [vmem:[%s15716_s25 + $0x30] sm:$0x1]  ;;  %v9514_v32 = vld [vmem:[%s15713_s1 + $0x200] sm:$0xff]  ;;  %v9517_v19 = vld [vmem:[%s15713_s1 + $0x218] sm:$0xff] }
0x1bad   :  { %9477 = vmatpush1.msk.msra.mxu1 %vm6521_vm9, %v9453_v42  ;;  %v9497_v42 = vld [vmem:[%s15713_s1 + $0x1c8] sm:$0xff] }
0x1bae   :  { %12314 = vmatprep.subr.bf16.mxu1 %v12313_v34  ;;  %v9496_v34 = vld [vmem:[%s15713_s1 + $0x1c0] sm:$0xff] }
0x1c51   :  { %v6208_v30 = vpop.f32.mrb[104].mxu1 }
0x1c52   :  { %v15223_v40 = vadd.f32 %v15155_v23, %v6208_v30  ;;  %v11314_v7 = vpop.f32.mrb[105].mxu1  ;;  %v12323_v30 = vpack.c.bf16 %v9497_v42, %v9494_v12  ;;  %v9516_v12 = vld [vmem:[%s15713_s1 + $0x210] sm:$0xff] }
0x1c53   :  { %v12332_v7 = vpack.c.bf16 %v9499_v60, %v9496_v34  ;;  %v9520_v42 = vld [vmem:[%s15713_s1 + $0x230] sm:$0xff]  ;;  %v9523_v34 = vld [vmem:[%s15713_s1 + $0x248] sm:$0xff] }
0x1c54   :  { %v6880_v35 = vpop.f32.mrb[82].mxu0  ;;  %v9519_v60 = vld [vmem:[%s15713_s1 + $0x228] sm:$0xff] }
0x1c69   :  { %v6597_v43 = vpop.f32.mrb[106].mxu1 }
0x1c6a   :  { %v12520_v37 = vadd.f32 %v12519_v6, %v6597_v43  ;;  %v6599_v52 = vpop.f32.mrb[107].mxu1  ;;  %v7382_v6 = vld [vmem:[%s15715_s4 + $0x18] sm:$0xff]  ;;  %v9502_v43 = vld [vmem:[%s15713_s1 + $0x1f0] sm:$0x1] }
0x1c6b   :  { %v12522_v18 = vadd.f32 %v12521_v14, %v6599_v52  ;;  %v12343_v14 = vpack.c.bf16 %v7383_v1, %v7380_v22  ;;  %v7389_v52 = vld [vmem:[%s15715_s4 + $0x50] sm:$0xff]  ;;  %v9526_v22 = vld [vmem:[%s15713_s1 + $0x260] sm:$0xff]  ;;  %v9529_v1 = vld [vmem:[%s15713_s1 + $0x278] sm:$0xff] }
0x1c6c   :  { %v9433_v27 = vmul.f32 -1.442695, %v12520_v37  ;;  %v7386_v37 = vld [vmem:[%s15715_s4 + $0x38] sm:$0xff] }
0x1c6d   :  { %v9434_v23 = vmul.f32 -1.442695, %v12522_v18  ;;  %v12347_v18 = vpack.c.bf16 %v7389_v52, %v7386_v37  ;;  %v9503_v52 = vld [vmem:[%s15714_s20 + $0x3] ss:$8 sm:$0x7] }
0x1c6e   :  { %12826 = vpow2.f32 %v9433_v27  ;;  %v12345_v27 = vpack.c.bf16 %v7382_v6, %v7379_v20  ;;  %v9528_v20 = vld [vmem:[%s15713_s1 + $0x270] sm:$0xff] }
0x1c6f   :  { %12828 = vpow2.f32 %v9434_v23  ;;  %v7385_v23 = vld [vmem:[%s15715_s4 + $0x30] sm:$0xff] }
0x1c78   :  { %v12827_v15 = vpop.eup %12826 }
0x1c79   :  { %v6676_v9 = vadd.f32 1.0, %v12827_v15  ;;  %v12829_v8 = vpop.eup %12828  ;;  %v7388_v15 = vld [vmem:[%s15715_s4 + $0x48] sm:$0xff] }
0x1c7a   :  { %v6683_v25 = vadd.f32 1.0, %v12829_v8  ;;  %v12349_v8 = vpack.c.bf16 %v7388_v15, %v7385_v23  ;;  %v7086_v23 = vrot.slane %v9503_v52, %v14683_v61 }
0x1c7b   :  { %12830 = vrcp.f32 %v6676_v9  ;;  %v7392_v9 = vld [vmem:[%s15715_s4 + $0x68] sm:$0xff] }
0x1c7c   :  { %12832 = vrcp.f32 %v6683_v25  ;;  %v12351_v36 = vpack.c.bf16 %v7395_v56, %v7392_v9  ;;  %v7391_v25 = vld [vmem:[%s15715_s4 + $0x60] sm:$0xff]  ;;  %v7090_v9 = vrot.slane %v9503_v52, %v14687_v26 }
0x1c85   :  { %v12831_v4 = vpop.eup %12830 }
0x1c86   :  { %v6686_v50 = vmul.f32 %v12831_v4, %v6669_v2  ;;  %v12833_v44 = vpop.eup %12832  ;;  %v7394_v2 = vld [vmem:[%s15715_s4 + $0x78] sm:$0xff] }
0x1c87   :  { %v6689_v28 = vsub.f32 1.0, %v12833_v44  ;;  %v6691_v11 = vmul.f32 %v12833_v44, %v15100_v47  ;;  %v12319_v47 = vpack.c.bf16 %v9491_v39, %v9488_v48  ;;  %v7398_v4 = vld [vmem:[%s15715_s4 + $0x98] sm:$0xff]  ;;  %v7397_v44 = vld [vmem:[%s15715_s4 + $0x90] sm:$0xff]  ;;  %v7277_v39 = vld [vmem:[%s15716_s25 + $0x28] sm:$0xff] }
0x1c88   :  { %v6687_v21 = vadd.f32 %v6686_v50, %v6475_v62  ;;  %v7401_v62 = vld [vmem:[%s15715_s4 + $0xb0] sm:$0xff]  ;;  %v12353_v50 = vpack.c.bf16 %v7394_v2, %v7391_v25  ;;  %v12357_v13 = vpack.c.bf16 %v7400_v63, %v7397_v44  ;;  %v7275_v48 = vld [vmem:[%s15716_s25 + $0x18] sm:$0xff] }
0x1c8a   :  { %12834 = vtanh.f32 %v6687_v21  ;;  %v12355_v21 = vpack.c.bf16 %v7401_v62, %v7398_v4 }
0x1c94   :  { %v12835_v51 = vpop.eup %12834 }
0x1c95   :  { %v6690_v45 = vmul.f32 %v12835_v51, %v6689_v28  ;;  %v6288_v28 = vld [vmem:[%s15712_s28 + $0x2] ss:$0 sm:$0xff] }
0x1c96   :  { %v15297_v38 = vadd.f32 %v6288_v28, %v15223_v40  ;;  %v7403_v51 = vld [vmem:[%s15715_s4 + $0xc0] sm:$0x3f]  ;;  %v11362_v40 = vpop.f32.mrb[83].mxu0 }
0x1c97   :  { %v6692_v53 = vadd.f32 %v6691_v11, %v6690_v45  ;;  %v7272_v45 = vld [vmem:[%s15716_s25] sm:$0xff]  ;;  %v7273_v11 = vld [vmem:[%s15716_s25 + $0x8] sm:$0xff] }
0x1c98   :  { %v6290_v0 = vmax.f32 %v15297_v38, 0.0  ;;  %v9530_v38 = vld [vmem:[%s15713_s1 + $0x280] sm:$0xff] }
0x1c99   :  { %9478 = vmatmul.mubr.msk.f32.vlgmr.msra.gmra.mrb[108].mxu1 %vm6517_vm10, %v6692_v53  ;;  %8768 = vst.msk [vmem:[#allocation2 + $0x28] sm:$0xff] %vm6517_vm10, %v6692_v53  ;;  %11378 = vmatmul.mubr.msk.f32.vlgmr.msra.gmra.mrb[84].mxu0 %vm6517_vm10, %v6692_v53 }
0x1c9a   :  { %12316 = vmatpush1.bf16.msra.mxu1 %v12315_v3  ;;  %12327 = vmatpush3.bf16.msra.mxu0 %v12326_v5  ;;  %v12335_v3 = vpack.c.bf16 %v7273_v11, %v7272_v45  ;;  %v7274_v5 = vld [vmem:[%s15716_s25 + $0x10] sm:$0xff] }
0x1c9b   :  { %12318 = vmatprep.subr.bf16.mxu1 %v12317_v57  ;;  %12328 = vmatprep.subr.bf16.mxu0 %v13245_v49  ;;  %v12338_v53 = vpack.c.bf16 %v7275_v48, %v7274_v5  ;;  %v7276_v57 = vld [vmem:[%s15716_s25 + $0x20] sm:$0xff] }
0x1c9c   :  { %7174 = vmatprep.mubr.f32.mxu1 %v13247_v55  ;;  %11394 = vmatprep.mubr.msk.f32.mxu0 %vm13246_vm6, %v13247_v55  ;;  %v12341_v10 = vpack.c.bf16 %v7277_v39, %v7276_v57  ;;  %v7381_v57 = vld [vmem:[%s15715_s4 + $0x10] sm:$0xff]  ;;  %v7384_v39 = vld [vmem:[%s15715_s4 + $0x28] sm:$0xff] }
0x1c9e   :  { %12320 = vmatpush1.bf16.msra.mxu1 %v12319_v47  ;;  %12330 = vmatpush3.bf16.msra.mxu0 %v12329_v17  ;;  %v9513_v47 = vld [vmem:[%s15713_s1 + $0x1f8] sm:$0xff]  ;;  %v12371_v17 = vpack.c.bf16 %v9517_v19, %v9514_v32  ;;  %v12360_v19 = vpack.c.bf16 %v7384_v39, %v7381_v57  ;;  %v9559_v39 = vld [vmem:[%s15713_s1 + $0x310] sm:$0xff] }
0x1c9f   :  { %12322 = vmatprep.subr.bf16.mxu1 %v12321_v46  ;;  %12331 = vmatprep.subr.bf16.mxu0 %v13245_v49  ;;  %v12373_v46 = vpack.c.bf16 %v9516_v12, %v9513_v47  ;;  %v7390_v12 = vld [vmem:[%s15715_s4 + $0x58] sm:$0xff] }
0x1ca0   :  { %v8776_v33 = vld [vmem:[#allocation2 + $0x28] sm:$0xff] }
0x1ca1   :  { %8784 = vst [vmem:[#allocation24 + $0x28] sm:$0xff] %v8776_v33  ;;  %v9525_v33 = vld [vmem:[%s15713_s1 + $0x258] sm:$0xff] }
0x1ca2   :  { %12324 = vmatpush1.bf16.msra.mxu1 %v12323_v30  ;;  %12333 = vmatpush3.bf16.msra.mxu0 %v12332_v7  ;;  %v12375_v30 = vpack.c.bf16 %v9523_v34, %v9520_v42  ;;  %v9522_v7 = vld [vmem:[%s15713_s1 + $0x240] sm:$0xff]  ;;  %v12381_v6 = vpack.c.bf16 %v9528_v20, %v9525_v33  ;;  %v7396_v42 = vld [vmem:[%s15715_s4 + $0x88] sm:$0xff]  ;;  %v9524_v20 = vld [vmem:[%s15713_s1 + $0x250] sm:$0xff] }
0x1ca3   :  { %9504 = vmatprep.subr.msk.mxu1 %vm6521_vm9, %v9501_v31  ;;  %11392 = vmatprep.subr.mxu0 %v13247_v55  ;;  %v12377_v31 = vpack.c.bf16 %v9522_v7, %v9519_v60  ;;  %v7399_v60 = vld [vmem:[%s15715_s4 + $0xa0] sm:$0xff] }
0x1ca6   :  { %9505 = vmatpush1.msk.msra.mxu1 %vm6521_vm9, %v9500_v41  ;;  %11393 = vmatpush3.msk.msra.mxu0 %vm6521_vm9, %v9502_v43  ;;  %v12379_v41 = vpack.c.bf16 %v9529_v1, %v9526_v22  ;;  %v9518_v22 = vld [vmem:[%s15713_s1 + $0x220] sm:$0xff]  ;;  %v7405_v1 = vld [vmem:[%s15715_s4 + $0xd0] sm:$0x3f] }
0x1ca7   :  { %9506 = vmatmul.mubr.msk.f32.vlgmr.msra.gmra.mrb[108].mxu1 %vm6517_vm10, %v15219_v59  ;;  %12344 = vmatprep.subr.bf16.mxu0 %v12343_v14 }
0x1ca8   :  { %11395 = vmatmul.mubr.msk.f32.vlgmr.msra.gmra.mrb[86].mxu0 %vm6517_vm10, %v15219_v59  ;;  %12334 = vmatprep.subr.bf16.mxu1 %v13245_v49 }
0x1ca9   :  { %12346 = vmatpush1.bf16.msra.mxu0 %v12345_v27  ;;  %7484 = vmatprep.mubr.f32.mxu0 %v13247_v55  ;;  %v9481_v27 = vld [vmem:[%s15714_s20 + $0x2] ss:$8 sm:$0x7] }
0x1caa   :  { %12348 = vmatprep.subr.bf16.mxu0 %v12347_v18  ;;  %11411 = vmatprep.mubr.msk.f32.mxu1 %vm13246_vm6, %v13247_v55  ;;  %v7043_v18 = vrot.slane %v9481_v27, %v14683_v61  ;;  %v7047_v15 = vrot.slane %v9481_v27, %v14687_v26 }
0x1cab   :  { %12336 = vmatpush3.bf16.msra.mxu1 %v12335_v3 }
0x1cac   :  { %12337 = vmatprep.subr.bf16.mxu1 %v13245_v49  ;;  %v12523_v56 = vadd.f32 %v7086_v23, %v7043_v18  ;;  %v9533_v18 = vld [vmem:[%s15713_s1 + $0x298] sm:$0x1] }
0x1cad   :  { %12350 = vmatpush1.bf16.msra.mxu0 %v12349_v8 }
0x1cae   :  { %12352 = vmatprep.subr.bf16.mxu0 %v12351_v36  ;;  %v12525_v36 = vadd.f32 %v7090_v9, %v7047_v15  ;;  %v15385_v15 = vld [vmem:[%s13259_s5 + $0x38] sm:$0xff]  ;;  %v7279_v9 = vld [vmem:[%s15712_s28 + $0x3] ss:$0 sm:$0xff]  ;;  %s15717_s5 = sld [smem:[#allocation54_spill]] }
0x1caf   :  { %12339 = vmatpush3.bf16.msra.mxu1 %v12338_v53  ;;  %351 = vst [vmem:[#allocation2 + $0x38] sm:$0xff] %v15385_v15 }
0x1cb0   :  { %12340 = vmatprep.subr.bf16.mxu1 %v13245_v49 }
0x1cb1   :  { %12354 = vmatpush1.bf16.msra.mxu0 %v12353_v50 }
0x1cb2   :  { %12356 = vmatprep.subr.bf16.mxu0 %v12355_v21 }
0x1cb3   :  { %12342 = vmatpush3.bf16.msra.mxu1 %v12341_v10 }
0x1cb4   :  { %11409 = vmatprep.subr.mxu1 %v13247_v55 }
0x1cb5   :  { %12358 = vmatpush1.bf16.msra.mxu0 %v12357_v13  ;;  %v7094_v13 = vrot.slane %v9503_v52, %v15232_v29  ;;  %v9549_v52 = vld [vmem:[%s15713_s1 + $0x2c0] sm:$0xff] }
0x1cb6   :  { %9534 = vmatprep.subr.msk.mxu0 %vm7410_vm11, %v7404_v54 }
0x1cb7   :  { %11410 = vmatpush3.msk.msra.mxu1 %vm6521_vm9, %v7278_v16 }
0x1cb8   :  { %12359 = vmatprep.subr.bf16.mxu1 %v13245_v49 }
0x1cb9   :  { %9535 = vmatpush1.msk.msra.mxu0 %vm7410_vm11, %v7403_v51  ;;  %v7051_v51 = vrot.slane %v9481_v27, %v15232_v29  ;;  %v9531_v27 = vld [vmem:[%s15713_s1 + $0x288] sm:$0x1] }
0x1cba   :  { %9536 = vmatmul.mubr.msk.f32.vlgmr.msra.gmra.mrb[88].mxu0 %vm7406_vm12, %v6290_v0  ;;  %12372 = vmatprep.subr.bf16.mxu0 %v12371_v17  ;;  %v7387_v17 = vld [vmem:[%s15715_s4 + $0x40] sm:$0xff] }
0x1cbb   :  { %7637 = vmatprep.mubr.f32.mxu0 %v13247_v55  ;;  %12374 = vmatpush1.bf16.msra.mxu0 %v12373_v46  ;;  %v12363_v46 = vpack.c.bf16 %v7390_v12, %v7387_v17  ;;  %v9563_v17 = vld [vmem:[%s15713_s1 + $0x330] sm:$0x1]  ;;  %v9565_v12 = vld [vmem:[%s15713_s1 + $0x340] sm:$0x1] }
0x1cbc   :  { %12376 = vmatprep.subr.bf16.mxu0 %v12375_v30  ;;  %v7402_v30 = vld [vmem:[%s15715_s4 + $0xb8] sm:$0xff] }
0x1cbd   :  { %v12369_v7 = vpack.c.bf16 %v7402_v30, %v7399_v60  ;;  %v9574_v30 = vld [vmem:[%s15717_s5 + $0x70] sm:$0xff] }
0x1cbf   :  { %12378 = vmatpush1.bf16.msra.mxu0 %v12377_v31  ;;  %v9515_v31 = vld [vmem:[%s15713_s1 + $0x208] sm:$0xff] }
0x1cc0   :  { %12380 = vmatprep.subr.bf16.mxu0 %v12379_v41  ;;  %v12384_v33 = vpack.c.bf16 %v9518_v22, %v9515_v31  ;;  %v9521_v41 = vld [vmem:[%s15713_s1 + $0x238] sm:$0xff] }
0x1cc1   :  { %v9579_v22 = vld [vmem:[%s15717_s5 + $0x98] sm:$0xff] }
0x1cc3   :  { %12382 = vmatpush1.bf16.msra.mxu0 %v12381_v6  ;;  %v12387_v6 = vpack.c.bf16 %v9524_v20, %v9521_v41  ;;  %v9580_v20 = vld [vmem:[%s15717_s5 + $0xa0] sm:$0xff] }
0x1d6c   :  { %v7033_v43 = vpop.f32.mrb[84].mxu0 }
0x1d6d   :  { %v7034_v14 = vadd.f32 %v7033_v43, %v6880_v35  ;;  %v11379_v37 = vpop.f32.mrb[85].mxu0  ;;  %v9527_v43 = vld [vmem:[%s15713_s1 + $0x268] sm:$0xff] }
0x1d6e   :  { %v9546_v37 = vld [vmem:[%s15713_s1 + $0x2a8] sm:$0xff] }
0x1d6f   :  { %v7057_v11 = vadd.f32 %v7051_v51, %v7034_v14  ;;  %v12390_v14 = vpack.c.bf16 %v9530_v38, %v9527_v43  ;;  %v12392_v23 = vpack.c.bf16 %v9549_v52, %v9546_v37  ;;  %v9558_v51 = vld [vmem:[%s15713_s1 + $0x308] sm:$0xff]  ;;  %v9584_v37 = vld [vmem:[%s15717_s5 + $0xc0] sm:$0xff] }
0x1d70   :  { %v9585_v43 = vld [vmem:[%s15717_s5 + $0xc8] sm:$0xff] }
0x1d7a   :  { %v7176_v8 = vpop.f32.mrb[108].mxu1 }
0x1d7b   :  { %v12524_v25 = vadd.f32 %v12523_v56, %v7176_v8  ;;  %v7178_v2 = vpop.f32.mrb[109].mxu1  ;;  %v7247_v4 = vpop.f32.mrb[86].mxu0  ;;  %v9545_v56 = vld [vmem:[%s15713_s1 + $0x2a0] sm:$0xff]  ;;  %v9548_v8 = vld [vmem:[%s15713_s1 + $0x2b8] sm:$0xff] }
0x1d7c   :  { %v11396_v62 = vpop.f32.mrb[87].mxu0  ;;  %v12526_v21 = vadd.f32 %v12525_v36, %v7178_v2  ;;  %v7248_v40 = vadd.f32 %v7247_v4, %v7094_v13  ;;  %v9552_v36 = vld [vmem:[%s15713_s1 + $0x2d8] sm:$0xff]  ;;  %v9555_v2 = vld [vmem:[%s15713_s1 + $0x2f0] sm:$0xff] }
0x1d7d   :  { %v9509_v50 = vmul.f32 -1.442695, %v12524_v25  ;;  %v9547_v4 = vld [vmem:[%s15713_s1 + $0x2b0] sm:$0xff]  ;;  %v9550_v62 = vld [vmem:[%s15713_s1 + $0x2c8] sm:$0xff] }
0x1d7e   :  { %v9510_v44 = vmul.f32 -1.442695, %v12526_v21  ;;  %v9551_v13 = vld [vmem:[%s15713_s1 + $0x2d0] sm:$0xff] }
0x1d7f   :  { %12836 = vpow2.f32 %v9509_v50 }
0x1d80   :  { %12838 = vpow2.f32 %v9510_v44  ;;  %v12394_v44 = vpack.c.bf16 %v9548_v8, %v9545_v56  ;;  %v8152_v8 = vld [vmem:[%s15718_s2] sm:$0xff] }
0x1d89   :  { %v12837_v63 = vpop.eup %12836 }
0x1d8a   :  { %v7255_v28 = vadd.f32 1.0, %v12837_v63  ;;  %v12839_v54 = vpop.eup %12838 }
0x1d8b   :  { %v7262_v35 = vadd.f32 1.0, %v12839_v54  ;;  %v9554_v54 = vld [vmem:[%s15713_s1 + $0x2e8] sm:$0xff] }
0x1d8c   :  { %12840 = vrcp.f32 %v7255_v28  ;;  %v12396_v28 = vpack.c.bf16 %v9555_v2, %v9552_v36  ;;  %v8153_v36 = vld [vmem:[%s15718_s2 + $0x8] sm:$0xff] }
0x1d8d   :  { %12842 = vrcp.f32 %v7262_v35  ;;  %v12405_v35 = vpack.c.bf16 %v9550_v62, %v9547_v4  ;;  %v12438_v2 = vpack.c.bf16 %v8153_v36, %v8152_v8  ;;  %v8155_v4 = vld [vmem:[%s15718_s2 + $0x18] sm:$0xff] }
0x1d96   :  { %v12841_v45 = vpop.eup %12840 }
0x1d97   :  { %v7265_v3 = vmul.f32 %v12841_v45, %v7248_v40  ;;  %v12843_v48 = vpop.eup %12842  ;;  %v9561_v40 = vld [vmem:[%s15713_s1 + $0x320] sm:$0xff] }
0x1d98   :  { %v7268_v53 = vsub.f32 1.0, %v12843_v48  ;;  %v7270_v32 = vmul.f32 %v12843_v48, %v15219_v59  ;;  %v7393_v59 = vld [vmem:[%s15715_s4 + $0x70] sm:$0xff]  ;;  %v9553_v45 = vld [vmem:[%s15713_s1 + $0x2e0] sm:$0xff] }
0x1d99   :  { %v7266_v5 = vadd.f32 %v7265_v3, %v7057_v11  ;;  %v12366_v34 = vpack.c.bf16 %v7396_v42, %v7393_v59  ;;  %v9556_v11 = vld [vmem:[%s15713_s1 + $0x2f8] sm:$0xff]  ;;  %v12398_v3 = vpack.c.bf16 %v9554_v54, %v9551_v13  ;;  %v9557_v48 = vld [vmem:[%s15713_s1 + $0x300] sm:$0xff] }
0x1d9a   :  { %v12408_v57 = vpack.c.bf16 %v9556_v11, %v9553_v45  ;;  %v9575_v42 = vld [vmem:[%s15717_s5 + $0x78] sm:$0xff]  ;;  %v8160_v54 = vld [vmem:[%s15718_s2 + $0x40] sm:$0xff] }
0x1d9b   :  { %12844 = vtanh.f32 %v7266_v5  ;;  %v12400_v5 = vpack.c.bf16 %v9561_v40, %v9558_v51  ;;  %v8161_v51 = vld [vmem:[%s15718_s2 + $0x48] sm:$0xff]  ;;  %v8162_v40 = vld [vmem:[%s15718_s2 + $0x50] sm:$0xff]  ;;  %v8163_v45 = vld [vmem:[%s15718_s2 + $0x58] sm:$0xff] }
0x1d9c   :  { %v12453_v11 = vpack.c.bf16 %v8163_v45, %v8162_v40 }
0x1da5   :  { %v12845_v10 = vpop.eup %12844 }
0x1da6   :  { %v7269_v16 = vmul.f32 %v12845_v10, %v7268_v53  ;;  %v9560_v53 = vld [vmem:[%s15713_s1 + $0x318] sm:$0xff]  ;;  %v9562_v10 = vld [vmem:[%s15713_s1 + $0x328] sm:$0xff] }
0x1da8   :  { %v15342_v47 = vadd.f32 %v7270_v32, %v7269_v16  ;;  %v12402_v16 = vpack.c.bf16 %v9560_v53, %v9557_v48  ;;  %v12411_v32 = vpack.c.bf16 %v9562_v10, %v9559_v39  ;;  %v8166_v53 = vld [vmem:[%s15718_s2 + $0x70] sm:$0xff]  ;;  %v8168_v10 = vld [vmem:[%s15718_s2 + $0x80] sm:$0xff] }
0x1daa   :  { %11412 = vmatmul.mubr.msk.f32.vlgmr.msra.gmra.mrb[110].mxu1 %vm6517_vm10, %v15342_v47 }
0x1dab   :  { %12361 = vmatpush3.bf16.msra.mxu1 %v12360_v19  ;;  %11432 = vmatprep.mubr.msk.f32.mxu1 %vm13246_vm6, %v13247_v55  ;;  %v9564_v19 = vld [vmem:[%s15713_s1 + $0x338] sm:$0x1] }
0x1dac   :  { %12362 = vmatprep.subr.bf16.mxu1 %v13245_v49 }
0x1daf   :  { %12364 = vmatpush3.bf16.msra.mxu1 %v12363_v46 }
0x1db0   :  { %12365 = vmatprep.subr.bf16.mxu1 %v13245_v49 }
0x1db3   :  { %12367 = vmatpush3.bf16.msra.mxu1 %v12366_v34  ;;  %v9577_v34 = vld [vmem:[%s15717_s5 + $0x88] sm:$0xff] }
0x1db4   :  { %12368 = vmatprep.subr.bf16.mxu1 %v13245_v49  ;;  %v12413_v60 = vpack.c.bf16 %v9577_v34, %v9575_v42  ;;  %v8173_v42 = vld [vmem:[%s15718_s2 + $0xa8] sm:$0xff] }
0x1db7   :  { %12370 = vmatpush3.bf16.msra.mxu1 %v12369_v7  ;;  %v9576_v7 = vld [vmem:[%s15717_s5 + $0x80] sm:$0xff] }
0x1db8   :  { %11430 = vmatprep.subr.mxu1 %v13247_v55  ;;  %v12415_v31 = vpack.c.bf16 %v9576_v7, %v9574_v30 }
0x1dbb   :  { %11431 = vmatpush3.msk.msra.mxu1 %vm7410_vm11, %v7405_v1  ;;  %v9581_v1 = vld [vmem:[%s15717_s5 + $0xa8] sm:$0xff] }
0x1dbc   :  { %11433 = vmatmul.mubr.msk.f32.vlgmr.msra.gmra.mrb[112].mxu1 %vm7406_vm12, %v6290_v0  ;;  %12383 = vmatprep.subr.bf16.mxu1 %v13245_v49  ;;  %v9532_v0 = vld [vmem:[%s15713_s1 + $0x290] sm:$0x1]  ;;  %v12417_v41 = vpack.c.bf16 %v9581_v1, %v9579_v22  ;;  %v9544_v22 = vld [vmem:[%s15714_s20 + $0x4] ss:$8 sm:$0x7] }
0x1dbd   :  { %12385 = vmatpush3.bf16.msra.mxu1 %v12384_v33  ;;  %11449 = vmatprep.mubr.msk.f32.mxu1 %vm13246_vm6, %v13247_v55  ;;  %v9578_v33 = vld [vmem:[%s15717_s5 + $0x90] sm:$0xff]  ;;  %v7720_v1 = vrot.slane %v9544_v22, %v14683_v61  ;;  %v7728_v36 = vrot.slane %v9544_v22, %v15232_v29 }
0x1dbe   :  { %12386 = vmatprep.subr.bf16.mxu1 %v13245_v49  ;;  %9539 = vmatprep.subr.msk.mxu0 %vm6521_vm9, %v9532_v0  ;;  %v12419_v38 = vpack.c.bf16 %v9580_v20, %v9578_v33  ;;  %v9582_v0 = vld [vmem:[%s15717_s5 + $0xb0] sm:$0xff] }
0x1dbf   :  { %9540 = vmatpush1.msk.msra.mxu0 %vm6521_vm9, %v9531_v27  ;;  %v12423_v52 = vpack.c.bf16 %v9584_v37, %v9582_v0  ;;  %v9587_v27 = vld [vmem:[%s15717_s5 + $0xd8] sm:$0x1] }
0x1dc0   :  { %12393 = vmatprep.subr.bf16.mxu0 %v12392_v23  ;;  %v7952_v23 = vld [vmem:[%s15717_s5 + $0x18] sm:$0xff] }
0x1dc1   :  { %12388 = vmatpush3.bf16.msra.mxu1 %v12387_v6  ;;  %v9583_v6 = vld [vmem:[%s15717_s5 + $0xb8] sm:$0xff] }
0x1dc2   :  { %12389 = vmatprep.subr.bf16.mxu1 %v13245_v49 }
0x1dc5   :  { %12391 = vmatpush3.bf16.msra.mxu1 %v12390_v14  ;;  %v12421_v14 = vpack.c.bf16 %v9585_v43, %v9583_v6 }
0x1dc6   :  { %11447 = vmatprep.subr.mxu1 %v13247_v55 }
0x1dc9   :  { %11448 = vmatpush3.msk.msra.mxu1 %vm6521_vm9, %v9533_v18  ;;  %v7950_v18 = vld [vmem:[%s15717_s5 + $0x8] sm:$0xff] }
0x1dca   :  { %12404 = vmatprep.subr.bf16.mxu1 %v13245_v49  ;;  %v12425_v56 = vpack.c.bf16 %v7952_v23, %v7950_v18 }
0x1e7d   :  { %v7352_v25 = vpop.f32.mrb[110].mxu1 }
0x1e7e   :  { %v7353_v50 = vadd.f32 %v7352_v25, %v7279_v9  ;;  %v11413_v21 = vpop.f32.mrb[111].mxu1  ;;  %v9586_v9 = vld [vmem:[%s15717_s5 + $0xd0] sm:$0x1] }
0x1e7f   :  { %v8154_v25 = vld [vmem:[%s15718_s2 + $0x10] sm:$0xff]  ;;  %v8157_v21 = vld [vmem:[%s15718_s2 + $0x28] sm:$0xff] }
0x1e80   :  { %v7356_v63 = vmax.f32 %v7353_v50, 0.0  ;;  %v12441_v62 = vpack.c.bf16 %v8155_v4, %v8154_v25  ;;  %v8156_v50 = vld [vmem:[%s15718_s2 + $0x20] sm:$0xff] }
0x1e82   :  { %9541 = vmatmul.mubr.msk.f32.vlgmr.msra.gmra.mrb[88].mxu0 %vm6517_vm10, %v7356_v63  ;;  %11450 = vmatmul.mubr.msk.f32.vlgmr.msra.gmra.mrb[114].mxu1 %vm6517_vm10, %v7356_v63  ;;  %v8158_v63 = vld [vmem:[%s15718_s2 + $0x30] sm:$0xff] }
0x1e83   :  { %12395 = vmatpush1.bf16.msra.mxu0 %v12394_v44  ;;  %7851 = vmatprep.mubr.f32.mxu0 %v13247_v55  ;;  %v12444_v44 = vpack.c.bf16 %v8157_v21, %v8156_v50 }
0x1e84   :  { %12397 = vmatprep.subr.bf16.mxu0 %v12396_v28  ;;  %12406 = vmatpush3.bf16.msra.mxu1 %v12405_v35  ;;  %v8159_v28 = vld [vmem:[%s15718_s2 + $0x38] sm:$0xff]  ;;  %v12450_v35 = vpack.c.bf16 %v8161_v51, %v8160_v54  ;;  %v7954_v51 = vld [vmem:[%s15717_s5 + $0x28] sm:$0xff] }
0x1e85   :  { %12407 = vmatprep.subr.bf16.mxu1 %v13245_v49  ;;  %11466 = vmatprep.mubr.msk.f32.mxu1 %vm13246_vm6, %v13247_v55  ;;  %v12447_v13 = vpack.c.bf16 %v8159_v28, %v8158_v63  ;;  %v7949_v28 = vld [vmem:[%s15717_s5] sm:$0xff] }
0x1e87   :  { %12399 = vmatpush1.bf16.msra.mxu0 %v12398_v3  ;;  %v8164_v3 = vld [vmem:[%s15718_s2 + $0x60] sm:$0xff] }
0x1e88   :  { %12401 = vmatprep.subr.bf16.mxu0 %v12400_v5  ;;  %12409 = vmatpush3.bf16.msra.mxu1 %v12408_v57  ;;  %v8165_v5 = vld [vmem:[%s15718_s2 + $0x68] sm:$0xff]  ;;  %v8167_v57 = vld [vmem:[%s15718_s2 + $0x78] sm:$0xff] }
0x1e89   :  { %12410 = vmatprep.subr.bf16.mxu1 %v13245_v49  ;;  %v12456_v48 = vpack.c.bf16 %v8165_v5, %v8164_v3  ;;  %v12459_v39 = vpack.c.bf16 %v8167_v57, %v8166_v53  ;;  %v7953_v5 = vld [vmem:[%s15717_s5 + $0x20] sm:$0xff]  ;;  %v7958_v53 = vld [vmem:[%s15717_s5 + $0x48] sm:$0xff]  ;;  %v7960_v57 = vld [vmem:[%s15717_s5 + $0x58] sm:$0xff] }
0x1e8b   :  { %12403 = vmatpush1.bf16.msra.mxu0 %v12402_v16  ;;  %v8169_v16 = vld [vmem:[%s15718_s2 + $0x88] sm:$0xff] }
0x1e8c   :  { %9567 = vmatprep.subr.msk.mxu0 %vm6521_vm9, %v9564_v19  ;;  %12412 = vmatpush3.bf16.msra.mxu1 %v12411_v32  ;;  %v12462_v32 = vpack.c.bf16 %v8169_v16, %v8168_v10  ;;  %v8170_v19 = vld [vmem:[%s15718_s2 + $0x90] sm:$0xff]  ;;  %v7957_v10 = vld [vmem:[%s15717_s5 + $0x40] sm:$0xff] }
0x1e8d   :  { %11464 = vmatprep.subr.mxu1 %v13247_v55  ;;  %v7959_v16 = vld [vmem:[%s15717_s5 + $0x50] sm:$0xff] }
0x1e8f   :  { %v15417_v46 = vpop.f32.mrb[112].mxu1  ;;  %9568 = vmatpush1.msk.msra.mxu0 %vm6521_vm9, %v9563_v17  ;;  %v8171_v17 = vld [vmem:[%s15718_s2 + $0x98] sm:$0xff] }
0x1e90   :  { %v11434_v59 = vpop.f32.mrb[113].mxu1  ;;  %9569 = vmatmul.mubr.msk.f32.vlgmr.msra.gmra.mrb[88].mxu0 %vm6517_vm10, %v15385_v15  ;;  %11465 = vmatpush3.msk.msra.mxu1 %vm6521_vm9, %v9565_v12  ;;  %v12465_v12 = vpack.c.bf16 %v8171_v17, %v8170_v19  ;;  %v7962_v19 = vld [vmem:[%s15717_s5 + $0x68] sm:$0x1] }
0x1e91   :  { %11467 = vmatmul.mubr.msk.f32.vlgmr.msra.gmra.mrb[116].mxu1 %vm6517_vm10, %v15385_v15  ;;  %8051 = vmatprep.mubr.f32.mxu0 %v13247_v55  ;;  %v8172_v59 = vld [vmem:[%s15718_s2 + $0xa0] sm:$0xff] }
0x1e92   :  { %12437 = vmatprep.subr.bf16.mxu1 %v13245_v49  ;;  %12414 = vmatprep.subr.bf16.mxu0 %v12413_v60  ;;  %v12468_v34 = vpack.c.bf16 %v8173_v42, %v8172_v59  ;;  %v8174_v59 = vld [vmem:[%s15718_s2 + $0xb0] sm:$0xff]  ;;  %v8175_v42 = vld [vmem:[%s15718_s2 + $0xb8] sm:$0xff] }
0x1e93   :  { %12416 = vmatpush1.bf16.msra.mxu0 %v12415_v31  ;;  %12439 = vmatpush1.bf16.msra.mxu1 %v12438_v2  ;;  %v9566_v31 = vld [vmem:[%s15714_s20 + $0x5] ss:$8 sm:$0x7] }
0x1e94   :  { %12418 = vmatprep.subr.bf16.mxu0 %v12417_v41  ;;  %12440 = vmatprep.subr.bf16.mxu1 %v13245_v49  ;;  %v7763_v33 = vrot.slane %v9566_v31, %v14683_v61  ;;  %v7724_v41 = vrot.slane %v9544_v22, %v14687_v26  ;;  %v7767_v20 = vrot.slane %v9566_v31, %v14687_v26 }
0x1e96   :  { %v12527_v6 = vadd.f32 %v7763_v33, %v7720_v1  ;;  %v9608_v1 = vld [vmem:[%s15716_s25 + $0x88] sm:$0xff] }
0x1e97   :  { %12420 = vmatpush1.bf16.msra.mxu0 %v12419_v38  ;;  %12442 = vmatpush1.bf16.msra.mxu1 %v12441_v62  ;;  %v12529_v38 = vadd.f32 %v7767_v20, %v7724_v41  ;;  %v9594_v41 = vld [vmem:[%s15712_s28 + $0x4] ss:$8 sm:$0x3] }
0x1e98   :  { %12422 = vmatprep.subr.bf16.mxu0 %v12421_v14  ;;  %12443 = vmatprep.subr.bf16.mxu1 %v13245_v49  ;;  %v8141_v20 = vrot.slane %v9594_v41, %v14683_v61 }
0x1e9b   :  { %12424 = vmatpush1.bf16.msra.mxu0 %v12423_v52  ;;  %12445 = vmatpush1.bf16.msra.mxu1 %v12444_v44 }
0x1e9c   :  { %9588 = vmatprep.subr.msk.mxu0 %vm6521_vm9, %v9587_v27  ;;  %12446 = vmatprep.subr.bf16.mxu1 %v13245_v49 }
0x1e9f   :  { %9589 = vmatpush1.msk.msra.mxu0 %vm6521_vm9, %v9586_v9  ;;  %12448 = vmatpush1.bf16.msra.mxu1 %v12447_v13  ;;  %v7951_v13 = vld [vmem:[%s15717_s5 + $0x10] sm:$0xff] }
0x1ea0   :  { %12426 = vmatprep.subr.bf16.mxu0 %v12425_v56  ;;  %12449 = vmatprep.subr.bf16.mxu1 %v13245_v49  ;;  %v7771_v56 = vrot.slane %v9566_v31, %v15232_v29  ;;  %v12427_v45 = vpack.c.bf16 %v7951_v13, %v7949_v28  ;;  %v9607_v31 = vld [vmem:[%s15716_s25 + $0x80] sm:$0xff]  ;;  %v9598_v28 = vld [vmem:[%s15716_s25 + $0x38] sm:$0xff] }
0x1ea1   :  { %v12477_v33 = vpack.c.bf16 %v9608_v1, %v9607_v31  ;;  %v9599_v13 = vld [vmem:[%s15716_s25 + $0x40] sm:$0xff] }
0x1ea2   :  { %v8430_v31 = vld [vmem:[%s15712_s28 + $0x6] ss:$0 sm:$0xff] }
0x1ea3   :  { %12451 = vmatpush1.bf16.msra.mxu1 %v12450_v35  ;;  %v7956_v35 = vld [vmem:[%s15717_s5 + $0x38] sm:$0xff] }
0x1ea4   :  { %12452 = vmatprep.subr.bf16.mxu1 %v13245_v49  ;;  %v12429_v3 = vpack.c.bf16 %v7956_v35, %v7954_v51  ;;  %v12483_v35 = vpack.c.bf16 %v9599_v13, %v9598_v28 }
0x1ea7   :  { %12454 = vmatpush1.bf16.msra.mxu1 %v12453_v11 }
0x1ea8   :  { %12455 = vmatprep.subr.bf16.mxu1 %v13245_v49 }
0x1eab   :  { %12457 = vmatpush1.bf16.msra.mxu1 %v12456_v48  ;;  %v7955_v48 = vld [vmem:[%s15717_s5 + $0x30] sm:$0xff] }
0x1eac   :  { %12458 = vmatprep.subr.bf16.mxu1 %v13245_v49 }
0x1eaf   :  { %12460 = vmatpush1.bf16.msra.mxu1 %v12459_v39  ;;  %v12431_v39 = vpack.c.bf16 %v7955_v48, %v7953_v5  ;;  %v9602_v5 = vld [vmem:[%s15716_s25 + $0x58] sm:$0xff]  ;;  %v9603_v48 = vld [vmem:[%s15716_s25 + $0x60] sm:$0xff] }
0x1eb0   :  { %12461 = vmatprep.subr.bf16.mxu1 %v13245_v49 }
0x1eb3   :  { %12463 = vmatpush1.bf16.msra.mxu1 %v12462_v32  ;;  %v12435_v32 = vpack.c.bf16 %v7959_v16, %v7957_v10  ;;  %v9623_v10 = vld [vmem:[%s15716_s25 + $0xe0] sm:$0xff]  ;;  %v9624_v16 = vld [vmem:[%s15716_s25 + $0xe8] sm:$0xff] }
0x1eb4   :  { %12464 = vmatprep.subr.bf16.mxu1 %v13245_v49 }
0x1eb7   :  { %12466 = vmatpush1.bf16.msra.mxu1 %v12465_v12  ;;  %v7961_v12 = vld [vmem:[%s15717_s5 + $0x60] sm:$0x1] }
0x1eb8   :  { %12467 = vmatprep.subr.bf16.mxu1 %v13245_v49 }
0x1ebb   :  { %12469 = vmatpush1.bf16.msra.mxu1 %v12468_v34  ;;  %v12471_v34 = vpack.c.bf16 %v8175_v42, %v8174_v59  ;;  %v9628_v59 = vld [vmem:[%s15716_s25 + $0x108] sm:$0xff] }
0x1ebc   :  { %12470 = vmatprep.subr.bf16.mxu1 %v13245_v49 }
0x1ebf   :  { %12472 = vmatpush1.bf16.msra.mxu1 %v12471_v34  ;;  %v9629_v34 = vld [vmem:[%s15716_s25 + $0x110] sm:$0x1] }
0x1ec0   :  { %8234 = vmatprep.subr.mxu1 %v13247_v55 }
0x1f55   :  { %v7710_v60 = vpop.f32.mrb[114].mxu1 }
0x1f56   :  { %v7711_v30 = vadd.f32 %v7710_v60, %v15417_v46  ;;  %v11451_v7 = vpop.f32.mrb[115].mxu1  ;;  %v8176_v60 = vld [vmem:[%s15718_s2 + $0xc0] sm:$0xf] }
0x1f57   :  { %9595 = vmatpush1.msk.msra.mxu1 %vm8182_vm13, %v8176_v60  ;;  %v9606_v7 = vld [vmem:[%s15716_s25 + $0x78] sm:$0xff] }
0x1f58   :  { %v7734_v62 = vadd.f32 %v7728_v36, %v7711_v30  ;;  %12500 = vmatprep.subr.bf16.mxu1 %v13245_v49  ;;  %v9605_v30 = vld [vmem:[%s15716_s25 + $0x70] sm:$0xff]  ;;  %v9622_v36 = vld [vmem:[%s15716_s25 + $0xd8] sm:$0x1] }
0x1f59   :  { %v12474_v22 = vpack.c.bf16 %v9606_v7, %v9605_v30 }
0x1f63   :  { %v7853_v43 = vpop.f32.mrb[88].mxu0 }
0x1f64   :  { %v12528_v14 = vadd.f32 %v12527_v6, %v7853_v43  ;;  %v7855_v0 = vpop.f32.mrb[89].mxu0  ;;  %v7924_v37 = vpop.f32.mrb[116].mxu1  ;;  %v8145_v6 = vrot.slane %v9594_v41, %v14687_v26  ;;  %v9620_v26 = vld [vmem:[%s15716_s25 + $0xc8] sm:$0xff] }
0x1f65   :  { %v11468_v52 = vpop.f32.mrb[117].mxu1  ;;  %v12530_v46 = vadd.f32 %v12529_v38, %v7855_v0  ;;  %v7925_v2 = vadd.f32 %v7924_v37, %v7771_v56  ;;  %v9616_v0 = vld [vmem:[%s15716_s25 + $0xa8] sm:$0xff]  ;;  %v9617_v37 = vld [vmem:[%s15716_s25 + $0xb0] sm:$0xff] }
0x1f66   :  { %v9572_v27 = vmul.f32 -1.442695, %v12528_v14  ;;  %v9621_v56 = vld [vmem:[%s15716_s25 + $0xd0] sm:$0xff] }
0x1f67   :  { %v9573_v18 = vmul.f32 -1.442695, %v12530_v46  ;;  %v12501_v46 = vpack.c.bf16 %v9617_v37, %v9616_v0  ;;  %v8682_v0 = vld [vmem:[%s13469_s9 + $0x18] sm:$0xff] }
0x1f68   :  { %12846 = vpow2.f32 %v9572_v27 }
0x1f69   :  { %12848 = vpow2.f32 %v9573_v18 }
0x1f72   :  { %v12847_v23 = vpop.eup %12846 }
0x1f73   :  { %v7932_v9 = vadd.f32 1.0, %v12847_v23  ;;  %v12849_v8 = vpop.eup %12848  ;;  %v9618_v23 = vld [vmem:[%s15716_s25 + $0xb8] sm:$0xff] }
0x1f74   :  { %v7939_v25 = vadd.f32 1.0, %v12849_v8  ;;  %v12507_v8 = vpack.c.bf16 %v9621_v56, %v9620_v26 }
0x1f75   :  { %12850 = vrcp.f32 %v7932_v9  ;;  %v9619_v9 = vld [vmem:[%s15716_s25 + $0xc0] sm:$0xff] }
0x1f76   :  { %12852 = vrcp.f32 %v7939_v25  ;;  %v12504_v61 = vpack.c.bf16 %v9619_v9, %v9618_v23  ;;  %v9638_v25 = vld [vmem:[%s13474_s29 + $0x8] sm:$0x7f]  ;;  %v8598_v9 = vld [vmem:[%s15712_s28 + $0x7] ss:$0 sm:$0xff] }
0x1f7f   :  { %v12851_v4 = vpop.eup %12850 }
0x1f80   :  { %v7942_v50 = vmul.f32 %v12851_v4, %v7925_v2  ;;  %v12853_v44 = vpop.eup %12852  ;;  %v9609_v2 = vld [vmem:[%s15716_s25 + $0x90] sm:$0xff] }
0x1f81   :  { %v7945_v63 = vsub.f32 1.0, %v12853_v44  ;;  %v7947_v40 = vmul.f32 %v12853_v44, %v15385_v15  ;;  %v12433_v15 = vpack.c.bf16 %v7960_v57, %v7958_v53  ;;  %v12489_v53 = vpack.c.bf16 %v9603_v48, %v9602_v5 }
0x1f82   :  { %v7943_v21 = vadd.f32 %v7942_v50, %v7734_v62  ;;  %v9611_v62 = vld [vmem:[%s15716_s25 + $0xa0] sm:$0x1]  ;;  %v8177_v50 = vld [vmem:[%s15712_s28 + $0x5] ss:$0 sm:$0xff] }
0x1f84   :  { %12854 = vtanh.f32 %v7943_v21 }
0x1f8e   :  { %v12855_v54 = vpop.eup %12854 }
0x1f8f   :  { %v7946_v29 = vmul.f32 %v12855_v54, %v7945_v63  ;;  %v9597_v54 = vld [vmem:[%s15719_s7] ss:$0 sm:$0xff] }
0x1f91   :  { %v15492_v11 = vadd.f32 %v7947_v40, %v7946_v29  ;;  %v9600_v40 = vld [vmem:[%s15716_s25 + $0x48] sm:$0xff] }
0x1f93   :  { %9590 = vmatmul.mubr.msk.f32.vlgmr.msra.gmra.mrb[90].mxu0 %vm6517_vm10, %v15492_v11  ;;  %8770 = vst.msk [vmem:[#allocation2 + $0x38] sm:$0xff] %vm6517_vm10, %v15492_v11 }
0x1f94   :  { %12428 = vmatpush1.bf16.msra.mxu0 %v12427_v45  ;;  %8128 = vmatprep.mubr.f32.mxu0 %v13247_v55  ;;  %v9601_v45 = vld [vmem:[%s15716_s25 + $0x50] sm:$0xff] }
0x1f95   :  { %12430 = vmatprep.subr.bf16.mxu0 %v12429_v3  ;;  %v12486_v3 = vpack.c.bf16 %v9601_v45, %v9600_v40 }
0x1f98   :  { %12432 = vmatpush1.bf16.msra.mxu0 %v12431_v39 }
0x1f99   :  { %12434 = vmatprep.subr.bf16.mxu0 %v12433_v15  ;;  %v9604_v15 = vld [vmem:[%s15716_s25 + $0x68] sm:$0x1] }
0x1f9a   :  { %v8778_v17 = vld [vmem:[#allocation2 + $0x38] sm:$0xff] }
0x1f9b   :  { %8786 = vst [vmem:[#allocation24 + $0x38] sm:$0xff] %v8778_v17  ;;  %v9626_v17 = vld [vmem:[%s15716_s25 + $0xf8] sm:$0xff] }
0x1f9c   :  { %12436 = vmatpush1.bf16.msra.mxu0 %v12435_v32  ;;  %v9625_v32 = vld [vmem:[%s15716_s25 + $0xf0] sm:$0xff] }
0x1f9d   :  { %9591 = vmatprep.subr.msk.mxu0 %vm6521_vm9, %v7962_v19  ;;  %v12492_v19 = vpack.c.bf16 %v9624_v16, %v9623_v10 }
0x1fa0   :  { %9592 = vmatpush1.msk.msra.mxu0 %vm6521_vm9, %v7961_v12  ;;  %v12495_v12 = vpack.c.bf16 %v9626_v17, %v9625_v32 }
0x1fa1   :  { %9593 = vmatmul.mubr.msk.f32.vlgmr.msra.gmra.mrb[90].mxu0 %vm6517_vm10, %v15342_v47  ;;  %12473 = vmatprep.subr.bf16.mxu0 %v13245_v49 }
0x1fa2   :  { %11483 = vmatprep.mubr.msk.f32.mxu0 %vm13246_vm6, %v13247_v55  ;;  %12475 = vmatpush3.bf16.msra.mxu0 %v12474_v22 }
0x1fa3   :  { %12476 = vmatprep.subr.bf16.mxu0 %v13245_v49 }
0x1fa6   :  { %12478 = vmatpush3.bf16.msra.mxu0 %v12477_v33 }
0x1fa7   :  { %12479 = vmatprep.subr.bf16.mxu0 %v13245_v49 }
0x2074   :  { %v8130_v43 = vpop.f32.mrb[90].mxu0 }
0x2075   :  { %v8148_v38 = vadd.f32 %v8141_v20, %v8130_v43  ;;  %v8132_v14 = vpop.f32.mrb[91].mxu0  ;;  %v8601_v20 = vld [vmem:[%s15720_s3] sm:$0x7f]  ;;  %v8680_v43 = vld [vmem:[%s13469_s9 + $0x8] sm:$0xff] }
0x2076   :  { %v8149_v52 = vadd.f32 %v8145_v6, %v8132_v14  ;;  %v8679_v6 = vld [vmem:[%s13469_s9] sm:$0xff]  ;;  %v8681_v14 = vld [vmem:[%s13469_s9 + $0x10] sm:$0xff] }
0x2077   :  { %v8150_v18 = vmax.f32 %v8148_v38, 0.0  ;;  %v12510_v38 = vpack.c.bf16 %v8680_v43, %v8679_v6  ;;  %v12513_v37 = vpack.c.bf16 %v8682_v0, %v8681_v14 }
0x2078   :  { %v8151_v27 = vmax.f32 %v8149_v52, 0.0  ;;  %v8683_v52 = vld [vmem:[%s13469_s9 + $0x20] sm:$0xff] }
0x207a   :  { %9596 = vmatprep.mubr.msk.f32.mxu1 %vm8178_vm14, %v8151_v27  ;;  %v8684_v27 = vld [vmem:[%s13469_s9 + $0x28] sm:$0xff] }
0x207b   :  { %8251 = vmatmul.mubr.f32.vlgmr.msra.gmra.mrb[118].mxu1 %v8150_v18  ;;  %v8685_v18 = vld [vmem:[%s13469_s9 + $0x30] sm:$0x1]  ;;  %s13249_s9 = smov [#allocation24]  }
0x207c   :  { %12502 = vmatpush3.bf16.msra.mxu1 %v12501_v46  ;;  %11534 = vmatprep.mubr.msk.f32.mxu1 %vm13246_vm6, %v13247_v55  ;;  %v12516_v46 = vpack.c.bf16 %v8684_v27, %v8683_v52 }
0x207d   :  { %12503 = vmatprep.subr.bf16.mxu1 %v13245_v49 }
0x2080   :  { %12505 = vmatpush3.bf16.msra.mxu1 %v12504_v61 }
0x2081   :  { %12506 = vmatprep.subr.bf16.mxu1 %v13245_v49 }
0x2084   :  { %12508 = vmatpush3.bf16.msra.mxu1 %v12507_v8 }
0x2085   :  { %11532 = vmatprep.subr.mxu1 %v13247_v55 }
0x2088   :  { %11533 = vmatpush3.msk.msra.mxu1 %vm6521_vm9, %v9622_v36 }
0x2089   :  { %11535 = vmatmul.mubr.msk.f32.vlgmr.msra.gmra.mrb[120].mxu1 %vm6517_vm10, %v15342_v47  ;;  %11559 = vmatprep.subr.mxu1 %v13247_v55  ;;  %v9610_v47 = vld [vmem:[%s15716_s25 + $0x98] sm:$0xff] }
0x208a   :  { %11560 = vmatpush3.msk.msra.mxu1 %vm401_vm0, %v9638_v25  ;;  %11561 = vmatprep.mubr.msk.f32.mxu1 %vm13246_vm6, %v13247_v55  ;;  %v12480_v4 = vpack.c.bf16 %v9610_v47, %v9609_v2 }
0x208b   :  { %11564 = vmatprep.subr.mxu1 %v13247_v55 }
0x208c   :  { %12481 = vmatpush3.bf16.msra.mxu0 %v12480_v4 }
0x208d   :  { %11562 = vmatmul.mubr.msk.f32.vlgmr.msra.gmra.mrb[122].mxu1 %vm376_vm1, %v15054_v24  ;;  %11481 = vmatprep.subr.mxu0 %v13247_v55 }
0x208e   :  { %11566 = vmatprep.mubr.msk.f32.mxu1 %vm13246_vm6, %v13247_v55 }
0x2090   :  { %11482 = vmatpush3.msk.msra.mxu0 %vm6521_vm9, %v9611_v62 }
0x2091   :  { %12482 = vmatprep.subr.bf16.mxu0 %v13245_v49 }
0x214e   :  { %v8252_v21 = vpop.f32.mrb[118].mxu1 }
0x214f   :  { %v8253_v44 = vadd.f32 %v8252_v21, %v8177_v50  ;;  %v8254_v63 = vpop.f32.mrb[119].mxu1  ;;  %v8772_v50 = vld [vmem:[#allocation2 + $0x8] sm:$0xff]  ;;  %v8773_v21 = vld [vmem:[#allocation2 + $0x10] sm:$0xff] }
0x2150   :  { %8780 = vst [vmem:[#allocation24 + $0x8] sm:$0xff] %v8772_v50  ;;  %8781 = vst [vmem:[#allocation24 + $0x10] sm:$0xff] %v8773_v21 }
0x2151   :  { %v8256_v51 = vmax.f32 %v8253_v44, 0.0  ;;  %v8775_v44 = vld [vmem:[#allocation2 + $0x20] sm:$0xff] }
0x2152   :  { %8783 = vst [vmem:[#allocation24 + $0x20] sm:$0xff] %v8775_v44 }
0x2153   :  { %v15563_v29 = vmul.f32 %v9597_v54, %v8256_v51 }
0x2155   :  { %11484 = vmatmul.mubr.msk.f32.vlgmr.msra.gmra.mrb[92].mxu0 %vm6517_vm10, %v15563_v29 }
0x2156   :  { %12484 = vmatpush3.bf16.msra.mxu0 %v12483_v35  ;;  %11500 = vmatprep.mubr.msk.f32.mxu0 %vm13246_vm6, %v13247_v55 }
0x2157   :  { %12485 = vmatprep.subr.bf16.mxu0 %v13245_v49 }
0x215a   :  { %12487 = vmatpush3.bf16.msra.mxu0 %v12486_v3 }
0x215b   :  { %12488 = vmatprep.subr.bf16.mxu0 %v13245_v49 }
0x215c   :  { %v15575_v57 = vpop.f32.mrb[120].mxu1 }
0x215d   :  { %v11536_v39 = vpop.f32.mrb[121].mxu1 }
0x215e   :  { %12490 = vmatpush3.bf16.msra.mxu0 %v12489_v53 }
0x215f   :  { %11498 = vmatprep.subr.mxu0 %v13247_v55 }
0x2162   :  { %11499 = vmatpush3.msk.msra.mxu0 %vm6521_vm9, %v9604_v15 }
0x2163   :  { %11501 = vmatmul.mubr.msk.f32.vlgmr.msra.gmra.mrb[94].mxu0 %vm6517_vm10, %v15492_v11  ;;  %12491 = vmatprep.subr.bf16.mxu0 %v13245_v49  ;;  %v9627_v11 = vld [vmem:[%s15716_s25 + $0x100] sm:$0xff] }
0x2164   :  { %11517 = vmatprep.mubr.msk.f32.mxu0 %vm13246_vm6, %v13247_v55  ;;  %12493 = vmatpush3.bf16.msra.mxu0 %v12492_v19  ;;  %v12498_v42 = vpack.c.bf16 %v9628_v59, %v9627_v11 }
0x2165   :  { %12494 = vmatprep.subr.bf16.mxu0 %v13245_v49 }
0x2168   :  { %12496 = vmatpush3.bf16.msra.mxu0 %v12495_v12 }
0x2169   :  { %12497 = vmatprep.subr.bf16.mxu0 %v13245_v49 }
0x216c   :  { %12499 = vmatpush3.bf16.msra.mxu0 %v12498_v42 }
0x216d   :  { %11515 = vmatprep.subr.mxu0 %v13247_v55 }
0x2170   :  { %11516 = vmatpush3.msk.msra.mxu0 %vm6521_vm9, %v9629_v34 }
0x2171   :  { %11537 = vmatprep.subr.mxu0 %v13247_v55 }
0x2228   :  { %v8353_v60 = vpop.f32.mrb[92].mxu0 }
0x2229   :  { %v11485_v30 = vpop.f32.mrb[93].mxu0 }
0x2236   :  { %v8426_v7 = vpop.f32.mrb[94].mxu0 }
0x2237   :  { %v8427_v22 = vadd.f32 %v8426_v7, %v8353_v60  ;;  %v11502_v1 = vpop.f32.mrb[95].mxu0 }
0x2239   :  { %v8431_v33 = vadd.f32 %v8430_v31, %v8427_v22 }
0x223b   :  { %v8432_v41 = vmax.f32 %v8431_v33, 0.0 }
0x223d   :  { %11518 = vmatmul.mubr.msk.f32.vlgmr.msra.gmra.mrb[96].mxu0 %vm6517_vm10, %v8432_v41 }
0x223e   :  { %11538 = vmatpush3.msk.msra.mxu0 %vm401_vm0, %v8601_v20  ;;  %11539 = vmatprep.mubr.msk.f32.mxu0 %vm13246_vm6, %v13247_v55 }
0x223f   :  { %12509 = vmatprep.subr.bf16.mxu0 %v13245_v49 }
0x2241   :  { %11540 = vmatmul.mubr.msk.f32.vlgmr.msra.gmra.mrb[98].mxu0 %vm376_vm1, %v15059_v58  ;;  %v8787_v58 = vld [vmem:[%s13474_s29] sm:$0x7f]  ;;  %s8959_s29 = sshll.u32 %s13249_s9, 4  ;;  %s8960_s29 = int_to_ptr.vmem [resolvable:$true] %s8959_s29 }
0x2242   :  { %12511 = vmatpush3.bf16.msra.mxu0 %v12510_v38  ;;  %11556 = vmatprep.mubr.msk.f32.mxu0 %vm13246_vm6, %v13247_v55  ;;  %s13122_s17 = scalar_lea.vmem %s8960_s29, 1024  ;;  %p13127_p13 = scmp.lt.s32.totalorder %s8960_s29, %s8960_s29 }
0x2243   :  { %12512 = vmatprep.subr.bf16.mxu0 %v13245_v49  ;;  %11565 = vmatpush3.msk.msra.mxu1 %vm401_vm0, %v8787_v58  ;;  %p13123_p12 = scmp.ne.s32.totalorder %s8960_s29, %s13122_s17  ;;  %p13128_p0 = scmp.lt.s32.totalorder %s13122_s17, %s13122_s17 }
0x2245   :  { %p13129_p1 = por %p13128_p0, %p13127_p13 }
0x2246   :  { %12514 = vmatpush3.bf16.msra.mxu0 %v12513_v37 }
0x2247   :  { %12515 = vmatprep.subr.bf16.mxu0 %v13245_v49  ;;  %p13130_p2 = pnand %p13129_p1, %p13123_p12 }
0x224a   :  { %12517 = vmatpush3.bf16.msra.mxu0 %v12516_v46 }
0x224b   :  { %11554 = vmatprep.subr.mxu0 %v13247_v55 }
0x224e   :  { %11555 = vmatpush3.msk.msra.mxu0 %vm6521_vm9, %v8685_v18 }
0x2310   :  { %v8521_v23 = vpop.f32.mrb[96].mxu0 }
0x2311   :  { %v8595_v61 = vadd.f32 %v15575_v57, %v8521_v23  ;;  %v11519_v26 = vpop.f32.mrb[97].mxu0 }
0x2313   :  { %v8599_v56 = vadd.f32 %v8598_v9, %v8595_v61 }
0x2314   :  { %v8674_v8 = vpop.f32.mrb[98].mxu0 }
0x2315   :  { %v8600_v49 = vmax.f32 %v8599_v56, 0.0  ;;  %v8678_v36 = vmul.f32 %v8674_v8, %v15563_v29  ;;  %v11541_v25 = vpop.f32.mrb[99].mxu0 }
0x2317   :  { %8769 = vst.msk [vmem:[#allocation2 + $0x30] sm:$0xff] %vm6517_vm10, %v8600_v49  ;;  %11557 = vmatmul.mubr.msk.f32.vlgmr.msra.gmra.mrb[100].mxu0 %vm6517_vm10, %v8678_v36 }
0x231e   :  { %v8777_v55 = vld [vmem:[#allocation2 + $0x30] sm:$0xff] }
0x231f   :  { %8785 = vst [vmem:[#allocation24 + $0x30] sm:$0xff] %v8777_v55 }
0x23ea   :  { %v8758_v2 = vpop.f32.mrb[100].mxu0 }
0x23eb   :  { %v8762_v47 = vadd.f32 %v8758_v2, %v15054_v24  ;;  %v11558_v4 = vpop.f32.mrb[101].mxu0 }
0x23ed   :  { %8763 = vst.msk [vmem:[#allocation2] sm:$0xff] %vm376_vm1, %v8762_v47  ;;  %11567 = vmatmul.mubr.msk.f32.vlgmr.msra.gmra.mrb[122].mxu1 %vm376_vm1, %v8762_v47 }
0x23f4   :  { %v8771_v62 = vld [vmem:[#allocation2] sm:$0xff] }
0x23f5   :  { %8779 = vst [vmem:[#allocation24] sm:$0xff] %v8771_v62 }
0x23f6   :  { %13133 = shalt.err (!%p13130_p2)
}
0x23f7   :  { %s13134_s24 = scalar_lea.hbm %s13484_s21, 1024 }
0x23f8   :  { %p13135_p3 = scmp.ne.s32.totalorder %s13484_s21, %s13134_s24  ;;  %p13138_p4 = scmp.lt.u32.totalorder %s13134_s24, %s13484_s21 }
0x23fa   :  { %p13140_p5 = pnand %p13138_p4, %p13135_p3 }
0x23fc   :  { %13143 = shalt.err (!%p13140_p5)
}
0x23fd   :  { %8962 = dma.vmem_to_hbm [thread:$0]  %s8960_s29, 1024, %s13484_s21, [#allocation25]  }
0x23fe   :  { %s13250_s13 = smov [#allocation23]  }
0x23ff   :  { %s8949_s14 = sshll.u32 %s13250_s13, 4  ;;  %s8950_s14 = int_to_ptr.vmem [resolvable:$true] %s8949_s14 }
0x2400   :  { %s13144_s10 = scalar_lea.vmem %s8950_s14, 128  ;;  %p13149_p7 = scmp.lt.s32.totalorder %s8950_s14, %s8950_s14 }
0x2401   :  { %p13145_p6 = scmp.ne.s32.totalorder %s8950_s14, %s13144_s10  ;;  %p13150_p8 = scmp.lt.s32.totalorder %s13144_s10, %s13144_s10 }
0x2403   :  { %p13151_p9 = por %p13150_p8, %p13149_p7 }
0x2405   :  { %p13152_p10 = pnand %p13151_p9, %p13145_p6 }
0x24c0   :  { %v8938_v24 = vpop.f32.mrb[122].mxu1 }
0x24c1   :  { %8942 = vst [vmem:[#allocation23] sm:$0xff] %v8938_v24  ;;  %v11568_v63 = vpop.f32.mrb[123].mxu1 }
0x24c2   :  { %13155 = shalt.err (!%p13152_p10)
}
0x24c3   :  { %s13156_s11 = scalar_lea.hbm %s13479_s6, 128 }
0x24c4   :  { %p13157_p11 = scmp.ne.s32.totalorder %s13479_s6, %s13156_s11  ;;  %p13160_p12 = scmp.lt.u32.totalorder %s13156_s11, %s13479_s6 }
0x24c6   :  { %p13162_p13 = pnand %p13160_p12, %p13157_p11 }
0x24c8   :  { %13165 = shalt.err (!%p13162_p13)
}
0x24c9   :  { %8952 = dma.vmem_to_hbm [thread:$0]  %s8950_s14, 128, %s13479_s6, [#allocation5]  }
0x24ca   :  { %13180 = dma.done.wait [#allocation5], 128  }
0x24cb   :  { %13181 = vsyncadd [#allocation5], 4294967168 }
0x24cc   :  { %13182 = dma.done.wait [#allocation25], 1024  }
0x24cd   :  { %13183 = vsyncadd [#allocation25], 4294966272 }
0x24ce   :  { %8969 = vsyncpa [#allocation4], 1 }
0x24cf   :  { %8970 = vsyncpa [#allocation7], 1 }
0x24d0   :  { %8971 = vsyncpa [#allocation10], 1 }
0x24d1   :  { %8972 = vsyncpa [#allocation13], 1 }
0x24d2   :  { %8973 = vsyncpa [#allocation16], 1 }
0x24d3   :  { %8974 = vsyncpa [#allocation19], 1 }
0x24d4   :  { %8975 = vsyncpa [#allocation22], 1 }
0x24d5   :  { %8976 = vsyncpa [#allocation5], 1 }
0x24d6   :  { %8977 = vsyncpa [#allocation25], 1 }

</bundles_post_ra>
